<compile_context>
chip_gen: v7x
topology: tpu7x:2x2x1
jax: 0.10.0
libtpu: 0.0.40
codegen_flags: <defaults>
</compile_context>

<pallas_src>
import jax
import jax.numpy as jnp
from jax.experimental import pallas as pl
from jax.experimental.pallas import tpu as pltpu

LANE = 128
SUBLANE = 8

# torch LSTM gate order is (i, f, g, o); the kernel uses (i, f, o, g) so the
# three sigmoid gates are contiguous.
GATE_PERM = (0, 1, 3, 2)


def _round_up(n, m):
    return ((n + m - 1) // m) * m


def lstm_kernel(x_ref, wx_ref, wh_ref, b_ref, wf_ref, bf_ref,
                out_ref, hlast_ref, xproj_sc):
    Bp = out_ref.shape[0]                      # padded batch (multiple of 8)
    Hp = wh_ref.shape[0]                       # padded hidden (multiple of 128)
    S = x_ref.shape[0] // Bp                   # static sequence length

    # One fused input projection for every timestep; bias broadcast hoisted out
    # of the time loop:  (S*Bp, D) @ (D, 4*Hp) + (1, 4*Hp)
    xproj_sc[...] = (
        jnp.dot(x_ref[...], wx_ref[...], preferred_element_type=jnp.float32)
        + b_ref[...])

    wh = wh_ref[...]                           # (Hp, 4*Hp), loaded once

    def step(t, carry):
        h, c = carry
        row = pl.multiple_of(t * Bp, SUBLANE)
        gates = xproj_sc[pl.ds(row, Bp), :] + jnp.dot(
            h, wh, preferred_element_type=jnp.float32)        # (Bp, 4*Hp)
        # Gate layout is [i | f | o | g], each a lane-dense 128-wide block.
        ifo = jax.nn.sigmoid(gates[:, :3 * Hp])               # one wide EUP op
        g_g = jnp.tanh(gates[:, 3 * Hp:])
        i_g = ifo[:, 0 * Hp:1 * Hp]
        f_g = ifo[:, 1 * Hp:2 * Hp]
        o_g = ifo[:, 2 * Hp:3 * Hp]
        c_new = f_g * c + i_g * g_g
        h_new = o_g * jnp.tanh(c_new)
        return h_new, c_new

    h0 = jnp.zeros((Bp, Hp), jnp.float32)
    c0 = jnp.zeros((Bp, Hp), jnp.float32)
    # S is static and small: fully unroll so the LLO scheduler sees the whole
    # recurrence as straight-line code.
    h_last, _ = jax.lax.fori_loop(0, S, step, (h0, c0), unroll=True)

    # Lane-dense (Bp, 128)-wide output stores; sliced back in the wrapper.
    hlast_ref[...] = h_last.astype(hlast_ref.dtype)
    out_ref[...] = (jnp.dot(h_last, wf_ref[...],
                            preferred_element_type=jnp.float32)
                    + bf_ref[...]).astype(out_ref.dtype)


def _pad_gate_cols(w, H, Hp):
    """Reorder gate blocks i,f,g,o -> i,f,o,g and zero-pad each block H->Hp."""
    lead = w.shape[:-1]
    w4 = w.reshape(lead + (4, H))
    w4 = jnp.take(w4, jnp.array(GATE_PERM), axis=-2)
    pad = [(0, 0)] * len(lead) + [(0, 0), (0, Hp - H)]
    return jnp.pad(w4, pad).reshape(lead + (4 * Hp,))


def lstm_model_forward(x, wx, wh, b, wf, bf):
    """x: (B, S, D) f32; wx: (D,4H); wh: (H,4H); b: (4H,); wf: (H,O); bf: (O,).

    Returns (output (B, O), last_hidden (B, H)) matching the PyTorch module.
    """
    B, S, D = x.shape
    H = wh.shape[0]
    O = wf.shape[1]

    Bp = _round_up(B, SUBLANE)
    Hp = _round_up(H, LANE)
    Op = _round_up(O, LANE)

    # Layout plumbing (wrapper-side): (B,S,D) -> (S*Bp, D) so the kernel can do
    # one big input-projection matmul; weights padded to lane-dense gate blocks.
    # D (=10) is left unpadded: the MXU handles short contractions and padding
    # it would only add HBM traffic.
    x_sbd = jnp.transpose(x, (1, 0, 2))                        # (S, B, D)
    x_sbd = jnp.pad(x_sbd, ((0, 0), (0, Bp - B), (0, 0)))      # (S, Bp, D)
    x2d = x_sbd.reshape(S * Bp, D)

    wx_p = _pad_gate_cols(wx, H, Hp)                                   # (D, 4Hp)
    wh_p = _pad_gate_cols(jnp.pad(wh, ((0, Hp - H), (0, 0))), H, Hp)   # (Hp, 4Hp)
    b_p = _pad_gate_cols(b.reshape(1, 4 * H), H, Hp)                   # (1, 4Hp)
    wf_p = jnp.pad(wf, ((0, Hp - H), (0, Op - O)))                     # (Hp, Op)
    bf_p = jnp.pad(bf.reshape(1, O), ((0, 0), (0, Op - O)))            # (1, Op)

    def full(arr):
        nd = arr.ndim
        return pl.BlockSpec(arr.shape, lambda i, _nd=nd: (0,) * _nd)

    out_p, hlast_p = pl.pallas_call(
        lstm_kernel,
        out_shape=(jax.ShapeDtypeStruct((Bp, Op), jnp.float32),
                   jax.ShapeDtypeStruct((Bp, Hp), jnp.float32)),
        grid_spec=pltpu.PrefetchScalarGridSpec(
            num_scalar_prefetch=0,
            grid=(1,),                        # single step; recurrence in-kernel
            in_specs=[full(x2d), full(wx_p), full(wh_p),
                      full(b_p), full(wf_p), full(bf_p)],
            out_specs=[pl.BlockSpec((Bp, Op), lambda i: (0, 0)),
                       pl.BlockSpec((Bp, Hp), lambda i: (0, 0))],
            scratch_shapes=[
                pltpu.VMEM((S * Bp, 4 * Hp), jnp.float32),  # precomputed x@Wx+b
            ],
        ),
        compiler_params=pltpu.CompilerParams(
            dimension_semantics=("arbitrary",)),
        # TODO(synk): at large B, add a leading 'parallel' batch grid axis to use
        # v7x's second TensorCore; unnecessary at these toy shapes.
    )(x2d, wx_p, wh_p, b_p, wf_p, bf_p)

    return out_p[:B, :O], hlast_p[:B, :H]


def ref_lstm_model(x, wx, wh, b, wf, bf):
    """Pure-JAX reference (lax.scan) matching torch.nn.LSTM semantics."""
    B = x.shape[0]
    H = wh.shape[0]

    def step(carry, xt):
        h, c = carry
        gates = xt @ wx + h @ wh + b
        i = jax.nn.sigmoid(gates[:, 0 * H:1 * H])
        f = jax.nn.sigmoid(gates[:, 1 * H:2 * H])
        g = jnp.tanh(gates[:, 2 * H:3 * H])
        o = jax.nn.sigmoid(gates[:, 3 * H:4 * H])
        c = f * c + i * g
        h = o * jnp.tanh(c)
        return (h, c), None

    (h, _), _ = jax.lax.scan(step,
                             (jnp.zeros((B, H), jnp.float32),
                              jnp.zeros((B, H), jnp.float32)),
                             jnp.transpose(x, (1, 0, 2)))
    return h @ wf + bf, h


if __name__ == "__main__":
    # Shapes implied by the module usage: x = rand(32, 20, 10), batch_first.
    B, S, D, H, O = 32, 20, 10, 32, 4

    key = jax.random.PRNGKey(0)
    k_x, k_wih, k_whh, k_bih, k_bhh, k_wf, k_bf = jax.random.split(key, 7)

    scale = 1.0 / jnp.sqrt(H)   # torch LSTM/Linear-style uniform init scale
    x = jax.random.uniform(k_x, (B, S, D), jnp.float32)

    # torch parameter shapes: w_ih (4H, D), w_hh (4H, H), b_ih/b_hh (4H,)
    w_ih = jax.random.uniform(k_wih, (4 * H, D), jnp.float32, -scale, scale)
    w_hh = jax.random.uniform(k_whh, (4 * H, H), jnp.float32, -scale, scale)
    b_ih = jax.random.uniform(k_bih, (4 * H,), jnp.float32, -scale, scale)
    b_hh = jax.random.uniform(k_bhh, (4 * H,), jnp.float32, -scale, scale)
    w_fc = jax.random.uniform(k_wf, (O, H), jnp.float32, -scale, scale)
    b_fc = jax.random.uniform(k_bf, (O,), jnp.float32, -scale, scale)

    # Pre-transpose for the kernel: gates = x_t @ Wx + h @ Wh + (b_ih + b_hh)
    wx = w_ih.T                  # (D, 4H)
    wh = w_hh.T                  # (H, 4H)
    b = b_ih + b_hh              # (4H,)
    wf = w_fc.T                  # (H, O)

    out, last_hidden = jax.jit(lstm_model_forward)(x, wx, wh, b, wf, b_fc)
    jax.block_until_ready((out, last_hidden))

    out_ref, last_ref = ref_lstm_model(x, wx, wh, b, wf, b_fc)
    assert out.shape == (B, O) and last_hidden.shape == (B, H)
    assert jnp.allclose(out, out_ref, atol=1e-5, rtol=1e-5)
    assert jnp.allclose(last_hidden, last_ref, atol=1e-5, rtol=1e-5)

    print("KERNEL_OK")
</pallas_src>

<mosaic_0001>
module attributes {stable_mosaic.version = 11 : i64} {
  func.func @lstm_kernel(%arg0: i32, %arg1: memref<640x10xf32, #tpu.memory_space<vmem>>, %arg2: memref<10x512xf32, #tpu.memory_space<vmem>>, %arg3: memref<128x512xf32, #tpu.memory_space<vmem>>, %arg4: memref<1x512xf32, #tpu.memory_space<vmem>>, %arg5: memref<128x128xf32, #tpu.memory_space<vmem>>, %arg6: memref<1x128xf32, #tpu.memory_space<vmem>>, %arg7: memref<32x128xf32, #tpu.memory_space<vmem>>, %arg8: memref<32x128xf32, #tpu.memory_space<vmem>>, %arg9: memref<640x512xf32, #tpu.memory_space<vmem>>) attributes {dimension_semantics = [#tpu.dimension_semantics<arbitrary>], iteration_bounds = array<i64: 1>, scalar_prefetch = 0 : i64, scratch_operands = 1 : i64, tpu.core_type = #tpu.core_type<tc>, window_params = [{pipeline_mode = #tpu.pipeline_mode<synchronous>, transform_indices = @transform_0, window_bounds = array<i64: 640, 10>}, {pipeline_mode = #tpu.pipeline_mode<synchronous>, transform_indices = @transform_1, window_bounds = array<i64: 10, 512>}, {pipeline_mode = #tpu.pipeline_mode<synchronous>, transform_indices = @transform_2, window_bounds = array<i64: 128, 512>}, {pipeline_mode = #tpu.pipeline_mode<synchronous>, transform_indices = @transform_3, window_bounds = array<i64: 1, 512>}, {pipeline_mode = #tpu.pipeline_mode<synchronous>, transform_indices = @transform_4, window_bounds = array<i64: 128, 128>}, {pipeline_mode = #tpu.pipeline_mode<synchronous>, transform_indices = @transform_5, window_bounds = array<i64: 1, 128>}, {pipeline_mode = #tpu.pipeline_mode<synchronous>, transform_indices = @transform_6, window_bounds = array<i64: 32, 128>}, {pipeline_mode = #tpu.pipeline_mode<synchronous>, transform_indices = @transform_7, window_bounds = array<i64: 32, 128>}]} {
    %c0 = arith.constant 0 : index
    %c0_0 = arith.constant 0 : index
    %0 = vector.load %arg1[%c0, %c0_0] : memref<640x10xf32, #tpu.memory_space<vmem>>, vector<640x10xf32>
    %c0_1 = arith.constant 0 : index
    %c0_2 = arith.constant 0 : index
    %1 = vector.load %arg2[%c0_1, %c0_2] : memref<10x512xf32, #tpu.memory_space<vmem>>, vector<10x512xf32>
    %cst = arith.constant dense<0.000000e+00> : vector<640x512xf32>
    %2 = tpu.matmul %0, %1, %cst {dimension_numbers = #tpu.dot_dimension_numbers<[1], [0], [0], [1], [0, 0, 1, 1], [], []>} : vector<640x10xf32>, vector<10x512xf32>, vector<640x512xf32> -> vector<640x512xf32>
    %c0_3 = arith.constant 0 : index
    %c0_4 = arith.constant 0 : index
    %3 = vector.load %arg4[%c0_3, %c0_4] : memref<1x512xf32, #tpu.memory_space<vmem>>, vector<1x512xf32>
    %4 = vector.broadcast %3 : vector<1x512xf32> to vector<640x512xf32>
    %5 = arith.addf %2, %4 : vector<640x512xf32>
    %c0_5 = arith.constant 0 : index
    %c0_6 = arith.constant 0 : index
    %6 = vector.load %arg9[%c0_5, %c0_6] : memref<640x512xf32, #tpu.memory_space<vmem>>, vector<640x512xf32>
    tpu.vector_store %arg9[%c0_5, %c0_6], %5 {strides = array<i32>} : memref<640x512xf32, #tpu.memory_space<vmem>>, vector<640x512xf32>,
    %c0_7 = arith.constant 0 : index
    %c0_8 = arith.constant 0 : index
    %7 = vector.load %arg3[%c0_7, %c0_8] : memref<128x512xf32, #tpu.memory_space<vmem>>, vector<128x512xf32>
    %cst_9 = arith.constant 0.000000e+00 : f32
    %8 = vector.broadcast %cst_9 : f32 to vector<32x128xf32>
    %cst_10 = arith.constant 0.000000e+00 : f32
    %9 = vector.broadcast %cst_10 : f32 to vector<32x128xf32>
    %c0_i32 = arith.constant 0 : i32
    %c32_i32 = arith.constant 32 : i32
    %10 = arith.muli %c0_i32, %c32_i32 : i32
    %11 = tpu.assume_multiple %10, 8 : i32
    %12 = arith.index_cast %11 : i32 to index
    %c0_11 = arith.constant 0 : index
    %13 = vector.load %arg9[%12, %c0_11] : memref<640x512xf32, #tpu.memory_space<vmem>>, vector<32x512xf32>
    %cst_12 = arith.constant dense<0.000000e+00> : vector<32x512xf32>
    %14 = tpu.matmul %8, %7, %cst_12 {dimension_numbers = #tpu.dot_dimension_numbers<[1], [0], [0], [1], [0, 0, 1, 1], [], []>} : vector<32x128xf32>, vector<128x512xf32>, vector<32x512xf32> -> vector<32x512xf32>
    %15 = arith.addf %13, %14 : vector<32x512xf32>
    %16 = vector.extract_strided_slice %15 {offsets = [0, 0], sizes = [32, 384], strides = [1, 1]} : vector<32x512xf32> to vector<32x384xf32>
    %17 = arith.negf %16 : vector<32x384xf32>
    %18 = math.exp %17 : vector<32x384xf32>
    %cst_13 = arith.constant 1.000000e+00 : f32
    %19 = vector.broadcast %cst_13 : f32 to vector<32x384xf32>
    %20 = arith.addf %19, %18 : vector<32x384xf32>
    %21 = arith.divf %19, %20 : vector<32x384xf32>
    %22 = vector.extract_strided_slice %15 {offsets = [0, 384], sizes = [32, 128], strides = [1, 1]} : vector<32x512xf32> to vector<32x128xf32>
    %23 = math.tanh %22 : vector<32x128xf32>
    %24 = vector.extract_strided_slice %21 {offsets = [0, 0], sizes = [32, 128], strides = [1, 1]} : vector<32x384xf32> to vector<32x128xf32>
    %25 = vector.extract_strided_slice %21 {offsets = [0, 128], sizes = [32, 128], strides = [1, 1]} : vector<32x384xf32> to vector<32x128xf32>
    %26 = vector.extract_strided_slice %21 {offsets = [0, 256], sizes = [32, 128], strides = [1, 1]} : vector<32x384xf32> to vector<32x128xf32>
    %27 = arith.mulf %25, %9 : vector<32x128xf32>
    %28 = arith.mulf %24, %23 : vector<32x128xf32>
    %29 = arith.addf %27, %28 : vector<32x128xf32>
    %30 = math.tanh %29 : vector<32x128xf32>
    %31 = arith.mulf %26, %30 : vector<32x128xf32>
    %c1_i32 = arith.constant 1 : i32
    %c32_i32_14 = arith.constant 32 : i32
    %32 = arith.muli %c1_i32, %c32_i32_14 : i32
    %33 = tpu.assume_multiple %32, 8 : i32
    %34 = arith.index_cast %33 : i32 to index
    %c0_15 = arith.constant 0 : index
    %35 = vector.load %arg9[%34, %c0_15] : memref<640x512xf32, #tpu.memory_space<vmem>>, vector<32x512xf32>
    %cst_16 = arith.constant dense<0.000000e+00> : vector<32x512xf32>
    %36 = tpu.matmul %31, %7, %cst_16 {dimension_numbers = #tpu.dot_dimension_numbers<[1], [0], [0], [1], [0, 0, 1, 1], [], []>} : vector<32x128xf32>, vector<128x512xf32>, vector<32x512xf32> -> vector<32x512xf32>
    %37 = arith.addf %35, %36 : vector<32x512xf32>
    %38 = vector.extract_strided_slice %37 {offsets = [0, 0], sizes = [32, 384], strides = [1, 1]} : vector<32x512xf32> to vector<32x384xf32>
    %39 = arith.negf %38 : vector<32x384xf32>
    %40 = math.exp %39 : vector<32x384xf32>
    %cst_17 = arith.constant 1.000000e+00 : f32
    %41 = vector.broadcast %cst_17 : f32 to vector<32x384xf32>
    %42 = arith.addf %41, %40 : vector<32x384xf32>
    %43 = arith.divf %41, %42 : vector<32x384xf32>
    %44 = vector.extract_strided_slice %37 {offsets = [0, 384], sizes = [32, 128], strides = [1, 1]} : vector<32x512xf32> to vector<32x128xf32>
    %45 = math.tanh %44 : vector<32x128xf32>
    %46 = vector.extract_strided_slice %43 {offsets = [0, 0], sizes = [32, 128], strides = [1, 1]} : vector<32x384xf32> to vector<32x128xf32>
    %47 = vector.extract_strided_slice %43 {offsets = [0, 128], sizes = [32, 128], strides = [1, 1]} : vector<32x384xf32> to vector<32x128xf32>
    %48 = vector.extract_strided_slice %43 {offsets = [0, 256], sizes = [32, 128], strides = [1, 1]} : vector<32x384xf32> to vector<32x128xf32>
    %49 = arith.mulf %47, %29 : vector<32x128xf32>
    %50 = arith.mulf %46, %45 : vector<32x128xf32>
    %51 = arith.addf %49, %50 : vector<32x128xf32>
    %52 = math.tanh %51 : vector<32x128xf32>
    %53 = arith.mulf %48, %52 : vector<32x128xf32>
    %c2_i32 = arith.constant 2 : i32
    %c32_i32_18 = arith.constant 32 : i32
    %54 = arith.muli %c2_i32, %c32_i32_18 : i32
    %55 = tpu.assume_multiple %54, 8 : i32
    %56 = arith.index_cast %55 : i32 to index
    %c0_19 = arith.constant 0 : index
    %57 = vector.load %arg9[%56, %c0_19] : memref<640x512xf32, #tpu.memory_space<vmem>>, vector<32x512xf32>
    %cst_20 = arith.constant dense<0.000000e+00> : vector<32x512xf32>
    %58 = tpu.matmul %53, %7, %cst_20 {dimension_numbers = #tpu.dot_dimension_numbers<[1], [0], [0], [1], [0, 0, 1, 1], [], []>} : vector<32x128xf32>, vector<128x512xf32>, vector<32x512xf32> -> vector<32x512xf32>
    %59 = arith.addf %57, %58 : vector<32x512xf32>
    %60 = vector.extract_strided_slice %59 {offsets = [0, 0], sizes = [32, 384], strides = [1, 1]} : vector<32x512xf32> to vector<32x384xf32>
    %61 = arith.negf %60 : vector<32x384xf32>
    %62 = math.exp %61 : vector<32x384xf32>
    %cst_21 = arith.constant 1.000000e+00 : f32
    %63 = vector.broadcast %cst_21 : f32 to vector<32x384xf32>
    %64 = arith.addf %63, %62 : vector<32x384xf32>
    %65 = arith.divf %63, %64 : vector<32x384xf32>
    %66 = vector.extract_strided_slice %59 {offsets = [0, 384], sizes = [32, 128], strides = [1, 1]} : vector<32x512xf32> to vector<32x128xf32>
    %67 = math.tanh %66 : vector<32x128xf32>
    %68 = vector.extract_strided_slice %65 {offsets = [0, 0], sizes = [32, 128], strides = [1, 1]} : vector<32x384xf32> to vector<32x128xf32>
    %69 = vector.extract_strided_slice %65 {offsets = [0, 128], sizes = [32, 128], strides = [1, 1]} : vector<32x384xf32> to vector<32x128xf32>
    %70 = vector.extract_strided_slice %65 {offsets = [0, 256], sizes = [32, 128], strides = [1, 1]} : vector<32x384xf32> to vector<32x128xf32>
    %71 = arith.mulf %69, %51 : vector<32x128xf32>
    %72 = arith.mulf %68, %67 : vector<32x128xf32>
    %73 = arith.addf %71, %72 : vector<32x128xf32>
    %74 = math.tanh %73 : vector<32x128xf32>
    %75 = arith.mulf %70, %74 : vector<32x128xf32>
    %c3_i32 = arith.constant 3 : i32
    %c32_i32_22 = arith.constant 32 : i32
    %76 = arith.muli %c3_i32, %c32_i32_22 : i32
    %77 = tpu.assume_multiple %76, 8 : i32
    %78 = arith.index_cast %77 : i32 to index
    %c0_23 = arith.constant 0 : index
    %79 = vector.load %arg9[%78, %c0_23] : memref<640x512xf32, #tpu.memory_space<vmem>>, vector<32x512xf32>
    %cst_24 = arith.constant dense<0.000000e+00> : vector<32x512xf32>
    %80 = tpu.matmul %75, %7, %cst_24 {dimension_numbers = #tpu.dot_dimension_numbers<[1], [0], [0], [1], [0, 0, 1, 1], [], []>} : vector<32x128xf32>, vector<128x512xf32>, vector<32x512xf32> -> vector<32x512xf32>
    %81 = arith.addf %79, %80 : vector<32x512xf32>
    %82 = vector.extract_strided_slice %81 {offsets = [0, 0], sizes = [32, 384], strides = [1, 1]} : vector<32x512xf32> to vector<32x384xf32>
    %83 = arith.negf %82 : vector<32x384xf32>
    %84 = math.exp %83 : vector<32x384xf32>
    %cst_25 = arith.constant 1.000000e+00 : f32
    %85 = vector.broadcast %cst_25 : f32 to vector<32x384xf32>
    %86 = arith.addf %85, %84 : vector<32x384xf32>
    %87 = arith.divf %85, %86 : vector<32x384xf32>
    %88 = vector.extract_strided_slice %81 {offsets = [0, 384], sizes = [32, 128], strides = [1, 1]} : vector<32x512xf32> to vector<32x128xf32>
    %89 = math.tanh %88 : vector<32x128xf32>
    %90 = vector.extract_strided_slice %87 {offsets = [0, 0], sizes = [32, 128], strides = [1, 1]} : vector<32x384xf32> to vector<32x128xf32>
    %91 = vector.extract_strided_slice %87 {offsets = [0, 128], sizes = [32, 128], strides = [1, 1]} : vector<32x384xf32> to vector<32x128xf32>
    %92 = vector.extract_strided_slice %87 {offsets = [0, 256], sizes = [32, 128], strides = [1, 1]} : vector<32x384xf32> to vector<32x128xf32>
    %93 = arith.mulf %91, %73 : vector<32x128xf32>
    %94 = arith.mulf %90, %89 : vector<32x128xf32>
    %95 = arith.addf %93, %94 : vector<32x128xf32>
    %96 = math.tanh %95 : vector<32x128xf32>
    %97 = arith.mulf %92, %96 : vector<32x128xf32>
    %c4_i32 = arith.constant 4 : i32
    %c32_i32_26 = arith.constant 32 : i32
    %98 = arith.muli %c4_i32, %c32_i32_26 : i32
    %99 = tpu.assume_multiple %98, 8 : i32
    %100 = arith.index_cast %99 : i32 to index
    %c0_27 = arith.constant 0 : index
    %101 = vector.load %arg9[%100, %c0_27] : memref<640x512xf32, #tpu.memory_space<vmem>>, vector<32x512xf32>
    %cst_28 = arith.constant dense<0.000000e+00> : vector<32x512xf32>
    %102 = tpu.matmul %97, %7, %cst_28 {dimension_numbers = #tpu.dot_dimension_numbers<[1], [0], [0], [1], [0, 0, 1, 1], [], []>} : vector<32x128xf32>, vector<128x512xf32>, vector<32x512xf32> -> vector<32x512xf32>
    %103 = arith.addf %101, %102 : vector<32x512xf32>
    %104 = vector.extract_strided_slice %103 {offsets = [0, 0], sizes = [32, 384], strides = [1, 1]} : vector<32x512xf32> to vector<32x384xf32>
    %105 = arith.negf %104 : vector<32x384xf32>
    %106 = math.exp %105 : vector<32x384xf32>
    %cst_29 = arith.constant 1.000000e+00 : f32
    %107 = vector.broadcast %cst_29 : f32 to vector<32x384xf32>
    %108 = arith.addf %107, %106 : vector<32x384xf32>
    %109 = arith.divf %107, %108 : vector<32x384xf32>
    %110 = vector.extract_strided_slice %103 {offsets = [0, 384], sizes = [32, 128], strides = [1, 1]} : vector<32x512xf32> to vector<32x128xf32>
    %111 = math.tanh %110 : vector<32x128xf32>
    %112 = vector.extract_strided_slice %109 {offsets = [0, 0], sizes = [32, 128], strides = [1, 1]} : vector<32x384xf32> to vector<32x128xf32>
    %113 = vector.extract_strided_slice %109 {offsets = [0, 128], sizes = [32, 128], strides = [1, 1]} : vector<32x384xf32> to vector<32x128xf32>
    %114 = vector.extract_strided_slice %109 {offsets = [0, 256], sizes = [32, 128], strides = [1, 1]} : vector<32x384xf32> to vector<32x128xf32>
    %115 = arith.mulf %113, %95 : vector<32x128xf32>
    %116 = arith.mulf %112, %111 : vector<32x128xf32>
    %117 = arith.addf %115, %116 : vector<32x128xf32>
    %118 = math.tanh %117 : vector<32x128xf32>
    %119 = arith.mulf %114, %118 : vector<32x128xf32>
    %c5_i32 = arith.constant 5 : i32
    %c32_i32_30 = arith.constant 32 : i32
    %120 = arith.muli %c5_i32, %c32_i32_30 : i32
    %121 = tpu.assume_multiple %120, 8 : i32
    %122 = arith.index_cast %121 : i32 to index
    %c0_31 = arith.constant 0 : index
    %123 = vector.load %arg9[%122, %c0_31] : memref<640x512xf32, #tpu.memory_space<vmem>>, vector<32x512xf32>
    %cst_32 = arith.constant dense<0.000000e+00> : vector<32x512xf32>
    %124 = tpu.matmul %119, %7, %cst_32 {dimension_numbers = #tpu.dot_dimension_numbers<[1], [0], [0], [1], [0, 0, 1, 1], [], []>} : vector<32x128xf32>, vector<128x512xf32>, vector<32x512xf32> -> vector<32x512xf32>
    %125 = arith.addf %123, %124 : vector<32x512xf32>
    %126 = vector.extract_strided_slice %125 {offsets = [0, 0], sizes = [32, 384], strides = [1, 1]} : vector<32x512xf32> to vector<32x384xf32>
    %127 = arith.negf %126 : vector<32x384xf32>
    %128 = math.exp %127 : vector<32x384xf32>
    %cst_33 = arith.constant 1.000000e+00 : f32
    %129 = vector.broadcast %cst_33 : f32 to vector<32x384xf32>
    %130 = arith.addf %129, %128 : vector<32x384xf32>
    %131 = arith.divf %129, %130 : vector<32x384xf32>
    %132 = vector.extract_strided_slice %125 {offsets = [0, 384], sizes = [32, 128], strides = [1, 1]} : vector<32x512xf32> to vector<32x128xf32>
    %133 = math.tanh %132 : vector<32x128xf32>
    %134 = vector.extract_strided_slice %131 {offsets = [0, 0], sizes = [32, 128], strides = [1, 1]} : vector<32x384xf32> to vector<32x128xf32>
    %135 = vector.extract_strided_slice %131 {offsets = [0, 128], sizes = [32, 128], strides = [1, 1]} : vector<32x384xf32> to vector<32x128xf32>
    %136 = vector.extract_strided_slice %131 {offsets = [0, 256], sizes = [32, 128], strides = [1, 1]} : vector<32x384xf32> to vector<32x128xf32>
    %137 = arith.mulf %135, %117 : vector<32x128xf32>
    %138 = arith.mulf %134, %133 : vector<32x128xf32>
    %139 = arith.addf %137, %138 : vector<32x128xf32>
    %140 = math.tanh %139 : vector<32x128xf32>
    %141 = arith.mulf %136, %140 : vector<32x128xf32>
    %c6_i32 = arith.constant 6 : i32
    %c32_i32_34 = arith.constant 32 : i32
    %142 = arith.muli %c6_i32, %c32_i32_34 : i32
    %143 = tpu.assume_multiple %142, 8 : i32
    %144 = arith.index_cast %143 : i32 to index
    %c0_35 = arith.constant 0 : index
    %145 = vector.load %arg9[%144, %c0_35] : memref<640x512xf32, #tpu.memory_space<vmem>>, vector<32x512xf32>
    %cst_36 = arith.constant dense<0.000000e+00> : vector<32x512xf32>
    %146 = tpu.matmul %141, %7, %cst_36 {dimension_numbers = #tpu.dot_dimension_numbers<[1], [0], [0], [1], [0, 0, 1, 1], [], []>} : vector<32x128xf32>, vector<128x512xf32>, vector<32x512xf32> -> vector<32x512xf32>
    %147 = arith.addf %145, %146 : vector<32x512xf32>
    %148 = vector.extract_strided_slice %147 {offsets = [0, 0], sizes = [32, 384], strides = [1, 1]} : vector<32x512xf32> to vector<32x384xf32>
    %149 = arith.negf %148 : vector<32x384xf32>
    %150 = math.exp %149 : vector<32x384xf32>
    %cst_37 = arith.constant 1.000000e+00 : f32
    %151 = vector.broadcast %cst_37 : f32 to vector<32x384xf32>
    %152 = arith.addf %151, %150 : vector<32x384xf32>
    %153 = arith.divf %151, %152 : vector<32x384xf32>
    %154 = vector.extract_strided_slice %147 {offsets = [0, 384], sizes = [32, 128], strides = [1, 1]} : vector<32x512xf32> to vector<32x128xf32>
    %155 = math.tanh %154 : vector<32x128xf32>
    %156 = vector.extract_strided_slice %153 {offsets = [0, 0], sizes = [32, 128], strides = [1, 1]} : vector<32x384xf32> to vector<32x128xf32>
    %157 = vector.extract_strided_slice %153 {offsets = [0, 128], sizes = [32, 128], strides = [1, 1]} : vector<32x384xf32> to vector<32x128xf32>
    %158 = vector.extract_strided_slice %153 {offsets = [0, 256], sizes = [32, 128], strides = [1, 1]} : vector<32x384xf32> to vector<32x128xf32>
    %159 = arith.mulf %157, %139 : vector<32x128xf32>
    %160 = arith.mulf %156, %155 : vector<32x128xf32>
    %161 = arith.addf %159, %160 : vector<32x128xf32>
    %162 = math.tanh %161 : vector<32x128xf32>
    %163 = arith.mulf %158, %162 : vector<32x128xf32>
    %c7_i32 = arith.constant 7 : i32
    %c32_i32_38 = arith.constant 32 : i32
    %164 = arith.muli %c7_i32, %c32_i32_38 : i32
    %165 = tpu.assume_multiple %164, 8 : i32
    %166 = arith.index_cast %165 : i32 to index
    %c0_39 = arith.constant 0 : index
    %167 = vector.load %arg9[%166, %c0_39] : memref<640x512xf32, #tpu.memory_space<vmem>>, vector<32x512xf32>
    %cst_40 = arith.constant dense<0.000000e+00> : vector<32x512xf32>
    %168 = tpu.matmul %163, %7, %cst_40 {dimension_numbers = #tpu.dot_dimension_numbers<[1], [0], [0], [1], [0, 0, 1, 1], [], []>} : vector<32x128xf32>, vector<128x512xf32>, vector<32x512xf32> -> vector<32x512xf32>
    %169 = arith.addf %167, %168 : vector<32x512xf32>
    %170 = vector.extract_strided_slice %169 {offsets = [0, 0], sizes = [32, 384], strides = [1, 1]} : vector<32x512xf32> to vector<32x384xf32>
    %171 = arith.negf %170 : vector<32x384xf32>
    %172 = math.exp %171 : vector<32x384xf32>
    %cst_41 = arith.constant 1.000000e+00 : f32
    %173 = vector.broadcast %cst_41 : f32 to vector<32x384xf32>
    %174 = arith.addf %173, %172 : vector<32x384xf32>
    %175 = arith.divf %173, %174 : vector<32x384xf32>
    %176 = vector.extract_strided_slice %169 {offsets = [0, 384], sizes = [32, 128], strides = [1, 1]} : vector<32x512xf32> to vector<32x128xf32>
    %177 = math.tanh %176 : vector<32x128xf32>
    %178 = vector.extract_strided_slice %175 {offsets = [0, 0], sizes = [32, 128], strides = [1, 1]} : vector<32x384xf32> to vector<32x128xf32>
    %179 = vector.extract_strided_slice %175 {offsets = [0, 128], sizes = [32, 128], strides = [1, 1]} : vector<32x384xf32> to vector<32x128xf32>
    %180 = vector.extract_strided_slice %175 {offsets = [0, 256], sizes = [32, 128], strides = [1, 1]} : vector<32x384xf32> to vector<32x128xf32>
    %181 = arith.mulf %179, %161 : vector<32x128xf32>
    %182 = arith.mulf %178, %177 : vector<32x128xf32>
    %183 = arith.addf %181, %182 : vector<32x128xf32>
    %184 = math.tanh %183 : vector<32x128xf32>
    %185 = arith.mulf %180, %184 : vector<32x128xf32>
    %c8_i32 = arith.constant 8 : i32
    %c32_i32_42 = arith.constant 32 : i32
    %186 = arith.muli %c8_i32, %c32_i32_42 : i32
    %187 = tpu.assume_multiple %186, 8 : i32
    %188 = arith.index_cast %187 : i32 to index
    %c0_43 = arith.constant 0 : index
    %189 = vector.load %arg9[%188, %c0_43] : memref<640x512xf32, #tpu.memory_space<vmem>>, vector<32x512xf32>
    %cst_44 = arith.constant dense<0.000000e+00> : vector<32x512xf32>
    %190 = tpu.matmul %185, %7, %cst_44 {dimension_numbers = #tpu.dot_dimension_numbers<[1], [0], [0], [1], [0, 0, 1, 1], [], []>} : vector<32x128xf32>, vector<128x512xf32>, vector<32x512xf32> -> vector<32x512xf32>
    %191 = arith.addf %189, %190 : vector<32x512xf32>
    %192 = vector.extract_strided_slice %191 {offsets = [0, 0], sizes = [32, 384], strides = [1, 1]} : vector<32x512xf32> to vector<32x384xf32>
    %193 = arith.negf %192 : vector<32x384xf32>
    %194 = math.exp %193 : vector<32x384xf32>
    %cst_45 = arith.constant 1.000000e+00 : f32
    %195 = vector.broadcast %cst_45 : f32 to vector<32x384xf32>
    %196 = arith.addf %195, %194 : vector<32x384xf32>
    %197 = arith.divf %195, %196 : vector<32x384xf32>
    %198 = vector.extract_strided_slice %191 {offsets = [0, 384], sizes = [32, 128], strides = [1, 1]} : vector<32x512xf32> to vector<32x128xf32>
    %199 = math.tanh %198 : vector<32x128xf32>
    %200 = vector.extract_strided_slice %197 {offsets = [0, 0], sizes = [32, 128], strides = [1, 1]} : vector<32x384xf32> to vector<32x128xf32>
    %201 = vector.extract_strided_slice %197 {offsets = [0, 128], sizes = [32, 128], strides = [1, 1]} : vector<32x384xf32> to vector<32x128xf32>
    %202 = vector.extract_strided_slice %197 {offsets = [0, 256], sizes = [32, 128], strides = [1, 1]} : vector<32x384xf32> to vector<32x128xf32>
    %203 = arith.mulf %201, %183 : vector<32x128xf32>
    %204 = arith.mulf %200, %199 : vector<32x128xf32>
    %205 = arith.addf %203, %204 : vector<32x128xf32>
    %206 = math.tanh %205 : vector<32x128xf32>
    %207 = arith.mulf %202, %206 : vector<32x128xf32>
    %c9_i32 = arith.constant 9 : i32
    %c32_i32_46 = arith.constant 32 : i32
    %208 = arith.muli %c9_i32, %c32_i32_46 : i32
    %209 = tpu.assume_multiple %208, 8 : i32
    %210 = arith.index_cast %209 : i32 to index
    %c0_47 = arith.constant 0 : index
    %211 = vector.load %arg9[%210, %c0_47] : memref<640x512xf32, #tpu.memory_space<vmem>>, vector<32x512xf32>
    %cst_48 = arith.constant dense<0.000000e+00> : vector<32x512xf32>
    %212 = tpu.matmul %207, %7, %cst_48 {dimension_numbers = #tpu.dot_dimension_numbers<[1], [0], [0], [1], [0, 0, 1, 1], [], []>} : vector<32x128xf32>, vector<128x512xf32>, vector<32x512xf32> -> vector<32x512xf32>
    %213 = arith.addf %211, %212 : vector<32x512xf32>
    %214 = vector.extract_strided_slice %213 {offsets = [0, 0], sizes = [32, 384], strides = [1, 1]} : vector<32x512xf32> to vector<32x384xf32>
    %215 = arith.negf %214 : vector<32x384xf32>
    %216 = math.exp %215 : vector<32x384xf32>
    %cst_49 = arith.constant 1.000000e+00 : f32
    %217 = vector.broadcast %cst_49 : f32 to vector<32x384xf32>
    %218 = arith.addf %217, %216 : vector<32x384xf32>
    %219 = arith.divf %217, %218 : vector<32x384xf32>
    %220 = vector.extract_strided_slice %213 {offsets = [0, 384], sizes = [32, 128], strides = [1, 1]} : vector<32x512xf32> to vector<32x128xf32>
    %221 = math.tanh %220 : vector<32x128xf32>
    %222 = vector.extract_strided_slice %219 {offsets = [0, 0], sizes = [32, 128], strides = [1, 1]} : vector<32x384xf32> to vector<32x128xf32>
    %223 = vector.extract_strided_slice %219 {offsets = [0, 128], sizes = [32, 128], strides = [1, 1]} : vector<32x384xf32> to vector<32x128xf32>
    %224 = vector.extract_strided_slice %219 {offsets = [0, 256], sizes = [32, 128], strides = [1, 1]} : vector<32x384xf32> to vector<32x128xf32>
    %225 = arith.mulf %223, %205 : vector<32x128xf32>
    %226 = arith.mulf %222, %221 : vector<32x128xf32>
    %227 = arith.addf %225, %226 : vector<32x128xf32>
    %228 = math.tanh %227 : vector<32x128xf32>
    %229 = arith.mulf %224, %228 : vector<32x128xf32>
    %c10_i32 = arith.constant 10 : i32
    %c32_i32_50 = arith.constant 32 : i32
    %230 = arith.muli %c10_i32, %c32_i32_50 : i32
    %231 = tpu.assume_multiple %230, 8 : i32
    %232 = arith.index_cast %231 : i32 to index
    %c0_51 = arith.constant 0 : index
    %233 = vector.load %arg9[%232, %c0_51] : memref<640x512xf32, #tpu.memory_space<vmem>>, vector<32x512xf32>
    %cst_52 = arith.constant dense<0.000000e+00> : vector<32x512xf32>
    %234 = tpu.matmul %229, %7, %cst_52 {dimension_numbers = #tpu.dot_dimension_numbers<[1], [0], [0], [1], [0, 0, 1, 1], [], []>} : vector<32x128xf32>, vector<128x512xf32>, vector<32x512xf32> -> vector<32x512xf32>
    %235 = arith.addf %233, %234 : vector<32x512xf32>
    %236 = vector.extract_strided_slice %235 {offsets = [0, 0], sizes = [32, 384], strides = [1, 1]} : vector<32x512xf32> to vector<32x384xf32>
    %237 = arith.negf %236 : vector<32x384xf32>
    %238 = math.exp %237 : vector<32x384xf32>
    %cst_53 = arith.constant 1.000000e+00 : f32
    %239 = vector.broadcast %cst_53 : f32 to vector<32x384xf32>
    %240 = arith.addf %239, %238 : vector<32x384xf32>
    %241 = arith.divf %239, %240 : vector<32x384xf32>
    %242 = vector.extract_strided_slice %235 {offsets = [0, 384], sizes = [32, 128], strides = [1, 1]} : vector<32x512xf32> to vector<32x128xf32>
    %243 = math.tanh %242 : vector<32x128xf32>
    %244 = vector.extract_strided_slice %241 {offsets = [0, 0], sizes = [32, 128], strides = [1, 1]} : vector<32x384xf32> to vector<32x128xf32>
    %245 = vector.extract_strided_slice %241 {offsets = [0, 128], sizes = [32, 128], strides = [1, 1]} : vector<32x384xf32> to vector<32x128xf32>
    %246 = vector.extract_strided_slice %241 {offsets = [0, 256], sizes = [32, 128], strides = [1, 1]} : vector<32x384xf32> to vector<32x128xf32>
    %247 = arith.mulf %245, %227 : vector<32x128xf32>
    %248 = arith.mulf %244, %243 : vector<32x128xf32>
    %249 = arith.addf %247, %248 : vector<32x128xf32>
    %250 = math.tanh %249 : vector<32x128xf32>
    %251 = arith.mulf %246, %250 : vector<32x128xf32>
    %c11_i32 = arith.constant 11 : i32
    %c32_i32_54 = arith.constant 32 : i32
    %252 = arith.muli %c11_i32, %c32_i32_54 : i32
    %253 = tpu.assume_multiple %252, 8 : i32
    %254 = arith.index_cast %253 : i32 to index
    %c0_55 = arith.constant 0 : index
    %255 = vector.load %arg9[%254, %c0_55] : memref<640x512xf32, #tpu.memory_space<vmem>>, vector<32x512xf32>
    %cst_56 = arith.constant dense<0.000000e+00> : vector<32x512xf32>
    %256 = tpu.matmul %251, %7, %cst_56 {dimension_numbers = #tpu.dot_dimension_numbers<[1], [0], [0], [1], [0, 0, 1, 1], [], []>} : vector<32x128xf32>, vector<128x512xf32>, vector<32x512xf32> -> vector<32x512xf32>
    %257 = arith.addf %255, %256 : vector<32x512xf32>
    %258 = vector.extract_strided_slice %257 {offsets = [0, 0], sizes = [32, 384], strides = [1, 1]} : vector<32x512xf32> to vector<32x384xf32>
    %259 = arith.negf %258 : vector<32x384xf32>
    %260 = math.exp %259 : vector<32x384xf32>
    %cst_57 = arith.constant 1.000000e+00 : f32
    %261 = vector.broadcast %cst_57 : f32 to vector<32x384xf32>
    %262 = arith.addf %261, %260 : vector<32x384xf32>
    %263 = arith.divf %261, %262 : vector<32x384xf32>
    %264 = vector.extract_strided_slice %257 {offsets = [0, 384], sizes = [32, 128], strides = [1, 1]} : vector<32x512xf32> to vector<32x128xf32>
    %265 = math.tanh %264 : vector<32x128xf32>
    %266 = vector.extract_strided_slice %263 {offsets = [0, 0], sizes = [32, 128], strides = [1, 1]} : vector<32x384xf32> to vector<32x128xf32>
    %267 = vector.extract_strided_slice %263 {offsets = [0, 128], sizes = [32, 128], strides = [1, 1]} : vector<32x384xf32> to vector<32x128xf32>
    %268 = vector.extract_strided_slice %263 {offsets = [0, 256], sizes = [32, 128], strides = [1, 1]} : vector<32x384xf32> to vector<32x128xf32>
    %269 = arith.mulf %267, %249 : vector<32x128xf32>
    %270 = arith.mulf %266, %265 : vector<32x128xf32>
    %271 = arith.addf %269, %270 : vector<32x128xf32>
    %272 = math.tanh %271 : vector<32x128xf32>
    %273 = arith.mulf %268, %272 : vector<32x128xf32>
    %c12_i32 = arith.constant 12 : i32
    %c32_i32_58 = arith.constant 32 : i32
    %274 = arith.muli %c12_i32, %c32_i32_58 : i32
    %275 = tpu.assume_multiple %274, 8 : i32
    %276 = arith.index_cast %275 : i32 to index
    %c0_59 = arith.constant 0 : index
    %277 = vector.load %arg9[%276, %c0_59] : memref<640x512xf32, #tpu.memory_space<vmem>>, vector<32x512xf32>
    %cst_60 = arith.constant dense<0.000000e+00> : vector<32x512xf32>
    %278 = tpu.matmul %273, %7, %cst_60 {dimension_numbers = #tpu.dot_dimension_numbers<[1], [0], [0], [1], [0, 0, 1, 1], [], []>} : vector<32x128xf32>, vector<128x512xf32>, vector<32x512xf32> -> vector<32x512xf32>
    %279 = arith.addf %277, %278 : vector<32x512xf32>
    %280 = vector.extract_strided_slice %279 {offsets = [0, 0], sizes = [32, 384], strides = [1, 1]} : vector<32x512xf32> to vector<32x384xf32>
    %281 = arith.negf %280 : vector<32x384xf32>
    %282 = math.exp %281 : vector<32x384xf32>
    %cst_61 = arith.constant 1.000000e+00 : f32
    %283 = vector.broadcast %cst_61 : f32 to vector<32x384xf32>
    %284 = arith.addf %283, %282 : vector<32x384xf32>
    %285 = arith.divf %283, %284 : vector<32x384xf32>
    %286 = vector.extract_strided_slice %279 {offsets = [0, 384], sizes = [32, 128], strides = [1, 1]} : vector<32x512xf32> to vector<32x128xf32>
    %287 = math.tanh %286 : vector<32x128xf32>
    %288 = vector.extract_strided_slice %285 {offsets = [0, 0], sizes = [32, 128], strides = [1, 1]} : vector<32x384xf32> to vector<32x128xf32>
    %289 = vector.extract_strided_slice %285 {offsets = [0, 128], sizes = [32, 128], strides = [1, 1]} : vector<32x384xf32> to vector<32x128xf32>
    %290 = vector.extract_strided_slice %285 {offsets = [0, 256], sizes = [32, 128], strides = [1, 1]} : vector<32x384xf32> to vector<32x128xf32>
    %291 = arith.mulf %289, %271 : vector<32x128xf32>
    %292 = arith.mulf %288, %287 : vector<32x128xf32>
    %293 = arith.addf %291, %292 : vector<32x128xf32>
    %294 = math.tanh %293 : vector<32x128xf32>
    %295 = arith.mulf %290, %294 : vector<32x128xf32>
    %c13_i32 = arith.constant 13 : i32
    %c32_i32_62 = arith.constant 32 : i32
    %296 = arith.muli %c13_i32, %c32_i32_62 : i32
    %297 = tpu.assume_multiple %296, 8 : i32
    %298 = arith.index_cast %297 : i32 to index
    %c0_63 = arith.constant 0 : index
    %299 = vector.load %arg9[%298, %c0_63] : memref<640x512xf32, #tpu.memory_space<vmem>>, vector<32x512xf32>
    %cst_64 = arith.constant dense<0.000000e+00> : vector<32x512xf32>
    %300 = tpu.matmul %295, %7, %cst_64 {dimension_numbers = #tpu.dot_dimension_numbers<[1], [0], [0], [1], [0, 0, 1, 1], [], []>} : vector<32x128xf32>, vector<128x512xf32>, vector<32x512xf32> -> vector<32x512xf32>
    %301 = arith.addf %299, %300 : vector<32x512xf32>
    %302 = vector.extract_strided_slice %301 {offsets = [0, 0], sizes = [32, 384], strides = [1, 1]} : vector<32x512xf32> to vector<32x384xf32>
    %303 = arith.negf %302 : vector<32x384xf32>
    %304 = math.exp %303 : vector<32x384xf32>
    %cst_65 = arith.constant 1.000000e+00 : f32
    %305 = vector.broadcast %cst_65 : f32 to vector<32x384xf32>
    %306 = arith.addf %305, %304 : vector<32x384xf32>
    %307 = arith.divf %305, %306 : vector<32x384xf32>
    %308 = vector.extract_strided_slice %301 {offsets = [0, 384], sizes = [32, 128], strides = [1, 1]} : vector<32x512xf32> to vector<32x128xf32>
    %309 = math.tanh %308 : vector<32x128xf32>
    %310 = vector.extract_strided_slice %307 {offsets = [0, 0], sizes = [32, 128], strides = [1, 1]} : vector<32x384xf32> to vector<32x128xf32>
    %311 = vector.extract_strided_slice %307 {offsets = [0, 128], sizes = [32, 128], strides = [1, 1]} : vector<32x384xf32> to vector<32x128xf32>
    %312 = vector.extract_strided_slice %307 {offsets = [0, 256], sizes = [32, 128], strides = [1, 1]} : vector<32x384xf32> to vector<32x128xf32>
    %313 = arith.mulf %311, %293 : vector<32x128xf32>
    %314 = arith.mulf %310, %309 : vector<32x128xf32>
    %315 = arith.addf %313, %314 : vector<32x128xf32>
    %316 = math.tanh %315 : vector<32x128xf32>
    %317 = arith.mulf %312, %316 : vector<32x128xf32>
    %c14_i32 = arith.constant 14 : i32
    %c32_i32_66 = arith.constant 32 : i32
    %318 = arith.muli %c14_i32, %c32_i32_66 : i32
    %319 = tpu.assume_multiple %318, 8 : i32
    %320 = arith.index_cast %319 : i32 to index
    %c0_67 = arith.constant 0 : index
    %321 = vector.load %arg9[%320, %c0_67] : memref<640x512xf32, #tpu.memory_space<vmem>>, vector<32x512xf32>
    %cst_68 = arith.constant dense<0.000000e+00> : vector<32x512xf32>
    %322 = tpu.matmul %317, %7, %cst_68 {dimension_numbers = #tpu.dot_dimension_numbers<[1], [0], [0], [1], [0, 0, 1, 1], [], []>} : vector<32x128xf32>, vector<128x512xf32>, vector<32x512xf32> -> vector<32x512xf32>
    %323 = arith.addf %321, %322 : vector<32x512xf32>
    %324 = vector.extract_strided_slice %323 {offsets = [0, 0], sizes = [32, 384], strides = [1, 1]} : vector<32x512xf32> to vector<32x384xf32>
    %325 = arith.negf %324 : vector<32x384xf32>
    %326 = math.exp %325 : vector<32x384xf32>
    %cst_69 = arith.constant 1.000000e+00 : f32
    %327 = vector.broadcast %cst_69 : f32 to vector<32x384xf32>
    %328 = arith.addf %327, %326 : vector<32x384xf32>
    %329 = arith.divf %327, %328 : vector<32x384xf32>
    %330 = vector.extract_strided_slice %323 {offsets = [0, 384], sizes = [32, 128], strides = [1, 1]} : vector<32x512xf32> to vector<32x128xf32>
    %331 = math.tanh %330 : vector<32x128xf32>
    %332 = vector.extract_strided_slice %329 {offsets = [0, 0], sizes = [32, 128], strides = [1, 1]} : vector<32x384xf32> to vector<32x128xf32>
    %333 = vector.extract_strided_slice %329 {offsets = [0, 128], sizes = [32, 128], strides = [1, 1]} : vector<32x384xf32> to vector<32x128xf32>
    %334 = vector.extract_strided_slice %329 {offsets = [0, 256], sizes = [32, 128], strides = [1, 1]} : vector<32x384xf32> to vector<32x128xf32>
    %335 = arith.mulf %333, %315 : vector<32x128xf32>
    %336 = arith.mulf %332, %331 : vector<32x128xf32>
    %337 = arith.addf %335, %336 : vector<32x128xf32>
    %338 = math.tanh %337 : vector<32x128xf32>
    %339 = arith.mulf %334, %338 : vector<32x128xf32>
    %c15_i32 = arith.constant 15 : i32
    %c32_i32_70 = arith.constant 32 : i32
    %340 = arith.muli %c15_i32, %c32_i32_70 : i32
    %341 = tpu.assume_multiple %340, 8 : i32
    %342 = arith.index_cast %341 : i32 to index
    %c0_71 = arith.constant 0 : index
    %343 = vector.load %arg9[%342, %c0_71] : memref<640x512xf32, #tpu.memory_space<vmem>>, vector<32x512xf32>
    %cst_72 = arith.constant dense<0.000000e+00> : vector<32x512xf32>
    %344 = tpu.matmul %339, %7, %cst_72 {dimension_numbers = #tpu.dot_dimension_numbers<[1], [0], [0], [1], [0, 0, 1, 1], [], []>} : vector<32x128xf32>, vector<128x512xf32>, vector<32x512xf32> -> vector<32x512xf32>
    %345 = arith.addf %343, %344 : vector<32x512xf32>
    %346 = vector.extract_strided_slice %345 {offsets = [0, 0], sizes = [32, 384], strides = [1, 1]} : vector<32x512xf32> to vector<32x384xf32>
    %347 = arith.negf %346 : vector<32x384xf32>
    %348 = math.exp %347 : vector<32x384xf32>
    %cst_73 = arith.constant 1.000000e+00 : f32
    %349 = vector.broadcast %cst_73 : f32 to vector<32x384xf32>
    %350 = arith.addf %349, %348 : vector<32x384xf32>
    %351 = arith.divf %349, %350 : vector<32x384xf32>
    %352 = vector.extract_strided_slice %345 {offsets = [0, 384], sizes = [32, 128], strides = [1, 1]} : vector<32x512xf32> to vector<32x128xf32>
    %353 = math.tanh %352 : vector<32x128xf32>
    %354 = vector.extract_strided_slice %351 {offsets = [0, 0], sizes = [32, 128], strides = [1, 1]} : vector<32x384xf32> to vector<32x128xf32>
    %355 = vector.extract_strided_slice %351 {offsets = [0, 128], sizes = [32, 128], strides = [1, 1]} : vector<32x384xf32> to vector<32x128xf32>
    %356 = vector.extract_strided_slice %351 {offsets = [0, 256], sizes = [32, 128], strides = [1, 1]} : vector<32x384xf32> to vector<32x128xf32>
    %357 = arith.mulf %355, %337 : vector<32x128xf32>
    %358 = arith.mulf %354, %353 : vector<32x128xf32>
    %359 = arith.addf %357, %358 : vector<32x128xf32>
    %360 = math.tanh %359 : vector<32x128xf32>
    %361 = arith.mulf %356, %360 : vector<32x128xf32>
    %c16_i32 = arith.constant 16 : i32
    %c32_i32_74 = arith.constant 32 : i32
    %362 = arith.muli %c16_i32, %c32_i32_74 : i32
    %363 = tpu.assume_multiple %362, 8 : i32
    %364 = arith.index_cast %363 : i32 to index
    %c0_75 = arith.constant 0 : index
    %365 = vector.load %arg9[%364, %c0_75] : memref<640x512xf32, #tpu.memory_space<vmem>>, vector<32x512xf32>
    %cst_76 = arith.constant dense<0.000000e+00> : vector<32x512xf32>
    %366 = tpu.matmul %361, %7, %cst_76 {dimension_numbers = #tpu.dot_dimension_numbers<[1], [0], [0], [1], [0, 0, 1, 1], [], []>} : vector<32x128xf32>, vector<128x512xf32>, vector<32x512xf32> -> vector<32x512xf32>
    %367 = arith.addf %365, %366 : vector<32x512xf32>
    %368 = vector.extract_strided_slice %367 {offsets = [0, 0], sizes = [32, 384], strides = [1, 1]} : vector<32x512xf32> to vector<32x384xf32>
    %369 = arith.negf %368 : vector<32x384xf32>
    %370 = math.exp %369 : vector<32x384xf32>
    %cst_77 = arith.constant 1.000000e+00 : f32
    %371 = vector.broadcast %cst_77 : f32 to vector<32x384xf32>
    %372 = arith.addf %371, %370 : vector<32x384xf32>
    %373 = arith.divf %371, %372 : vector<32x384xf32>
    %374 = vector.extract_strided_slice %367 {offsets = [0, 384], sizes = [32, 128], strides = [1, 1]} : vector<32x512xf32> to vector<32x128xf32>
    %375 = math.tanh %374 : vector<32x128xf32>
    %376 = vector.extract_strided_slice %373 {offsets = [0, 0], sizes = [32, 128], strides = [1, 1]} : vector<32x384xf32> to vector<32x128xf32>
    %377 = vector.extract_strided_slice %373 {offsets = [0, 128], sizes = [32, 128], strides = [1, 1]} : vector<32x384xf32> to vector<32x128xf32>
    %378 = vector.extract_strided_slice %373 {offsets = [0, 256], sizes = [32, 128], strides = [1, 1]} : vector<32x384xf32> to vector<32x128xf32>
    %379 = arith.mulf %377, %359 : vector<32x128xf32>
    %380 = arith.mulf %376, %375 : vector<32x128xf32>
    %381 = arith.addf %379, %380 : vector<32x128xf32>
    %382 = math.tanh %381 : vector<32x128xf32>
    %383 = arith.mulf %378, %382 : vector<32x128xf32>
    %c17_i32 = arith.constant 17 : i32
    %c32_i32_78 = arith.constant 32 : i32
    %384 = arith.muli %c17_i32, %c32_i32_78 : i32
    %385 = tpu.assume_multiple %384, 8 : i32
    %386 = arith.index_cast %385 : i32 to index
    %c0_79 = arith.constant 0 : index
    %387 = vector.load %arg9[%386, %c0_79] : memref<640x512xf32, #tpu.memory_space<vmem>>, vector<32x512xf32>
    %cst_80 = arith.constant dense<0.000000e+00> : vector<32x512xf32>
    %388 = tpu.matmul %383, %7, %cst_80 {dimension_numbers = #tpu.dot_dimension_numbers<[1], [0], [0], [1], [0, 0, 1, 1], [], []>} : vector<32x128xf32>, vector<128x512xf32>, vector<32x512xf32> -> vector<32x512xf32>
    %389 = arith.addf %387, %388 : vector<32x512xf32>
    %390 = vector.extract_strided_slice %389 {offsets = [0, 0], sizes = [32, 384], strides = [1, 1]} : vector<32x512xf32> to vector<32x384xf32>
    %391 = arith.negf %390 : vector<32x384xf32>
    %392 = math.exp %391 : vector<32x384xf32>
    %cst_81 = arith.constant 1.000000e+00 : f32
    %393 = vector.broadcast %cst_81 : f32 to vector<32x384xf32>
    %394 = arith.addf %393, %392 : vector<32x384xf32>
    %395 = arith.divf %393, %394 : vector<32x384xf32>
    %396 = vector.extract_strided_slice %389 {offsets = [0, 384], sizes = [32, 128], strides = [1, 1]} : vector<32x512xf32> to vector<32x128xf32>
    %397 = math.tanh %396 : vector<32x128xf32>
    %398 = vector.extract_strided_slice %395 {offsets = [0, 0], sizes = [32, 128], strides = [1, 1]} : vector<32x384xf32> to vector<32x128xf32>
    %399 = vector.extract_strided_slice %395 {offsets = [0, 128], sizes = [32, 128], strides = [1, 1]} : vector<32x384xf32> to vector<32x128xf32>
    %400 = vector.extract_strided_slice %395 {offsets = [0, 256], sizes = [32, 128], strides = [1, 1]} : vector<32x384xf32> to vector<32x128xf32>
    %401 = arith.mulf %399, %381 : vector<32x128xf32>
    %402 = arith.mulf %398, %397 : vector<32x128xf32>
    %403 = arith.addf %401, %402 : vector<32x128xf32>
    %404 = math.tanh %403 : vector<32x128xf32>
    %405 = arith.mulf %400, %404 : vector<32x128xf32>
    %c18_i32 = arith.constant 18 : i32
    %c32_i32_82 = arith.constant 32 : i32
    %406 = arith.muli %c18_i32, %c32_i32_82 : i32
    %407 = tpu.assume_multiple %406, 8 : i32
    %408 = arith.index_cast %407 : i32 to index
    %c0_83 = arith.constant 0 : index
    %409 = vector.load %arg9[%408, %c0_83] : memref<640x512xf32, #tpu.memory_space<vmem>>, vector<32x512xf32>
    %cst_84 = arith.constant dense<0.000000e+00> : vector<32x512xf32>
    %410 = tpu.matmul %405, %7, %cst_84 {dimension_numbers = #tpu.dot_dimension_numbers<[1], [0], [0], [1], [0, 0, 1, 1], [], []>} : vector<32x128xf32>, vector<128x512xf32>, vector<32x512xf32> -> vector<32x512xf32>
    %411 = arith.addf %409, %410 : vector<32x512xf32>
    %412 = vector.extract_strided_slice %411 {offsets = [0, 0], sizes = [32, 384], strides = [1, 1]} : vector<32x512xf32> to vector<32x384xf32>
    %413 = arith.negf %412 : vector<32x384xf32>
    %414 = math.exp %413 : vector<32x384xf32>
    %cst_85 = arith.constant 1.000000e+00 : f32
    %415 = vector.broadcast %cst_85 : f32 to vector<32x384xf32>
    %416 = arith.addf %415, %414 : vector<32x384xf32>
    %417 = arith.divf %415, %416 : vector<32x384xf32>
    %418 = vector.extract_strided_slice %411 {offsets = [0, 384], sizes = [32, 128], strides = [1, 1]} : vector<32x512xf32> to vector<32x128xf32>
    %419 = math.tanh %418 : vector<32x128xf32>
    %420 = vector.extract_strided_slice %417 {offsets = [0, 0], sizes = [32, 128], strides = [1, 1]} : vector<32x384xf32> to vector<32x128xf32>
    %421 = vector.extract_strided_slice %417 {offsets = [0, 128], sizes = [32, 128], strides = [1, 1]} : vector<32x384xf32> to vector<32x128xf32>
    %422 = vector.extract_strided_slice %417 {offsets = [0, 256], sizes = [32, 128], strides = [1, 1]} : vector<32x384xf32> to vector<32x128xf32>
    %423 = arith.mulf %421, %403 : vector<32x128xf32>
    %424 = arith.mulf %420, %419 : vector<32x128xf32>
    %425 = arith.addf %423, %424 : vector<32x128xf32>
    %426 = math.tanh %425 : vector<32x128xf32>
    %427 = arith.mulf %422, %426 : vector<32x128xf32>
    %c19_i32 = arith.constant 19 : i32
    %c32_i32_86 = arith.constant 32 : i32
    %428 = arith.muli %c19_i32, %c32_i32_86 : i32
    %429 = tpu.assume_multiple %428, 8 : i32
    %430 = arith.index_cast %429 : i32 to index
    %c0_87 = arith.constant 0 : index
    %431 = vector.load %arg9[%430, %c0_87] : memref<640x512xf32, #tpu.memory_space<vmem>>, vector<32x512xf32>
    %cst_88 = arith.constant dense<0.000000e+00> : vector<32x512xf32>
    %432 = tpu.matmul %427, %7, %cst_88 {dimension_numbers = #tpu.dot_dimension_numbers<[1], [0], [0], [1], [0, 0, 1, 1], [], []>} : vector<32x128xf32>, vector<128x512xf32>, vector<32x512xf32> -> vector<32x512xf32>
    %433 = arith.addf %431, %432 : vector<32x512xf32>
    %434 = vector.extract_strided_slice %433 {offsets = [0, 0], sizes = [32, 384], strides = [1, 1]} : vector<32x512xf32> to vector<32x384xf32>
    %435 = arith.negf %434 : vector<32x384xf32>
    %436 = math.exp %435 : vector<32x384xf32>
    %cst_89 = arith.constant 1.000000e+00 : f32
    %437 = vector.broadcast %cst_89 : f32 to vector<32x384xf32>
    %438 = arith.addf %437, %436 : vector<32x384xf32>
    %439 = arith.divf %437, %438 : vector<32x384xf32>
    %440 = vector.extract_strided_slice %433 {offsets = [0, 384], sizes = [32, 128], strides = [1, 1]} : vector<32x512xf32> to vector<32x128xf32>
    %441 = math.tanh %440 : vector<32x128xf32>
    %442 = vector.extract_strided_slice %439 {offsets = [0, 0], sizes = [32, 128], strides = [1, 1]} : vector<32x384xf32> to vector<32x128xf32>
    %443 = vector.extract_strided_slice %439 {offsets = [0, 128], sizes = [32, 128], strides = [1, 1]} : vector<32x384xf32> to vector<32x128xf32>
    %444 = vector.extract_strided_slice %439 {offsets = [0, 256], sizes = [32, 128], strides = [1, 1]} : vector<32x384xf32> to vector<32x128xf32>
    %445 = arith.mulf %443, %425 : vector<32x128xf32>
    %446 = arith.mulf %442, %441 : vector<32x128xf32>
    %447 = arith.addf %445, %446 : vector<32x128xf32>
    %448 = math.tanh %447 : vector<32x128xf32>
    %449 = arith.mulf %444, %448 : vector<32x128xf32>
    %c20_i32 = arith.constant 20 : i32
    %c0_90 = arith.constant 0 : index
    %c0_91 = arith.constant 0 : index
    %450 = vector.load %arg8[%c0_90, %c0_91] : memref<32x128xf32, #tpu.memory_space<vmem>>, vector<32x128xf32>
    tpu.vector_store %arg8[%c0_90, %c0_91], %449 {strides = array<i32>} : memref<32x128xf32, #tpu.memory_space<vmem>>, vector<32x128xf32>,
    %c0_92 = arith.constant 0 : index
    %c0_93 = arith.constant 0 : index
    %451 = vector.load %arg5[%c0_92, %c0_93] : memref<128x128xf32, #tpu.memory_space<vmem>>, vector<128x128xf32>
    %cst_94 = arith.constant dense<0.000000e+00> : vector<32x128xf32>
    %452 = tpu.matmul %449, %451, %cst_94 {dimension_numbers = #tpu.dot_dimension_numbers<[1], [0], [0], [1], [0, 0, 1, 1], [], []>} : vector<32x128xf32>, vector<128x128xf32>, vector<32x128xf32> -> vector<32x128xf32>
    %c0_95 = arith.constant 0 : index
    %c0_96 = arith.constant 0 : index
    %453 = vector.load %arg6[%c0_95, %c0_96] : memref<1x128xf32, #tpu.memory_space<vmem>>, vector<1x128xf32>
    %454 = vector.broadcast %453 : vector<1x128xf32> to vector<32x128xf32>
    %455 = arith.addf %452, %454 : vector<32x128xf32>
    %c0_97 = arith.constant 0 : index
    %c0_98 = arith.constant 0 : index
    %456 = vector.load %arg7[%c0_97, %c0_98] : memref<32x128xf32, #tpu.memory_space<vmem>>, vector<32x128xf32>
    tpu.vector_store %arg7[%c0_97, %c0_98], %455 {strides = array<i32>} : memref<32x128xf32, #tpu.memory_space<vmem>>, vector<32x128xf32>,
    return
  }
  func.func @transform_0(%arg0: i32) -> (i32, i32) {
    %c0_i32 = arith.constant 0 : i32
    %c0_i32_0 = arith.constant 0 : i32
    %c0_i32_1 = arith.constant 0 : i32
    return %c0_i32, %c0_i32_0 : i32, i32
  }
  func.func @transform_1(%arg0: i32) -> (i32, i32) {
    %c0_i32 = arith.constant 0 : i32
    %c0_i32_0 = arith.constant 0 : i32
    %c0_i32_1 = arith.constant 0 : i32
    return %c0_i32, %c0_i32_0 : i32, i32
  }
  func.func @transform_2(%arg0: i32) -> (i32, i32) {
    %c0_i32 = arith.constant 0 : i32
    %c0_i32_0 = arith.constant 0 : i32
    %c0_i32_1 = arith.constant 0 : i32
    return %c0_i32, %c0_i32_0 : i32, i32
  }
  func.func @transform_3(%arg0: i32) -> (i32, i32) {
    %c0_i32 = arith.constant 0 : i32
    %c0_i32_0 = arith.constant 0 : i32
    %c0_i32_1 = arith.constant 0 : i32
    return %c0_i32, %c0_i32_0 : i32, i32
  }
  func.func @transform_4(%arg0: i32) -> (i32, i32) {
    %c0_i32 = arith.constant 0 : i32
    %c0_i32_0 = arith.constant 0 : i32
    %c0_i32_1 = arith.constant 0 : i32
    return %c0_i32, %c0_i32_0 : i32, i32
  }
  func.func @transform_5(%arg0: i32) -> (i32, i32) {
    %c0_i32 = arith.constant 0 : i32
    %c0_i32_0 = arith.constant 0 : i32
    %c0_i32_1 = arith.constant 0 : i32
    return %c0_i32, %c0_i32_0 : i32, i32
  }
  func.func @transform_6(%arg0: i32) -> (i32, i32) {
    %c0_i32 = arith.constant 0 : i32
    %c0_i32_0 = arith.constant 0 : i32
    %c0_i32_1 = arith.constant 0 : i32
    return %c0_i32, %c0_i32_0 : i32, i32
  }
  func.func @transform_7(%arg0: i32) -> (i32, i32) {
    %c0_i32 = arith.constant 0 : i32
    %c0_i32_0 = arith.constant 0 : i32
    %c0_i32_1 = arith.constant 0 : i32
    return %c0_i32, %c0_i32_0 : i32, i32
  }
}

</mosaic_0001>

<bundles_post_ra>
// kernel: lstm_model_forward.1
= control target key start
LH: loop header
LB: loop body
LE: loop exit
PB: predicated region body
PF: predicated region fallthrough
CT: control target
= control target key end

     0   :  { %vm377_vm0 = vcmask 1041408   ;;  %vm11940_vm1 = vmmov 1   ;;  %v14394_v7 = vmov 0.0   ;;  %vm136_vm3 = vcmask 80896   ;;  %s14386_s0 = inlined_call_operand.vmem [shape: f32[640,10], index: 0, kind: input, shape index: {}]   ;;  %s14387_s1 = inlined_call_operand.vmem [shape: f32[10,512], index: 1, kind: input, shape index: {}]   ;;  %s14388_s2 = inlined_call_operand.vmem [shape: f32[128,512], index: 2, kind: input, shape index: {}]   ;;  %s14389_s3 = inlined_call_operand.vmem [shape: f32[1,512], index: 3, kind: input, shape index: {}]   ;;  %s14390_s4 = inlined_call_operand.vmem [shape: f32[128,128], index: 4, kind: input, shape index: {}]   ;;  %s14391_s5 = inlined_call_operand.vmem [shape: f32[1,128], index: 5, kind: input, shape index: {}]   ;;  %s14392_s6 = inlined_call_operand.vmem [shape: f32[32,128], index: 6, kind: output, shape index: {0}]   ;;  %s14393_s7 = inlined_call_operand.hbm [shape: f32[32,128], index: 7, kind: output, shape index: {1}]  }
   0x1   :  { %v107_v0 = vld [vmem:[%s14387_s1 + $0x8] sm:$0xff]  ;;  %v106_v2 = vld [vmem:[%s14387_s1] sm:$0xff]  ;;  %vm11994_vm2 = vmpackc.low %vm377_vm0, %vm11940_vm1  ;;  %454 = vmatprep.mubr.f32.mxu0 %v14394_v7  ;;  %916 = vmatprep.mubr.f32.mxu1 %v14394_v7 }
   0x2   :  { %v111_v1 = vld [vmem:[%s14387_s1 + $0x28] sm:$0x3]  ;;  %v110_v5 = vld [vmem:[%s14387_s1 + $0x20] sm:$0x3]  ;;  %v109_v8 = vld [vmem:[%s14387_s1 + $0x18] sm:$0xff] }
   0x3   :  { %v8662_v3 = vpack.c.bf16 %v111_v1, %v107_v0  ;;  %v8665_v6 = vpack.c.bf16 %v110_v5, %v106_v2  ;;  %v113_v9 = vld [vmem:[%s14387_s1 + $0x38] sm:$0x3]  ;;  %v108_v11 = vld [vmem:[%s14387_s1 + $0x10] sm:$0xff]  ;;  %v26_v13 = vld [vmem:[%s14386_s0] sm:$0xff] }
   0x4   :  { %v8668_v10 = vpack.c.bf16 %v113_v9, %v109_v8  ;;  %v112_v12 = vld [vmem:[%s14387_s1 + $0x30] sm:$0x3]  ;;  %v103_v14 = vld [vmem:[%s14386_s0 + $0x268] sm:$0xff]  ;;  %v1800_v18 = vld [vmem:[%s14388_s2] sm:$0xff] }
   0x5   :  { %8664 = vmatprep.subr.msk.bf16.mxu0 %vm11994_vm2, %v8662_v3  ;;  %9986 = vmatprep.subr.msk.bf16.mxu1 %vm11994_vm2, %v8662_v3  ;;  %v8671_v15 = vpack.c.bf16 %v112_v12, %v108_v11  ;;  %v1801_v16 = vld [vmem:[%s14388_s2 + $0x8] sm:$0xff]  ;;  %v1804_v20 = vld [vmem:[%s14388_s2 + $0x20] sm:$0xff]  ;;  %v1803_v21 = vld [vmem:[%s14388_s2 + $0x18] sm:$0xff] }
   0x6   :  { %8667 = vmatpush1.bf16.msk.msra.mxu0 %vm11994_vm2, %v8665_v6  ;;  %9987 = vmatpush1.bf16.msk.msra.mxu1 %vm11994_vm2, %v8665_v6  ;;  %v1805_v17 = vld [vmem:[%s14388_s2 + $0x28] sm:$0xff]  ;;  %v12050_v22 = vpack.c.bf16 %v1804_v20, %v1800_v18  ;;  %v1807_v23 = vld [vmem:[%s14388_s2 + $0x38] sm:$0xff]  ;;  %v104_v25 = vld [vmem:[%s14386_s0 + $0x270] sm:$0xff] }
   0x7   :  { %8670 = vmatprep.subr.msk.bf16.mxu1 %vm11994_vm2, %v8668_v10  ;;  %v12040_v19 = vpack.c.bf16 %v1805_v17, %v1801_v16  ;;  %v27_v24 = vld [vmem:[%s14386_s0 + $0x8] sm:$0xff]  ;;  %v12064_v26 = vpack.c.bf16 %v1807_v23, %v1803_v21  ;;  %v1808_v29 = vld [vmem:[%s14388_s2 + $0x40] sm:$0xff]  ;;  %v28_v30 = vld [vmem:[%s14386_s0 + $0x10] sm:$0xff] }
   0x8   :  { %v1809_v27 = vld [vmem:[%s14388_s2 + $0x48] sm:$0xff]  ;;  %v105_v31 = vld [vmem:[%s14386_s0 + $0x278] sm:$0xff]  ;;  %v1812_v33 = vld [vmem:[%s14388_s2 + $0x60] sm:$0xff] }
   0x9   :  { %8201 = vmatmul.mubr.msk.f32.vlgmr.msra.gmra.mrb[0].mxu0 %vm136_vm3, %v26_v13  ;;  %8278 = vmatmul.mubr.msk.f32.vlgmr.msra.gmra.mrb[0].mxu1 %vm136_vm3, %v103_v14  ;;  %v1813_v28 = vld [vmem:[%s14388_s2 + $0x68] sm:$0xff]  ;;  %v1802_v34 = vld [vmem:[%s14388_s2 + $0x10] sm:$0xff]  ;;  %v12100_v36 = vpack.c.bf16 %v1812_v33, %v1808_v29  ;;  %v1811_v37 = vld [vmem:[%s14388_s2 + $0x58] sm:$0xff] }
   0xa   :  { %8673 = vmatpush1.bf16.msk.msra.mxu1 %vm11994_vm2, %v8671_v15  ;;  %460 = vmatprep.mubr.f32.mxu0 %v14394_v7  ;;  %v12089_v32 = vpack.c.bf16 %v1813_v28, %v1809_v27  ;;  %v1806_v35 = vld [vmem:[%s14388_s2 + $0x30] sm:$0xff]  ;;  %v1815_v38 = vld [vmem:[%s14388_s2 + $0x78] sm:$0xff]  ;;  %v1817_v41 = vld [vmem:[%s14388_s2 + $0x88] sm:$0xff] }
   0xb   :  { %922 = vmatprep.mubr.f32.mxu1 %v14394_v7  ;;  %8675 = vmatprep.subr.bf16.mxu0 %v12040_v19  ;;  %v29_v39 = vld [vmem:[%s14386_s0 + $0x18] sm:$0xff]  ;;  %v12116_v40 = vpack.c.bf16 %v1806_v35, %v1802_v34  ;;  %v12122_v42 = vpack.c.bf16 %v1815_v38, %v1811_v37  ;;  %v1810_v43 = vld [vmem:[%s14388_s2 + $0x50] sm:$0xff]  ;;  %v1821_v44 = vld [vmem:[%s14388_s2 + $0xa8] sm:$0xff] }
   0xc   :  { %8677 = vmatpush1.bf16.msra.mxu0 %v12050_v22  ;;  %8707 = vmatprep.subr.bf16.mxu1 %v12064_v26  ;;  %v1814_v45 = vld [vmem:[%s14388_s2 + $0x70] sm:$0xff]  ;;  %v12133_v46 = vpack.c.bf16 %v1821_v44, %v1817_v41  ;;  %v1816_v47 = vld [vmem:[%s14388_s2 + $0x80] sm:$0xff]  ;;  %v1819_v49 = vld [vmem:[%s14388_s2 + $0x98] sm:$0xff] }
   0xd   :  { %8202 = vmatmul.mubr.msk.f32.gmra.mrb[2].mxu0 %vm136_vm3, %v27_v24  ;;  %8279 = vmatmul.mubr.msk.f32.gmra.mrb[2].mxu1 %vm136_vm3, %v104_v25  ;;  %v1820_v48 = vld [vmem:[%s14388_s2 + $0xa0] sm:$0xff]  ;;  %v1823_v50 = vld [vmem:[%s14388_s2 + $0xb8] sm:$0xff]  ;;  %v12156_v52 = vpack.c.bf16 %v1814_v45, %v1810_v43  ;;  %v1818_v55 = vld [vmem:[%s14388_s2 + $0x90] sm:$0xff] }
   0xe   :  { %466 = vmatprep.mubr.f32.mxu0 %v14394_v7  ;;  %928 = vmatprep.mubr.f32.mxu1 %v14394_v7  ;;  %v30_v51 = vld [vmem:[%s14386_s0 + $0x20] sm:$0xff]  ;;  %v12158_v53 = vpack.c.bf16 %v1820_v48, %v1816_v47  ;;  %v12161_v54 = vpack.c.bf16 %v1823_v50, %v1819_v49  ;;  %v1822_v56 = vld [vmem:[%s14388_s2 + $0xb0] sm:$0xff]  ;;  %v1825_v57 = vld [vmem:[%s14388_s2 + $0xc8] sm:$0xff] }
   0xf   :  { %8679 = vmatprep.subr.bf16.mxu0 %v12089_v32  ;;  %v1829_v58 = vld [vmem:[%s14388_s2 + $0xe8] sm:$0xff]  ;;  %v1824_v59 = vld [vmem:[%s14388_s2 + $0xc0] sm:$0xff]  ;;  %v1827_v63 = vld [vmem:[%s14388_s2 + $0xd8] sm:$0xff]  ;;  %v12195_v0 = vpack.c.bf16 %v1822_v56, %v1818_v55 }
  0x10   :  { %8681 = vmatpush1.bf16.msra.mxu0 %v12100_v36  ;;  %v1828_v60 = vld [vmem:[%s14388_s2 + $0xe0] sm:$0xff]  ;;  %v31_v61 = vld [vmem:[%s14386_s0 + $0x28] sm:$0xff]  ;;  %v12188_v62 = vpack.c.bf16 %v1829_v58, %v1825_v57  ;;  %v1831_v2 = vld [vmem:[%s14388_s2 + $0xf8] sm:$0xff] }
  0x11   :  { %8203 = vmatmul.mubr.msk.f32.gmra.mrb[4].mxu0 %vm136_vm3, %v28_v30  ;;  %8280 = vmatmul.mubr.msk.f32.gmra.mrb[4].mxu1 %vm136_vm3, %v105_v31  ;;  %v12197_v1 = vpack.c.bf16 %v1828_v60, %v1824_v59  ;;  %v12204_v3 = vpack.c.bf16 %v1831_v2, %v1827_v63  ;;  %v1826_v4 = vld [vmem:[%s14388_s2 + $0xd0] sm:$0xff] }
  0x12   :  { %472 = vmatprep.mubr.f32.mxu0 %v14394_v7  ;;  %999 = vmatprep.mubr.f32.mxu1 %v14394_v7  ;;  %v1830_v5 = vld [vmem:[%s14388_s2 + $0xf0] sm:$0xff] }
  0x13   :  { %8683 = vmatprep.subr.bf16.mxu0 %v12133_v46 }
  0x14   :  { %8685 = vmatpush1.bf16.msra.mxu0 %v12158_v53 }
  0x15   :  { %8204 = vmatmul.mubr.msk.f32.gmra.mrb[6].mxu0 %vm136_vm3, %v29_v39  ;;  %8283 = vmatmul.mubr.msk.f32.vlgmr.msra.gmra.mrb[6].mxu1 %vm136_vm3, %v26_v13 }
  0x16   :  { %8709 = vmatpush1.bf16.msra.mxu1 %v12116_v40  ;;  %478 = vmatprep.mubr.f32.mxu0 %v14394_v7 }
  0x17   :  { %1005 = vmatprep.mubr.f32.mxu1 %v14394_v7  ;;  %8711 = vmatprep.subr.bf16.mxu1 %v12122_v42 }
  0x18   :  { %8687 = vmatprep.subr.bf16.mxu0 %v12188_v62 }
  0x19   :  { %8205 = vmatmul.mubr.msk.f32.gmra.mrb[8].mxu0 %vm136_vm3, %v30_v51  ;;  %8284 = vmatmul.mubr.msk.f32.gmra.mrb[8].mxu1 %vm136_vm3, %v27_v24 }
  0x1a   :  { %484 = vmatprep.mubr.f32.mxu0 %v14394_v7  ;;  %1011 = vmatprep.mubr.f32.mxu1 %v14394_v7 }
  0x1b   :  { %8713 = vmatpush1.bf16.msra.mxu1 %v12156_v52 }
  0x1c   :  { %8715 = vmatprep.subr.bf16.mxu1 %v12161_v54 }
  0x1d   :  { %8206 = vmatmul.mubr.msk.f32.gmra.mrb[10].mxu0 %vm136_vm3, %v31_v61  ;;  %8285 = vmatmul.mubr.msk.f32.gmra.mrb[10].mxu1 %vm136_vm3, %v28_v30 }
  0x1e   :  { %13 = vsyncpa [#allocation4], 0  ;;  %490 = vmatprep.mubr.f32.mxu0 %v14394_v7  ;;  %1017 = vmatprep.mubr.f32.mxu1 %v14394_v7  ;;  %v32_v6 = vld [vmem:[%s14386_s0 + $0x30] sm:$0xff]  ;;  %v12221_v8 = vpack.c.bf16 %v1830_v5, %v1826_v4  ;;  %v33_v9 = vld [vmem:[%s14386_s0 + $0x38] sm:$0xff] }
  0x1f   :  { %8717 = vmatpush1.bf16.msra.mxu1 %v12195_v0  ;;  %8689 = vmatpush1.bf16.msra.mxu0 %v12197_v1  ;;  %v34_v10 = vld [vmem:[%s14386_s0 + $0x40] sm:$0xff]  ;;  %v35_v11 = vld [vmem:[%s14386_s0 + $0x48] sm:$0xff]  ;;  %v36_v17 = vld [vmem:[%s14386_s0 + $0x50] sm:$0xff] }
  0x20   :  { %8719 = vmatprep.subr.bf16.mxu1 %v12204_v3  ;;  %v1833_v12 = vld [vmem:[%s14388_s2 + $0x108] sm:$0xff]  ;;  %v1832_v15 = vld [vmem:[%s14388_s2 + $0x100] sm:$0xff]  ;;  %v37_v20 = vld [vmem:[%s14386_s0 + $0x58] sm:$0xff] }
  0x21   :  { %8207 = vmatmul.mubr.msk.f32.gmra.mrb[12].mxu0 %vm136_vm3, %v32_v6  ;;  %8286 = vmatmul.mubr.msk.f32.gmra.mrb[12].mxu1 %vm136_vm3, %v29_v39  ;;  %v1837_v13 = vld [vmem:[%s14388_s2 + $0x128] sm:$0xff]  ;;  %v1836_v16 = vld [vmem:[%s14388_s2 + $0x120] sm:$0xff]  ;;  %v1835_v21 = vld [vmem:[%s14388_s2 + $0x118] sm:$0xff] }
  0x22   :  { %496 = vmatprep.mubr.f32.mxu0 %v14394_v7  ;;  %1023 = vmatprep.mubr.f32.mxu1 %v14394_v7  ;;  %v12252_v14 = vpack.c.bf16 %v1837_v13, %v1833_v12  ;;  %v12267_v18 = vpack.c.bf16 %v1836_v16, %v1832_v15  ;;  %v1839_v23 = vld [vmem:[%s14388_s2 + $0x138] sm:$0xff]  ;;  %v1834_v24 = vld [vmem:[%s14388_s2 + $0x110] sm:$0xff]  ;;  %v38_v25 = vld [vmem:[%s14386_s0 + $0x60] sm:$0xff] }
  0x23   :  { %8721 = vmatpush1.bf16.msra.mxu1 %v12221_v8  ;;  %v12294_v27 = vpack.c.bf16 %v1839_v23, %v1835_v21  ;;  %v1838_v28 = vld [vmem:[%s14388_s2 + $0x130] sm:$0xff]  ;;  %v39_v30 = vld [vmem:[%s14386_s0 + $0x68] sm:$0xff]  ;;  %v41_v33 = vld [vmem:[%s14386_s0 + $0x78] sm:$0xff] }
  0x24   :  { %8691 = vmatprep.subr.bf16.mxu0 %v12252_v14  ;;  %v12299_v29 = vpack.c.bf16 %v1838_v28, %v1834_v24  ;;  %v40_v31 = vld [vmem:[%s14386_s0 + $0x70] sm:$0xff]  ;;  %v42_v34 = vld [vmem:[%s14386_s0 + $0x80] sm:$0xff]  ;;  %v43_v35 = vld [vmem:[%s14386_s0 + $0x88] sm:$0xff] }
  0x25   :  { %8208 = vmatmul.mubr.msk.f32.gmra.mrb[14].mxu0 %vm136_vm3, %v33_v9  ;;  %8287 = vmatmul.mubr.msk.f32.gmra.mrb[14].mxu1 %vm136_vm3, %v30_v51  ;;  %v44_v37 = vld [vmem:[%s14386_s0 + $0x90] sm:$0xff]  ;;  %v1841_v38 = vld [vmem:[%s14388_s2 + $0x148] sm:$0xff]  ;;  %v45_v41 = vld [vmem:[%s14386_s0 + $0x98] sm:$0xff] }
  0x26   :  { %502 = vmatprep.mubr.f32.mxu0 %v14394_v7  ;;  %1029 = vmatprep.mubr.f32.mxu1 %v14394_v7  ;;  %v1845_v39 = vld [vmem:[%s14388_s2 + $0x168] sm:$0xff]  ;;  %v1840_v44 = vld [vmem:[%s14388_s2 + $0x140] sm:$0xff]  ;;  %v48_v50 = vld [vmem:[%s14386_s0 + $0xb0] sm:$0xff] }
  0x27   :  { %8693 = vmatpush1.bf16.msra.mxu0 %v12267_v18  ;;  %8723 = vmatprep.subr.bf16.mxu1 %v12294_v27  ;;  %v12358_v43 = vpack.c.bf16 %v1845_v39, %v1841_v38  ;;  %v1844_v45 = vld [vmem:[%s14388_s2 + $0x160] sm:$0xff]  ;;  %v47_v49 = vld [vmem:[%s14386_s0 + $0xa8] sm:$0xff]  ;;  %v1843_v51 = vld [vmem:[%s14388_s2 + $0x158] sm:$0xff] }
  0x28   :  { %8725 = vmatpush1.bf16.msra.mxu1 %v12299_v29  ;;  %v12366_v47 = vpack.c.bf16 %v1844_v45, %v1840_v44  ;;  %v46_v48 = vld [vmem:[%s14386_s0 + $0xa0] sm:$0xff]  ;;  %v1847_v55 = vld [vmem:[%s14388_s2 + $0x178] sm:$0xff]  ;;  %v1842_v56 = vld [vmem:[%s14388_s2 + $0x150] sm:$0xff] }
  0x29   :  { %8209 = vmatmul.mubr.msk.f32.gmra.mrb[16].mxu0 %vm136_vm3, %v34_v10  ;;  %8288 = vmatmul.mubr.msk.f32.gmra.mrb[16].mxu1 %vm136_vm3, %v31_v61  ;;  %v12400_v57 = vpack.c.bf16 %v1847_v55, %v1843_v51  ;;  %v1846_v58 = vld [vmem:[%s14388_s2 + $0x170] sm:$0xff]  ;;  %v49_v60 = vld [vmem:[%s14386_s0 + $0xb8] sm:$0xff]  ;;  %v50_v61 = vld [vmem:[%s14386_s0 + $0xc0] sm:$0xff] }
  0x2a   :  { %508 = vmatprep.mubr.f32.mxu0 %v14394_v7  ;;  %1035 = vmatprep.mubr.f32.mxu1 %v14394_v7  ;;  %v12405_v59 = vpack.c.bf16 %v1846_v58, %v1842_v56  ;;  %v51_v63 = vld [vmem:[%s14386_s0 + $0xc8] sm:$0xff]  ;;  %v52_v2 = vld [vmem:[%s14386_s0 + $0xd0] sm:$0xff]  ;;  %v53_v4 = vld [vmem:[%s14386_s0 + $0xd8] sm:$0xff] }
  0x2b   :  { %8695 = vmatprep.subr.bf16.mxu0 %v12358_v43  ;;  %8727 = vmatprep.subr.bf16.mxu1 %v12400_v57  ;;  %v54_v5 = vld [vmem:[%s14386_s0 + $0xe0] sm:$0xff]  ;;  %v56_v16 = vld [vmem:[%s14386_s0 + $0xf0] sm:$0xff]  ;;  %v1855_v21 = vld [vmem:[%s14388_s2 + $0x1b8] sm:$0xff] }
  0x2c   :  { %8697 = vmatpush1.bf16.msra.mxu0 %v12366_v47  ;;  %8729 = vmatpush1.bf16.msra.mxu1 %v12405_v59  ;;  %v1852_v13 = vld [vmem:[%s14388_s2 + $0x1a0] sm:$0xff]  ;;  %v1850_v23 = vld [vmem:[%s14388_s2 + $0x190] sm:$0xff]  ;;  %v1857_v39 = vld [vmem:[%s14388_s2 + $0x1c8] sm:$0xff] }
  0x2d   :  { %8210 = vmatmul.mubr.msk.f32.gmra.mrb[18].mxu0 %vm136_vm3, %v35_v11  ;;  %8289 = vmatmul.mubr.msk.f32.gmra.mrb[18].mxu1 %vm136_vm3, %v32_v6  ;;  %v1849_v6 = vld [vmem:[%s14388_s2 + $0x188] sm:$0xff]  ;;  %v58_v24 = vld [vmem:[%s14386_s0 + $0x100] sm:$0xff]  ;;  %v1854_v28 = vld [vmem:[%s14388_s2 + $0x1b0] sm:$0xff] }
  0x2e   :  { %514 = vmatprep.mubr.f32.mxu0 %v14394_v7  ;;  %1041 = vmatprep.mubr.f32.mxu1 %v14394_v7  ;;  %v64_v38 = vld [vmem:[%s14386_s0 + $0x130] sm:$0xff]  ;;  %v1856_v45 = vld [vmem:[%s14388_s2 + $0x1c0] sm:$0xff]  ;;  %v67_v55 = vld [vmem:[%s14386_s0 + $0x148] sm:$0xff] }
  0x2f   :  { %v66_v51 = vld [vmem:[%s14386_s0 + $0x140] sm:$0xff]  ;;  %v1859_v56 = vld [vmem:[%s14388_s2 + $0x1d8] sm:$0xff] }
  0x30   :  { %v1863_v58 = vld [vmem:[%s14388_s2 + $0x1f8] sm:$0xff] }
  0x31   :  { %8211 = vmatmul.mubr.msk.f32.gmra.mrb[20].mxu0 %vm136_vm3, %v36_v17  ;;  %8290 = vmatmul.mubr.msk.f32.gmra.mrb[20].mxu1 %vm136_vm3, %v33_v9  ;;  %v1853_v9 = vld [vmem:[%s14388_s2 + $0x1a8] sm:$0xff] }
  0x32   :  { %520 = vmatprep.mubr.f32.mxu0 %v14394_v7  ;;  %1047 = vmatprep.mubr.f32.mxu1 %v14394_v7  ;;  %v12467_v12 = vpack.c.bf16 %v1853_v9, %v1849_v6  ;;  %v70_v6 = vld [vmem:[%s14386_s0 + $0x160] sm:$0xff]  ;;  %v71_v9 = vld [vmem:[%s14386_s0 + $0x168] sm:$0xff] }
  0x34   :  { %8699 = vmatprep.subr.bf16.mxu0 %v12467_v12 }
  0x35   :  { %8212 = vmatmul.mubr.msk.f32.gmra.mrb[22].mxu0 %vm136_vm3, %v37_v20  ;;  %8291 = vmatmul.mubr.msk.f32.gmra.mrb[22].mxu1 %vm136_vm3, %v34_v10  ;;  %v1848_v10 = vld [vmem:[%s14388_s2 + $0x180] sm:$0xff] }
  0x36   :  { %526 = vmatprep.mubr.f32.mxu0 %v14394_v7  ;;  %1053 = vmatprep.mubr.f32.mxu1 %v14394_v7  ;;  %v12472_v15 = vpack.c.bf16 %v1852_v13, %v1848_v10  ;;  %v72_v10 = vld [vmem:[%s14386_s0 + $0x170] sm:$0xff]  ;;  %v74_v13 = vld [vmem:[%s14386_s0 + $0x180] sm:$0xff] }
  0x38   :  { %8701 = vmatpush1.bf16.msra.mxu0 %v12472_v15 }
  0x39   :  { %8213 = vmatmul.mubr.msk.f32.gmra.mrb[24].mxu0 %vm136_vm3, %v38_v25  ;;  %8292 = vmatmul.mubr.msk.f32.gmra.mrb[24].mxu1 %vm136_vm3, %v35_v11  ;;  %v55_v11 = vld [vmem:[%s14386_s0 + $0xe8] sm:$0xff] }
  0x3a   :  { %532 = vmatprep.mubr.f32.mxu0 %v14394_v7  ;;  %1059 = vmatprep.mubr.f32.mxu1 %v14394_v7 }
  0x3d   :  { %8214 = vmatmul.mubr.msk.f32.gmra.mrb[26].mxu0 %vm136_vm3, %v39_v30  ;;  %8293 = vmatmul.mubr.msk.f32.gmra.mrb[26].mxu1 %vm136_vm3, %v36_v17  ;;  %v57_v17 = vld [vmem:[%s14386_s0 + $0xf8] sm:$0xff] }
  0x3e   :  { %538 = vmatprep.mubr.f32.mxu0 %v14394_v7  ;;  %1065 = vmatprep.mubr.f32.mxu1 %v14394_v7 }
  0x41   :  { %8215 = vmatmul.mubr.msk.f32.gmra.mrb[28].mxu0 %vm136_vm3, %v40_v31  ;;  %8294 = vmatmul.mubr.msk.f32.gmra.mrb[28].mxu1 %vm136_vm3, %v37_v20  ;;  %v1851_v20 = vld [vmem:[%s14388_s2 + $0x198] sm:$0xff] }
  0x42   :  { %544 = vmatprep.mubr.f32.mxu0 %v14394_v7  ;;  %1071 = vmatprep.mubr.f32.mxu1 %v14394_v7 }
  0x45   :  { %8216 = vmatmul.mubr.msk.f32.gmra.mrb[30].mxu0 %vm136_vm3, %v41_v33  ;;  %8295 = vmatmul.mubr.msk.f32.gmra.mrb[30].mxu1 %vm136_vm3, %v38_v25  ;;  %v12506_v25 = vpack.c.bf16 %v1855_v21, %v1851_v20  ;;  %v77_v20 = vld [vmem:[%s14386_s0 + $0x198] sm:$0xff]  ;;  %v78_v21 = vld [vmem:[%s14386_s0 + $0x1a0] sm:$0xff] }
  0x46   :  { %550 = vmatprep.mubr.f32.mxu0 %v14394_v7  ;;  %1077 = vmatprep.mubr.f32.mxu1 %v14394_v7 }
  0x47   :  { %8731 = vmatprep.subr.bf16.mxu1 %v12506_v25 }
  0x49   :  { %8217 = vmatmul.mubr.msk.f32.gmra.mrb[32].mxu0 %vm136_vm3, %v42_v34  ;;  %8296 = vmatmul.mubr.msk.f32.gmra.mrb[32].mxu1 %vm136_vm3, %v39_v30  ;;  %v12511_v30 = vpack.c.bf16 %v1854_v28, %v1850_v23  ;;  %v79_v23 = vld [vmem:[%s14386_s0 + $0x1a8] sm:$0xff] }
  0x4a   :  { %556 = vmatprep.mubr.f32.mxu0 %v14394_v7  ;;  %1083 = vmatprep.mubr.f32.mxu1 %v14394_v7 }
  0x4b   :  { %8733 = vmatpush1.bf16.msra.mxu1 %v12511_v30 }
  0x4d   :  { %8218 = vmatmul.mubr.msk.f32.gmra.mrb[34].mxu0 %vm136_vm3, %v43_v35  ;;  %8297 = vmatmul.mubr.msk.f32.gmra.mrb[34].mxu1 %vm136_vm3, %v40_v31  ;;  %v59_v31 = vld [vmem:[%s14386_s0 + $0x108] sm:$0xff] }
  0x4e   :  { %562 = vmatprep.mubr.f32.mxu0 %v14394_v7  ;;  %1089 = vmatprep.mubr.f32.mxu1 %v14394_v7 }
  0x51   :  { %8219 = vmatmul.mubr.msk.f32.gmra.mrb[36].mxu0 %vm136_vm3, %v44_v37  ;;  %8298 = vmatmul.mubr.msk.f32.gmra.mrb[36].mxu1 %vm136_vm3, %v41_v33  ;;  %v60_v33 = vld [vmem:[%s14386_s0 + $0x110] sm:$0xff] }
  0x52   :  { %568 = vmatprep.mubr.f32.mxu0 %v14394_v7  ;;  %1095 = vmatprep.mubr.f32.mxu1 %v14394_v7 }
  0x55   :  { %8220 = vmatmul.mubr.msk.f32.gmra.mrb[38].mxu0 %vm136_vm3, %v45_v41  ;;  %8299 = vmatmul.mubr.msk.f32.gmra.mrb[38].mxu1 %vm136_vm3, %v42_v34  ;;  %v61_v34 = vld [vmem:[%s14386_s0 + $0x118] sm:$0xff] }
  0x56   :  { %574 = vmatprep.mubr.f32.mxu0 %v14394_v7  ;;  %1101 = vmatprep.mubr.f32.mxu1 %v14394_v7 }
  0x59   :  { %8221 = vmatmul.mubr.msk.f32.gmra.mrb[40].mxu0 %vm136_vm3, %v46_v48  ;;  %8300 = vmatmul.mubr.msk.f32.gmra.mrb[40].mxu1 %vm136_vm3, %v43_v35  ;;  %v62_v35 = vld [vmem:[%s14386_s0 + $0x120] sm:$0xff] }
  0x5a   :  { %580 = vmatprep.mubr.f32.mxu0 %v14394_v7  ;;  %1107 = vmatprep.mubr.f32.mxu1 %v14394_v7 }
  0x5d   :  { %8222 = vmatmul.mubr.msk.f32.gmra.mrb[42].mxu0 %vm136_vm3, %v47_v49  ;;  %8301 = vmatmul.mubr.msk.f32.gmra.mrb[42].mxu1 %vm136_vm3, %v44_v37  ;;  %v63_v37 = vld [vmem:[%s14386_s0 + $0x128] sm:$0xff] }
  0x5e   :  { %586 = vmatprep.mubr.f32.mxu0 %v14394_v7  ;;  %1113 = vmatprep.mubr.f32.mxu1 %v14394_v7 }
  0x61   :  { %8223 = vmatmul.mubr.msk.f32.gmra.mrb[44].mxu0 %vm136_vm3, %v48_v50  ;;  %8302 = vmatmul.mubr.msk.f32.gmra.mrb[44].mxu1 %vm136_vm3, %v45_v41  ;;  %v1861_v41 = vld [vmem:[%s14388_s2 + $0x1e8] sm:$0xff] }
  0x62   :  { %592 = vmatprep.mubr.f32.mxu0 %v14394_v7  ;;  %1119 = vmatprep.mubr.f32.mxu1 %v14394_v7  ;;  %v12563_v44 = vpack.c.bf16 %v1861_v41, %v1857_v39  ;;  %v82_v39 = vld [vmem:[%s14386_s0 + $0x1c0] sm:$0xff]  ;;  %v83_v41 = vld [vmem:[%s14386_s0 + $0x1c8] sm:$0xff] }
  0x64   :  { %8703 = vmatprep.subr.bf16.mxu0 %v12563_v44 }
  0x65   :  { %8224 = vmatmul.mubr.msk.f32.gmra.mrb[46].mxu0 %vm136_vm3, %v49_v60  ;;  %8303 = vmatmul.mubr.msk.f32.gmra.mrb[46].mxu1 %vm136_vm3, %v46_v48  ;;  %v1860_v48 = vld [vmem:[%s14388_s2 + $0x1e0] sm:$0xff] }
  0x66   :  { %598 = vmatprep.mubr.f32.mxu0 %v14394_v7  ;;  %1125 = vmatprep.mubr.f32.mxu1 %v14394_v7 }
  0x69   :  { %8225 = vmatmul.mubr.msk.f32.gmra.mrb[48].mxu0 %vm136_vm3, %v50_v61  ;;  %8304 = vmatmul.mubr.msk.f32.gmra.mrb[48].mxu1 %vm136_vm3, %v47_v49  ;;  %v65_v49 = vld [vmem:[%s14386_s0 + $0x138] sm:$0xff] }
  0x6a   :  { %604 = vmatprep.mubr.f32.mxu0 %v14394_v7  ;;  %1131 = vmatprep.mubr.f32.mxu1 %v14394_v7 }
  0x6d   :  { %8226 = vmatmul.mubr.msk.f32.gmra.mrb[50].mxu0 %vm136_vm3, %v51_v63  ;;  %8305 = vmatmul.mubr.msk.f32.gmra.mrb[50].mxu1 %vm136_vm3, %v48_v50  ;;  %v12578_v50 = vpack.c.bf16 %v1860_v48, %v1856_v45  ;;  %v84_v45 = vld [vmem:[%s14386_s0 + $0x1d0] sm:$0xff]  ;;  %v85_v48 = vld [vmem:[%s14386_s0 + $0x1d8] sm:$0xff] }
  0x6e   :  { %610 = vmatprep.mubr.f32.mxu0 %v14394_v7  ;;  %1137 = vmatprep.mubr.f32.mxu1 %v14394_v7 }
  0x6f   :  { %8705 = vmatpush1.bf16.msra.mxu0 %v12578_v50 }
  0x70   :  { %8739 = vmatprep.subr.bf16.mxu0 %v12040_v19 }
  0x71   :  { %8227 = vmatmul.mubr.msk.f32.gmra.mrb[52].mxu0 %vm136_vm3, %v52_v2  ;;  %8306 = vmatmul.mubr.msk.f32.gmra.mrb[52].mxu1 %vm136_vm3, %v49_v60  ;;  %v1858_v60 = vld [vmem:[%s14388_s2 + $0x1d0] sm:$0xff] }
  0x72   :  { %616 = vmatprep.mubr.f32.mxu0 %v14394_v7  ;;  %1143 = vmatprep.mubr.f32.mxu1 %v14394_v7 }
  0x75   :  { %8228 = vmatmul.mubr.msk.f32.gmra.mrb[54].mxu0 %vm136_vm3, %v53_v4  ;;  %8307 = vmatmul.mubr.msk.f32.gmra.mrb[54].mxu1 %vm136_vm3, %v50_v61  ;;  %v68_v61 = vld [vmem:[%s14386_s0 + $0x150] sm:$0xff] }
  0x76   :  { %622 = vmatprep.mubr.f32.mxu0 %v14394_v7  ;;  %1149 = vmatprep.mubr.f32.mxu1 %v14394_v7 }
  0x79   :  { %8229 = vmatmul.mubr.msk.f32.gmra.mrb[56].mxu0 %vm136_vm3, %v54_v5  ;;  %8308 = vmatmul.mubr.msk.f32.gmra.mrb[56].mxu1 %vm136_vm3, %v51_v63  ;;  %v12613_v63 = vpack.c.bf16 %v1863_v58, %v1859_v56  ;;  %v89_v56 = vld [vmem:[%s14386_s0 + $0x1f8] sm:$0xff]  ;;  %v90_v58 = vld [vmem:[%s14386_s0 + $0x200] sm:$0xff] }
  0x7a   :  { %628 = vmatprep.mubr.f32.mxu0 %v14394_v7  ;;  %1155 = vmatprep.mubr.f32.mxu1 %v14394_v7 }
  0x7b   :  { %8735 = vmatprep.subr.bf16.mxu1 %v12613_v63 }
  0x7d   :  { %8230 = vmatmul.mubr.msk.f32.gmra.mrb[58].mxu0 %vm136_vm3, %v55_v11  ;;  %8309 = vmatmul.mubr.msk.f32.gmra.mrb[58].mxu1 %vm136_vm3, %v52_v2  ;;  %v1862_v2 = vld [vmem:[%s14388_s2 + $0x1f0] sm:$0xff] }
  0x7e   :  { %634 = vmatprep.mubr.f32.mxu0 %v14394_v7  ;;  %1161 = vmatprep.mubr.f32.mxu1 %v14394_v7 }
  0x81   :  { %8231 = vmatmul.mubr.msk.f32.gmra.mrb[60].mxu0 %vm136_vm3, %v56_v16  ;;  %8310 = vmatmul.mubr.msk.f32.gmra.mrb[60].mxu1 %vm136_vm3, %v53_v4  ;;  %v12618_v4 = vpack.c.bf16 %v1862_v2, %v1858_v60  ;;  %v91_v60 = vld [vmem:[%s14386_s0 + $0x208] sm:$0xff]  ;;  %v93_v2 = vld [vmem:[%s14386_s0 + $0x218] sm:$0xff] }
  0x82   :  { %640 = vmatprep.mubr.f32.mxu0 %v14394_v7  ;;  %1167 = vmatprep.mubr.f32.mxu1 %v14394_v7 }
  0x83   :  { %8737 = vmatpush1.bf16.msra.mxu1 %v12618_v4 }
  0x84   :  { %8771 = vmatprep.subr.bf16.mxu1 %v12064_v26 }
  0x85   :  { %8232 = vmatmul.mubr.msk.f32.gmra.mrb[62].mxu0 %vm136_vm3, %v57_v17  ;;  %8311 = vmatmul.mubr.msk.f32.gmra.mrb[62].mxu1 %vm136_vm3, %v54_v5  ;;  %v69_v5 = vld [vmem:[%s14386_s0 + $0x158] sm:$0xff] }
  0x86   :  { %646 = vmatprep.mubr.f32.mxu0 %v14394_v7  ;;  %1173 = vmatprep.mubr.f32.mxu1 %v14394_v7 }
  0x89   :  { %8233 = vmatmul.mubr.msk.f32.gmra.mrb[64].mxu0 %vm136_vm3, %v58_v24  ;;  %8312 = vmatmul.mubr.msk.f32.gmra.mrb[64].mxu1 %vm136_vm3, %v55_v11  ;;  %v73_v11 = vld [vmem:[%s14386_s0 + $0x178] sm:$0xff] }
  0x8a   :  { %652 = vmatprep.mubr.f32.mxu0 %v14394_v7  ;;  %1179 = vmatprep.mubr.f32.mxu1 %v14394_v7 }
  0x8d   :  { %8234 = vmatmul.mubr.msk.f32.gmra.mrb[66].mxu0 %vm136_vm3, %v59_v31  ;;  %8313 = vmatmul.mubr.msk.f32.gmra.mrb[66].mxu1 %vm136_vm3, %v56_v16  ;;  %v75_v16 = vld [vmem:[%s14386_s0 + $0x188] sm:$0xff] }
  0x8e   :  { %658 = vmatprep.mubr.f32.mxu0 %v14394_v7  ;;  %1185 = vmatprep.mubr.f32.mxu1 %v14394_v7 }
  0x91   :  { %8235 = vmatmul.mubr.msk.f32.gmra.mrb[68].mxu0 %vm136_vm3, %v60_v33  ;;  %8314 = vmatmul.mubr.msk.f32.gmra.mrb[68].mxu1 %vm136_vm3, %v57_v17  ;;  %v76_v17 = vld [vmem:[%s14386_s0 + $0x190] sm:$0xff] }
  0x92   :  { %664 = vmatprep.mubr.f32.mxu0 %v14394_v7  ;;  %1191 = vmatprep.mubr.f32.mxu1 %v14394_v7 }
  0x95   :  { %8236 = vmatmul.mubr.msk.f32.gmra.mrb[70].mxu0 %vm136_vm3, %v61_v34  ;;  %8315 = vmatmul.mubr.msk.f32.gmra.mrb[70].mxu1 %vm136_vm3, %v58_v24 }
  0x96   :  { %670 = vmatprep.mubr.f32.mxu0 %v14394_v7  ;;  %1197 = vmatprep.mubr.f32.mxu1 %v14394_v7 }
  0x99   :  { %8237 = vmatmul.mubr.msk.f32.gmra.mrb[72].mxu0 %vm136_vm3, %v62_v35  ;;  %8316 = vmatmul.mubr.msk.f32.gmra.mrb[72].mxu1 %vm136_vm3, %v59_v31  ;;  %v80_v31 = vld [vmem:[%s14386_s0 + $0x1b0] sm:$0xff] }
  0x9a   :  { %676 = vmatprep.mubr.f32.mxu0 %v14394_v7  ;;  %1203 = vmatprep.mubr.f32.mxu1 %v14394_v7 }
  0x9d   :  { %8238 = vmatmul.mubr.msk.f32.gmra.mrb[74].mxu0 %vm136_vm3, %v63_v37  ;;  %8317 = vmatmul.mubr.msk.f32.gmra.mrb[74].mxu1 %vm136_vm3, %v60_v33 }
  0x9e   :  { %682 = vmatprep.mubr.f32.mxu0 %v14394_v7  ;;  %1209 = vmatprep.mubr.f32.mxu1 %v14394_v7 }
  0xa1   :  { %8239 = vmatmul.mubr.msk.f32.gmra.mrb[76].mxu0 %vm136_vm3, %v64_v38  ;;  %8318 = vmatmul.mubr.msk.f32.gmra.mrb[76].mxu1 %vm136_vm3, %v61_v34 }
  0xa2   :  { %688 = vmatprep.mubr.f32.mxu0 %v14394_v7  ;;  %1215 = vmatprep.mubr.f32.mxu1 %v14394_v7 }
  0xa5   :  { %8240 = vmatmul.mubr.msk.f32.gmra.mrb[78].mxu0 %vm136_vm3, %v65_v49  ;;  %8319 = vmatmul.mubr.msk.f32.gmra.mrb[78].mxu1 %vm136_vm3, %v62_v35  ;;  %v81_v35 = vld [vmem:[%s14386_s0 + $0x1b8] sm:$0xff] }
  0xa6   :  { %694 = vmatprep.mubr.f32.mxu0 %v14394_v7  ;;  %1221 = vmatprep.mubr.f32.mxu1 %v14394_v7 }
  0xa9   :  { %8241 = vmatmul.mubr.msk.f32.gmra.mrb[80].mxu0 %vm136_vm3, %v66_v51  ;;  %8320 = vmatmul.mubr.msk.f32.gmra.mrb[80].mxu1 %vm136_vm3, %v63_v37 }
  0xaa   :  { %700 = vmatprep.mubr.f32.mxu0 %v14394_v7  ;;  %1227 = vmatprep.mubr.f32.mxu1 %v14394_v7 }
  0xad   :  { %8242 = vmatmul.mubr.msk.f32.gmra.mrb[82].mxu0 %vm136_vm3, %v67_v55  ;;  %8321 = vmatmul.mubr.msk.f32.gmra.mrb[82].mxu1 %vm136_vm3, %v64_v38 }
  0xae   :  { %706 = vmatprep.mubr.f32.mxu0 %v14394_v7  ;;  %1233 = vmatprep.mubr.f32.mxu1 %v14394_v7 }
  0xb1   :  { %8243 = vmatmul.mubr.msk.f32.gmra.mrb[84].mxu0 %vm136_vm3, %v68_v61  ;;  %8322 = vmatmul.mubr.msk.f32.gmra.mrb[84].mxu1 %vm136_vm3, %v65_v49  ;;  %v86_v49 = vld [vmem:[%s14386_s0 + $0x1e0] sm:$0xff] }
  0xb2   :  { %712 = vmatprep.mubr.f32.mxu0 %v14394_v7  ;;  %1239 = vmatprep.mubr.f32.mxu1 %v14394_v7 }
  0xb5   :  { %8244 = vmatmul.mubr.msk.f32.gmra.mrb[86].mxu0 %vm136_vm3, %v69_v5  ;;  %8323 = vmatmul.mubr.msk.f32.gmra.mrb[86].mxu1 %vm136_vm3, %v66_v51  ;;  %v87_v51 = vld [vmem:[%s14386_s0 + $0x1e8] sm:$0xff] }
  0xb6   :  { %718 = vmatprep.mubr.f32.mxu0 %v14394_v7  ;;  %1245 = vmatprep.mubr.f32.mxu1 %v14394_v7 }
  0xb9   :  { %8245 = vmatmul.mubr.msk.f32.gmra.mrb[88].mxu0 %vm136_vm3, %v70_v6  ;;  %8324 = vmatmul.mubr.msk.f32.gmra.mrb[88].mxu1 %vm136_vm3, %v67_v55  ;;  %v88_v55 = vld [vmem:[%s14386_s0 + $0x1f0] sm:$0xff] }
  0xba   :  { %724 = vmatprep.mubr.f32.mxu0 %v14394_v7  ;;  %1251 = vmatprep.mubr.f32.mxu1 %v14394_v7 }
  0xbd   :  { %8246 = vmatmul.mubr.msk.f32.gmra.mrb[90].mxu0 %vm136_vm3, %v71_v9  ;;  %8325 = vmatmul.mubr.msk.f32.gmra.mrb[90].mxu1 %vm136_vm3, %v68_v61  ;;  %v92_v61 = vld [vmem:[%s14386_s0 + $0x210] sm:$0xff] }
  0xbe   :  { %730 = vmatprep.mubr.f32.mxu0 %v14394_v7  ;;  %1257 = vmatprep.mubr.f32.mxu1 %v14394_v7 }
  0xc1   :  { %8247 = vmatmul.mubr.msk.f32.gmra.mrb[92].mxu0 %vm136_vm3, %v72_v10  ;;  %8326 = vmatmul.mubr.msk.f32.gmra.mrb[92].mxu1 %vm136_vm3, %v69_v5  ;;  %v94_v5 = vld [vmem:[%s14386_s0 + $0x220] sm:$0xff] }
  0xc2   :  { %736 = vmatprep.mubr.f32.mxu0 %v14394_v7  ;;  %1263 = vmatprep.mubr.f32.mxu1 %v14394_v7 }
  0xc5   :  { %8248 = vmatmul.mubr.msk.f32.gmra.mrb[94].mxu0 %vm136_vm3, %v73_v11  ;;  %8327 = vmatmul.mubr.msk.f32.gmra.mrb[94].mxu1 %vm136_vm3, %v70_v6  ;;  %v95_v6 = vld [vmem:[%s14386_s0 + $0x228] sm:$0xff] }
  0xc6   :  { %742 = vmatprep.mubr.f32.mxu0 %v14394_v7  ;;  %1269 = vmatprep.mubr.f32.mxu1 %v14394_v7 }
  0xc9   :  { %8249 = vmatmul.mubr.msk.f32.gmra.mrb[96].mxu0 %vm136_vm3, %v74_v13  ;;  %8328 = vmatmul.mubr.msk.f32.gmra.mrb[96].mxu1 %vm136_vm3, %v71_v9  ;;  %v96_v9 = vld [vmem:[%s14386_s0 + $0x230] sm:$0xff] }
  0xca   :  { %748 = vmatprep.mubr.f32.mxu0 %v14394_v7  ;;  %1275 = vmatprep.mubr.f32.mxu1 %v14394_v7 }
  0xcd   :  { %8250 = vmatmul.mubr.msk.f32.gmra.mrb[98].mxu0 %vm136_vm3, %v75_v16  ;;  %8329 = vmatmul.mubr.msk.f32.gmra.mrb[98].mxu1 %vm136_vm3, %v72_v10  ;;  %v97_v10 = vld [vmem:[%s14386_s0 + $0x238] sm:$0xff] }
  0xce   :  { %754 = vmatprep.mubr.f32.mxu0 %v14394_v7  ;;  %1281 = vmatprep.mubr.f32.mxu1 %v14394_v7 }
  0xd1   :  { %8251 = vmatmul.mubr.msk.f32.gmra.mrb[100].mxu0 %vm136_vm3, %v76_v17  ;;  %8330 = vmatmul.mubr.msk.f32.gmra.mrb[100].mxu1 %vm136_vm3, %v73_v11  ;;  %v98_v11 = vld [vmem:[%s14386_s0 + $0x240] sm:$0xff] }
  0xd2   :  { %760 = vmatprep.mubr.f32.mxu0 %v14394_v7  ;;  %1287 = vmatprep.mubr.f32.mxu1 %v14394_v7 }
  0xd5   :  { %8252 = vmatmul.mubr.msk.f32.gmra.mrb[102].mxu0 %vm136_vm3, %v77_v20  ;;  %8331 = vmatmul.mubr.msk.f32.gmra.mrb[102].mxu1 %vm136_vm3, %v74_v13  ;;  %v99_v13 = vld [vmem:[%s14386_s0 + $0x248] sm:$0xff] }
  0xd6   :  { %766 = vmatprep.mubr.f32.mxu0 %v14394_v7  ;;  %1293 = vmatprep.mubr.f32.mxu1 %v14394_v7 }
  0xd9   :  { %8253 = vmatmul.mubr.msk.f32.gmra.mrb[104].mxu0 %vm136_vm3, %v78_v21  ;;  %8332 = vmatmul.mubr.msk.f32.gmra.mrb[104].mxu1 %vm136_vm3, %v75_v16  ;;  %v100_v16 = vld [vmem:[%s14386_s0 + $0x250] sm:$0xff] }
  0xda   :  { %772 = vmatprep.mubr.f32.mxu0 %v14394_v7  ;;  %1299 = vmatprep.mubr.f32.mxu1 %v14394_v7 }
  0xdc   :  { %v12700_v24 = vpop.f32.mrb[0].mxu1 }
  0xdd   :  { %14401 = vst [vmem:[#allocation6_spill] sm:$0xff] %v12700_v24  ;;  %8254 = vmatmul.mubr.msk.f32.gmra.mrb[106].mxu0 %vm136_vm3, %v79_v23  ;;  %v12703_v28 = vpop.f32.mrb[1].mxu1  ;;  %8333 = vmatmul.mubr.msk.f32.gmra.mrb[106].mxu1 %vm136_vm3, %v76_v17  ;;  %v101_v17 = vld [vmem:[%s14386_s0 + $0x258] sm:$0xff] }
  0xde   :  { %14402 = vst [vmem:[#allocation7_spill] sm:$0xff] %v12703_v28  ;;  %778 = vmatprep.mubr.f32.mxu0 %v14394_v7  ;;  %1305 = vmatprep.mubr.f32.mxu1 %v14394_v7 }
  0xe0   :  { %v12711_v33 = vpop.f32.mrb[2].mxu1 }
  0xe1   :  { %14403 = vst [vmem:[#allocation8_spill] sm:$0xff] %v12711_v33  ;;  %8255 = vmatmul.mubr.msk.f32.gmra.mrb[108].mxu0 %vm136_vm3, %v80_v31  ;;  %v12714_v34 = vpop.f32.mrb[3].mxu1  ;;  %8334 = vmatmul.mubr.msk.f32.gmra.mrb[108].mxu1 %vm136_vm3, %v77_v20  ;;  %v102_v20 = vld [vmem:[%s14386_s0 + $0x260] sm:$0xff] }
  0xe2   :  { %14404 = vst [vmem:[#allocation9_spill] sm:$0xff] %v12714_v34  ;;  %784 = vmatprep.mubr.f32.mxu0 %v14394_v7  ;;  %1311 = vmatprep.mubr.f32.mxu1 %v14394_v7 }
  0xe4   :  { %v12722_v37 = vpop.f32.mrb[4].mxu1 }
  0xe5   :  { %14405 = vst [vmem:[#allocation10_spill] sm:$0xff] %v12722_v37  ;;  %8256 = vmatmul.mubr.msk.f32.gmra.mrb[110].mxu0 %vm136_vm3, %v81_v35  ;;  %v12725_v38 = vpop.f32.mrb[5].mxu1  ;;  %8335 = vmatmul.mubr.msk.f32.gmra.mrb[110].mxu1 %vm136_vm3, %v78_v21  ;;  %v11913_v21 = vld [vmem:[%s14386_s0 + $0x268] sm:$0xff] }
  0xe6   :  { %14406 = vst [vmem:[#allocation11_spill] sm:$0xff] %v12725_v38  ;;  %790 = vmatprep.mubr.f32.mxu0 %v14394_v7  ;;  %1317 = vmatprep.mubr.f32.mxu1 %v14394_v7 }
  0xe9   :  { %8257 = vmatmul.mubr.msk.f32.gmra.mrb[112].mxu0 %vm136_vm3, %v82_v39  ;;  %8336 = vmatmul.mubr.msk.f32.gmra.mrb[112].mxu1 %vm136_vm3, %v79_v23  ;;  %v11914_v23 = vld [vmem:[%s14386_s0 + $0x270] sm:$0xff] }
  0xea   :  { %796 = vmatprep.mubr.f32.mxu0 %v14394_v7  ;;  %1323 = vmatprep.mubr.f32.mxu1 %v14394_v7 }
  0xed   :  { %8258 = vmatmul.mubr.msk.f32.gmra.mrb[114].mxu0 %vm136_vm3, %v83_v41  ;;  %8337 = vmatmul.mubr.msk.f32.gmra.mrb[114].mxu1 %vm136_vm3, %v80_v31  ;;  %v11915_v31 = vld [vmem:[%s14386_s0 + $0x278] sm:$0xff] }
  0xee   :  { %802 = vmatprep.mubr.f32.mxu0 %v14394_v7  ;;  %1329 = vmatprep.mubr.f32.mxu1 %v14394_v7 }
  0xf1   :  { %8259 = vmatmul.mubr.msk.f32.gmra.mrb[116].mxu0 %vm136_vm3, %v84_v45  ;;  %8338 = vmatmul.mubr.msk.f32.gmra.mrb[116].mxu1 %vm136_vm3, %v81_v35  ;;  %v116_v35 = vlaneseq }
  0xf2   :  { %808 = vmatprep.mubr.f32.mxu0 %v14394_v7  ;;  %1335 = vmatprep.mubr.f32.mxu1 %v14394_v7 }
  0xf5   :  { %8260 = vmatmul.mubr.msk.f32.gmra.mrb[118].mxu0 %vm136_vm3, %v85_v48  ;;  %8339 = vmatmul.mubr.msk.f32.gmra.mrb[118].mxu1 %vm136_vm3, %v82_v39  ;;  %v117_v39 = vshrl.u32 %v116_v35, 7 }
  0xf6   :  { %814 = vmatprep.mubr.f32.mxu0 %v14394_v7  ;;  %1341 = vmatprep.mubr.f32.mxu1 %v14394_v7 }
  0xf9   :  { %8261 = vmatmul.mubr.msk.f32.gmra.mrb[120].mxu0 %vm136_vm3, %v86_v49  ;;  %8340 = vmatmul.mubr.msk.f32.gmra.mrb[120].mxu1 %vm136_vm3, %v83_v41  ;;  %v118_v41 = vsub.s32 0, %v117_v39 }
  0xfa   :  { %820 = vmatprep.mubr.f32.mxu0 %v14394_v7  ;;  %1347 = vmatprep.mubr.f32.mxu1 %v14394_v7 }
  0xfd   :  { %8262 = vmatmul.mubr.msk.f32.gmra.mrb[122].mxu0 %vm136_vm3, %v87_v51  ;;  %8341 = vmatmul.mubr.msk.f32.gmra.mrb[122].mxu1 %vm136_vm3, %v84_v45  ;;  %v122_v45 = vsub.s32 1, %v117_v39 }
  0xfe   :  { %826 = vmatprep.mubr.f32.mxu0 %v14394_v7  ;;  %1353 = vmatprep.mubr.f32.mxu1 %v14394_v7 }
 0x101   :  { %8263 = vmatmul.mubr.msk.f32.gmra.mrb[124].mxu0 %vm136_vm3, %v88_v55  ;;  %8342 = vmatmul.mubr.msk.f32.gmra.mrb[124].mxu1 %vm136_vm3, %v85_v48  ;;  %v114_v48 = vld [vmem:[%s14389_s3] sm:$0xf] }
 0x102   :  { %832 = vmatprep.mubr.f32.mxu0 %v14394_v7  ;;  %1359 = vmatprep.mubr.f32.mxu1 %v14394_v7 }
 0x105   :  { %8264 = vmatmul.mubr.msk.f32.gmra.mrb[126].mxu0 %vm136_vm3, %v89_v56  ;;  %8343 = vmatmul.mubr.msk.f32.gmra.mrb[126].mxu1 %vm136_vm3, %v86_v49  ;;  %v12949_v49 = vrot.slane %v114_v48, %v118_v41 }
 0x106   :  { %838 = vmatprep.mubr.f32.mxu0 %v14394_v7  ;;  %1365 = vmatprep.mubr.f32.mxu1 %v14394_v7 }
 0x107   :  { %14407 = vst [vmem:[#allocation12_spill] sm:$0xff] %v12949_v49 }
 0x109   :  { %8265 = vmatmul.mubr.msk.f32.gmra.mrb[128].mxu0 %vm136_vm3, %v90_v58  ;;  %8344 = vmatmul.mubr.msk.f32.gmra.mrb[128].mxu1 %vm136_vm3, %v87_v51  ;;  %v12951_v51 = vrot.slane %v114_v48, %v122_v45 }
 0x10a   :  { %844 = vmatprep.mubr.f32.mxu0 %v14394_v7  ;;  %1371 = vmatprep.mubr.f32.mxu1 %v14394_v7 }
 0x10d   :  { %8266 = vmatmul.mubr.msk.f32.gmra.mrb[130].mxu0 %vm136_vm3, %v91_v60  ;;  %8345 = vmatmul.mubr.msk.f32.gmra.mrb[130].mxu1 %vm136_vm3, %v88_v55 }
 0x10e   :  { %850 = vmatprep.mubr.f32.mxu0 %v14394_v7  ;;  %1377 = vmatprep.mubr.f32.mxu1 %v14394_v7 }
 0x111   :  { %8267 = vmatmul.mubr.msk.f32.gmra.mrb[132].mxu0 %vm136_vm3, %v92_v61  ;;  %8346 = vmatmul.mubr.msk.f32.gmra.mrb[132].mxu1 %vm136_vm3, %v89_v56 }
 0x112   :  { %856 = vmatprep.mubr.f32.mxu0 %v14394_v7  ;;  %1383 = vmatprep.mubr.f32.mxu1 %v14394_v7 }
 0x115   :  { %8268 = vmatmul.mubr.msk.f32.gmra.mrb[134].mxu0 %vm136_vm3, %v93_v2  ;;  %8347 = vmatmul.mubr.msk.f32.gmra.mrb[134].mxu1 %vm136_vm3, %v90_v58 }
 0x116   :  { %862 = vmatprep.mubr.f32.mxu0 %v14394_v7  ;;  %1389 = vmatprep.mubr.f32.mxu1 %v14394_v7 }
 0x119   :  { %8269 = vmatmul.mubr.msk.f32.gmra.mrb[136].mxu0 %vm136_vm3, %v94_v5  ;;  %8348 = vmatmul.mubr.msk.f32.gmra.mrb[136].mxu1 %vm136_vm3, %v91_v60 }
 0x11a   :  { %868 = vmatprep.mubr.f32.mxu0 %v14394_v7  ;;  %1395 = vmatprep.mubr.f32.mxu1 %v14394_v7 }
 0x11d   :  { %8270 = vmatmul.mubr.msk.f32.gmra.mrb[138].mxu0 %vm136_vm3, %v95_v6  ;;  %8349 = vmatmul.mubr.msk.f32.gmra.mrb[138].mxu1 %vm136_vm3, %v92_v61 }
 0x11e   :  { %874 = vmatprep.mubr.f32.mxu0 %v14394_v7  ;;  %1401 = vmatprep.mubr.f32.mxu1 %v14394_v7 }
 0x121   :  { %8271 = vmatmul.mubr.msk.f32.gmra.mrb[140].mxu0 %vm136_vm3, %v96_v9  ;;  %8350 = vmatmul.mubr.msk.f32.gmra.mrb[140].mxu1 %vm136_vm3, %v93_v2 }
 0x122   :  { %880 = vmatprep.mubr.f32.mxu0 %v14394_v7  ;;  %1407 = vmatprep.mubr.f32.mxu1 %v14394_v7 }
 0x125   :  { %8272 = vmatmul.mubr.msk.f32.gmra.mrb[142].mxu0 %vm136_vm3, %v97_v10  ;;  %8351 = vmatmul.mubr.msk.f32.gmra.mrb[142].mxu1 %vm136_vm3, %v94_v5 }
 0x126   :  { %886 = vmatprep.mubr.f32.mxu0 %v14394_v7  ;;  %1413 = vmatprep.mubr.f32.mxu1 %v14394_v7 }
 0x129   :  { %8273 = vmatmul.mubr.msk.f32.gmra.mrb[144].mxu0 %vm136_vm3, %v98_v11  ;;  %8352 = vmatmul.mubr.msk.f32.gmra.mrb[144].mxu1 %vm136_vm3, %v95_v6 }
 0x12a   :  { %892 = vmatprep.mubr.f32.mxu0 %v14394_v7  ;;  %1419 = vmatprep.mubr.f32.mxu1 %v14394_v7 }
 0x12d   :  { %8274 = vmatmul.mubr.msk.f32.gmra.mrb[146].mxu0 %vm136_vm3, %v99_v13  ;;  %8353 = vmatmul.mubr.msk.f32.gmra.mrb[146].mxu1 %vm136_vm3, %v96_v9 }
 0x12e   :  { %898 = vmatprep.mubr.f32.mxu0 %v14394_v7  ;;  %1425 = vmatprep.mubr.f32.mxu1 %v14394_v7 }
 0x131   :  { %8275 = vmatmul.mubr.msk.f32.gmra.mrb[148].mxu0 %vm136_vm3, %v100_v16  ;;  %8354 = vmatmul.mubr.msk.f32.gmra.mrb[148].mxu1 %vm136_vm3, %v97_v10 }
 0x132   :  { %904 = vmatprep.mubr.f32.mxu0 %v14394_v7  ;;  %1431 = vmatprep.mubr.f32.mxu1 %v14394_v7 }
 0x135   :  { %8276 = vmatmul.mubr.msk.f32.gmra.mrb[150].mxu0 %vm136_vm3, %v101_v17  ;;  %8355 = vmatmul.mubr.msk.f32.gmra.mrb[150].mxu1 %vm136_vm3, %v98_v11 }
 0x136   :  { %910 = vmatprep.mubr.f32.mxu0 %v14394_v7  ;;  %1437 = vmatprep.mubr.f32.mxu1 %v14394_v7 }
 0x139   :  { %8277 = vmatmul.mubr.msk.f32.gmra.mrb[152].mxu0 %vm136_vm3, %v102_v20  ;;  %8356 = vmatmul.mubr.msk.f32.gmra.mrb[152].mxu1 %vm136_vm3, %v99_v13 }
 0x13a   :  { %1443 = vmatprep.mubr.f32.mxu1 %v14394_v7  ;;  %1947 = vmatprep.mubr.f32.mxu0 %v14394_v7 }
 0x13d   :  { %8357 = vmatmul.mubr.msk.f32.gmra.mrb[154].mxu1 %vm136_vm3, %v100_v16  ;;  %1948 = vmatmul.mubr.f32.vlgmr.msra.gmra.mrb[0].mxu0 %v14394_v7 }
 0x13e   :  { %1449 = vmatprep.mubr.f32.mxu1 %v14394_v7  ;;  %1953 = vmatprep.mubr.f32.mxu0 %v14394_v7 }
 0x13f   :  { %8741 = vmatpush1.bf16.msra.mxu0 %v12050_v22 }
 0x140   :  { %8743 = vmatprep.subr.bf16.mxu0 %v12089_v32 }
 0x141   :  { %8358 = vmatmul.mubr.msk.f32.gmra.mrb[156].mxu1 %vm136_vm3, %v101_v17  ;;  %1954 = vmatmul.mubr.f32.gmra.mrb[2].mxu0 %v14394_v7 }
 0x142   :  { %1455 = vmatprep.mubr.f32.mxu1 %v14394_v7  ;;  %1959 = vmatprep.mubr.f32.mxu0 %v14394_v7 }
 0x143   :  { %8745 = vmatpush1.bf16.msra.mxu0 %v12100_v36 }
 0x144   :  { %8747 = vmatprep.subr.bf16.mxu0 %v12133_v46 }
 0x145   :  { %8359 = vmatmul.mubr.msk.f32.gmra.mrb[158].mxu1 %vm136_vm3, %v102_v20  ;;  %1960 = vmatmul.mubr.f32.gmra.mrb[4].mxu0 %v14394_v7 }
 0x146   :  { %1461 = vmatprep.mubr.f32.mxu1 %v14394_v7  ;;  %1965 = vmatprep.mubr.f32.mxu0 %v14394_v7 }
 0x147   :  { %8749 = vmatpush1.bf16.msra.mxu0 %v12158_v53 }
 0x148   :  { %8751 = vmatprep.subr.bf16.mxu0 %v12188_v62 }
 0x149   :  { %8360 = vmatmul.mubr.msk.f32.gmra.mrb[160].mxu1 %vm136_vm3, %v11913_v21  ;;  %1966 = vmatmul.mubr.f32.gmra.mrb[6].mxu0 %v14394_v7 }
 0x14a   :  { %1467 = vmatprep.mubr.f32.mxu1 %v14394_v7  ;;  %2256 = vmatprep.mubr.f32.mxu0 %v14394_v7 }
 0x14b   :  { %8753 = vmatpush1.bf16.msra.mxu0 %v12197_v1 }
 0x14c   :  { %8755 = vmatprep.subr.bf16.mxu0 %v12252_v14 }
 0x14d   :  { %8361 = vmatmul.mubr.msk.f32.gmra.mrb[162].mxu1 %vm136_vm3, %v11914_v23 }
 0x14e   :  { %1473 = vmatprep.mubr.f32.mxu1 %v14394_v7 }
 0x14f   :  { %8757 = vmatpush1.bf16.msra.mxu0 %v12267_v18 }
 0x150   :  { %8759 = vmatprep.subr.bf16.mxu0 %v12358_v43 }
 0x151   :  { %8362 = vmatmul.mubr.msk.f32.gmra.mrb[164].mxu1 %vm136_vm3, %v11915_v31 }
 0x152   :  { %2036 = vmatprep.mubr.f32.mxu1 %v14394_v7 }
 0x153   :  { %8761 = vmatpush1.bf16.msra.mxu0 %v12366_v47 }
 0x154   :  { %8763 = vmatprep.subr.bf16.mxu0 %v12467_v12 }
 0x155   :  { %2037 = vmatmul.mubr.f32.vlgmr.msra.gmra.mrb[6].mxu1 %v14394_v7 }
 0x156   :  { %2042 = vmatprep.mubr.f32.mxu1 %v14394_v7  ;;  %8773 = vmatpush1.bf16.msra.mxu1 %v12116_v40 }
 0x157   :  { %8775 = vmatprep.subr.bf16.mxu1 %v12122_v42  ;;  %8765 = vmatpush1.bf16.msra.mxu0 %v12472_v15 }
 0x158   :  { %8767 = vmatprep.subr.bf16.mxu0 %v12563_v44 }
 0x159   :  { %2043 = vmatmul.mubr.f32.gmra.mrb[8].mxu1 %v14394_v7 }
 0x15a   :  { %2048 = vmatprep.mubr.f32.mxu1 %v14394_v7  ;;  %8777 = vmatpush1.bf16.msra.mxu1 %v12156_v52 }
 0x15b   :  { %8779 = vmatprep.subr.bf16.mxu1 %v12161_v54  ;;  %8769 = vmatpush1.bf16.msra.mxu0 %v12578_v50 }
 0x15c   :  { %8803 = vmatprep.subr.bf16.mxu0 %v12040_v19 }
 0x15d   :  { %2049 = vmatmul.mubr.f32.gmra.mrb[10].mxu1 %v14394_v7 }
 0x15e   :  { %2054 = vmatprep.mubr.f32.mxu1 %v14394_v7  ;;  %8781 = vmatpush1.bf16.msra.mxu1 %v12195_v0 }
 0x15f   :  { %8783 = vmatprep.subr.bf16.mxu1 %v12204_v3 }
 0x161   :  { %2055 = vmatmul.mubr.f32.gmra.mrb[12].mxu1 %v14394_v7 }
 0x162   :  { %8785 = vmatpush1.bf16.msra.mxu1 %v12221_v8  ;;  %2345 = vmatprep.mubr.f32.mxu1 %v14394_v7 }
 0x163   :  { %8787 = vmatprep.subr.bf16.mxu1 %v12294_v27 }
 0x166   :  { %8789 = vmatpush1.bf16.msra.mxu1 %v12299_v29 }
 0x167   :  { %8791 = vmatprep.subr.bf16.mxu1 %v12400_v57 }
 0x16a   :  { %8793 = vmatpush1.bf16.msra.mxu1 %v12405_v59 }
 0x16b   :  { %8795 = vmatprep.subr.bf16.mxu1 %v12506_v25 }
 0x16e   :  { %8797 = vmatpush1.bf16.msra.mxu1 %v12511_v30 }
 0x16f   :  { %8799 = vmatprep.subr.bf16.mxu1 %v12613_v63 }
 0x172   :  { %8801 = vmatpush1.bf16.msra.mxu1 %v12618_v4 }
 0x173   :  { %8835 = vmatprep.subr.bf16.mxu1 %v12064_v26 }
 0x210   :  { %v1949_v55 = vpop.f32.mrb[0].mxu0 }
 0x211   :  { %v1951_v56 = vpop.f32.mrb[1].mxu0  ;;  %v9988_v58 = vadd.f32 %v1949_v55, %v12949_v49 }
 0x212   :  { %v9989_v60 = vadd.f32 %v1951_v56, %v12951_v51 }
 0x213   :  { %v8363_v6 = vmul.f32 -1.442695, %v9988_v58  ;;  %v126_v58 = vsub.s32 2, %v117_v39 }
 0x214   :  { %v1955_v61 = vpop.f32.mrb[2].mxu0  ;;  %v8364_v2 = vmul.f32 -1.442695, %v9989_v60 }
 0x215   :  { %v1957_v5 = vpop.f32.mrb[3].mxu0  ;;  %v9990_v9 = vadd.f32 %v1955_v61, %v12949_v49  ;;  %v130_v61 = vsub.s32 3, %v117_v39 }
 0x216   :  { %v9991_v10 = vadd.f32 %v1957_v5, %v12951_v51  ;;  %10633 = vpow2.f32 %v8364_v2 }
 0x217   :  { %10635 = vpow2.f32 %v8363_v6  ;;  %v8366_v17 = vmul.f32 -1.442695, %v9990_v9  ;;  %v12961_v6 = vrot.slane %v114_v48, %v126_v58 }
 0x218   :  { %v1961_v11 = vpop.f32.mrb[4].mxu0  ;;  %v8367_v13 = vmul.f32 -1.442695, %v9991_v10  ;;  %v12963_v10 = vrot.slane %v114_v48, %v130_v61 }
 0x219   :  { %v1963_v16 = vpop.f32.mrb[5].mxu0  ;;  %v9992_v20 = vadd.f32 %v1961_v11, %v12949_v49 }
 0x21a   :  { %v9993_v21 = vadd.f32 %v1963_v16, %v12951_v51  ;;  %10637 = vpow2.f32 %v8367_v13 }
 0x21b   :  { %10639 = vpow2.f32 %v8366_v17  ;;  %v8369_v41 = vmul.f32 -1.442695, %v9992_v20 }
 0x21c   :  { %v8370_v23 = vmul.f32 -1.442695, %v9993_v21  ;;  %v1967_v31 = vpop.f32.mrb[6].mxu0 }
 0x21d   :  { %v1969_v35 = vpop.f32.mrb[7].mxu0  ;;  %v9994_v45 = vadd.f32 %v1967_v31, %v12949_v49 }
 0x21e   :  { %v9995_v55 = vadd.f32 %v1969_v35, %v12951_v51  ;;  %10641 = vpow2.f32 %v8370_v23 }
 0x21f   :  { %10643 = vpow2.f32 %v8369_v41  ;;  %v8372_v60 = vmul.f32 -1.442695, %v9994_v45 }
 0x220   :  { %v8373_v56 = vmul.f32 -1.442695, %v9995_v55  ;;  %v10634_v2 = vpop.eup %10633 }
 0x221   :  { %v10636_v5 = vpop.eup %10635  ;;  %v2114_v9 = vadd.f32 1.0, %v10634_v2 }
 0x222   :  { %10645 = vpow2.f32 %v8373_v56  ;;  %v2113_v13 = vadd.f32 1.0, %v10636_v5 }
 0x223   :  { %10647 = vpow2.f32 %v8372_v60 }
 0x224   :  { %v10638_v11 = vpop.eup %10637  ;;  %10649 = vrcp.f32 %v2114_v9 }
 0x225   :  { %v10640_v16 = vpop.eup %10639  ;;  %v2117_v31 = vadd.f32 1.0, %v10638_v11  ;;  %10651 = vrcp.f32 %v2113_v13 }
 0x226   :  { %v2116_v35 = vadd.f32 1.0, %v10640_v16 }
 0x228   :  { %v2038_v17 = vpop.f32.mrb[6].mxu1  ;;  %v10642_v23 = vpop.eup %10641 }
 0x229   :  { %v10154_v20 = vadd.f32 %v2038_v17, %v12961_v6  ;;  %v2040_v21 = vpop.f32.mrb[7].mxu1  ;;  %v10644_v45 = vpop.eup %10643  ;;  %v2120_v48 = vadd.f32 1.0, %v10642_v23 }
 0x22a   :  { %v10155_v39 = vadd.f32 %v2040_v21, %v12963_v10  ;;  %v2119_v2 = vadd.f32 1.0, %v10644_v45 }
 0x22b   :  { %v8365_v41 = vmul.f32 -1.442695, %v10154_v20 }
 0x22c   :  { %10653 = vtanh.f32 %v10155_v39  ;;  %v2044_v55 = vpop.f32.mrb[8].mxu1  ;;  %v10646_v61 = vpop.eup %10645 }
 0x22d   :  { %10655 = vpow2.f32 %v8365_v41  ;;  %v10156_v56 = vadd.f32 %v2044_v55, %v12961_v6  ;;  %v2046_v58 = vpop.f32.mrb[9].mxu1  ;;  %v10648_v9 = vpop.eup %10647  ;;  %v2123_v17 = vadd.f32 1.0, %v10646_v61 }
 0x22e   :  { %10657 = vrcp.f32 %v2117_v31  ;;  %v10157_v60 = vadd.f32 %v2046_v58, %v12963_v10  ;;  %v2122_v21 = vadd.f32 1.0, %v10648_v9  ;;  %v10650_v31 = vpop.eup %10649 }
 0x22f   :  { %10659 = vrcp.f32 %v2116_v35  ;;  %v8368_v5 = vmul.f32 -1.442695, %v10156_v56  ;;  %v10652_v35 = vpop.eup %10651  ;;  %v2153_v58 = vmul.f32 0.0, %v10650_v31 }
 0x230   :  { %10661 = vtanh.f32 %v10157_v60  ;;  %v2050_v11 = vpop.f32.mrb[10].mxu1 }
 0x231   :  { %10663 = vrcp.f32 %v2120_v48  ;;  %v10158_v13 = vadd.f32 %v2050_v11, %v12961_v6  ;;  %v2052_v16 = vpop.f32.mrb[11].mxu1 }
 0x232   :  { %10665 = vpow2.f32 %v8368_v5  ;;  %v10159_v20 = vadd.f32 %v2052_v16, %v12963_v10 }
 0x233   :  { %10667 = vrcp.f32 %v2119_v2  ;;  %v8371_v23 = vmul.f32 -1.442695, %v10158_v13 }
 0x234   :  { %10669 = vtanh.f32 %v10159_v20  ;;  %v2056_v39 = vpop.f32.mrb[12].mxu1 }
 0x235   :  { %10671 = vpow2.f32 %v8371_v23  ;;  %v10160_v41 = vadd.f32 %v2056_v39, %v12961_v6  ;;  %v2058_v45 = vpop.f32.mrb[13].mxu1 }
 0x236   :  { %v10654_v55 = vpop.eup %10653  ;;  %10673 = vrcp.f32 %v2123_v17  ;;  %v10161_v48 = vadd.f32 %v2058_v45, %v12963_v10 }
 0x237   :  { %v10656_v56 = vpop.eup %10655  ;;  %10675 = vrcp.f32 %v2122_v21  ;;  %v2157_v60 = vmul.f32 %v10654_v55, %v10652_v35  ;;  %v8374_v61 = vmul.f32 -1.442695, %v10160_v41 }
 0x238   :  { %v10658_v2 = vpop.eup %10657  ;;  %v2115_v5 = vadd.f32 1.0, %v10656_v56  ;;  %10677 = vtanh.f32 %v10161_v48 }
 0x239   :  { %v10660_v9 = vpop.eup %10659  ;;  %v12973_v11 = vadd.f32 %v2157_v60, %v2153_v58  ;;  %10679 = vpow2.f32 %v8374_v61  ;;  %v2154_v20 = vmul.f32 0.0, %v10658_v2 }
 0x23a   :  { %v10662_v13 = vpop.eup %10661  ;;  %10681 = vrcp.f32 %v2115_v5 }
 0x23b   :  { %v10664_v16 = vpop.eup %10663  ;;  %10683 = vtanh.f32 %v12973_v11  ;;  %v2158_v17 = vmul.f32 %v10662_v13, %v10660_v9 }
 0x23c   :  { %v10666_v23 = vpop.eup %10665  ;;  %v2155_v45 = vmul.f32 0.0, %v10664_v16 }
 0x23d   :  { %v10668_v39 = vpop.eup %10667  ;;  %v2118_v31 = vadd.f32 1.0, %v10666_v23  ;;  %v12976_v21 = vadd.f32 %v2158_v17, %v2154_v20 }
 0x23e   :  { %v10670_v35 = vpop.eup %10669 }
 0x23f   :  { %v10672_v41 = vpop.eup %10671  ;;  %10685 = vrcp.f32 %v2118_v31  ;;  %v2159_v55 = vmul.f32 %v10670_v35, %v10668_v39 }
 0x240   :  { %v10674_v48 = vpop.eup %10673  ;;  %v2121_v56 = vadd.f32 1.0, %v10672_v41  ;;  %10687 = vtanh.f32 %v12976_v21 }
 0x241   :  { %v10676_v58 = vpop.eup %10675  ;;  %v12979_v60 = vadd.f32 %v2159_v55, %v2155_v45  ;;  %v2156_v5 = vmul.f32 0.0, %v10674_v48 }
 0x242   :  { %v10678_v61 = vpop.eup %10677  ;;  %10689 = vrcp.f32 %v2121_v56 }
 0x243   :  { %v10680_v2 = vpop.eup %10679  ;;  %v2160_v9 = vmul.f32 %v10678_v61, %v10676_v58  ;;  %10691 = vtanh.f32 %v12979_v60 }
 0x244   :  { %v10682_v13 = vpop.eup %10681  ;;  %v2124_v20 = vadd.f32 1.0, %v10680_v2 }
 0x245   :  { %v10684_v17 = vpop.eup %10683  ;;  %v12982_v16 = vadd.f32 %v2160_v9, %v2156_v5 }
 0x246   :  { %10693 = vrcp.f32 %v2124_v20  ;;  %v2169_v23 = vmul.f32 %v10684_v17, %v10682_v13 }
 0x247   :  { %10695 = vtanh.f32 %v12982_v16 }
 0x248   :  { %2257 = vmatmul.mubr.f32.vlgmr.msra.gmra.mrb[8].mxu0 %v2169_v23  ;;  %2346 = vmatmul.mubr.f32.vlgmr.msra.gmra.mrb[14].mxu1 %v2169_v23 }
 0x249   :  { %v10686_v39 = vpop.eup %10685  ;;  %2262 = vmatprep.mubr.f32.mxu0 %v14394_v7  ;;  %2351 = vmatprep.mubr.f32.mxu1 %v14394_v7 }
 0x24a   :  { %v10688_v31 = vpop.eup %10687  ;;  %8805 = vmatpush1.bf16.msra.mxu0 %v12050_v22  ;;  %8837 = vmatpush1.bf16.msra.mxu1 %v12116_v40 }
 0x24b   :  { %v2170_v35 = vmul.f32 %v10688_v31, %v10686_v39  ;;  %8807 = vmatprep.subr.bf16.mxu0 %v12089_v32  ;;  %8839 = vmatprep.subr.bf16.mxu1 %v12122_v42 }
 0x24c   :  { %v10690_v41 = vpop.eup %10689 }
 0x24d   :  { %v10692_v45 = vpop.eup %10691  ;;  %2263 = vmatmul.mubr.f32.gmra.mrb[10].mxu0 %v2170_v35  ;;  %2352 = vmatmul.mubr.f32.gmra.mrb[16].mxu1 %v2170_v35 }
 0x24e   :  { %2268 = vmatprep.mubr.f32.mxu0 %v14394_v7  ;;  %2357 = vmatprep.mubr.f32.mxu1 %v14394_v7  ;;  %v2171_v55 = vmul.f32 %v10692_v45, %v10690_v41 }
 0x24f   :  { %8809 = vmatpush1.bf16.msra.mxu0 %v12100_v36  ;;  %8841 = vmatpush1.bf16.msra.mxu1 %v12156_v52 }
 0x250   :  { %v10694_v48 = vpop.eup %10693  ;;  %8811 = vmatprep.subr.bf16.mxu0 %v12133_v46  ;;  %8843 = vmatprep.subr.bf16.mxu1 %v12161_v54 }
 0x251   :  { %v10696_v56 = vpop.eup %10695  ;;  %2269 = vmatmul.mubr.f32.gmra.mrb[12].mxu0 %v2171_v55  ;;  %2358 = vmatmul.mubr.f32.gmra.mrb[18].mxu1 %v2171_v55 }
 0x252   :  { %2274 = vmatprep.mubr.f32.mxu0 %v14394_v7  ;;  %2363 = vmatprep.mubr.f32.mxu1 %v14394_v7  ;;  %v2172_v58 = vmul.f32 %v10696_v56, %v10694_v48 }
 0x253   :  { %8813 = vmatpush1.bf16.msra.mxu0 %v12158_v53  ;;  %8845 = vmatpush1.bf16.msra.mxu1 %v12195_v0 }
 0x254   :  { %8815 = vmatprep.subr.bf16.mxu0 %v12188_v62  ;;  %8847 = vmatprep.subr.bf16.mxu1 %v12204_v3 }
 0x255   :  { %2275 = vmatmul.mubr.f32.gmra.mrb[14].mxu0 %v2172_v58  ;;  %2364 = vmatmul.mubr.f32.gmra.mrb[20].mxu1 %v2172_v58 }
 0x256   :  { %2565 = vmatprep.mubr.f32.mxu0 %v14394_v7  ;;  %2654 = vmatprep.mubr.f32.mxu1 %v14394_v7 }
 0x257   :  { %8817 = vmatpush1.bf16.msra.mxu0 %v12197_v1  ;;  %8849 = vmatpush1.bf16.msra.mxu1 %v12221_v8 }
 0x258   :  { %8819 = vmatprep.subr.bf16.mxu0 %v12252_v14  ;;  %8851 = vmatprep.subr.bf16.mxu1 %v12294_v27 }
 0x25b   :  { %8821 = vmatpush1.bf16.msra.mxu0 %v12267_v18  ;;  %8853 = vmatpush1.bf16.msra.mxu1 %v12299_v29 }
 0x25c   :  { %8823 = vmatprep.subr.bf16.mxu0 %v12358_v43  ;;  %8855 = vmatprep.subr.bf16.mxu1 %v12400_v57 }
 0x25f   :  { %8825 = vmatpush1.bf16.msra.mxu0 %v12366_v47  ;;  %8857 = vmatpush1.bf16.msra.mxu1 %v12405_v59 }
 0x260   :  { %8827 = vmatprep.subr.bf16.mxu0 %v12467_v12  ;;  %8859 = vmatprep.subr.bf16.mxu1 %v12506_v25 }
 0x263   :  { %8829 = vmatpush1.bf16.msra.mxu0 %v12472_v15  ;;  %8861 = vmatpush1.bf16.msra.mxu1 %v12511_v30 }
 0x264   :  { %8831 = vmatprep.subr.bf16.mxu0 %v12563_v44  ;;  %8863 = vmatprep.subr.bf16.mxu1 %v12613_v63 }
 0x267   :  { %8833 = vmatpush1.bf16.msra.mxu0 %v12578_v50  ;;  %8865 = vmatpush1.bf16.msra.mxu1 %v12618_v4 }
 0x268   :  { %8867 = vmatprep.subr.bf16.mxu0 %v12040_v19  ;;  %8899 = vmatprep.subr.bf16.mxu1 %v12064_v26 }
 0x31b   :  { %v2258_v61 = vpop.f32.mrb[8].mxu0  ;;  %v2347_v2 = vpop.f32.mrb[14].mxu1 }
 0x31c   :  { %v9996_v5 = vadd.f32 %v2258_v61, %v12949_v49  ;;  %v2260_v9 = vpop.f32.mrb[9].mxu0  ;;  %v2349_v13 = vpop.f32.mrb[15].mxu1  ;;  %v10162_v55 = vadd.f32 %v2347_v2, %v12961_v6 }
 0x31d   :  { %v9997_v20 = vadd.f32 %v2260_v9, %v12951_v51  ;;  %v10163_v58 = vadd.f32 %v2349_v13, %v12963_v10 }
 0x31e   :  { %v8375_v17 = vmul.f32 -1.442695, %v9996_v5  ;;  %v8377_v38 = vmul.f32 -1.442695, %v10162_v55 }
 0x31f   :  { %v8376_v23 = vmul.f32 -1.442695, %v9997_v20 }
 0x320   :  { %10697 = vpow2.f32 %v8375_v17  ;;  %v2264_v39 = vpop.f32.mrb[10].mxu0  ;;  %v2353_v31 = vpop.f32.mrb[16].mxu1 }
 0x321   :  { %v9998_v35 = vadd.f32 %v2264_v39, %v12949_v49  ;;  %v2266_v41 = vpop.f32.mrb[11].mxu0  ;;  %v2355_v45 = vpop.f32.mrb[17].mxu1  ;;  %10699 = vpow2.f32 %v8376_v23  ;;  %v10164_v39 = vadd.f32 %v2353_v31, %v12961_v6 }
 0x322   :  { %v9999_v48 = vadd.f32 %v2266_v41, %v12951_v51  ;;  %v10165_v23 = vadd.f32 %v2355_v45, %v12963_v10 }
 0x323   :  { %v8378_v56 = vmul.f32 -1.442695, %v9998_v35  ;;  %v8380_v55 = vmul.f32 -1.442695, %v10164_v39 }
 0x324   :  { %v8379_v61 = vmul.f32 -1.442695, %v9999_v48  ;;  %v2270_v7 = vpop.f32.mrb[12].mxu0  ;;  %v2359_v9 = vpop.f32.mrb[18].mxu1 }
 0x325   :  { %10701 = vpow2.f32 %v8378_v56  ;;  %v10000_v5 = vadd.f32 %v2270_v7, %v12949_v49  ;;  %v2272_v20 = vpop.f32.mrb[13].mxu0  ;;  %v2361_v17 = vpop.f32.mrb[19].mxu1  ;;  %v10166_v31 = vadd.f32 %v2359_v9, %v12961_v6 }
 0x326   :  { %v10001_v37 = vadd.f32 %v2272_v20, %v12951_v51  ;;  %10703 = vpow2.f32 %v8379_v61 }
 0x327   :  { %v8381_v2 = vmul.f32 -1.442695, %v10000_v5  ;;  %10705 = vtanh.f32 %v10163_v58 }
 0x328   :  { %v8382_v35 = vmul.f32 -1.442695, %v10001_v37  ;;  %v2276_v13 = vpop.f32.mrb[14].mxu0  ;;  %v2365_v41 = vpop.f32.mrb[20].mxu1  ;;  %v10167_v37 = vadd.f32 %v2361_v17, %v12963_v10 }
 0x329   :  { %10707 = vpow2.f32 %v8381_v2  ;;  %v10002_v48 = vadd.f32 %v2276_v13, %v12949_v49  ;;  %v2278_v56 = vpop.f32.mrb[15].mxu0  ;;  %v2367_v7 = vpop.f32.mrb[21].mxu1  ;;  %v8383_v2 = vmul.f32 -1.442695, %v10166_v31  ;;  %v10168_v31 = vadd.f32 %v2365_v41, %v12961_v6 }
 0x32a   :  { %v10698_v34 = vpop.eup %10697  ;;  %10709 = vpow2.f32 %v8377_v38  ;;  %v10003_v5 = vadd.f32 %v2278_v56, %v12951_v51 }
 0x32b   :  { %v2422_v33 = vadd.f32 1.0, %v10698_v34  ;;  %10711 = vpow2.f32 %v8382_v35  ;;  %v10700_v61 = vpop.eup %10699  ;;  %v8384_v58 = vmul.f32 -1.442695, %v10002_v48 }
 0x32c   :  { %10713 = vtanh.f32 %v10165_v23  ;;  %v2423_v45 = vadd.f32 1.0, %v10700_v61  ;;  %v8385_v34 = vmul.f32 -1.442695, %v10003_v5  ;;  %v10169_v61 = vadd.f32 %v2367_v7, %v12963_v10 }
 0x32d   :  { %10715 = vrcp.f32 %v2422_v33 }
 0x32e   :  { %10717 = vpow2.f32 %v8380_v55 }
 0x32f   :  { %v10702_v20 = vpop.eup %10701  ;;  %10719 = vrcp.f32 %v2423_v45 }
 0x330   :  { %v2425_v13 = vadd.f32 1.0, %v10702_v20  ;;  %10721 = vpow2.f32 %v8384_v58  ;;  %v10704_v38 = vpop.eup %10703 }
 0x331   :  { %10723 = vtanh.f32 %v10167_v37  ;;  %v10706_v9 = vpop.eup %10705  ;;  %v2426_v39 = vadd.f32 1.0, %v10704_v38 }
 0x332   :  { %10725 = vrcp.f32 %v2425_v13 }
 0x333   :  { %v10708_v23 = vpop.eup %10707  ;;  %10727 = vpow2.f32 %v8383_v2 }
 0x334   :  { %v10710_v33 = vpop.eup %10709  ;;  %10729 = vrcp.f32 %v2426_v39  ;;  %v2428_v35 = vadd.f32 1.0, %v10708_v23  ;;  %v8386_v39 = vmul.f32 -1.442695, %v10168_v31 }
 0x335   :  { %v10712_v17 = vpop.eup %10711  ;;  %10731 = vpow2.f32 %v8385_v34  ;;  %v2424_v45 = vadd.f32 1.0, %v10710_v33 }
 0x336   :  { %v10714_v48 = vpop.eup %10713  ;;  %10733 = vrcp.f32 %v2428_v35  ;;  %v2429_v56 = vadd.f32 1.0, %v10712_v17 }
 0x337   :  { %v10716_v55 = vpop.eup %10715 }
 0x338   :  { %v10718_v58 = vpop.eup %10717  ;;  %v2466_v37 = vmul.f32 %v10716_v55, %v10706_v9  ;;  %10735 = vrcp.f32 %v2429_v56 }
 0x339   :  { %v10720_v5 = vpop.eup %10719  ;;  %10737 = vtanh.f32 %v10169_v61  ;;  %v2427_v41 = vadd.f32 1.0, %v10718_v58 }
 0x33a   :  { %v10722_v20 = vpop.eup %10721  ;;  %v2462_v2 = vmul.f32 %v10720_v5, %v12973_v11  ;;  %10739 = vrcp.f32 %v2424_v45 }
 0x33b   :  { %v10724_v13 = vpop.eup %10723  ;;  %v2431_v38 = vadd.f32 1.0, %v10722_v20 }
 0x33c   :  { %v10726_v34 = vpop.eup %10725  ;;  %v13042_v23 = vadd.f32 %v2466_v37, %v2462_v2 }
 0x33d   :  { %v10728_v35 = vpop.eup %10727  ;;  %v2467_v17 = vmul.f32 %v10726_v34, %v10714_v48  ;;  %10741 = vrcp.f32 %v2431_v38 }
 0x33e   :  { %v10730_v7 = vpop.eup %10729  ;;  %10743 = vtanh.f32 %v13042_v23  ;;  %v2430_v45 = vadd.f32 1.0, %v10728_v35 }
 0x33f   :  { %v10732_v9 = vpop.eup %10731  ;;  %v2463_v33 = vmul.f32 %v10730_v7, %v12976_v21  ;;  %10745 = vpow2.f32 %v8386_v39 }
 0x340   :  { %v10734_v11 = vpop.eup %10733  ;;  %v2432_v56 = vadd.f32 1.0, %v10732_v9  ;;  %10747 = vrcp.f32 %v2427_v41 }
 0x341   :  { %v13046_v55 = vadd.f32 %v2467_v17, %v2463_v33  ;;  %v2468_v31 = vmul.f32 %v10734_v11, %v10724_v13 }
 0x342   :  { %v10736_v61 = vpop.eup %10735  ;;  %10749 = vrcp.f32 %v2432_v56 }
 0x343   :  { %v2464_v58 = vmul.f32 %v10736_v61, %v12979_v60  ;;  %10751 = vtanh.f32 %v13046_v55  ;;  %v10738_v48 = vpop.eup %10737  ;;  %v14408_v60 = vmov 0.0  }
 0x344   :  { %v10740_v5 = vpop.eup %10739  ;;  %10753 = vrcp.f32 %v2430_v45 }
 0x345   :  { %v13050_v37 = vadd.f32 %v2468_v31, %v2464_v58 }
 0x347   :  { %v10742_v21 = vpop.eup %10741  ;;  %10755 = vtanh.f32 %v13050_v37 }
 0x348   :  { %v10744_v20 = vpop.eup %10743  ;;  %v2469_v2 = vmul.f32 %v10742_v21, %v10738_v48 }
 0x349   :  { %v10746_v38 = vpop.eup %10745  ;;  %v2478_v39 = vmul.f32 %v10744_v20, %v10740_v5 }
 0x34a   :  { %v10748_v13 = vpop.eup %10747  ;;  %v2433_v35 = vadd.f32 1.0, %v10746_v38 }
 0x34b   :  { %2566 = vmatmul.mubr.f32.vlgmr.msra.gmra.mrb[16].mxu0 %v2478_v39  ;;  %2655 = vmatmul.mubr.f32.vlgmr.msra.gmra.mrb[22].mxu1 %v2478_v39 }
 0x34c   :  { %v10750_v34 = vpop.eup %10749  ;;  %2571 = vmatprep.mubr.f32.mxu0 %v14408_v60  ;;  %2660 = vmatprep.mubr.f32.mxu1 %v14408_v60  ;;  %10757 = vrcp.f32 %v2433_v35 }
 0x34d   :  { %v10752_v41 = vpop.eup %10751  ;;  %v2465_v17 = vmul.f32 %v10750_v34, %v12982_v16  ;;  %8869 = vmatpush1.bf16.msra.mxu0 %v12050_v22  ;;  %8901 = vmatpush1.bf16.msra.mxu1 %v12116_v40 }
 0x34e   :  { %v2479_v7 = vmul.f32 %v10752_v41, %v10748_v13  ;;  %8871 = vmatprep.subr.bf16.mxu0 %v12089_v32  ;;  %8903 = vmatprep.subr.bf16.mxu1 %v12122_v42  ;;  %v10754_v33 = vpop.eup %10753 }
 0x34f   :  { %v13060_v9 = vadd.f32 %v2469_v2, %v2465_v17 }
 0x350   :  { %2572 = vmatmul.mubr.f32.gmra.mrb[18].mxu0 %v2479_v7  ;;  %2661 = vmatmul.mubr.f32.gmra.mrb[24].mxu1 %v2479_v7 }
 0x351   :  { %v10756_v11 = vpop.eup %10755  ;;  %2577 = vmatprep.mubr.f32.mxu0 %v14408_v60  ;;  %2666 = vmatprep.mubr.f32.mxu1 %v14408_v60  ;;  %10759 = vtanh.f32 %v13060_v9 }
 0x352   :  { %v2480_v16 = vmul.f32 %v10756_v11, %v10754_v33  ;;  %8873 = vmatpush1.bf16.msra.mxu0 %v12100_v36  ;;  %8905 = vmatpush1.bf16.msra.mxu1 %v12156_v52 }
 0x353   :  { %8875 = vmatprep.subr.bf16.mxu0 %v12133_v46  ;;  %8907 = vmatprep.subr.bf16.mxu1 %v12161_v54 }
 0x354   :  { %2578 = vmatmul.mubr.f32.gmra.mrb[20].mxu0 %v2480_v16  ;;  %2667 = vmatmul.mubr.f32.gmra.mrb[26].mxu1 %v2480_v16 }
 0x355   :  { %2583 = vmatprep.mubr.f32.mxu0 %v14408_v60  ;;  %2672 = vmatprep.mubr.f32.mxu1 %v14408_v60 }
 0x356   :  { %8877 = vmatpush1.bf16.msra.mxu0 %v12158_v53  ;;  %8909 = vmatpush1.bf16.msra.mxu1 %v12195_v0  ;;  %v10758_v56 = vpop.eup %10757 }
 0x357   :  { %8879 = vmatprep.subr.bf16.mxu0 %v12188_v62  ;;  %8911 = vmatprep.subr.bf16.mxu1 %v12204_v3 }
 0x35a   :  { %8881 = vmatpush1.bf16.msra.mxu0 %v12197_v1  ;;  %8913 = vmatpush1.bf16.msra.mxu1 %v12221_v8 }
 0x35b   :  { %v10760_v31 = vpop.eup %10759  ;;  %8883 = vmatprep.subr.bf16.mxu0 %v12252_v14  ;;  %8915 = vmatprep.subr.bf16.mxu1 %v12294_v27 }
 0x35c   :  { %v2481_v61 = vmul.f32 %v10760_v31, %v10758_v56 }
 0x35e   :  { %2584 = vmatmul.mubr.f32.gmra.mrb[22].mxu0 %v2481_v61  ;;  %2673 = vmatmul.mubr.f32.gmra.mrb[28].mxu1 %v2481_v61 }
 0x35f   :  { %8885 = vmatpush1.bf16.msra.mxu0 %v12267_v18  ;;  %8917 = vmatpush1.bf16.msra.mxu1 %v12299_v29 }
 0x360   :  { %8887 = vmatprep.subr.bf16.mxu0 %v12358_v43  ;;  %8919 = vmatprep.subr.bf16.mxu1 %v12400_v57 }
 0x361   :  { %2874 = vmatprep.mubr.f32.mxu0 %v14408_v60  ;;  %2963 = vmatprep.mubr.f32.mxu1 %v14408_v60 }
 0x363   :  { %8889 = vmatpush1.bf16.msra.mxu0 %v12366_v47  ;;  %8921 = vmatpush1.bf16.msra.mxu1 %v12405_v59 }
 0x364   :  { %8891 = vmatprep.subr.bf16.mxu0 %v12467_v12  ;;  %8923 = vmatprep.subr.bf16.mxu1 %v12506_v25 }
 0x367   :  { %8893 = vmatpush1.bf16.msra.mxu0 %v12472_v15  ;;  %8925 = vmatpush1.bf16.msra.mxu1 %v12511_v30 }
 0x368   :  { %8895 = vmatprep.subr.bf16.mxu0 %v12563_v44  ;;  %8927 = vmatprep.subr.bf16.mxu1 %v12613_v63 }
 0x36b   :  { %8897 = vmatpush1.bf16.msra.mxu0 %v12578_v50  ;;  %8929 = vmatpush1.bf16.msra.mxu1 %v12618_v4 }
 0x36c   :  { %8931 = vmatprep.subr.bf16.mxu0 %v12040_v19  ;;  %8963 = vmatprep.subr.bf16.mxu1 %v12064_v26 }
 0x41e   :  { %v2567_v45 = vpop.f32.mrb[16].mxu0  ;;  %v2656_v58 = vpop.f32.mrb[22].mxu1 }
 0x41f   :  { %v10004_v48 = vadd.f32 %v2567_v45, %v12949_v49  ;;  %v2569_v5 = vpop.f32.mrb[17].mxu0  ;;  %v2658_v21 = vpop.f32.mrb[23].mxu1  ;;  %v10170_v33 = vadd.f32 %v2656_v58, %v12961_v6 }
 0x420   :  { %v10005_v20 = vadd.f32 %v2569_v5, %v12951_v51 }
 0x421   :  { %v8387_v2 = vmul.f32 -1.442695, %v10004_v48  ;;  %v10171_v48 = vadd.f32 %v2658_v21, %v12963_v10 }
 0x422   :  { %v8388_v38 = vmul.f32 -1.442695, %v10005_v20 }
 0x423   :  { %10761 = vpow2.f32 %v8387_v2  ;;  %v2573_v39 = vpop.f32.mrb[18].mxu0  ;;  %v2662_v13 = vpop.f32.mrb[24].mxu1 }
 0x424   :  { %v10006_v34 = vadd.f32 %v2573_v39, %v12949_v49  ;;  %v2575_v35 = vpop.f32.mrb[19].mxu0  ;;  %v2664_v41 = vpop.f32.mrb[25].mxu1  ;;  %10763 = vpow2.f32 %v8388_v38  ;;  %v10172_v5 = vadd.f32 %v2662_v13, %v12961_v6  ;;  %v8389_v38 = vmul.f32 -1.442695, %v10170_v33 }
 0x425   :  { %v10007_v17 = vadd.f32 %v2575_v35, %v12951_v51  ;;  %v10173_v21 = vadd.f32 %v2664_v41, %v12963_v10 }
 0x426   :  { %v8390_v7 = vmul.f32 -1.442695, %v10006_v34  ;;  %v8392_v34 = vmul.f32 -1.442695, %v10172_v5 }
 0x427   :  { %v8391_v11 = vmul.f32 -1.442695, %v10007_v17  ;;  %v2579_v16 = vpop.f32.mrb[20].mxu0  ;;  %v2668_v56 = vpop.f32.mrb[26].mxu1 }
 0x428   :  { %10765 = vpow2.f32 %v8390_v7  ;;  %v10008_v31 = vadd.f32 %v2579_v16, %v12949_v49  ;;  %v2581_v61 = vpop.f32.mrb[21].mxu0  ;;  %v2670_v45 = vpop.f32.mrb[27].mxu1  ;;  %v10174_v17 = vadd.f32 %v2668_v56, %v12961_v6 }
 0x429   :  { %v10009_v20 = vadd.f32 %v2581_v61, %v12951_v51  ;;  %10767 = vpow2.f32 %v8391_v11  ;;  %v10175_v16 = vadd.f32 %v2670_v45, %v12963_v10 }
 0x42a   :  { %v8393_v2 = vmul.f32 -1.442695, %v10008_v31  ;;  %v8395_v61 = vmul.f32 -1.442695, %v10174_v17 }
 0x42b   :  { %v8394_v39 = vmul.f32 -1.442695, %v10009_v20 }
 0x42c   :  { %10769 = vpow2.f32 %v8393_v2 }
 0x42d   :  { %v10762_v58 = vpop.eup %10761  ;;  %10771 = vtanh.f32 %v10171_v48 }
 0x42e   :  { %v2731_v35 = vadd.f32 1.0, %v10762_v58  ;;  %10773 = vpow2.f32 %v8394_v39  ;;  %v10764_v7 = vpop.eup %10763 }
 0x42f   :  { %10775 = vpow2.f32 %v8389_v38  ;;  %v2732_v13 = vadd.f32 1.0, %v10764_v7 }
 0x430   :  { %10777 = vrcp.f32 %v2731_v35 }
 0x431   :  { %10779 = vpow2.f32 %v8392_v34  ;;  %v2585_v11 = vpop.f32.mrb[22].mxu0  ;;  %v2674_v33 = vpop.f32.mrb[28].mxu1 }
 0x432   :  { %v10766_v31 = vpop.eup %10765  ;;  %10781 = vrcp.f32 %v2732_v13  ;;  %v10010_v48 = vadd.f32 %v2585_v11, %v12949_v49  ;;  %v2587_v5 = vpop.f32.mrb[23].mxu0 }
 0x433   :  { %v2676_v20 = vpop.f32.mrb[29].mxu1  ;;  %v2734_v56 = vadd.f32 1.0, %v10766_v31  ;;  %10783 = vtanh.f32 %v10173_v21  ;;  %v10768_v2 = vpop.eup %10767  ;;  %v10011_v39 = vadd.f32 %v2587_v5, %v12951_v51 }
 0x434   :  { %10785 = vtanh.f32 %v10175_v16  ;;  %v8396_v38 = vmul.f32 -1.442695, %v10010_v48  ;;  %v2735_v41 = vadd.f32 1.0, %v10768_v2 }
 0x435   :  { %10787 = vrcp.f32 %v2734_v56  ;;  %v8397_v13 = vmul.f32 -1.442695, %v10011_v39 }
 0x436   :  { %v10770_v45 = vpop.eup %10769  ;;  %10789 = vpow2.f32 %v8395_v61 }
 0x437   :  { %v10772_v58 = vpop.eup %10771  ;;  %10791 = vrcp.f32 %v2735_v41  ;;  %v2737_v34 = vadd.f32 1.0, %v10770_v45 }
 0x438   :  { %v10774_v35 = vpop.eup %10773  ;;  %10793 = vpow2.f32 %v8396_v38  ;;  %v10176_v38 = vadd.f32 %v2674_v33, %v12961_v6 }
 0x439   :  { %v10776_v17 = vpop.eup %10775  ;;  %10795 = vrcp.f32 %v2737_v34  ;;  %v2738_v7 = vadd.f32 1.0, %v10774_v35  ;;  %v10177_v35 = vadd.f32 %v2676_v20, %v12963_v10 }
 0x43a   :  { %v10778_v11 = vpop.eup %10777  ;;  %v2733_v48 = vadd.f32 1.0, %v10776_v17 }
 0x43b   :  { %v10780_v21 = vpop.eup %10779  ;;  %v2775_v31 = vmul.f32 %v10778_v11, %v10772_v58  ;;  %10797 = vrcp.f32 %v2738_v7  ;;  %v8398_v11 = vmul.f32 -1.442695, %v10176_v38 }
 0x43c   :  { %v10782_v16 = vpop.eup %10781  ;;  %10799 = vpow2.f32 %v8397_v13  ;;  %v2736_v45 = vadd.f32 1.0, %v10780_v21 }
 0x43d   :  { %v10784_v56 = vpop.eup %10783  ;;  %v2771_v5 = vmul.f32 %v10782_v16, %v13042_v23  ;;  %10801 = vrcp.f32 %v2733_v48 }
 0x43e   :  { %v10786_v61 = vpop.eup %10785 }
 0x43f   :  { %v10788_v2 = vpop.eup %10787  ;;  %v13112_v41 = vadd.f32 %v2775_v31, %v2771_v5 }
 0x440   :  { %v10790_v34 = vpop.eup %10789  ;;  %v2776_v39 = vmul.f32 %v10788_v2, %v10784_v56 }
 0x441   :  { %v10792_v58 = vpop.eup %10791  ;;  %10803 = vtanh.f32 %v13112_v41  ;;  %v2739_v16 = vadd.f32 1.0, %v10790_v34 }
 0x442   :  { %v10794_v17 = vpop.eup %10793  ;;  %v2772_v7 = vmul.f32 %v10792_v58, %v13046_v55  ;;  %10805 = vrcp.f32 %v2736_v45 }
 0x443   :  { %v10796_v23 = vpop.eup %10795  ;;  %v2740_v13 = vadd.f32 1.0, %v10794_v17  ;;  %10807 = vtanh.f32 %v10177_v35 }
 0x444   :  { %v13118_v31 = vadd.f32 %v2776_v39, %v2772_v7  ;;  %v2777_v21 = vmul.f32 %v10796_v23, %v10786_v61 }
 0x445   :  { %v10798_v33 = vpop.eup %10797  ;;  %10809 = vrcp.f32 %v2740_v13 }
 0x446   :  { %v2773_v48 = vmul.f32 %v10798_v33, %v13050_v37  ;;  %10811 = vtanh.f32 %v13118_v31  ;;  %v10800_v20 = vpop.eup %10799 }
 0x447   :  { %10813 = vpow2.f32 %v8398_v11  ;;  %v2741_v55 = vadd.f32 1.0, %v10800_v20  ;;  %v10802_v5 = vpop.eup %10801 }
 0x448   :  { %v13122_v56 = vadd.f32 %v2777_v21, %v2773_v48  ;;  %10815 = vrcp.f32 %v2739_v16 }
 0x449   :  { %10817 = vrcp.f32 %v2741_v55 }
 0x44a   :  { %10819 = vtanh.f32 %v13122_v56 }
 0x44b   :  { %v10804_v2 = vpop.eup %10803 }
 0x44c   :  { %v2787_v61 = vmul.f32 %v10804_v2, %v10802_v5  ;;  %v10806_v45 = vpop.eup %10805 }
 0x44d   :  { %v10808_v38 = vpop.eup %10807 }
 0x44e   :  { %2875 = vmatmul.mubr.f32.vlgmr.msra.gmra.mrb[24].mxu0 %v2787_v61  ;;  %2964 = vmatmul.mubr.f32.vlgmr.msra.gmra.mrb[30].mxu1 %v2787_v61 }
 0x44f   :  { %v10810_v34 = vpop.eup %10809  ;;  %2880 = vmatprep.mubr.f32.mxu0 %v14408_v60  ;;  %2969 = vmatprep.mubr.f32.mxu1 %v14408_v60 }
 0x450   :  { %v10812_v37 = vpop.eup %10811  ;;  %v2778_v39 = vmul.f32 %v10810_v34, %v10808_v38  ;;  %8933 = vmatpush1.bf16.msra.mxu0 %v12050_v22  ;;  %8965 = vmatpush1.bf16.msra.mxu1 %v12116_v40 }
 0x451   :  { %v10814_v35 = vpop.eup %10813  ;;  %v2788_v58 = vmul.f32 %v10812_v37, %v10806_v45  ;;  %8935 = vmatprep.subr.bf16.mxu0 %v12089_v32  ;;  %8967 = vmatprep.subr.bf16.mxu1 %v12122_v42 }
 0x452   :  { %v10816_v17 = vpop.eup %10815  ;;  %v2742_v23 = vadd.f32 1.0, %v10814_v35 }
 0x453   :  { %2881 = vmatmul.mubr.f32.gmra.mrb[26].mxu0 %v2788_v58  ;;  %2970 = vmatmul.mubr.f32.gmra.mrb[32].mxu1 %v2788_v58  ;;  %v10818_v7 = vpop.eup %10817 }
 0x454   :  { %2886 = vmatprep.mubr.f32.mxu0 %v14408_v60  ;;  %2975 = vmatprep.mubr.f32.mxu1 %v14408_v60  ;;  %v10820_v13 = vpop.eup %10819  ;;  %v2774_v11 = vmul.f32 %v10818_v7, %v13060_v9  ;;  %10821 = vrcp.f32 %v2742_v23 }
 0x455   :  { %8937 = vmatpush1.bf16.msra.mxu0 %v12100_v36  ;;  %8969 = vmatpush1.bf16.msra.mxu1 %v12156_v52  ;;  %v2789_v21 = vmul.f32 %v10820_v13, %v10816_v17 }
 0x456   :  { %8939 = vmatprep.subr.bf16.mxu0 %v12133_v46  ;;  %8971 = vmatprep.subr.bf16.mxu1 %v12161_v54  ;;  %v13138_v33 = vadd.f32 %v2778_v39, %v2774_v11 }
 0x457   :  { %2887 = vmatmul.mubr.f32.gmra.mrb[28].mxu0 %v2789_v21  ;;  %2976 = vmatmul.mubr.f32.gmra.mrb[34].mxu1 %v2789_v21 }
 0x458   :  { %2892 = vmatprep.mubr.f32.mxu0 %v14408_v60  ;;  %2981 = vmatprep.mubr.f32.mxu1 %v14408_v60  ;;  %10823 = vtanh.f32 %v13138_v33 }
 0x459   :  { %8941 = vmatpush1.bf16.msra.mxu0 %v12158_v53  ;;  %8973 = vmatpush1.bf16.msra.mxu1 %v12195_v0 }
 0x45a   :  { %8943 = vmatprep.subr.bf16.mxu0 %v12188_v62  ;;  %8975 = vmatprep.subr.bf16.mxu1 %v12204_v3 }
 0x45d   :  { %8945 = vmatpush1.bf16.msra.mxu0 %v12197_v1  ;;  %8977 = vmatpush1.bf16.msra.mxu1 %v12221_v8 }
 0x45e   :  { %8947 = vmatprep.subr.bf16.mxu0 %v12252_v14  ;;  %8979 = vmatprep.subr.bf16.mxu1 %v12294_v27  ;;  %v10822_v9 = vpop.eup %10821 }
 0x461   :  { %8949 = vmatpush1.bf16.msra.mxu0 %v12267_v18  ;;  %8981 = vmatpush1.bf16.msra.mxu1 %v12299_v29 }
 0x462   :  { %v10824_v16 = vpop.eup %10823  ;;  %8951 = vmatprep.subr.bf16.mxu0 %v12358_v43  ;;  %8983 = vmatprep.subr.bf16.mxu1 %v12400_v57 }
 0x463   :  { %v2790_v48 = vmul.f32 %v10824_v16, %v10822_v9 }
 0x465   :  { %2893 = vmatmul.mubr.f32.gmra.mrb[30].mxu0 %v2790_v48  ;;  %2982 = vmatmul.mubr.f32.gmra.mrb[36].mxu1 %v2790_v48 }
 0x466   :  { %8953 = vmatpush1.bf16.msra.mxu0 %v12366_v47  ;;  %8985 = vmatpush1.bf16.msra.mxu1 %v12405_v59 }
 0x467   :  { %8955 = vmatprep.subr.bf16.mxu0 %v12467_v12  ;;  %8987 = vmatprep.subr.bf16.mxu1 %v12506_v25 }
 0x468   :  { %3183 = vmatprep.mubr.f32.mxu0 %v14408_v60  ;;  %3272 = vmatprep.mubr.f32.mxu1 %v14408_v60 }
 0x46a   :  { %8957 = vmatpush1.bf16.msra.mxu0 %v12472_v15  ;;  %8989 = vmatpush1.bf16.msra.mxu1 %v12511_v30 }
 0x46b   :  { %8959 = vmatprep.subr.bf16.mxu0 %v12563_v44  ;;  %8991 = vmatprep.subr.bf16.mxu1 %v12613_v63 }
 0x46e   :  { %8961 = vmatpush1.bf16.msra.mxu0 %v12578_v50  ;;  %8993 = vmatpush1.bf16.msra.mxu1 %v12618_v4 }
 0x46f   :  { %8995 = vmatprep.subr.bf16.mxu0 %v12040_v19  ;;  %9027 = vmatprep.subr.bf16.mxu1 %v12064_v26 }
 0x521   :  { %v2876_v20 = vpop.f32.mrb[24].mxu0  ;;  %v2965_v55 = vpop.f32.mrb[30].mxu1 }
 0x522   :  { %v10012_v5 = vadd.f32 %v2876_v20, %v12949_v49  ;;  %v2878_v2 = vpop.f32.mrb[25].mxu0  ;;  %v2967_v61 = vpop.f32.mrb[31].mxu1  ;;  %v10178_v23 = vadd.f32 %v2965_v55, %v12961_v6 }
 0x523   :  { %v10013_v45 = vadd.f32 %v2878_v2, %v12951_v51  ;;  %v10179_v21 = vadd.f32 %v2967_v61, %v12963_v10 }
 0x524   :  { %v8399_v38 = vmul.f32 -1.442695, %v10012_v5  ;;  %v8401_v2 = vmul.f32 -1.442695, %v10178_v23 }
 0x525   :  { %v8400_v34 = vmul.f32 -1.442695, %v10013_v45 }
 0x526   :  { %10825 = vpow2.f32 %v8399_v38  ;;  %v2882_v37 = vpop.f32.mrb[26].mxu0  ;;  %v2971_v39 = vpop.f32.mrb[32].mxu1 }
 0x527   :  { %v10014_v35 = vadd.f32 %v2882_v37, %v12949_v49  ;;  %v2884_v58 = vpop.f32.mrb[27].mxu0  ;;  %v2973_v17 = vpop.f32.mrb[33].mxu1  ;;  %10827 = vpow2.f32 %v8400_v34  ;;  %v10180_v34 = vadd.f32 %v2971_v39, %v12961_v6 }
 0x528   :  { %v10015_v7 = vadd.f32 %v2884_v58, %v12951_v51  ;;  %v10181_v58 = vadd.f32 %v2973_v17, %v12963_v10 }
 0x529   :  { %v8402_v13 = vmul.f32 -1.442695, %v10014_v35 }
 0x52a   :  { %v8403_v11 = vmul.f32 -1.442695, %v10015_v7  ;;  %v2888_v9 = vpop.f32.mrb[28].mxu0  ;;  %v2977_v16 = vpop.f32.mrb[34].mxu1 }
 0x52b   :  { %10829 = vpow2.f32 %v8402_v13  ;;  %v10016_v48 = vadd.f32 %v2888_v9, %v12949_v49  ;;  %v2890_v20 = vpop.f32.mrb[29].mxu0  ;;  %v2979_v5 = vpop.f32.mrb[35].mxu1  ;;  %v8404_v13 = vmul.f32 -1.442695, %v10180_v34  ;;  %v10182_v23 = vadd.f32 %v2977_v16, %v12961_v6 }
 0x52c   :  { %10831 = vpow2.f32 %v8403_v11  ;;  %v10017_v45 = vadd.f32 %v2890_v20, %v12951_v51  ;;  %v10183_v39 = vadd.f32 %v2979_v5, %v12963_v10 }
 0x52d   :  { %v8405_v38 = vmul.f32 -1.442695, %v10016_v48  ;;  %10833 = vtanh.f32 %v10179_v21  ;;  %v8407_v20 = vmul.f32 -1.442695, %v10182_v23 }
 0x52e   :  { %v8406_v55 = vmul.f32 -1.442695, %v10017_v45 }
 0x52f   :  { %10835 = vpow2.f32 %v8405_v38 }
 0x530   :  { %v10826_v37 = vpop.eup %10825  ;;  %10837 = vpow2.f32 %v8401_v2 }
 0x531   :  { %v3040_v35 = vadd.f32 1.0, %v10826_v37  ;;  %v10828_v61 = vpop.eup %10827  ;;  %10839 = vpow2.f32 %v8406_v55 }
 0x532   :  { %v3041_v7 = vadd.f32 1.0, %v10828_v61 }
 0x533   :  { %10841 = vrcp.f32 %v3040_v35 }
 0x534   :  { %10843 = vrcp.f32 %v3041_v7 }
 0x535   :  { %v10830_v11 = vpop.eup %10829  ;;  %10845 = vtanh.f32 %v10181_v58 }
 0x536   :  { %v3043_v9 = vadd.f32 1.0, %v10830_v11  ;;  %v10832_v21 = vpop.eup %10831  ;;  %10847 = vpow2.f32 %v8404_v13 }
 0x537   :  { %v3044_v48 = vadd.f32 1.0, %v10832_v21  ;;  %v10834_v2 = vpop.eup %10833 }
 0x538   :  { %10849 = vrcp.f32 %v3043_v9  ;;  %v2894_v45 = vpop.f32.mrb[30].mxu0  ;;  %v2983_v17 = vpop.f32.mrb[36].mxu1 }
 0x539   :  { %v10836_v38 = vpop.eup %10835  ;;  %10851 = vrcp.f32 %v3044_v48  ;;  %v10018_v34 = vadd.f32 %v2894_v45, %v12949_v49  ;;  %v2896_v55 = vpop.f32.mrb[31].mxu0 }
 0x53a   :  { %v2985_v16 = vpop.f32.mrb[37].mxu1  ;;  %v10838_v37 = vpop.eup %10837  ;;  %v3046_v35 = vadd.f32 1.0, %v10836_v38  ;;  %10853 = vtanh.f32 %v10183_v39  ;;  %v10019_v61 = vadd.f32 %v2896_v55, %v12951_v51 }
 0x53b   :  { %v10840_v58 = vpop.eup %10839  ;;  %10855 = vpow2.f32 %v8407_v20  ;;  %v8408_v5 = vmul.f32 -1.442695, %v10018_v34  ;;  %v3042_v21 = vadd.f32 1.0, %v10838_v37  ;;  %v10184_v34 = vadd.f32 %v2983_v17, %v12961_v6 }
 0x53c   :  { %10857 = vrcp.f32 %v3046_v35  ;;  %v3047_v13 = vadd.f32 1.0, %v10840_v58  ;;  %v8409_v11 = vmul.f32 -1.442695, %v10019_v61 }
 0x53d   :  { %v10842_v7 = vpop.eup %10841 }
 0x53e   :  { %v3084_v23 = vmul.f32 %v10842_v7, %v10834_v2  ;;  %v10844_v9 = vpop.eup %10843  ;;  %10859 = vrcp.f32 %v3047_v13  ;;  %v10185_v13 = vadd.f32 %v2985_v16, %v12963_v10 }
 0x53f   :  { %v10846_v48 = vpop.eup %10845  ;;  %v3080_v45 = vmul.f32 %v10844_v9, %v13112_v41  ;;  %10861 = vpow2.f32 %v8408_v5  ;;  %v8410_v5 = vmul.f32 -1.442695, %v10184_v34 }
 0x540   :  { %v10848_v28 = vpop.eup %10847  ;;  %10863 = vpow2.f32 %v8409_v11 }
 0x541   :  { %v13184_v39 = vadd.f32 %v3084_v23, %v3080_v45  ;;  %10865 = vrcp.f32 %v3042_v21  ;;  %v3045_v2 = vadd.f32 1.0, %v10848_v28 }
 0x542   :  { %v10850_v38 = vpop.eup %10849 }
 0x543   :  { %v3085_v20 = vmul.f32 %v10850_v38, %v10846_v48  ;;  %v10852_v55 = vpop.eup %10851  ;;  %10867 = vtanh.f32 %v13184_v39 }
 0x544   :  { %v10854_v35 = vpop.eup %10853  ;;  %v3081_v37 = vmul.f32 %v10852_v55, %v13118_v31  ;;  %10869 = vrcp.f32 %v3045_v2 }
 0x545   :  { %v10856_v61 = vpop.eup %10855 }
 0x546   :  { %v10858_v58 = vpop.eup %10857  ;;  %v13189_v41 = vadd.f32 %v3085_v20, %v3081_v37  ;;  %v3048_v11 = vadd.f32 1.0, %v10856_v61 }
 0x547   :  { %v3086_v7 = vmul.f32 %v10858_v58, %v10854_v35 }
 0x548   :  { %v10860_v23 = vpop.eup %10859  ;;  %10871 = vtanh.f32 %v13189_v41 }
 0x549   :  { %v10862_v17 = vpop.eup %10861  ;;  %v3082_v9 = vmul.f32 %v10860_v23, %v13122_v56  ;;  %10873 = vpow2.f32 %v8410_v5 }
 0x54a   :  { %v3049_v28 = vadd.f32 1.0, %v10862_v17  ;;  %v10864_v21 = vpop.eup %10863  ;;  %10875 = vtanh.f32 %v10185_v13 }
 0x54b   :  { %v13194_v31 = vadd.f32 %v3086_v7, %v3082_v9  ;;  %v10866_v48 = vpop.eup %10865  ;;  %v3050_v45 = vadd.f32 1.0, %v10864_v21 }
 0x54c   :  { %10877 = vrcp.f32 %v3049_v28 }
 0x54d   :  { %v10868_v38 = vpop.eup %10867  ;;  %10879 = vrcp.f32 %v3048_v11 }
 0x54e   :  { %10881 = vrcp.f32 %v3050_v45  ;;  %v3096_v16 = vmul.f32 %v10868_v38, %v10866_v48  ;;  %v10870_v20 = vpop.eup %10869 }
 0x54f   :  { %10883 = vtanh.f32 %v13194_v31 }
 0x550   :  { %3184 = vmatmul.mubr.f32.vlgmr.msra.gmra.mrb[32].mxu0 %v3096_v16  ;;  %3273 = vmatmul.mubr.f32.vlgmr.msra.gmra.mrb[38].mxu1 %v3096_v16 }
 0x551   :  { %3189 = vmatprep.mubr.f32.mxu0 %v14408_v60  ;;  %3278 = vmatprep.mubr.f32.mxu1 %v14408_v60 }
 0x552   :  { %v10872_v56 = vpop.eup %10871  ;;  %8997 = vmatpush1.bf16.msra.mxu0 %v12050_v22  ;;  %9029 = vmatpush1.bf16.msra.mxu1 %v12116_v40 }
 0x553   :  { %v3097_v34 = vmul.f32 %v10872_v56, %v10870_v20  ;;  %8999 = vmatprep.subr.bf16.mxu0 %v12089_v32  ;;  %9031 = vmatprep.subr.bf16.mxu1 %v12122_v42  ;;  %v10874_v55 = vpop.eup %10873 }
 0x554   :  { %v10876_v2 = vpop.eup %10875  ;;  %v3051_v5 = vadd.f32 1.0, %v10874_v55 }
 0x555   :  { %3190 = vmatmul.mubr.f32.gmra.mrb[34].mxu0 %v3097_v34  ;;  %3279 = vmatmul.mubr.f32.gmra.mrb[40].mxu1 %v3097_v34 }
 0x556   :  { %v10878_v35 = vpop.eup %10877  ;;  %3195 = vmatprep.mubr.f32.mxu0 %v14408_v60  ;;  %3284 = vmatprep.mubr.f32.mxu1 %v14408_v60  ;;  %10885 = vrcp.f32 %v3051_v5 }
 0x557   :  { %v10880_v37 = vpop.eup %10879  ;;  %v3087_v61 = vmul.f32 %v10878_v35, %v10876_v2  ;;  %9001 = vmatpush1.bf16.msra.mxu0 %v12100_v36  ;;  %9033 = vmatpush1.bf16.msra.mxu1 %v12156_v52 }
 0x558   :  { %v10882_v58 = vpop.eup %10881  ;;  %9003 = vmatprep.subr.bf16.mxu0 %v12133_v46  ;;  %9035 = vmatprep.subr.bf16.mxu1 %v12161_v54 }
 0x559   :  { %v10884_v7 = vpop.eup %10883  ;;  %v3083_v13 = vmul.f32 %v10882_v58, %v13138_v33 }
 0x55a   :  { %v3098_v23 = vmul.f32 %v10884_v7, %v10880_v37 }
 0x55b   :  { %v13210_v17 = vadd.f32 %v3087_v61, %v3083_v13  ;;  %9005 = vmatpush1.bf16.msra.mxu0 %v12158_v53  ;;  %9037 = vmatpush1.bf16.msra.mxu1 %v12195_v0 }
 0x55c   :  { %3196 = vmatmul.mubr.f32.gmra.mrb[36].mxu0 %v3098_v23  ;;  %3285 = vmatmul.mubr.f32.gmra.mrb[42].mxu1 %v3098_v23 }
 0x55d   :  { %3201 = vmatprep.mubr.f32.mxu0 %v14408_v60  ;;  %3290 = vmatprep.mubr.f32.mxu1 %v14408_v60  ;;  %10887 = vtanh.f32 %v13210_v17 }
 0x55e   :  { %9007 = vmatprep.subr.bf16.mxu0 %v12188_v62  ;;  %9039 = vmatprep.subr.bf16.mxu1 %v12204_v3 }
 0x55f   :  { %9009 = vmatpush1.bf16.msra.mxu0 %v12197_v1  ;;  %9041 = vmatpush1.bf16.msra.mxu1 %v12221_v8 }
 0x560   :  { %9011 = vmatprep.subr.bf16.mxu0 %v12252_v14  ;;  %9043 = vmatprep.subr.bf16.mxu1 %v12294_v27  ;;  %v10886_v33 = vpop.eup %10885 }
 0x563   :  { %9013 = vmatpush1.bf16.msra.mxu0 %v12267_v18  ;;  %9045 = vmatpush1.bf16.msra.mxu1 %v12299_v29 }
 0x564   :  { %9015 = vmatprep.subr.bf16.mxu0 %v12358_v43  ;;  %9047 = vmatprep.subr.bf16.mxu1 %v12400_v57 }
 0x567   :  { %v10888_v11 = vpop.eup %10887  ;;  %9017 = vmatpush1.bf16.msra.mxu0 %v12366_v47  ;;  %9049 = vmatpush1.bf16.msra.mxu1 %v12405_v59 }
 0x568   :  { %v3099_v9 = vmul.f32 %v10888_v11, %v10886_v33  ;;  %9019 = vmatprep.subr.bf16.mxu0 %v12467_v12  ;;  %9051 = vmatprep.subr.bf16.mxu1 %v12506_v25 }
 0x56a   :  { %3202 = vmatmul.mubr.f32.gmra.mrb[38].mxu0 %v3099_v9  ;;  %3291 = vmatmul.mubr.f32.gmra.mrb[44].mxu1 %v3099_v9 }
 0x56b   :  { %9021 = vmatpush1.bf16.msra.mxu0 %v12472_v15  ;;  %9053 = vmatpush1.bf16.msra.mxu1 %v12511_v30 }
 0x56c   :  { %9023 = vmatprep.subr.bf16.mxu0 %v12563_v44  ;;  %9055 = vmatprep.subr.bf16.mxu1 %v12613_v63 }
 0x56d   :  { %3492 = vmatprep.mubr.f32.mxu0 %v14408_v60  ;;  %3581 = vmatprep.mubr.f32.mxu1 %v14408_v60 }
 0x56f   :  { %9025 = vmatpush1.bf16.msra.mxu0 %v12578_v50  ;;  %9057 = vmatpush1.bf16.msra.mxu1 %v12618_v4 }
 0x570   :  { %9059 = vmatprep.subr.bf16.mxu0 %v12040_v19  ;;  %9091 = vmatprep.subr.bf16.mxu1 %v12064_v26 }
 0x623   :  { %v3185_v28 = vpop.f32.mrb[32].mxu0  ;;  %v3274_v21 = vpop.f32.mrb[38].mxu1 }
 0x624   :  { %v10020_v48 = vadd.f32 %v3185_v28, %v12949_v49  ;;  %v3187_v45 = vpop.f32.mrb[33].mxu0  ;;  %v3276_v38 = vpop.f32.mrb[39].mxu1  ;;  %v10186_v58 = vadd.f32 %v3274_v21, %v12961_v6 }
 0x625   :  { %v10021_v16 = vadd.f32 %v3187_v45, %v12951_v51  ;;  %v10187_v13 = vadd.f32 %v3276_v38, %v12963_v10 }
 0x626   :  { %v8411_v20 = vmul.f32 -1.442695, %v10020_v48  ;;  %v8413_v23 = vmul.f32 -1.442695, %v10186_v58 }
 0x627   :  { %v8412_v56 = vmul.f32 -1.442695, %v10021_v16 }
 0x628   :  { %10889 = vpow2.f32 %v8411_v20  ;;  %v3191_v34 = vpop.f32.mrb[34].mxu0  ;;  %v3280_v55 = vpop.f32.mrb[40].mxu1 }
 0x629   :  { %v10022_v2 = vadd.f32 %v3191_v34, %v12949_v49  ;;  %v3193_v35 = vpop.f32.mrb[35].mxu0  ;;  %v3282_v37 = vpop.f32.mrb[41].mxu1  ;;  %10891 = vpow2.f32 %v8412_v56  ;;  %v10188_v9 = vadd.f32 %v3280_v55, %v12961_v6 }
 0x62a   :  { %v10023_v61 = vadd.f32 %v3193_v35, %v12951_v51  ;;  %v10189_v21 = vadd.f32 %v3282_v37, %v12963_v10 }
 0x62b   :  { %v8414_v5 = vmul.f32 -1.442695, %v10022_v2  ;;  %v8416_v2 = vmul.f32 -1.442695, %v10188_v9 }
 0x62c   :  { %v8415_v7 = vmul.f32 -1.442695, %v10023_v61 }
 0x62d   :  { %10893 = vpow2.f32 %v8414_v5 }
 0x62e   :  { %10895 = vpow2.f32 %v8415_v7 }
 0x62f   :  { %v3197_v33 = vpop.f32.mrb[36].mxu0  ;;  %v3286_v11 = vpop.f32.mrb[42].mxu1  ;;  %10897 = vtanh.f32 %v10187_v13 }
 0x630   :  { %v10024_v28 = vadd.f32 %v3197_v33, %v12949_v49  ;;  %v3199_v48 = vpop.f32.mrb[37].mxu0  ;;  %v3288_v45 = vpop.f32.mrb[43].mxu1  ;;  %10899 = vpow2.f32 %v8413_v23  ;;  %v10190_v37 = vadd.f32 %v3286_v11, %v12961_v6 }
 0x631   :  { %v10025_v16 = vadd.f32 %v3199_v48, %v12951_v51  ;;  %v10191_v23 = vadd.f32 %v3288_v45, %v12963_v10 }
 0x632   :  { %v10890_v20 = vpop.eup %10889  ;;  %v8417_v56 = vmul.f32 -1.442695, %v10024_v28 }
 0x633   :  { %v3349_v34 = vadd.f32 1.0, %v10890_v20  ;;  %v10892_v38 = vpop.eup %10891  ;;  %v8418_v61 = vmul.f32 -1.442695, %v10025_v16 }
 0x634   :  { %10901 = vpow2.f32 %v8417_v56  ;;  %v3350_v35 = vadd.f32 1.0, %v10892_v38  ;;  %v8419_v38 = vmul.f32 -1.442695, %v10190_v37 }
 0x635   :  { %10903 = vrcp.f32 %v3349_v34 }
 0x636   :  { %10905 = vtanh.f32 %v10189_v21 }
 0x637   :  { %v10894_v55 = vpop.eup %10893  ;;  %10907 = vrcp.f32 %v3350_v35 }
 0x638   :  { %v3352_v58 = vadd.f32 1.0, %v10894_v55  ;;  %10909 = vpow2.f32 %v8416_v2  ;;  %v10896_v5 = vpop.eup %10895 }
 0x639   :  { %10911 = vpow2.f32 %v8418_v61  ;;  %v3353_v7 = vadd.f32 1.0, %v10896_v5  ;;  %v10898_v13 = vpop.eup %10897 }
 0x63a   :  { %10913 = vrcp.f32 %v3352_v58  ;;  %v10900_v33 = vpop.eup %10899 }
 0x63b   :  { %10915 = vrcp.f32 %v3353_v7  ;;  %v3351_v58 = vadd.f32 1.0, %v10900_v33 }
 0x63c   :  { %10917 = vtanh.f32 %v10191_v23 }
 0x63d   :  { %v3203_v9 = vpop.f32.mrb[38].mxu0  ;;  %v3292_v28 = vpop.f32.mrb[44].mxu1 }
 0x63e   :  { %v10902_v48 = vpop.eup %10901  ;;  %v10026_v16 = vadd.f32 %v3203_v9, %v12949_v49  ;;  %v3205_v20 = vpop.f32.mrb[39].mxu0 }
 0x63f   :  { %v3294_v21 = vpop.f32.mrb[45].mxu1  ;;  %v10904_v56 = vpop.eup %10903  ;;  %v3355_v34 = vadd.f32 1.0, %v10902_v48  ;;  %v10027_v2 = vadd.f32 %v3205_v20, %v12951_v51 }
 0x640   :  { %v10906_v35 = vpop.eup %10905  ;;  %v3393_v61 = vmul.f32 %v10904_v56, %v10898_v13  ;;  %v8420_v11 = vmul.f32 -1.442695, %v10026_v16  ;;  %v10192_v13 = vadd.f32 %v3292_v28, %v12961_v6 }
 0x641   :  { %v10908_v55 = vpop.eup %10907  ;;  %10919 = vrcp.f32 %v3355_v34  ;;  %v8421_v45 = vmul.f32 -1.442695, %v10027_v2  ;;  %v10193_v34 = vadd.f32 %v3294_v21, %v12963_v10 }
 0x642   :  { %v10910_v5 = vpop.eup %10909  ;;  %v3389_v7 = vmul.f32 %v10908_v55, %v13184_v39  ;;  %10921 = vpow2.f32 %v8420_v11  ;;  %v8422_v20 = vmul.f32 -1.442695, %v10192_v13 }
 0x643   :  { %v10912_v9 = vpop.eup %10911  ;;  %10923 = vpow2.f32 %v8419_v38  ;;  %v3354_v33 = vadd.f32 1.0, %v10910_v5 }
 0x644   :  { %v10914_v24 = vpop.eup %10913  ;;  %v13256_v49 = vadd.f32 %v3393_v61, %v3389_v7  ;;  %v3356_v37 = vadd.f32 1.0, %v10912_v9  ;;  %10925 = vpow2.f32 %v8421_v45 }
 0x645   :  { %10927 = vrcp.f32 %v3351_v58  ;;  %v3394_v48 = vmul.f32 %v10914_v24, %v10906_v35  ;;  %v10916_v23 = vpop.eup %10915 }
 0x646   :  { %10929 = vtanh.f32 %v13256_v49  ;;  %v3390_v16 = vmul.f32 %v10916_v23, %v13189_v41  ;;  %v10918_v56 = vpop.eup %10917 }
 0x647   :  { %10931 = vrcp.f32 %v3356_v37 }
 0x648   :  { %v13261_v39 = vadd.f32 %v3394_v48, %v3390_v16  ;;  %10933 = vrcp.f32 %v3354_v33 }
 0x64a   :  { %10935 = vtanh.f32 %v13261_v39 }
 0x64b   :  { %v10920_v38 = vpop.eup %10919  ;;  %10937 = vpow2.f32 %v8422_v20 }
 0x64c   :  { %v10922_v24 = vpop.eup %10921  ;;  %v3395_v2 = vmul.f32 %v10920_v38, %v10918_v56  ;;  %10939 = vtanh.f32 %v10193_v34 }
 0x64d   :  { %v10924_v28 = vpop.eup %10923  ;;  %v3358_v35 = vadd.f32 1.0, %v10922_v24 }
 0x64e   :  { %v10926_v61 = vpop.eup %10925  ;;  %v3357_v45 = vadd.f32 1.0, %v10924_v28 }
 0x64f   :  { %v10928_v11 = vpop.eup %10927  ;;  %10941 = vrcp.f32 %v3358_v35  ;;  %v3359_v41 = vadd.f32 1.0, %v10926_v61 }
 0x650   :  { %v10930_v55 = vpop.eup %10929 }
 0x651   :  { %v10932_v58 = vpop.eup %10931  ;;  %10943 = vrcp.f32 %v3359_v41  ;;  %v3405_v5 = vmul.f32 %v10930_v55, %v10928_v11  ;;  %v14409_v41 = vld [vmem:[#allocation12_spill] sm:$0xff] }
 0x652   :  { %v3391_v21 = vmul.f32 %v10932_v58, %v13194_v31  ;;  %v10934_v7 = vpop.eup %10933  ;;  %10945 = vrcp.f32 %v3357_v45 }
 0x653   :  { %3493 = vmatmul.mubr.f32.vlgmr.msra.gmra.mrb[40].mxu0 %v3405_v5  ;;  %3582 = vmatmul.mubr.f32.vlgmr.msra.gmra.mrb[46].mxu1 %v3405_v5 }
 0x654   :  { %v13266_v9 = vadd.f32 %v3395_v2, %v3391_v21  ;;  %3498 = vmatprep.mubr.f32.mxu0 %v14408_v60  ;;  %3587 = vmatprep.mubr.f32.mxu1 %v14408_v60  ;;  %v10936_v37 = vpop.eup %10935 }
 0x655   :  { %9061 = vmatpush1.bf16.msra.mxu0 %v12050_v22  ;;  %9093 = vmatpush1.bf16.msra.mxu1 %v12116_v40  ;;  %v3406_v48 = vmul.f32 %v10936_v37, %v10934_v7  ;;  %v10938_v31 = vpop.eup %10937 }
 0x656   :  { %10947 = vtanh.f32 %v13266_v9  ;;  %9063 = vmatprep.subr.bf16.mxu0 %v12089_v32  ;;  %9095 = vmatprep.subr.bf16.mxu1 %v12122_v42  ;;  %v10940_v13 = vpop.eup %10939  ;;  %v3360_v20 = vadd.f32 1.0, %v10938_v31 }
 0x657   :  { %3499 = vmatmul.mubr.f32.gmra.mrb[42].mxu0 %v3406_v48  ;;  %3588 = vmatmul.mubr.f32.gmra.mrb[48].mxu1 %v3406_v48 }
 0x658   :  { %3504 = vmatprep.mubr.f32.mxu0 %v14408_v60  ;;  %3593 = vmatprep.mubr.f32.mxu1 %v14408_v60  ;;  %10949 = vrcp.f32 %v3360_v20 }
 0x659   :  { %v10942_v23 = vpop.eup %10941  ;;  %9065 = vmatpush1.bf16.msra.mxu0 %v12100_v36  ;;  %9097 = vmatpush1.bf16.msra.mxu1 %v12156_v52 }
 0x65a   :  { %v3396_v33 = vmul.f32 %v10942_v23, %v10940_v13  ;;  %9067 = vmatprep.subr.bf16.mxu0 %v12133_v46  ;;  %9099 = vmatprep.subr.bf16.mxu1 %v12161_v54 }
 0x65b   :  { %v10944_v16 = vpop.eup %10943 }
 0x65c   :  { %v3392_v56 = vmul.f32 %v10944_v16, %v13210_v17  ;;  %v10946_v38 = vpop.eup %10945 }
 0x65d   :  { %9069 = vmatpush1.bf16.msra.mxu0 %v12158_v53  ;;  %9101 = vmatpush1.bf16.msra.mxu1 %v12195_v0 }
 0x65e   :  { %v13282_v34 = vadd.f32 %v3396_v33, %v3392_v56  ;;  %9071 = vmatprep.subr.bf16.mxu0 %v12188_v62  ;;  %9103 = vmatprep.subr.bf16.mxu1 %v12204_v3 }
 0x660   :  { %v10948_v24 = vpop.eup %10947  ;;  %10951 = vtanh.f32 %v13282_v34 }
 0x661   :  { %v3407_v2 = vmul.f32 %v10948_v24, %v10946_v38  ;;  %9073 = vmatpush1.bf16.msra.mxu0 %v12197_v1  ;;  %9105 = vmatpush1.bf16.msra.mxu1 %v12221_v8 }
 0x662   :  { %9075 = vmatprep.subr.bf16.mxu0 %v12252_v14  ;;  %9107 = vmatprep.subr.bf16.mxu1 %v12294_v27  ;;  %v10950_v17 = vpop.eup %10949 }
 0x663   :  { %3505 = vmatmul.mubr.f32.gmra.mrb[44].mxu0 %v3407_v2  ;;  %3594 = vmatmul.mubr.f32.gmra.mrb[50].mxu1 %v3407_v2 }
 0x664   :  { %3510 = vmatprep.mubr.f32.mxu0 %v14408_v60  ;;  %3599 = vmatprep.mubr.f32.mxu1 %v14408_v60 }
 0x665   :  { %9077 = vmatpush1.bf16.msra.mxu0 %v12267_v18  ;;  %9109 = vmatpush1.bf16.msra.mxu1 %v12299_v29 }
 0x666   :  { %9079 = vmatprep.subr.bf16.mxu0 %v12358_v43  ;;  %9111 = vmatprep.subr.bf16.mxu1 %v12400_v57 }
 0x669   :  { %9081 = vmatpush1.bf16.msra.mxu0 %v12366_v47  ;;  %9113 = vmatpush1.bf16.msra.mxu1 %v12405_v59 }
 0x66a   :  { %v10952_v28 = vpop.eup %10951  ;;  %9083 = vmatprep.subr.bf16.mxu0 %v12467_v12  ;;  %9115 = vmatprep.subr.bf16.mxu1 %v12506_v25 }
 0x66b   :  { %v3408_v35 = vmul.f32 %v10952_v28, %v10950_v17 }
 0x66d   :  { %3511 = vmatmul.mubr.f32.gmra.mrb[46].mxu0 %v3408_v35  ;;  %3600 = vmatmul.mubr.f32.gmra.mrb[52].mxu1 %v3408_v35 }
 0x66e   :  { %9085 = vmatpush1.bf16.msra.mxu0 %v12472_v15  ;;  %9117 = vmatpush1.bf16.msra.mxu1 %v12511_v30 }
 0x66f   :  { %9087 = vmatprep.subr.bf16.mxu0 %v12563_v44  ;;  %9119 = vmatprep.subr.bf16.mxu1 %v12613_v63 }
 0x670   :  { %3801 = vmatprep.mubr.f32.mxu0 %v14408_v60  ;;  %3890 = vmatprep.mubr.f32.mxu1 %v14408_v60 }
 0x672   :  { %9089 = vmatpush1.bf16.msra.mxu0 %v12578_v50  ;;  %9121 = vmatpush1.bf16.msra.mxu1 %v12618_v4 }
 0x673   :  { %9123 = vmatprep.subr.bf16.mxu0 %v12040_v19  ;;  %9155 = vmatprep.subr.bf16.mxu1 %v12064_v26 }
 0x726   :  { %v3494_v61 = vpop.f32.mrb[40].mxu0  ;;  %v3583_v11 = vpop.f32.mrb[46].mxu1 }
 0x727   :  { %v10028_v55 = vadd.f32 %v3494_v61, %v14409_v41  ;;  %v3496_v58 = vpop.f32.mrb[41].mxu0  ;;  %v3585_v45 = vpop.f32.mrb[47].mxu1  ;;  %v10194_v37 = vadd.f32 %v3583_v11, %v12961_v6 }
 0x728   :  { %v10029_v5 = vadd.f32 %v3496_v58, %v12951_v51  ;;  %v10195_v2 = vadd.f32 %v3585_v45, %v12963_v10 }
 0x729   :  { %v8423_v21 = vmul.f32 -1.442695, %v10028_v55  ;;  %v8425_v56 = vmul.f32 -1.442695, %v10194_v37 }
 0x72a   :  { %v8424_v7 = vmul.f32 -1.442695, %v10029_v5  ;;  %v3500_v48 = vpop.f32.mrb[42].mxu0  ;;  %v3589_v31 = vpop.f32.mrb[48].mxu1 }
 0x72b   :  { %10953 = vpow2.f32 %v8423_v21  ;;  %v10030_v13 = vadd.f32 %v3500_v48, %v14409_v41  ;;  %v3502_v23 = vpop.f32.mrb[43].mxu0  ;;  %v3591_v33 = vpop.f32.mrb[49].mxu1  ;;  %v10196_v24 = vadd.f32 %v3589_v31, %v12961_v6 }
 0x72c   :  { %10955 = vpow2.f32 %v8424_v7  ;;  %v10031_v16 = vadd.f32 %v3502_v23, %v12951_v51  ;;  %v10197_v37 = vadd.f32 %v3591_v33, %v12963_v10 }
 0x72d   :  { %v8426_v20 = vmul.f32 -1.442695, %v10030_v13  ;;  %v8428_v28 = vmul.f32 -1.442695, %v10196_v24 }
 0x72e   :  { %v8427_v38 = vmul.f32 -1.442695, %v10031_v16 }
 0x72f   :  { %10957 = vpow2.f32 %v8426_v20 }
 0x730   :  { %10959 = vpow2.f32 %v8427_v38 }
 0x731   :  { %10961 = vpow2.f32 %v8425_v56 }
 0x732   :  { %10963 = vtanh.f32 %v10195_v2 }
 0x735   :  { %v10954_v17 = vpop.eup %10953 }
 0x736   :  { %v3658_v35 = vadd.f32 1.0, %v10954_v17  ;;  %v3506_v61 = vpop.f32.mrb[44].mxu0  ;;  %v3595_v11 = vpop.f32.mrb[50].mxu1 }
 0x737   :  { %v10956_v55 = vpop.eup %10955  ;;  %v10032_v58 = vadd.f32 %v3506_v61, %v14409_v41  ;;  %v3508_v5 = vpop.f32.mrb[45].mxu0 }
 0x738   :  { %v3597_v21 = vpop.f32.mrb[51].mxu1  ;;  %10965 = vrcp.f32 %v3658_v35  ;;  %v3659_v7 = vadd.f32 1.0, %v10956_v55  ;;  %v10033_v48 = vadd.f32 %v3508_v5, %v12951_v51  ;;  %v10198_v55 = vadd.f32 %v3595_v11, %v12961_v6 }
 0x739   :  { %10967 = vpow2.f32 %v8428_v28  ;;  %v8429_v31 = vmul.f32 -1.442695, %v10032_v58  ;;  %v10958_v45 = vpop.eup %10957  ;;  %v10199_v58 = vadd.f32 %v3597_v21, %v12963_v10 }
 0x73a   :  { %10969 = vrcp.f32 %v3659_v7  ;;  %v3661_v13 = vadd.f32 1.0, %v10958_v45  ;;  %v10960_v23 = vpop.eup %10959  ;;  %v8430_v16 = vmul.f32 -1.442695, %v10033_v48 }
 0x73b   :  { %10971 = vpow2.f32 %v8429_v31  ;;  %v10962_v20 = vpop.eup %10961  ;;  %v3662_v56 = vadd.f32 1.0, %v10960_v23 }
 0x73c   :  { %10973 = vtanh.f32 %v10197_v37  ;;  %v3660_v38 = vadd.f32 1.0, %v10962_v20  ;;  %v10964_v33 = vpop.eup %10963 }
 0x73d   :  { %10975 = vrcp.f32 %v3661_v13 }
 0x73e   :  { %10977 = vrcp.f32 %v3662_v56  ;;  %v8431_v56 = vmul.f32 -1.442695, %v10198_v55 }
 0x73f   :  { %10979 = vpow2.f32 %v8430_v16 }
 0x740   :  { %v3512_v24 = vpop.f32.mrb[46].mxu0  ;;  %v3601_v2 = vpop.f32.mrb[52].mxu1  ;;  %10981 = vrcp.f32 %v3660_v38 }
 0x741   :  { %v10034_v17 = vadd.f32 %v3512_v24, %v14409_v41  ;;  %v3514_v28 = vpop.f32.mrb[47].mxu0  ;;  %v3603_v35 = vpop.f32.mrb[53].mxu1  ;;  %v10200_v38 = vadd.f32 %v3601_v2, %v12961_v6 }
 0x742   :  { %v10966_v61 = vpop.eup %10965  ;;  %v10035_v5 = vadd.f32 %v3514_v28, %v12951_v51 }
 0x743   :  { %v10968_v7 = vpop.eup %10967  ;;  %v3702_v37 = vmul.f32 %v10966_v61, %v10964_v33  ;;  %v8432_v48 = vmul.f32 -1.442695, %v10034_v17 }
 0x744   :  { %v10970_v31 = vpop.eup %10969  ;;  %v8433_v45 = vmul.f32 -1.442695, %v10035_v5  ;;  %v3663_v21 = vadd.f32 1.0, %v10968_v7  ;;  %v8434_v5 = vmul.f32 -1.442695, %v10200_v38 }
 0x745   :  { %v10972_v13 = vpop.eup %10971  ;;  %v3698_v23 = vmul.f32 %v10970_v31, %v13256_v49  ;;  %10983 = vpow2.f32 %v8432_v48 }
 0x746   :  { %v10974_v16 = vpop.eup %10973  ;;  %v3664_v20 = vadd.f32 1.0, %v10972_v13  ;;  %10985 = vtanh.f32 %v10199_v58  ;;  %v10201_v58 = vadd.f32 %v3603_v35, %v12963_v10 }
 0x747   :  { %v10976_v24 = vpop.eup %10975  ;;  %v13328_v11 = vadd.f32 %v3702_v37, %v3698_v23  ;;  %10987 = vpow2.f32 %v8433_v45 }
 0x748   :  { %v3703_v28 = vmul.f32 %v10976_v24, %v10974_v16  ;;  %10989 = vrcp.f32 %v3664_v20  ;;  %v10978_v33 = vpop.eup %10977 }
 0x749   :  { %10991 = vtanh.f32 %v13328_v11  ;;  %v10980_v17 = vpop.eup %10979  ;;  %v3699_v49 = vmul.f32 %v10978_v33, %v13261_v39 }
 0x74a   :  { %10993 = vpow2.f32 %v8431_v56  ;;  %v3665_v61 = vadd.f32 1.0, %v10980_v17  ;;  %v10982_v7 = vpop.eup %10981 }
 0x74b   :  { %10995 = vrcp.f32 %v3663_v21  ;;  %v13333_v55 = vadd.f32 %v3703_v28, %v3699_v49 }
 0x74c   :  { %10997 = vrcp.f32 %v3665_v61 }
 0x74d   :  { %10999 = vtanh.f32 %v13333_v55 }
 0x74e   :  { %11001 = vtanh.f32 %v10201_v58 }
 0x74f   :  { %v10984_v37 = vpop.eup %10983  ;;  %11003 = vpow2.f32 %v8434_v5 }
 0x750   :  { %v10986_v48 = vpop.eup %10985  ;;  %v3667_v31 = vadd.f32 1.0, %v10984_v37 }
 0x751   :  { %v10988_v2 = vpop.eup %10987 }
 0x752   :  { %v10990_v45 = vpop.eup %10989  ;;  %11005 = vrcp.f32 %v3667_v31  ;;  %v3668_v39 = vadd.f32 1.0, %v10988_v2 }
 0x753   :  { %v10992_v13 = vpop.eup %10991  ;;  %v3704_v23 = vmul.f32 %v10990_v45, %v10986_v48 }
 0x754   :  { %v10994_v16 = vpop.eup %10993  ;;  %11007 = vrcp.f32 %v3668_v39  ;;  %v3714_v20 = vmul.f32 %v10992_v13, %v10982_v7 }
 0x755   :  { %v10996_v35 = vpop.eup %10995  ;;  %v3666_v24 = vadd.f32 1.0, %v10994_v16 }
 0x756   :  { %3802 = vmatmul.mubr.f32.vlgmr.msra.gmra.mrb[48].mxu0 %v3714_v20  ;;  %3891 = vmatmul.mubr.f32.vlgmr.msra.gmra.mrb[54].mxu1 %v3714_v20  ;;  %v10998_v56 = vpop.eup %10997 }
 0x757   :  { %3807 = vmatprep.mubr.f32.mxu0 %v14408_v60  ;;  %3896 = vmatprep.mubr.f32.mxu1 %v14408_v60  ;;  %v11000_v21 = vpop.eup %10999  ;;  %v3700_v28 = vmul.f32 %v10998_v56, %v13266_v9  ;;  %11009 = vrcp.f32 %v3666_v24 }
 0x758   :  { %9125 = vmatpush1.bf16.msra.mxu0 %v12050_v22  ;;  %9157 = vmatpush1.bf16.msra.mxu1 %v12116_v40  ;;  %v3715_v33 = vmul.f32 %v11000_v21, %v10996_v35  ;;  %v11002_v38 = vpop.eup %11001 }
 0x759   :  { %9127 = vmatprep.subr.bf16.mxu0 %v12089_v32  ;;  %9159 = vmatprep.subr.bf16.mxu1 %v12122_v42  ;;  %v13344_v17 = vadd.f32 %v3704_v23, %v3700_v28  ;;  %v11004_v49 = vpop.eup %11003 }
 0x75a   :  { %3808 = vmatmul.mubr.f32.gmra.mrb[50].mxu0 %v3715_v33  ;;  %3897 = vmatmul.mubr.f32.gmra.mrb[56].mxu1 %v3715_v33  ;;  %v3669_v5 = vadd.f32 1.0, %v11004_v49 }
 0x75b   :  { %3813 = vmatprep.mubr.f32.mxu0 %v14408_v60  ;;  %3902 = vmatprep.mubr.f32.mxu1 %v14408_v60  ;;  %11011 = vtanh.f32 %v13344_v17 }
 0x75c   :  { %v11006_v61 = vpop.eup %11005  ;;  %9129 = vmatpush1.bf16.msra.mxu0 %v12100_v36  ;;  %9161 = vmatpush1.bf16.msra.mxu1 %v12156_v52  ;;  %11013 = vrcp.f32 %v3669_v5 }
 0x75d   :  { %v3705_v9 = vmul.f32 %v11006_v61, %v11002_v38  ;;  %9131 = vmatprep.subr.bf16.mxu0 %v12133_v46  ;;  %9163 = vmatprep.subr.bf16.mxu1 %v12161_v54 }
 0x75e   :  { %v11008_v58 = vpop.eup %11007 }
 0x75f   :  { %v3701_v7 = vmul.f32 %v11008_v58, %v13282_v34 }
 0x760   :  { %9133 = vmatpush1.bf16.msra.mxu0 %v12158_v53  ;;  %9165 = vmatpush1.bf16.msra.mxu1 %v12195_v0 }
 0x761   :  { %v13354_v37 = vadd.f32 %v3705_v9, %v3701_v7  ;;  %9135 = vmatprep.subr.bf16.mxu0 %v12188_v62  ;;  %9167 = vmatprep.subr.bf16.mxu1 %v12204_v3  ;;  %v11010_v48 = vpop.eup %11009 }
 0x763   :  { %11015 = vtanh.f32 %v13354_v37 }
 0x764   :  { %9137 = vmatpush1.bf16.msra.mxu0 %v12197_v1  ;;  %9169 = vmatpush1.bf16.msra.mxu1 %v12221_v8 }
 0x765   :  { %v11012_v31 = vpop.eup %11011  ;;  %9139 = vmatprep.subr.bf16.mxu0 %v12252_v14  ;;  %9171 = vmatprep.subr.bf16.mxu1 %v12294_v27 }
 0x766   :  { %v3716_v34 = vmul.f32 %v11012_v31, %v11010_v48  ;;  %v11014_v2 = vpop.eup %11013 }
 0x768   :  { %3814 = vmatmul.mubr.f32.gmra.mrb[52].mxu0 %v3716_v34  ;;  %3903 = vmatmul.mubr.f32.gmra.mrb[58].mxu1 %v3716_v34 }
 0x769   :  { %3819 = vmatprep.mubr.f32.mxu0 %v14408_v60  ;;  %3908 = vmatprep.mubr.f32.mxu1 %v14408_v60 }
 0x76a   :  { %9141 = vmatpush1.bf16.msra.mxu0 %v12267_v18  ;;  %9173 = vmatpush1.bf16.msra.mxu1 %v12299_v29 }
 0x76b   :  { %9143 = vmatprep.subr.bf16.mxu0 %v12358_v43  ;;  %9175 = vmatprep.subr.bf16.mxu1 %v12400_v57 }
 0x76d   :  { %v11016_v45 = vpop.eup %11015 }
 0x76e   :  { %v3717_v39 = vmul.f32 %v11016_v45, %v11014_v2  ;;  %9145 = vmatpush1.bf16.msra.mxu0 %v12366_v47  ;;  %9177 = vmatpush1.bf16.msra.mxu1 %v12405_v59 }
 0x76f   :  { %9147 = vmatprep.subr.bf16.mxu0 %v12467_v12  ;;  %9179 = vmatprep.subr.bf16.mxu1 %v12506_v25 }
 0x770   :  { %3820 = vmatmul.mubr.f32.gmra.mrb[54].mxu0 %v3717_v39  ;;  %3909 = vmatmul.mubr.f32.gmra.mrb[60].mxu1 %v3717_v39 }
 0x771   :  { %4110 = vmatprep.mubr.f32.mxu0 %v14408_v60  ;;  %4199 = vmatprep.mubr.f32.mxu1 %v14408_v60 }
 0x772   :  { %9149 = vmatpush1.bf16.msra.mxu0 %v12472_v15  ;;  %9181 = vmatpush1.bf16.msra.mxu1 %v12511_v30 }
 0x773   :  { %9151 = vmatprep.subr.bf16.mxu0 %v12563_v44  ;;  %9183 = vmatprep.subr.bf16.mxu1 %v12613_v63 }
 0x776   :  { %9153 = vmatpush1.bf16.msra.mxu0 %v12578_v50  ;;  %9185 = vmatpush1.bf16.msra.mxu1 %v12618_v4 }
 0x777   :  { %9187 = vmatprep.subr.bf16.mxu0 %v12040_v19  ;;  %9219 = vmatprep.subr.bf16.mxu1 %v12064_v26 }
 0x829   :  { %v3803_v13 = vpop.f32.mrb[48].mxu0  ;;  %v3892_v23 = vpop.f32.mrb[54].mxu1 }
 0x82a   :  { %v10036_v16 = vadd.f32 %v3803_v13, %v14409_v41  ;;  %v3805_v20 = vpop.f32.mrb[49].mxu0  ;;  %v3894_v35 = vpop.f32.mrb[55].mxu1  ;;  %v10202_v5 = vadd.f32 %v3892_v23, %v12961_v6 }
 0x82b   :  { %v10037_v56 = vadd.f32 %v3805_v20, %v12951_v51  ;;  %v10203_v31 = vadd.f32 %v3894_v35, %v12963_v10 }
 0x82c   :  { %v8435_v24 = vmul.f32 -1.442695, %v10036_v16  ;;  %v8437_v34 = vmul.f32 -1.442695, %v10202_v5 }
 0x82d   :  { %v8436_v21 = vmul.f32 -1.442695, %v10037_v56  ;;  %v3809_v28 = vpop.f32.mrb[50].mxu0  ;;  %v3898_v33 = vpop.f32.mrb[56].mxu1 }
 0x82e   :  { %11017 = vpow2.f32 %v8435_v24  ;;  %v10038_v38 = vadd.f32 %v3809_v28, %v14409_v41  ;;  %v3811_v49 = vpop.f32.mrb[51].mxu0  ;;  %v3900_v61 = vpop.f32.mrb[57].mxu1  ;;  %v10204_v48 = vadd.f32 %v3898_v33, %v12961_v6 }
 0x82f   :  { %11019 = vpow2.f32 %v8436_v21  ;;  %v10039_v9 = vadd.f32 %v3811_v49, %v12951_v51  ;;  %v10205_v20 = vadd.f32 %v3900_v61, %v12963_v10 }
 0x830   :  { %v8438_v58 = vmul.f32 -1.442695, %v10038_v38  ;;  %v8440_v45 = vmul.f32 -1.442695, %v10204_v48 }
 0x831   :  { %v8439_v7 = vmul.f32 -1.442695, %v10039_v9 }
 0x832   :  { %11021 = vpow2.f32 %v8438_v58 }
 0x833   :  { %11023 = vpow2.f32 %v8439_v7 }
 0x834   :  { %11025 = vtanh.f32 %v10203_v31 }
 0x835   :  { %11027 = vpow2.f32 %v8437_v34 }
 0x838   :  { %v11018_v2 = vpop.eup %11017 }
 0x839   :  { %v3967_v39 = vadd.f32 1.0, %v11018_v2  ;;  %v11020_v13 = vpop.eup %11019 }
 0x83a   :  { %v3968_v16 = vadd.f32 1.0, %v11020_v13 }
 0x83b   :  { %11029 = vrcp.f32 %v3967_v39  ;;  %v3815_v23 = vpop.f32.mrb[52].mxu0  ;;  %v3904_v56 = vpop.f32.mrb[58].mxu1 }
 0x83c   :  { %11031 = vpow2.f32 %v8440_v45  ;;  %v11022_v24 = vpop.eup %11021  ;;  %v10040_v21 = vadd.f32 %v3815_v23, %v14409_v41  ;;  %v3817_v35 = vpop.f32.mrb[53].mxu0  ;;  %v10206_v23 = vadd.f32 %v3904_v56, %v12961_v6 }
 0x83d   :  { %11033 = vrcp.f32 %v3968_v16  ;;  %v3906_v28 = vpop.f32.mrb[59].mxu1  ;;  %v3970_v33 = vadd.f32 1.0, %v11022_v24  ;;  %v10041_v38 = vadd.f32 %v3817_v35, %v12951_v51  ;;  %v11024_v49 = vpop.eup %11023 }
 0x83e   :  { %11035 = vtanh.f32 %v10205_v20  ;;  %v8441_v9 = vmul.f32 -1.442695, %v10040_v21  ;;  %v3971_v58 = vadd.f32 1.0, %v11024_v49  ;;  %v11026_v61 = vpop.eup %11025 }
 0x83f   :  { %11037 = vrcp.f32 %v3970_v33  ;;  %v8442_v5 = vmul.f32 -1.442695, %v10041_v38  ;;  %v11028_v31 = vpop.eup %11027 }
 0x840   :  { %11039 = vrcp.f32 %v3971_v58  ;;  %v3969_v35 = vadd.f32 1.0, %v11028_v31 }
 0x841   :  { %11041 = vpow2.f32 %v8441_v9 }
 0x842   :  { %11043 = vpow2.f32 %v8442_v5 }
 0x843   :  { %v3821_v7 = vpop.f32.mrb[54].mxu0  ;;  %v3910_v48 = vpop.f32.mrb[60].mxu1 }
 0x844   :  { %v10042_v34 = vadd.f32 %v3821_v7, %v14409_v41  ;;  %v3823_v2 = vpop.f32.mrb[55].mxu0  ;;  %v3912_v45 = vpop.f32.mrb[61].mxu1  ;;  %v8443_v41 = vmul.f32 -1.442695, %v10206_v23  ;;  %v10208_v56 = vadd.f32 %v3910_v48, %v12961_v6 }
 0x845   :  { %v11030_v39 = vpop.eup %11029  ;;  %v10043_v13 = vadd.f32 %v3823_v2, %v12951_v51 }
 0x846   :  { %v11032_v16 = vpop.eup %11031  ;;  %v4011_v20 = vmul.f32 %v11030_v39, %v11026_v61  ;;  %v8444_v24 = vmul.f32 -1.442695, %v10042_v34  ;;  %v10207_v61 = vadd.f32 %v3906_v28, %v12963_v10  ;;  %v10209_v34 = vadd.f32 %v3912_v45, %v12963_v10 }
 0x847   :  { %v11034_v21 = vpop.eup %11033  ;;  %v8445_v33 = vmul.f32 -1.442695, %v10043_v13  ;;  %v3972_v9 = vadd.f32 1.0, %v11032_v16  ;;  %v8446_v28 = vmul.f32 -1.442695, %v10208_v56 }
 0x848   :  { %v4007_v38 = vmul.f32 %v11034_v21, %v13328_v11  ;;  %11045 = vpow2.f32 %v8444_v24  ;;  %v11036_v49 = vpop.eup %11035 }
 0x849   :  { %v11038_v58 = vpop.eup %11037  ;;  %11047 = vpow2.f32 %v8445_v33 }
 0x84a   :  { %v13399_v7 = vadd.f32 %v4011_v20, %v4007_v38  ;;  %11049 = vrcp.f32 %v3969_v35  ;;  %v4012_v5 = vmul.f32 %v11038_v58, %v11036_v49  ;;  %v11040_v2 = vpop.eup %11039 }
 0x84b   :  { %v11042_v31 = vpop.eup %11041  ;;  %v4008_v11 = vmul.f32 %v11040_v2, %v13333_v55 }
 0x84c   :  { %11051 = vtanh.f32 %v13399_v7  ;;  %v3973_v39 = vadd.f32 1.0, %v11042_v31  ;;  %v11044_v13 = vpop.eup %11043 }
 0x84d   :  { %11053 = vrcp.f32 %v3972_v9  ;;  %v13406_v16 = vadd.f32 %v4012_v5, %v4008_v11  ;;  %v3974_v20 = vadd.f32 1.0, %v11044_v13 }
 0x84e   :  { %11055 = vpow2.f32 %v8443_v41 }
 0x84f   :  { %11057 = vtanh.f32 %v10207_v61 }
 0x850   :  { %11059 = vrcp.f32 %v3973_v39 }
 0x851   :  { %11061 = vtanh.f32 %v10209_v34 }
 0x852   :  { %v11046_v23 = vpop.eup %11045  ;;  %11063 = vrcp.f32 %v3974_v20 }
 0x853   :  { %v3976_v24 = vadd.f32 1.0, %v11046_v23  ;;  %11065 = vtanh.f32 %v13406_v16  ;;  %v11048_v48 = vpop.eup %11047 }
 0x854   :  { %11067 = vpow2.f32 %v8446_v28  ;;  %v11050_v55 = vpop.eup %11049  ;;  %v3977_v45 = vadd.f32 1.0, %v11048_v48 }
 0x855   :  { %11069 = vrcp.f32 %v3976_v24 }
 0x856   :  { %v11052_v21 = vpop.eup %11051  ;;  %11071 = vrcp.f32 %v3977_v45 }
 0x857   :  { %v11054_v41 = vpop.eup %11053  ;;  %v4023_v35 = vmul.f32 %v11052_v21, %v11050_v55 }
 0x858   :  { %v11056_v33 = vpop.eup %11055 }
 0x859   :  { %v11058_v38 = vpop.eup %11057  ;;  %4111 = vmatmul.mubr.f32.vlgmr.msra.gmra.mrb[56].mxu0 %v4023_v35  ;;  %4200 = vmatmul.mubr.f32.vlgmr.msra.gmra.mrb[62].mxu1 %v4023_v35  ;;  %v3975_v61 = vadd.f32 1.0, %v11056_v33  ;;  %v14410_v33 = vld [vmem:[#allocation12_spill] sm:$0xff] }
 0x85a   :  { %v11060_v49 = vpop.eup %11059  ;;  %4116 = vmatprep.mubr.f32.mxu0 %v14408_v60  ;;  %4205 = vmatprep.mubr.f32.mxu1 %v14408_v60 }
 0x85b   :  { %v11062_v9 = vpop.eup %11061  ;;  %v4013_v58 = vmul.f32 %v11060_v49, %v11058_v38  ;;  %9189 = vmatpush1.bf16.msra.mxu0 %v12050_v22  ;;  %9221 = vmatpush1.bf16.msra.mxu1 %v12116_v40  ;;  %11073 = vrcp.f32 %v3975_v61 }
 0x85c   :  { %v11064_v5 = vpop.eup %11063  ;;  %9191 = vmatprep.subr.bf16.mxu0 %v12089_v32  ;;  %9223 = vmatprep.subr.bf16.mxu1 %v12122_v42 }
 0x85d   :  { %v11066_v2 = vpop.eup %11065  ;;  %v4009_v56 = vmul.f32 %v11064_v5, %v13344_v17 }
 0x85e   :  { %v11068_v31 = vpop.eup %11067  ;;  %v4024_v11 = vmul.f32 %v11066_v2, %v11054_v41 }
 0x85f   :  { %v11070_v34 = vpop.eup %11069  ;;  %v13416_v39 = vadd.f32 %v4013_v58, %v4009_v56  ;;  %9193 = vmatpush1.bf16.msra.mxu0 %v12100_v36  ;;  %9225 = vmatpush1.bf16.msra.mxu1 %v12156_v52  ;;  %v3978_v28 = vadd.f32 1.0, %v11068_v31 }
 0x860   :  { %v4014_v13 = vmul.f32 %v11070_v34, %v11062_v9  ;;  %4117 = vmatmul.mubr.f32.gmra.mrb[58].mxu0 %v4024_v11  ;;  %4206 = vmatmul.mubr.f32.gmra.mrb[64].mxu1 %v4024_v11  ;;  %v11072_v20 = vpop.eup %11071 }
 0x861   :  { %4122 = vmatprep.mubr.f32.mxu0 %v14408_v60  ;;  %4211 = vmatprep.mubr.f32.mxu1 %v14408_v60  ;;  %11075 = vtanh.f32 %v13416_v39  ;;  %v4010_v17 = vmul.f32 %v11072_v20, %v13354_v37 }
 0x862   :  { %9195 = vmatprep.subr.bf16.mxu0 %v12133_v46  ;;  %9227 = vmatprep.subr.bf16.mxu1 %v12161_v54  ;;  %11077 = vrcp.f32 %v3978_v28 }
 0x863   :  { %9197 = vmatpush1.bf16.msra.mxu0 %v12158_v53  ;;  %9229 = vmatpush1.bf16.msra.mxu1 %v12195_v0  ;;  %v13428_v23 = vadd.f32 %v4014_v13, %v4010_v17 }
 0x864   :  { %9199 = vmatprep.subr.bf16.mxu0 %v12188_v62  ;;  %9231 = vmatprep.subr.bf16.mxu1 %v12204_v3 }
 0x865   :  { %11079 = vtanh.f32 %v13428_v23  ;;  %v11074_v37 = vpop.eup %11073 }
 0x867   :  { %9201 = vmatpush1.bf16.msra.mxu0 %v12197_v1  ;;  %9233 = vmatpush1.bf16.msra.mxu1 %v12221_v8 }
 0x868   :  { %9203 = vmatprep.subr.bf16.mxu0 %v12252_v14  ;;  %9235 = vmatprep.subr.bf16.mxu1 %v12294_v27 }
 0x86b   :  { %v11076_v24 = vpop.eup %11075  ;;  %9205 = vmatpush1.bf16.msra.mxu0 %v12267_v18  ;;  %9237 = vmatpush1.bf16.msra.mxu1 %v12299_v29 }
 0x86c   :  { %v4025_v48 = vmul.f32 %v11076_v24, %v11074_v37  ;;  %9207 = vmatprep.subr.bf16.mxu0 %v12358_v43  ;;  %9239 = vmatprep.subr.bf16.mxu1 %v12400_v57  ;;  %v11078_v55 = vpop.eup %11077 }
 0x86e   :  { %4123 = vmatmul.mubr.f32.gmra.mrb[60].mxu0 %v4025_v48  ;;  %4212 = vmatmul.mubr.f32.gmra.mrb[66].mxu1 %v4025_v48 }
 0x86f   :  { %4128 = vmatprep.mubr.f32.mxu0 %v14408_v60  ;;  %4217 = vmatprep.mubr.f32.mxu1 %v14408_v60  ;;  %v11080_v45 = vpop.eup %11079 }
 0x870   :  { %9209 = vmatpush1.bf16.msra.mxu0 %v12366_v47  ;;  %9241 = vmatpush1.bf16.msra.mxu1 %v12405_v59  ;;  %v4026_v21 = vmul.f32 %v11080_v45, %v11078_v55 }
 0x871   :  { %9211 = vmatprep.subr.bf16.mxu0 %v12467_v12  ;;  %9243 = vmatprep.subr.bf16.mxu1 %v12506_v25 }
 0x872   :  { %4129 = vmatmul.mubr.f32.gmra.mrb[62].mxu0 %v4026_v21  ;;  %4218 = vmatmul.mubr.f32.gmra.mrb[68].mxu1 %v4026_v21 }
 0x873   :  { %4419 = vmatprep.mubr.f32.mxu0 %v14408_v60  ;;  %4508 = vmatprep.mubr.f32.mxu1 %v14408_v60 }
 0x874   :  { %9213 = vmatpush1.bf16.msra.mxu0 %v12472_v15  ;;  %9245 = vmatpush1.bf16.msra.mxu1 %v12511_v30 }
 0x875   :  { %9215 = vmatprep.subr.bf16.mxu0 %v12563_v44  ;;  %9247 = vmatprep.subr.bf16.mxu1 %v12613_v63 }
 0x878   :  { %9217 = vmatpush1.bf16.msra.mxu0 %v12578_v50  ;;  %9249 = vmatpush1.bf16.msra.mxu1 %v12618_v4 }
 0x879   :  { %9251 = vmatprep.subr.bf16.mxu0 %v12040_v19  ;;  %9283 = vmatprep.subr.bf16.mxu1 %v12064_v26 }
 0x92c   :  { %v4112_v41 = vpop.f32.mrb[56].mxu0  ;;  %v4201_v35 = vpop.f32.mrb[62].mxu1 }
 0x92d   :  { %v10044_v38 = vadd.f32 %v4112_v41, %v14410_v33  ;;  %v4114_v49 = vpop.f32.mrb[57].mxu0  ;;  %v4203_v9 = vpop.f32.mrb[63].mxu1  ;;  %v10210_v31 = vadd.f32 %v4201_v35, %v12961_v6 }
 0x92e   :  { %v10045_v58 = vadd.f32 %v4114_v49, %v12951_v51  ;;  %v10211_v48 = vadd.f32 %v4203_v9, %v12963_v10 }
 0x92f   :  { %v8447_v5 = vmul.f32 -1.442695, %v10044_v38  ;;  %v8449_v24 = vmul.f32 -1.442695, %v10210_v31 }
 0x930   :  { %v8448_v61 = vmul.f32 -1.442695, %v10045_v58 }
 0x931   :  { %11081 = vpow2.f32 %v8447_v5 }
 0x932   :  { %11083 = vpow2.f32 %v8448_v61 }
 0x933   :  { %v4118_v2 = vpop.f32.mrb[58].mxu0  ;;  %v4207_v56 = vpop.f32.mrb[64].mxu1 }
 0x934   :  { %v10046_v11 = vadd.f32 %v4118_v2, %v14410_v33  ;;  %v4120_v34 = vpop.f32.mrb[59].mxu0  ;;  %v4209_v13 = vpop.f32.mrb[65].mxu1  ;;  %v10212_v17 = vadd.f32 %v4207_v56, %v12961_v6 }
 0x935   :  { %v10047_v20 = vadd.f32 %v4120_v34, %v12951_v51  ;;  %v10213_v38 = vadd.f32 %v4209_v13, %v12963_v10 }
 0x936   :  { %v8450_v28 = vmul.f32 -1.442695, %v10046_v11  ;;  %v8452_v45 = vmul.f32 -1.442695, %v10212_v17 }
 0x937   :  { %v8451_v37 = vmul.f32 -1.442695, %v10047_v20 }
 0x938   :  { %11085 = vpow2.f32 %v8450_v28 }
 0x939   :  { %11087 = vpow2.f32 %v8451_v37 }
 0x93a   :  { %11089 = vpow2.f32 %v8449_v24 }
 0x93b   :  { %v11082_v55 = vpop.eup %11081  ;;  %11091 = vtanh.f32 %v10211_v48 }
 0x93c   :  { %v4276_v21 = vadd.f32 1.0, %v11082_v55  ;;  %v11084_v41 = vpop.eup %11083 }
 0x93d   :  { %v4277_v35 = vadd.f32 1.0, %v11084_v41 }
 0x93e   :  { %11093 = vrcp.f32 %v4276_v21 }
 0x93f   :  { %11095 = vpow2.f32 %v8452_v45 }
 0x940   :  { %11097 = vrcp.f32 %v4277_v35 }
 0x941   :  { %v4124_v49 = vpop.f32.mrb[60].mxu0  ;;  %v4213_v58 = vpop.f32.mrb[66].mxu1  ;;  %11099 = vtanh.f32 %v10213_v38 }
 0x942   :  { %v11086_v5 = vpop.eup %11085  ;;  %v10048_v61 = vadd.f32 %v4124_v49, %v14410_v33  ;;  %v4126_v2 = vpop.f32.mrb[61].mxu0 }
 0x943   :  { %v4215_v9 = vpop.f32.mrb[67].mxu1  ;;  %v4279_v56 = vadd.f32 1.0, %v11086_v5  ;;  %v10049_v31 = vadd.f32 %v4126_v2, %v12951_v51  ;;  %v11088_v11 = vpop.eup %11087  ;;  %v10214_v2 = vadd.f32 %v4213_v58, %v12961_v6 }
 0x944   :  { %v8453_v34 = vmul.f32 -1.442695, %v10048_v61  ;;  %v4280_v20 = vadd.f32 1.0, %v11088_v11  ;;  %v11090_v28 = vpop.eup %11089 }
 0x945   :  { %11101 = vrcp.f32 %v4279_v56  ;;  %v8454_v17 = vmul.f32 -1.442695, %v10049_v31  ;;  %v4130_v37 = vpop.f32.mrb[62].mxu0  ;;  %v4219_v24 = vpop.f32.mrb[68].mxu1  ;;  %v4278_v49 = vadd.f32 1.0, %v11090_v28 }
 0x946   :  { %v11092_v13 = vpop.eup %11091  ;;  %11103 = vrcp.f32 %v4280_v20  ;;  %v10050_v48 = vadd.f32 %v4130_v37, %v14410_v33  ;;  %v4132_v55 = vpop.f32.mrb[63].mxu0  ;;  %v10216_v11 = vadd.f32 %v4219_v24, %v12961_v6 }
 0x947   :  { %v4221_v45 = vpop.f32.mrb[69].mxu1  ;;  %11105 = vpow2.f32 %v8453_v34  ;;  %v10051_v41 = vadd.f32 %v4132_v55, %v12951_v51  ;;  %v8455_v55 = vmul.f32 -1.442695, %v10214_v2 }
 0x948   :  { %v11094_v21 = vpop.eup %11093  ;;  %v8456_v5 = vmul.f32 -1.442695, %v10050_v48  ;;  %11107 = vpow2.f32 %v8454_v17  ;;  %v8458_v17 = vmul.f32 -1.442695, %v10216_v11  ;;  %v10217_v24 = vadd.f32 %v4221_v45, %v12963_v10 }
 0x949   :  { %v11096_v35 = vpop.eup %11095  ;;  %v4320_v38 = vmul.f32 %v11094_v21, %v11092_v13  ;;  %v8457_v56 = vmul.f32 -1.442695, %v10051_v41  ;;  %v10215_v13 = vadd.f32 %v4215_v9, %v12963_v10 }
 0x94a   :  { %v11098_v61 = vpop.eup %11097  ;;  %11109 = vpow2.f32 %v8456_v5  ;;  %v4281_v34 = vadd.f32 1.0, %v11096_v35 }
 0x94b   :  { %v4316_v31 = vmul.f32 %v11098_v61, %v13399_v7  ;;  %11111 = vrcp.f32 %v4278_v49  ;;  %v11100_v37 = vpop.eup %11099 }
 0x94c   :  { %11113 = vpow2.f32 %v8457_v56 }
 0x94d   :  { %v13472_v20 = vadd.f32 %v4320_v38, %v4316_v31 }
 0x94f   :  { %v11102_v28 = vpop.eup %11101  ;;  %11115 = vtanh.f32 %v13472_v20 }
 0x950   :  { %v4321_v58 = vmul.f32 %v11102_v28, %v11100_v37  ;;  %v11104_v48 = vpop.eup %11103  ;;  %11117 = vrcp.f32 %v4281_v34 }
 0x951   :  { %v11106_v7 = vpop.eup %11105  ;;  %v4317_v21 = vmul.f32 %v11104_v48, %v13406_v16  ;;  %11119 = vpow2.f32 %v8455_v55 }
 0x952   :  { %v4282_v41 = vadd.f32 1.0, %v11106_v7  ;;  %11121 = vtanh.f32 %v10215_v13  ;;  %v11108_v35 = vpop.eup %11107 }
 0x953   :  { %v13478_v49 = vadd.f32 %v4321_v58, %v4317_v21  ;;  %11123 = vpow2.f32 %v8458_v17  ;;  %v4283_v38 = vadd.f32 1.0, %v11108_v35 }
 0x954   :  { %11125 = vrcp.f32 %v4282_v41  ;;  %v11110_v5 = vpop.eup %11109 }
 0x955   :  { %11127 = vtanh.f32 %v10217_v24  ;;  %v11112_v9 = vpop.eup %11111  ;;  %v4285_v61 = vadd.f32 1.0, %v11110_v5 }
 0x956   :  { %11129 = vrcp.f32 %v4283_v38  ;;  %v11114_v2 = vpop.eup %11113 }
 0x957   :  { %11131 = vtanh.f32 %v13478_v49  ;;  %v4286_v56 = vadd.f32 1.0, %v11114_v2 }
 0x958   :  { %11133 = vrcp.f32 %v4285_v61 }
 0x959   :  { %v11116_v16 = vpop.eup %11115  ;;  %11135 = vrcp.f32 %v4286_v56 }
 0x95a   :  { %v4332_v45 = vmul.f32 %v11116_v16, %v11112_v9  ;;  %v11118_v31 = vpop.eup %11117 }
 0x95b   :  { %v11120_v11 = vpop.eup %11119 }
 0x95c   :  { %4420 = vmatmul.mubr.f32.vlgmr.msra.gmra.mrb[64].mxu0 %v4332_v45  ;;  %4509 = vmatmul.mubr.f32.vlgmr.msra.gmra.mrb[70].mxu1 %v4332_v45  ;;  %v11122_v34 = vpop.eup %11121  ;;  %v4284_v17 = vadd.f32 1.0, %v11120_v11 }
 0x95d   :  { %4425 = vmatprep.mubr.f32.mxu0 %v14408_v60  ;;  %4514 = vmatprep.mubr.f32.mxu1 %v14408_v60  ;;  %v11124_v37 = vpop.eup %11123 }
 0x95e   :  { %9253 = vmatpush1.bf16.msra.mxu0 %v12050_v22  ;;  %9285 = vmatpush1.bf16.msra.mxu1 %v12116_v40  ;;  %v11126_v55 = vpop.eup %11125  ;;  %11137 = vrcp.f32 %v4284_v17  ;;  %v4287_v5 = vadd.f32 1.0, %v11124_v37 }
 0x95f   :  { %9255 = vmatprep.subr.bf16.mxu0 %v12089_v32  ;;  %9287 = vmatprep.subr.bf16.mxu1 %v12122_v42  ;;  %v11128_v28 = vpop.eup %11127  ;;  %v4322_v13 = vmul.f32 %v11126_v55, %v11122_v34 }
 0x960   :  { %v11130_v58 = vpop.eup %11129 }
 0x961   :  { %v11132_v48 = vpop.eup %11131  ;;  %v4318_v7 = vmul.f32 %v11130_v58, %v13416_v39 }
 0x962   :  { %9257 = vmatpush1.bf16.msra.mxu0 %v12100_v36  ;;  %9289 = vmatpush1.bf16.msra.mxu1 %v12156_v52  ;;  %v11134_v21 = vpop.eup %11133  ;;  %v4333_v24 = vmul.f32 %v11132_v48, %v11118_v31 }
 0x963   :  { %9259 = vmatprep.subr.bf16.mxu0 %v12133_v46  ;;  %9291 = vmatprep.subr.bf16.mxu1 %v12161_v54  ;;  %v13492_v41 = vadd.f32 %v4322_v13, %v4318_v7  ;;  %v4323_v35 = vmul.f32 %v11134_v21, %v11128_v28  ;;  %v11136_v38 = vpop.eup %11135 }
 0x964   :  { %4426 = vmatmul.mubr.f32.gmra.mrb[66].mxu0 %v4333_v24  ;;  %4515 = vmatmul.mubr.f32.gmra.mrb[72].mxu1 %v4333_v24  ;;  %v4319_v39 = vmul.f32 %v11136_v38, %v13428_v23 }
 0x965   :  { %4431 = vmatprep.mubr.f32.mxu0 %v14408_v60  ;;  %4520 = vmatprep.mubr.f32.mxu1 %v14408_v60  ;;  %11139 = vtanh.f32 %v13492_v41 }
 0x966   :  { %9261 = vmatpush1.bf16.msra.mxu0 %v12158_v53  ;;  %9293 = vmatpush1.bf16.msra.mxu1 %v12195_v0  ;;  %v13500_v9 = vadd.f32 %v4323_v35, %v4319_v39  ;;  %11141 = vrcp.f32 %v4287_v5 }
 0x967   :  { %9263 = vmatprep.subr.bf16.mxu0 %v12188_v62  ;;  %9295 = vmatprep.subr.bf16.mxu1 %v12204_v3 }
 0x968   :  { %11143 = vtanh.f32 %v13500_v9  ;;  %v11138_v23 = vpop.eup %11137 }
 0x96a   :  { %9265 = vmatpush1.bf16.msra.mxu0 %v12197_v1  ;;  %9297 = vmatpush1.bf16.msra.mxu1 %v12221_v8 }
 0x96b   :  { %9267 = vmatprep.subr.bf16.mxu0 %v12252_v14  ;;  %9299 = vmatprep.subr.bf16.mxu1 %v12294_v27 }
 0x96e   :  { %9269 = vmatpush1.bf16.msra.mxu0 %v12267_v18  ;;  %9301 = vmatpush1.bf16.msra.mxu1 %v12299_v29 }
 0x96f   :  { %v11140_v61 = vpop.eup %11139  ;;  %9271 = vmatprep.subr.bf16.mxu0 %v12358_v43  ;;  %9303 = vmatprep.subr.bf16.mxu1 %v12400_v57 }
 0x970   :  { %v4334_v2 = vmul.f32 %v11140_v61, %v11138_v23  ;;  %v11142_v16 = vpop.eup %11141 }
 0x972   :  { %4432 = vmatmul.mubr.f32.gmra.mrb[68].mxu0 %v4334_v2  ;;  %4521 = vmatmul.mubr.f32.gmra.mrb[74].mxu1 %v4334_v2  ;;  %v11144_v56 = vpop.eup %11143 }
 0x973   :  { %4437 = vmatprep.mubr.f32.mxu0 %v14408_v60  ;;  %4526 = vmatprep.mubr.f32.mxu1 %v14408_v60  ;;  %v4335_v45 = vmul.f32 %v11144_v56, %v11142_v16 }
 0x974   :  { %9273 = vmatpush1.bf16.msra.mxu0 %v12366_v47  ;;  %9305 = vmatpush1.bf16.msra.mxu1 %v12405_v59 }
 0x975   :  { %9275 = vmatprep.subr.bf16.mxu0 %v12467_v12  ;;  %9307 = vmatprep.subr.bf16.mxu1 %v12506_v25 }
 0x976   :  { %4438 = vmatmul.mubr.f32.gmra.mrb[70].mxu0 %v4335_v45  ;;  %4527 = vmatmul.mubr.f32.gmra.mrb[76].mxu1 %v4335_v45 }
 0x977   :  { %4728 = vmatprep.mubr.f32.mxu0 %v14408_v60  ;;  %4817 = vmatprep.mubr.f32.mxu1 %v14408_v60 }
 0x978   :  { %9277 = vmatpush1.bf16.msra.mxu0 %v12472_v15  ;;  %9309 = vmatpush1.bf16.msra.mxu1 %v12511_v30 }
 0x979   :  { %9279 = vmatprep.subr.bf16.mxu0 %v12563_v44  ;;  %9311 = vmatprep.subr.bf16.mxu1 %v12613_v63 }
 0x97c   :  { %9281 = vmatpush1.bf16.msra.mxu0 %v12578_v50  ;;  %9313 = vmatpush1.bf16.msra.mxu1 %v12618_v4 }
 0x97d   :  { %9315 = vmatprep.subr.bf16.mxu0 %v12040_v19  ;;  %9347 = vmatprep.subr.bf16.mxu1 %v12064_v26 }
 0xa2f   :  { %v4421_v31 = vpop.f32.mrb[64].mxu0  ;;  %v4510_v11 = vpop.f32.mrb[70].mxu1 }
 0xa30   :  { %v10052_v34 = vadd.f32 %v4421_v31, %v14410_v33  ;;  %v4423_v37 = vpop.f32.mrb[65].mxu0  ;;  %v4512_v55 = vpop.f32.mrb[71].mxu1  ;;  %v10218_v17 = vadd.f32 %v4510_v11, %v12961_v6 }
 0xa31   :  { %v10053_v28 = vadd.f32 %v4423_v37, %v12951_v51  ;;  %v10219_v23 = vadd.f32 %v4512_v55, %v12963_v10 }
 0xa32   :  { %v8459_v13 = vmul.f32 -1.442695, %v10052_v34  ;;  %v8461_v38 = vmul.f32 -1.442695, %v10218_v17 }
 0xa33   :  { %v8460_v58 = vmul.f32 -1.442695, %v10053_v28 }
 0xa34   :  { %11145 = vpow2.f32 %v8459_v13 }
 0xa35   :  { %11147 = vpow2.f32 %v8460_v58 }
 0xa37   :  { %v4427_v48 = vpop.f32.mrb[66].mxu0  ;;  %v4516_v7 = vpop.f32.mrb[72].mxu1 }
 0xa38   :  { %v10054_v21 = vadd.f32 %v4427_v48, %v14410_v33  ;;  %v4429_v24 = vpop.f32.mrb[67].mxu0  ;;  %v4518_v35 = vpop.f32.mrb[73].mxu1  ;;  %v10220_v2 = vadd.f32 %v4516_v7, %v12961_v6 }
 0xa39   :  { %v10055_v5 = vadd.f32 %v4429_v24, %v12951_v51  ;;  %v10221_v34 = vadd.f32 %v4518_v35, %v12963_v10 }
 0xa3a   :  { %v8462_v39 = vmul.f32 -1.442695, %v10054_v21  ;;  %v8464_v11 = vmul.f32 -1.442695, %v10220_v2 }
 0xa3b   :  { %v8463_v61 = vmul.f32 -1.442695, %v10055_v5 }
 0xa3c   :  { %11149 = vpow2.f32 %v8462_v39 }
 0xa3d   :  { %11151 = vpow2.f32 %v8461_v38 }
 0xa3e   :  { %v11146_v16 = vpop.eup %11145  ;;  %11153 = vpow2.f32 %v8463_v61 }
 0xa3f   :  { %v4585_v56 = vadd.f32 1.0, %v11146_v16  ;;  %v11148_v45 = vpop.eup %11147  ;;  %11155 = vtanh.f32 %v10219_v23 }
 0xa40   :  { %v4586_v31 = vadd.f32 1.0, %v11148_v45 }
 0xa41   :  { %11157 = vrcp.f32 %v4585_v56 }
 0xa42   :  { %11159 = vrcp.f32 %v4586_v31 }
 0xa43   :  { %11161 = vpow2.f32 %v8464_v11 }
 0xa44   :  { %11163 = vtanh.f32 %v10221_v34 }
 0xa45   :  { %v4433_v37 = vpop.f32.mrb[68].mxu0  ;;  %v4522_v28 = vpop.f32.mrb[74].mxu1 }
 0xa46   :  { %v11150_v55 = vpop.eup %11149  ;;  %v10056_v13 = vadd.f32 %v4433_v37, %v14410_v33  ;;  %v4435_v58 = vpop.f32.mrb[69].mxu0 }
 0xa47   :  { %v4524_v17 = vpop.f32.mrb[75].mxu1  ;;  %v11152_v48 = vpop.eup %11151  ;;  %v4588_v7 = vadd.f32 1.0, %v11150_v55  ;;  %v10057_v21 = vadd.f32 %v4435_v58, %v12951_v51 }
 0xa48   :  { %v11154_v24 = vpop.eup %11153  ;;  %v8465_v38 = vmul.f32 -1.442695, %v10056_v13  ;;  %v4587_v31 = vadd.f32 1.0, %v11152_v48 }
 0xa49   :  { %v11156_v5 = vpop.eup %11155  ;;  %11165 = vrcp.f32 %v4588_v7  ;;  %v4589_v39 = vadd.f32 1.0, %v11154_v24  ;;  %v4439_v23 = vpop.f32.mrb[70].mxu0  ;;  %v8466_v2 = vmul.f32 -1.442695, %v10057_v21  ;;  %v10222_v7 = vadd.f32 %v4522_v28, %v12961_v6 }
 0xa4a   :  { %v4528_v61 = vpop.f32.mrb[76].mxu1  ;;  %v10058_v16 = vadd.f32 %v4439_v23, %v14410_v33  ;;  %v4441_v56 = vpop.f32.mrb[71].mxu0 }
 0xa4b   :  { %v11158_v35 = vpop.eup %11157  ;;  %v4530_v45 = vpop.f32.mrb[77].mxu1  ;;  %11167 = vrcp.f32 %v4589_v39  ;;  %v10059_v37 = vadd.f32 %v4441_v56, %v12951_v51  ;;  %v10224_v48 = vadd.f32 %v4528_v61, %v12961_v6  ;;  %v8467_v23 = vmul.f32 -1.442695, %v10222_v7 }
 0xa4c   :  { %v4629_v11 = vmul.f32 %v11158_v35, %v11156_v5  ;;  %v11160_v55 = vpop.eup %11159  ;;  %11169 = vpow2.f32 %v8465_v38  ;;  %v8468_v34 = vmul.f32 -1.442695, %v10058_v16  ;;  %v10223_v35 = vadd.f32 %v4524_v17, %v12963_v10 }
 0xa4d   :  { %v4625_v13 = vmul.f32 %v11160_v55, %v13472_v20  ;;  %v11162_v58 = vpop.eup %11161  ;;  %11171 = vpow2.f32 %v8466_v2  ;;  %v8469_v24 = vmul.f32 -1.442695, %v10059_v37  ;;  %v8470_v16 = vmul.f32 -1.442695, %v10224_v48 }
 0xa4e   :  { %11173 = vrcp.f32 %v4587_v31  ;;  %v4590_v5 = vadd.f32 1.0, %v11162_v58  ;;  %v11164_v39 = vpop.eup %11163  ;;  %v10225_v31 = vadd.f32 %v4530_v45, %v12963_v10 }
 0xa4f   :  { %v13543_v21 = vadd.f32 %v4629_v11, %v4625_v13  ;;  %11175 = vpow2.f32 %v8468_v34 }
 0xa51   :  { %11177 = vtanh.f32 %v13543_v21 }
 0xa52   :  { %11179 = vpow2.f32 %v8469_v24 }
 0xa53   :  { %v11166_v38 = vpop.eup %11165  ;;  %11181 = vrcp.f32 %v4590_v5 }
 0xa54   :  { %v4630_v20 = vmul.f32 %v11166_v38, %v11164_v39  ;;  %11183 = vpow2.f32 %v8467_v23 }
 0xa55   :  { %v11168_v28 = vpop.eup %11167  ;;  %11185 = vtanh.f32 %v10223_v35 }
 0xa56   :  { %v11170_v2 = vpop.eup %11169  ;;  %v4626_v56 = vmul.f32 %v11168_v28, %v13478_v49  ;;  %11187 = vpow2.f32 %v8470_v16 }
 0xa57   :  { %v4591_v61 = vadd.f32 1.0, %v11170_v2  ;;  %v11172_v11 = vpop.eup %11171 }
 0xa58   :  { %v13550_v37 = vadd.f32 %v4630_v20, %v4626_v56  ;;  %v11174_v55 = vpop.eup %11173  ;;  %v4592_v17 = vadd.f32 1.0, %v11172_v11 }
 0xa59   :  { %11189 = vrcp.f32 %v4591_v61  ;;  %v11176_v34 = vpop.eup %11175 }
 0xa5a   :  { %11191 = vtanh.f32 %v10225_v31  ;;  %v4594_v58 = vadd.f32 1.0, %v11176_v34 }
 0xa5b   :  { %v11178_v13 = vpop.eup %11177  ;;  %11193 = vrcp.f32 %v4592_v17 }
 0xa5c   :  { %v4641_v7 = vmul.f32 %v11178_v13, %v11174_v55  ;;  %11195 = vtanh.f32 %v13550_v37  ;;  %v11180_v49 = vpop.eup %11179 }
 0xa5d   :  { %11197 = vrcp.f32 %v4594_v58  ;;  %v4595_v45 = vadd.f32 1.0, %v11180_v49  ;;  %v11182_v24 = vpop.eup %11181 }
 0xa5e   :  { %4729 = vmatmul.mubr.f32.vlgmr.msra.gmra.mrb[72].mxu0 %v4641_v7  ;;  %4818 = vmatmul.mubr.f32.vlgmr.msra.gmra.mrb[78].mxu1 %v4641_v7  ;;  %v11184_v48 = vpop.eup %11183 }
 0xa5f   :  { %4734 = vmatprep.mubr.f32.mxu0 %v14408_v60  ;;  %4823 = vmatprep.mubr.f32.mxu1 %v14408_v60  ;;  %11199 = vrcp.f32 %v4595_v45  ;;  %v11186_v5 = vpop.eup %11185  ;;  %v4593_v16 = vadd.f32 1.0, %v11184_v48 }
 0xa60   :  { %9317 = vmatpush1.bf16.msra.mxu0 %v12050_v22  ;;  %9349 = vmatpush1.bf16.msra.mxu1 %v12116_v40  ;;  %v11188_v39 = vpop.eup %11187 }
 0xa61   :  { %9319 = vmatprep.subr.bf16.mxu0 %v12089_v32  ;;  %9351 = vmatprep.subr.bf16.mxu1 %v12122_v42  ;;  %11201 = vrcp.f32 %v4593_v16  ;;  %v4596_v17 = vadd.f32 1.0, %v11188_v39 }
 0xa63   :  { %v11190_v23 = vpop.eup %11189 }
 0xa64   :  { %v11192_v38 = vpop.eup %11191  ;;  %v4631_v35 = vmul.f32 %v11190_v23, %v11186_v5  ;;  %9321 = vmatpush1.bf16.msra.mxu0 %v12100_v36  ;;  %9353 = vmatpush1.bf16.msra.mxu1 %v12156_v52 }
 0xa65   :  { %v11194_v20 = vpop.eup %11193  ;;  %9323 = vmatprep.subr.bf16.mxu0 %v12133_v46  ;;  %9355 = vmatprep.subr.bf16.mxu1 %v12161_v54 }
 0xa66   :  { %v11196_v28 = vpop.eup %11195  ;;  %v4627_v2 = vmul.f32 %v11194_v20, %v13492_v41 }
 0xa67   :  { %v11198_v56 = vpop.eup %11197  ;;  %v4642_v31 = vmul.f32 %v11196_v28, %v11182_v24 }
 0xa68   :  { %v13564_v61 = vadd.f32 %v4631_v35, %v4627_v2  ;;  %v4632_v11 = vmul.f32 %v11198_v56, %v11192_v38  ;;  %9325 = vmatpush1.bf16.msra.mxu0 %v12158_v53  ;;  %9357 = vmatpush1.bf16.msra.mxu1 %v12195_v0 }
 0xa69   :  { %4735 = vmatmul.mubr.f32.gmra.mrb[74].mxu0 %v4642_v31  ;;  %4824 = vmatmul.mubr.f32.gmra.mrb[80].mxu1 %v4642_v31  ;;  %v11200_v55 = vpop.eup %11199 }
 0xa6a   :  { %4740 = vmatprep.mubr.f32.mxu0 %v14408_v60  ;;  %4829 = vmatprep.mubr.f32.mxu1 %v14408_v60  ;;  %11203 = vtanh.f32 %v13564_v61  ;;  %v4628_v41 = vmul.f32 %v11200_v55, %v13500_v9 }
 0xa6b   :  { %9327 = vmatprep.subr.bf16.mxu0 %v12188_v62  ;;  %9359 = vmatprep.subr.bf16.mxu1 %v12204_v3  ;;  %11205 = vrcp.f32 %v4596_v17  ;;  %v11202_v9 = vpop.eup %11201 }
 0xa6c   :  { %9329 = vmatpush1.bf16.msra.mxu0 %v12197_v1  ;;  %9361 = vmatpush1.bf16.msra.mxu1 %v12221_v8  ;;  %v13576_v34 = vadd.f32 %v4632_v11, %v4628_v41 }
 0xa6d   :  { %9331 = vmatprep.subr.bf16.mxu0 %v12252_v14  ;;  %9363 = vmatprep.subr.bf16.mxu1 %v12294_v27 }
 0xa6e   :  { %11207 = vtanh.f32 %v13576_v34 }
 0xa70   :  { %9333 = vmatpush1.bf16.msra.mxu0 %v12267_v18  ;;  %9365 = vmatpush1.bf16.msra.mxu1 %v12299_v29 }
 0xa71   :  { %9335 = vmatprep.subr.bf16.mxu0 %v12358_v43  ;;  %9367 = vmatprep.subr.bf16.mxu1 %v12400_v57 }
 0xa74   :  { %v11204_v13 = vpop.eup %11203  ;;  %9337 = vmatpush1.bf16.msra.mxu0 %v12366_v47  ;;  %9369 = vmatpush1.bf16.msra.mxu1 %v12405_v59 }
 0xa75   :  { %v4643_v58 = vmul.f32 %v11204_v13, %v11202_v9  ;;  %9339 = vmatprep.subr.bf16.mxu0 %v12467_v12  ;;  %9371 = vmatprep.subr.bf16.mxu1 %v12506_v25  ;;  %v11206_v7 = vpop.eup %11205 }
 0xa77   :  { %4741 = vmatmul.mubr.f32.gmra.mrb[76].mxu0 %v4643_v58  ;;  %4830 = vmatmul.mubr.f32.gmra.mrb[82].mxu1 %v4643_v58 }
 0xa78   :  { %4746 = vmatprep.mubr.f32.mxu0 %v14408_v60  ;;  %4835 = vmatprep.mubr.f32.mxu1 %v14408_v60  ;;  %v11208_v49 = vpop.eup %11207 }
 0xa79   :  { %9341 = vmatpush1.bf16.msra.mxu0 %v12472_v15  ;;  %9373 = vmatpush1.bf16.msra.mxu1 %v12511_v30  ;;  %v4644_v45 = vmul.f32 %v11208_v49, %v11206_v7 }
 0xa7a   :  { %9343 = vmatprep.subr.bf16.mxu0 %v12563_v44  ;;  %9375 = vmatprep.subr.bf16.mxu1 %v12613_v63 }
 0xa7b   :  { %4747 = vmatmul.mubr.f32.gmra.mrb[78].mxu0 %v4644_v45  ;;  %4836 = vmatmul.mubr.f32.gmra.mrb[84].mxu1 %v4644_v45 }
 0xa7c   :  { %5037 = vmatprep.mubr.f32.mxu0 %v14408_v60  ;;  %5126 = vmatprep.mubr.f32.mxu1 %v14408_v60 }
 0xa7d   :  { %9345 = vmatpush1.bf16.msra.mxu0 %v12578_v50  ;;  %9377 = vmatpush1.bf16.msra.mxu1 %v12618_v4 }
 0xa7e   :  { %9379 = vmatprep.subr.bf16.mxu0 %v12040_v19  ;;  %9411 = vmatprep.subr.bf16.mxu1 %v12064_v26 }
 0xb31   :  { %v4730_v24 = vpop.f32.mrb[72].mxu0  ;;  %v4819_v48 = vpop.f32.mrb[78].mxu1 }
 0xb32   :  { %v10060_v5 = vadd.f32 %v4730_v24, %v14410_v33  ;;  %v4732_v39 = vpop.f32.mrb[73].mxu0  ;;  %v4821_v23 = vpop.f32.mrb[79].mxu1  ;;  %v10226_v16 = vadd.f32 %v4819_v48, %v12961_v6 }
 0xb33   :  { %v10061_v38 = vadd.f32 %v4732_v39, %v12951_v51  ;;  %v10227_v17 = vadd.f32 %v4821_v23, %v12963_v10 }
 0xb34   :  { %v8471_v35 = vmul.f32 -1.442695, %v10060_v5  ;;  %v8473_v28 = vmul.f32 -1.442695, %v10226_v16 }
 0xb35   :  { %v8472_v20 = vmul.f32 -1.442695, %v10061_v38 }
 0xb36   :  { %11209 = vpow2.f32 %v8471_v35 }
 0xb37   :  { %11211 = vpow2.f32 %v8472_v20 }
 0xb38   :  { %11213 = vpow2.f32 %v8473_v28 }
 0xb3c   :  { %v4736_v2 = vpop.f32.mrb[74].mxu0  ;;  %v4825_v56 = vpop.f32.mrb[80].mxu1 }
 0xb3d   :  { %v10062_v31 = vadd.f32 %v4736_v2, %v14410_v33  ;;  %v4738_v11 = vpop.f32.mrb[75].mxu0  ;;  %v4827_v55 = vpop.f32.mrb[81].mxu1  ;;  %v10228_v24 = vadd.f32 %v4825_v56, %v12961_v6 }
 0xb3e   :  { %v10063_v41 = vadd.f32 %v4738_v11, %v12951_v51  ;;  %v10229_v48 = vadd.f32 %v4827_v55, %v12963_v10 }
 0xb3f   :  { %v8474_v9 = vmul.f32 -1.442695, %v10062_v31  ;;  %v8476_v5 = vmul.f32 -1.442695, %v10228_v24 }
 0xb40   :  { %v11210_v13 = vpop.eup %11209  ;;  %v8475_v49 = vmul.f32 -1.442695, %v10063_v41 }
 0xb41   :  { %v4894_v58 = vadd.f32 1.0, %v11210_v13  ;;  %11215 = vpow2.f32 %v8474_v9  ;;  %v11212_v7 = vpop.eup %11211 }
 0xb42   :  { %11217 = vtanh.f32 %v10227_v17  ;;  %v4895_v45 = vadd.f32 1.0, %v11212_v7  ;;  %v11214_v39 = vpop.eup %11213 }
 0xb43   :  { %11219 = vrcp.f32 %v4894_v58  ;;  %v4896_v41 = vadd.f32 1.0, %v11214_v39 }
 0xb44   :  { %11221 = vrcp.f32 %v4895_v45 }
 0xb45   :  { %11223 = vpow2.f32 %v8475_v49 }
 0xb46   :  { %11225 = vtanh.f32 %v10229_v48 }
 0xb47   :  { %11227 = vpow2.f32 %v8476_v5 }
 0xb4a   :  { %v4742_v23 = vpop.f32.mrb[76].mxu0  ;;  %v4831_v38 = vpop.f32.mrb[82].mxu1 }
 0xb4b   :  { %v11216_v35 = vpop.eup %11215  ;;  %v10064_v20 = vadd.f32 %v4742_v23, %v14410_v33  ;;  %v4744_v16 = vpop.f32.mrb[77].mxu0 }
 0xb4c   :  { %v4833_v28 = vpop.f32.mrb[83].mxu1  ;;  %v11218_v2 = vpop.eup %11217  ;;  %v4897_v31 = vadd.f32 1.0, %v11216_v35  ;;  %v10065_v11 = vadd.f32 %v4744_v16, %v12951_v51  ;;  %v10230_v16 = vadd.f32 %v4831_v38, %v12961_v6 }
 0xb4d   :  { %v11220_v17 = vpop.eup %11219  ;;  %v8477_v56 = vmul.f32 -1.442695, %v10064_v20 }
 0xb4e   :  { %v4938_v9 = vmul.f32 %v11220_v17, %v11218_v2  ;;  %11229 = vrcp.f32 %v4897_v31  ;;  %v8478_v55 = vmul.f32 -1.442695, %v10065_v11  ;;  %v11222_v13 = vpop.eup %11221  ;;  %v4748_v58 = vpop.f32.mrb[78].mxu0  ;;  %v8479_v11 = vmul.f32 -1.442695, %v10230_v16 }
 0xb4f   :  { %v4837_v7 = vpop.f32.mrb[84].mxu1  ;;  %v11224_v49 = vpop.eup %11223  ;;  %v4934_v45 = vmul.f32 %v11222_v13, %v13543_v21  ;;  %11231 = vpow2.f32 %v8477_v56  ;;  %v10066_v24 = vadd.f32 %v4748_v58, %v14410_v33 }
 0xb50   :  { %v4750_v23 = vpop.f32.mrb[79].mxu0  ;;  %v4839_v48 = vpop.f32.mrb[85].mxu1  ;;  %11233 = vrcp.f32 %v4896_v41  ;;  %v4898_v35 = vadd.f32 1.0, %v11224_v49  ;;  %v10231_v41 = vadd.f32 %v4833_v28, %v12963_v10  ;;  %v10232_v56 = vadd.f32 %v4837_v7, %v12961_v6 }
 0xb51   :  { %v10067_v39 = vadd.f32 %v4750_v23, %v12951_v51  ;;  %v13614_v5 = vadd.f32 %v4938_v9, %v4934_v45  ;;  %11235 = vpow2.f32 %v8478_v55  ;;  %v8480_v20 = vmul.f32 -1.442695, %v10066_v24  ;;  %v11226_v21 = vpop.eup %11225 }
 0xb52   :  { %11237 = vrcp.f32 %v4898_v35  ;;  %v11228_v31 = vpop.eup %11227  ;;  %v8482_v45 = vmul.f32 -1.442695, %v10232_v56  ;;  %v10233_v35 = vadd.f32 %v4839_v48, %v12963_v10 }
 0xb53   :  { %11239 = vtanh.f32 %v13614_v5  ;;  %v8481_v2 = vmul.f32 -1.442695, %v10067_v39  ;;  %v4899_v55 = vadd.f32 1.0, %v11228_v31 }
 0xb54   :  { %11241 = vpow2.f32 %v8480_v20 }
 0xb55   :  { %11243 = vpow2.f32 %v8481_v2 }
 0xb56   :  { %11245 = vpow2.f32 %v8479_v11 }
 0xb57   :  { %11247 = vtanh.f32 %v10231_v41 }
 0xb58   :  { %v11230_v17 = vpop.eup %11229 }
 0xb59   :  { %v4939_v9 = vmul.f32 %v11230_v17, %v11226_v21  ;;  %v11232_v13 = vpop.eup %11231 }
 0xb5a   :  { %v11234_v58 = vpop.eup %11233  ;;  %v4900_v49 = vadd.f32 1.0, %v11232_v13 }
 0xb5b   :  { %v11236_v38 = vpop.eup %11235 }
 0xb5c   :  { %v11238_v24 = vpop.eup %11237  ;;  %11249 = vrcp.f32 %v4900_v49  ;;  %v4901_v23 = vadd.f32 1.0, %v11236_v38 }
 0xb5d   :  { %v11240_v39 = vpop.eup %11239  ;;  %11251 = vrcp.f32 %v4899_v55  ;;  %v4935_v28 = vmul.f32 %v11238_v24, %v13550_v37 }
 0xb5e   :  { %11253 = vrcp.f32 %v4901_v23  ;;  %v4950_v7 = vmul.f32 %v11240_v39, %v11234_v58  ;;  %v11242_v20 = vpop.eup %11241 }
 0xb5f   :  { %v13622_v16 = vadd.f32 %v4939_v9, %v4935_v28  ;;  %11255 = vpow2.f32 %v8482_v45  ;;  %v4903_v2 = vadd.f32 1.0, %v11242_v20  ;;  %v11244_v21 = vpop.eup %11243 }
 0xb60   :  { %11257 = vtanh.f32 %v10233_v35  ;;  %5038 = vmatmul.mubr.f32.vlgmr.msra.gmra.mrb[80].mxu0 %v4950_v7  ;;  %5127 = vmatmul.mubr.f32.vlgmr.msra.gmra.mrb[86].mxu1 %v4950_v7  ;;  %v4904_v48 = vadd.f32 1.0, %v11244_v21  ;;  %v11246_v37 = vpop.eup %11245 }
 0xb61   :  { %5043 = vmatprep.mubr.f32.mxu0 %v14408_v60  ;;  %5132 = vmatprep.mubr.f32.mxu1 %v14408_v60  ;;  %11259 = vtanh.f32 %v13622_v16  ;;  %v11248_v31 = vpop.eup %11247  ;;  %v4902_v9 = vadd.f32 1.0, %v11246_v37 }
 0xb62   :  { %11261 = vrcp.f32 %v4903_v2  ;;  %9381 = vmatpush1.bf16.msra.mxu0 %v12050_v22  ;;  %9413 = vmatpush1.bf16.msra.mxu1 %v12116_v40 }
 0xb63   :  { %9383 = vmatprep.subr.bf16.mxu0 %v12089_v32  ;;  %9415 = vmatprep.subr.bf16.mxu1 %v12122_v42  ;;  %11263 = vrcp.f32 %v4904_v48 }
 0xb64   :  { %11265 = vrcp.f32 %v4902_v9 }
 0xb66   :  { %v11250_v11 = vpop.eup %11249  ;;  %9385 = vmatpush1.bf16.msra.mxu0 %v12100_v36  ;;  %9417 = vmatpush1.bf16.msra.mxu1 %v12156_v52 }
 0xb67   :  { %v11252_v17 = vpop.eup %11251  ;;  %v4940_v41 = vmul.f32 %v11250_v11, %v11248_v31  ;;  %9387 = vmatprep.subr.bf16.mxu0 %v12133_v46  ;;  %9419 = vmatprep.subr.bf16.mxu1 %v12161_v54 }
 0xb68   :  { %v11254_v56 = vpop.eup %11253 }
 0xb69   :  { %v11256_v13 = vpop.eup %11255  ;;  %v4936_v55 = vmul.f32 %v11254_v56, %v13564_v61 }
 0xb6a   :  { %v11258_v58 = vpop.eup %11257  ;;  %9389 = vmatpush1.bf16.msra.mxu0 %v12158_v53  ;;  %9421 = vmatpush1.bf16.msra.mxu1 %v12195_v0  ;;  %v4905_v61 = vadd.f32 1.0, %v11256_v13 }
 0xb6b   :  { %v11260_v49 = vpop.eup %11259  ;;  %v13638_v38 = vadd.f32 %v4940_v41, %v4936_v55  ;;  %9391 = vmatprep.subr.bf16.mxu0 %v12188_v62  ;;  %9423 = vmatprep.subr.bf16.mxu1 %v12204_v3 }
 0xb6c   :  { %v11262_v45 = vpop.eup %11261  ;;  %v4951_v24 = vmul.f32 %v11260_v49, %v11252_v17 }
 0xb6d   :  { %v4941_v23 = vmul.f32 %v11262_v45, %v11258_v58  ;;  %11267 = vtanh.f32 %v13638_v38  ;;  %v11264_v35 = vpop.eup %11263 }
 0xb6e   :  { %5044 = vmatmul.mubr.f32.gmra.mrb[82].mxu0 %v4951_v24  ;;  %5133 = vmatmul.mubr.f32.gmra.mrb[88].mxu1 %v4951_v24  ;;  %v4937_v39 = vmul.f32 %v11264_v35, %v13576_v34  ;;  %11269 = vrcp.f32 %v4905_v61  ;;  %v11266_v34 = vpop.eup %11265 }
 0xb6f   :  { %5049 = vmatprep.mubr.f32.mxu0 %v14408_v60  ;;  %5138 = vmatprep.mubr.f32.mxu1 %v14408_v60 }
 0xb70   :  { %9393 = vmatpush1.bf16.msra.mxu0 %v12197_v1  ;;  %9425 = vmatpush1.bf16.msra.mxu1 %v12221_v8  ;;  %v13648_v28 = vadd.f32 %v4941_v23, %v4937_v39 }
 0xb71   :  { %9395 = vmatprep.subr.bf16.mxu0 %v12252_v14  ;;  %9427 = vmatprep.subr.bf16.mxu1 %v12294_v27 }
 0xb72   :  { %11271 = vtanh.f32 %v13648_v28 }
 0xb74   :  { %9397 = vmatpush1.bf16.msra.mxu0 %v12267_v18  ;;  %9429 = vmatpush1.bf16.msra.mxu1 %v12299_v29 }
 0xb75   :  { %9399 = vmatprep.subr.bf16.mxu0 %v12358_v43  ;;  %9431 = vmatprep.subr.bf16.mxu1 %v12400_v57 }
 0xb77   :  { %v11268_v7 = vpop.eup %11267 }
 0xb78   :  { %v4952_v20 = vmul.f32 %v11268_v7, %v11266_v34  ;;  %9401 = vmatpush1.bf16.msra.mxu0 %v12366_v47  ;;  %9433 = vmatpush1.bf16.msra.mxu1 %v12405_v59  ;;  %v11270_v2 = vpop.eup %11269 }
 0xb79   :  { %9403 = vmatprep.subr.bf16.mxu0 %v12467_v12  ;;  %9435 = vmatprep.subr.bf16.mxu1 %v12506_v25 }
 0xb7a   :  { %5050 = vmatmul.mubr.f32.gmra.mrb[84].mxu0 %v4952_v20  ;;  %5139 = vmatmul.mubr.f32.gmra.mrb[90].mxu1 %v4952_v20 }
 0xb7b   :  { %5055 = vmatprep.mubr.f32.mxu0 %v14408_v60  ;;  %5144 = vmatprep.mubr.f32.mxu1 %v14408_v60 }
 0xb7c   :  { %9405 = vmatpush1.bf16.msra.mxu0 %v12472_v15  ;;  %9437 = vmatpush1.bf16.msra.mxu1 %v12511_v30  ;;  %v11272_v21 = vpop.eup %11271 }
 0xb7d   :  { %9407 = vmatprep.subr.bf16.mxu0 %v12563_v44  ;;  %9439 = vmatprep.subr.bf16.mxu1 %v12613_v63  ;;  %v4953_v48 = vmul.f32 %v11272_v21, %v11270_v2 }
 0xb7f   :  { %5056 = vmatmul.mubr.f32.gmra.mrb[86].mxu0 %v4953_v48  ;;  %5145 = vmatmul.mubr.f32.gmra.mrb[92].mxu1 %v4953_v48 }
 0xb80   :  { %9409 = vmatpush1.bf16.msra.mxu0 %v12578_v50  ;;  %9441 = vmatpush1.bf16.msra.mxu1 %v12618_v4 }
 0xb81   :  { %5346 = vmatprep.mubr.f32.mxu0 %v14408_v60  ;;  %5435 = vmatprep.mubr.f32.mxu1 %v14408_v60 }
 0xb82   :  { %9443 = vmatprep.subr.bf16.mxu0 %v12040_v19  ;;  %9475 = vmatprep.subr.bf16.mxu1 %v12064_v26 }
 0xc33   :  { %v5039_v37 = vpop.f32.mrb[80].mxu0  ;;  %v5128_v31 = vpop.f32.mrb[86].mxu1 }
 0xc34   :  { %v10068_v11 = vadd.f32 %v5039_v37, %v14410_v33  ;;  %v5041_v17 = vpop.f32.mrb[81].mxu0  ;;  %v5130_v41 = vpop.f32.mrb[87].mxu1  ;;  %v10234_v13 = vadd.f32 %v5128_v31, %v12961_v6 }
 0xc35   :  { %v10069_v56 = vadd.f32 %v5041_v17, %v12951_v51  ;;  %v10235_v49 = vadd.f32 %v5130_v41, %v12963_v10 }
 0xc36   :  { %v8483_v9 = vmul.f32 -1.442695, %v10068_v11  ;;  %v8485_v58 = vmul.f32 -1.442695, %v10234_v13 }
 0xc37   :  { %v8484_v55 = vmul.f32 -1.442695, %v10069_v56 }
 0xc38   :  { %11273 = vpow2.f32 %v8483_v9 }
 0xc39   :  { %11275 = vpow2.f32 %v8484_v55 }
 0xc3a   :  { %11277 = vpow2.f32 %v8485_v58 }
 0xc3b   :  { %11279 = vtanh.f32 %v10235_v49 }
 0xc41   :  { %v5045_v45 = vpop.f32.mrb[82].mxu0  ;;  %v5134_v24 = vpop.f32.mrb[88].mxu1 }
 0xc42   :  { %v11274_v23 = vpop.eup %11273  ;;  %v10070_v35 = vadd.f32 %v5045_v45, %v14410_v33  ;;  %v5047_v61 = vpop.f32.mrb[83].mxu0  ;;  %v10236_v31 = vadd.f32 %v5134_v24, %v12961_v6 }
 0xc43   :  { %v5136_v39 = vpop.f32.mrb[89].mxu1  ;;  %v5203_v34 = vadd.f32 1.0, %v11274_v23  ;;  %v10071_v7 = vadd.f32 %v5047_v61, %v12951_v51  ;;  %v11276_v20 = vpop.eup %11275 }
 0xc44   :  { %v8486_v2 = vmul.f32 -1.442695, %v10070_v35  ;;  %v5204_v21 = vadd.f32 1.0, %v11276_v20  ;;  %v11278_v37 = vpop.eup %11277  ;;  %v8488_v17 = vmul.f32 -1.442695, %v10236_v31  ;;  %v10237_v45 = vadd.f32 %v5136_v39, %v12963_v10 }
 0xc45   :  { %11281 = vrcp.f32 %v5203_v34  ;;  %v8487_v48 = vmul.f32 -1.442695, %v10071_v7  ;;  %v5205_v11 = vadd.f32 1.0, %v11278_v37  ;;  %v11280_v9 = vpop.eup %11279 }
 0xc46   :  { %11283 = vrcp.f32 %v5204_v21 }
 0xc47   :  { %11285 = vpow2.f32 %v8486_v2 }
 0xc48   :  { %11287 = vpow2.f32 %v8487_v48 }
 0xc49   :  { %11289 = vrcp.f32 %v5205_v11 }
 0xc4a   :  { %11291 = vpow2.f32 %v8488_v17 }
 0xc4d   :  { %v5051_v41 = vpop.f32.mrb[84].mxu0  ;;  %v5140_v56 = vpop.f32.mrb[90].mxu1 }
 0xc4e   :  { %v10072_v13 = vadd.f32 %v5051_v41, %v14410_v33  ;;  %v5053_v55 = vpop.f32.mrb[85].mxu0  ;;  %v5142_v58 = vpop.f32.mrb[91].mxu1 }
 0xc4f   :  { %v11282_v49 = vpop.eup %11281  ;;  %v10073_v23 = vadd.f32 %v5053_v55, %v12951_v51 }
 0xc50   :  { %v5247_v35 = vmul.f32 %v11282_v49, %v11280_v9  ;;  %v8489_v61 = vmul.f32 -1.442695, %v10072_v13  ;;  %v11284_v34 = vpop.eup %11283  ;;  %v10239_v49 = vadd.f32 %v5142_v58, %v12963_v10 }
 0xc51   :  { %v8490_v24 = vmul.f32 -1.442695, %v10073_v23  ;;  %v11286_v7 = vpop.eup %11285  ;;  %v5243_v20 = vmul.f32 %v11284_v34, %v13614_v5  ;;  %v10238_v5 = vadd.f32 %v5140_v56, %v12961_v6 }
 0xc52   :  { %11293 = vpow2.f32 %v8489_v61  ;;  %v5206_v2 = vadd.f32 1.0, %v11286_v7  ;;  %v5057_v21 = vpop.f32.mrb[86].mxu0  ;;  %v5146_v48 = vpop.f32.mrb[92].mxu1 }
 0xc53   :  { %11295 = vtanh.f32 %v10237_v45  ;;  %v11288_v37 = vpop.eup %11287  ;;  %v13684_v31 = vadd.f32 %v5247_v35, %v5243_v20  ;;  %v10074_v39 = vadd.f32 %v5057_v21, %v14410_v33  ;;  %v5059_v11 = vpop.f32.mrb[87].mxu0  ;;  %v8491_v23 = vmul.f32 -1.442695, %v10238_v5 }
 0xc54   :  { %11297 = vpow2.f32 %v8490_v24  ;;  %v5148_v41 = vpop.f32.mrb[93].mxu1  ;;  %v5207_v9 = vadd.f32 1.0, %v11288_v37  ;;  %v10075_v17 = vadd.f32 %v5059_v11, %v12951_v51  ;;  %v11290_v45 = vpop.eup %11289  ;;  %v10240_v34 = vadd.f32 %v5146_v48, %v12961_v6 }
 0xc55   :  { %11299 = vrcp.f32 %v5206_v2  ;;  %v8492_v13 = vmul.f32 -1.442695, %v10074_v39  ;;  %v11292_v35 = vpop.eup %11291  ;;  %v10241_v58 = vadd.f32 %v5148_v41, %v12963_v10 }
 0xc56   :  { %11301 = vtanh.f32 %v13684_v31  ;;  %v8493_v55 = vmul.f32 -1.442695, %v10075_v17  ;;  %v8494_v39 = vmul.f32 -1.442695, %v10240_v34  ;;  %v5208_v5 = vadd.f32 1.0, %v11292_v35 }
 0xc57   :  { %11303 = vrcp.f32 %v5207_v9 }
 0xc58   :  { %11305 = vpow2.f32 %v8492_v13 }
 0xc59   :  { %11307 = vpow2.f32 %v8493_v55 }
 0xc5a   :  { %11309 = vtanh.f32 %v10239_v49 }
 0xc5b   :  { %11311 = vpow2.f32 %v8491_v23 }
 0xc5c   :  { %v11294_v61 = vpop.eup %11293 }
 0xc5d   :  { %v11296_v24 = vpop.eup %11295  ;;  %v5209_v7 = vadd.f32 1.0, %v11294_v61 }
 0xc5e   :  { %v11298_v20 = vpop.eup %11297 }
 0xc5f   :  { %v11300_v2 = vpop.eup %11299  ;;  %11313 = vrcp.f32 %v5209_v7  ;;  %v5210_v56 = vadd.f32 1.0, %v11298_v20 }
 0xc60   :  { %v11302_v21 = vpop.eup %11301  ;;  %v5248_v37 = vmul.f32 %v11300_v2, %v11296_v24 }
 0xc61   :  { %11315 = vrcp.f32 %v5210_v56  ;;  %v5259_v11 = vmul.f32 %v11302_v21, %v11290_v45  ;;  %v11304_v9 = vpop.eup %11303 }
 0xc62   :  { %v11306_v17 = vpop.eup %11305  ;;  %v5244_v48 = vmul.f32 %v11304_v9, %v13622_v16  ;;  %11317 = vpow2.f32 %v8494_v39 }
 0xc63   :  { %5347 = vmatmul.mubr.f32.vlgmr.msra.gmra.mrb[88].mxu0 %v5259_v11  ;;  %5436 = vmatmul.mubr.f32.vlgmr.msra.gmra.mrb[94].mxu1 %v5259_v11  ;;  %v5212_v13 = vadd.f32 1.0, %v11306_v17  ;;  %v11308_v55 = vpop.eup %11307  ;;  %11319 = vtanh.f32 %v10241_v58 }
 0xc64   :  { %5352 = vmatprep.mubr.f32.mxu0 %v14408_v60  ;;  %5441 = vmatprep.mubr.f32.mxu1 %v14408_v60  ;;  %v13696_v49 = vadd.f32 %v5248_v37, %v5244_v48  ;;  %v5213_v41 = vadd.f32 1.0, %v11308_v55  ;;  %v11310_v16 = vpop.eup %11309 }
 0xc65   :  { %9445 = vmatpush1.bf16.msra.mxu0 %v12050_v22  ;;  %9477 = vmatpush1.bf16.msra.mxu1 %v12116_v40  ;;  %11321 = vrcp.f32 %v5212_v13  ;;  %v11312_v45 = vpop.eup %11311 }
 0xc66   :  { %9447 = vmatprep.subr.bf16.mxu0 %v12089_v32  ;;  %9479 = vmatprep.subr.bf16.mxu1 %v12122_v42  ;;  %11323 = vrcp.f32 %v5208_v5  ;;  %v5211_v34 = vadd.f32 1.0, %v11312_v45 }
 0xc67   :  { %11325 = vrcp.f32 %v5213_v41 }
 0xc68   :  { %11327 = vtanh.f32 %v13696_v49 }
 0xc69   :  { %v11314_v23 = vpop.eup %11313  ;;  %9449 = vmatpush1.bf16.msra.mxu0 %v12100_v36  ;;  %9481 = vmatpush1.bf16.msra.mxu1 %v12156_v52  ;;  %11329 = vrcp.f32 %v5211_v34 }
 0xc6a   :  { %v5249_v35 = vmul.f32 %v11314_v23, %v11310_v16  ;;  %9451 = vmatprep.subr.bf16.mxu0 %v12133_v46  ;;  %9483 = vmatprep.subr.bf16.mxu1 %v12161_v54 }
 0xc6b   :  { %v11316_v61 = vpop.eup %11315 }
 0xc6c   :  { %v5245_v24 = vmul.f32 %v11316_v61, %v13638_v38  ;;  %v11318_v7 = vpop.eup %11317 }
 0xc6d   :  { %9453 = vmatpush1.bf16.msra.mxu0 %v12158_v53  ;;  %9485 = vmatpush1.bf16.msra.mxu1 %v12195_v0  ;;  %v11320_v2 = vpop.eup %11319  ;;  %v5214_v39 = vadd.f32 1.0, %v11318_v7 }
 0xc6e   :  { %v13710_v20 = vadd.f32 %v5249_v35, %v5245_v24  ;;  %9455 = vmatprep.subr.bf16.mxu0 %v12188_v62  ;;  %9487 = vmatprep.subr.bf16.mxu1 %v12204_v3 }
 0xc6f   :  { %v11322_v56 = vpop.eup %11321 }
 0xc70   :  { %11331 = vtanh.f32 %v13710_v20  ;;  %v11324_v21 = vpop.eup %11323  ;;  %v5250_v37 = vmul.f32 %v11322_v56, %v11320_v2 }
 0xc71   :  { %9457 = vmatpush1.bf16.msra.mxu0 %v12197_v1  ;;  %9489 = vmatpush1.bf16.msra.mxu1 %v12221_v8  ;;  %v11326_v38 = vpop.eup %11325  ;;  %11333 = vrcp.f32 %v5214_v39 }
 0xc72   :  { %9459 = vmatprep.subr.bf16.mxu0 %v12252_v14  ;;  %9491 = vmatprep.subr.bf16.mxu1 %v12294_v27  ;;  %v11328_v58 = vpop.eup %11327  ;;  %v5246_v11 = vmul.f32 %v11326_v38, %v13648_v28 }
 0xc73   :  { %v5260_v9 = vmul.f32 %v11328_v58, %v11324_v21  ;;  %v11330_v28 = vpop.eup %11329 }
 0xc74   :  { %v13720_v17 = vadd.f32 %v5250_v37, %v5246_v11 }
 0xc75   :  { %9461 = vmatpush1.bf16.msra.mxu0 %v12267_v18  ;;  %9493 = vmatpush1.bf16.msra.mxu1 %v12299_v29 }
 0xc76   :  { %5353 = vmatmul.mubr.f32.gmra.mrb[90].mxu0 %v5260_v9  ;;  %5442 = vmatmul.mubr.f32.gmra.mrb[96].mxu1 %v5260_v9  ;;  %11335 = vtanh.f32 %v13720_v17 }
 0xc77   :  { %5358 = vmatprep.mubr.f32.mxu0 %v14408_v60  ;;  %5447 = vmatprep.mubr.f32.mxu1 %v14408_v60 }
 0xc78   :  { %9463 = vmatprep.subr.bf16.mxu0 %v12358_v43  ;;  %9495 = vmatprep.subr.bf16.mxu1 %v12400_v57 }
 0xc79   :  { %9465 = vmatpush1.bf16.msra.mxu0 %v12366_v47  ;;  %9497 = vmatpush1.bf16.msra.mxu1 %v12405_v59 }
 0xc7a   :  { %v11332_v5 = vpop.eup %11331  ;;  %9467 = vmatprep.subr.bf16.mxu0 %v12467_v12  ;;  %9499 = vmatprep.subr.bf16.mxu1 %v12506_v25 }
 0xc7b   :  { %v5261_v48 = vmul.f32 %v11332_v5, %v11330_v28  ;;  %v11334_v13 = vpop.eup %11333 }
 0xc7d   :  { %5359 = vmatmul.mubr.f32.gmra.mrb[92].mxu0 %v5261_v48  ;;  %5448 = vmatmul.mubr.f32.gmra.mrb[98].mxu1 %v5261_v48 }
 0xc7e   :  { %5364 = vmatprep.mubr.f32.mxu0 %v14408_v60  ;;  %5453 = vmatprep.mubr.f32.mxu1 %v14408_v60 }
 0xc7f   :  { %9469 = vmatpush1.bf16.msra.mxu0 %v12472_v15  ;;  %9501 = vmatpush1.bf16.msra.mxu1 %v12511_v30 }
 0xc80   :  { %9471 = vmatprep.subr.bf16.mxu0 %v12563_v44  ;;  %9503 = vmatprep.subr.bf16.mxu1 %v12613_v63  ;;  %v11336_v55 = vpop.eup %11335 }
 0xc81   :  { %v5262_v41 = vmul.f32 %v11336_v55, %v11334_v13 }
 0xc83   :  { %9473 = vmatpush1.bf16.msra.mxu0 %v12578_v50  ;;  %9505 = vmatpush1.bf16.msra.mxu1 %v12618_v4 }
 0xc84   :  { %5365 = vmatmul.mubr.f32.gmra.mrb[94].mxu0 %v5262_v41  ;;  %5454 = vmatmul.mubr.f32.gmra.mrb[100].mxu1 %v5262_v41 }
 0xc85   :  { %5655 = vmatprep.mubr.f32.mxu0 %v14408_v60  ;;  %5744 = vmatprep.mubr.f32.mxu1 %v14408_v60 }
 0xc86   :  { %9507 = vmatprep.subr.bf16.mxu0 %v12040_v19  ;;  %9539 = vmatprep.subr.bf16.mxu1 %v12064_v26 }
 0xd36   :  { %v5348_v16 = vpop.f32.mrb[88].mxu0  ;;  %v5437_v45 = vpop.f32.mrb[94].mxu1 }
 0xd37   :  { %v10076_v23 = vadd.f32 %v5348_v16, %v14410_v33  ;;  %v5350_v35 = vpop.f32.mrb[89].mxu0  ;;  %v5439_v61 = vpop.f32.mrb[95].mxu1  ;;  %v10242_v2 = vadd.f32 %v5437_v45, %v12961_v6 }
 0xd38   :  { %v10077_v34 = vadd.f32 %v5350_v35, %v12951_v51  ;;  %v10243_v21 = vadd.f32 %v5439_v61, %v12963_v10 }
 0xd39   :  { %v8495_v24 = vmul.f32 -1.442695, %v10076_v23  ;;  %v8497_v56 = vmul.f32 -1.442695, %v10242_v2 }
 0xd3a   :  { %v8496_v7 = vmul.f32 -1.442695, %v10077_v34 }
 0xd3b   :  { %11337 = vpow2.f32 %v8495_v24 }
 0xd3c   :  { %11339 = vpow2.f32 %v8496_v7 }
 0xd3d   :  { %11341 = vpow2.f32 %v8497_v56 }
 0xd3e   :  { %11343 = vtanh.f32 %v10243_v21 }
 0xd45   :  { %v11338_v37 = vpop.eup %11337 }
 0xd46   :  { %v5512_v38 = vadd.f32 1.0, %v11338_v37  ;;  %v11340_v39 = vpop.eup %11339 }
 0xd47   :  { %v5513_v58 = vadd.f32 1.0, %v11340_v39  ;;  %v11342_v16 = vpop.eup %11341 }
 0xd48   :  { %11345 = vrcp.f32 %v5512_v38  ;;  %v11344_v35 = vpop.eup %11343  ;;  %v5514_v2 = vadd.f32 1.0, %v11342_v16 }
 0xd49   :  { %v5354_v11 = vpop.f32.mrb[90].mxu0  ;;  %v5443_v9 = vpop.f32.mrb[96].mxu1  ;;  %11347 = vrcp.f32 %v5513_v58 }
 0xd4a   :  { %v10078_v28 = vadd.f32 %v5354_v11, %v14410_v33  ;;  %v5356_v5 = vpop.f32.mrb[91].mxu0  ;;  %v5445_v48 = vpop.f32.mrb[97].mxu1  ;;  %v10244_v56 = vadd.f32 %v5443_v9, %v12961_v6 }
 0xd4b   :  { %v10079_v13 = vadd.f32 %v5356_v5, %v12951_v51  ;;  %v10245_v58 = vadd.f32 %v5445_v48, %v12963_v10 }
 0xd4c   :  { %v8498_v55 = vmul.f32 -1.442695, %v10078_v28  ;;  %v8500_v5 = vmul.f32 -1.442695, %v10244_v56 }
 0xd4d   :  { %v8499_v41 = vmul.f32 -1.442695, %v10079_v13 }
 0xd4e   :  { %11349 = vpow2.f32 %v8498_v55 }
 0xd4f   :  { %11351 = vpow2.f32 %v8499_v41 }
 0xd50   :  { %v5360_v45 = vpop.f32.mrb[92].mxu0  ;;  %v5449_v23 = vpop.f32.mrb[98].mxu1 }
 0xd51   :  { %v10080_v61 = vadd.f32 %v5360_v45, %v14410_v33  ;;  %v5362_v34 = vpop.f32.mrb[93].mxu0  ;;  %v5451_v24 = vpop.f32.mrb[99].mxu1 }
 0xd52   :  { %v11346_v7 = vpop.eup %11345  ;;  %v10081_v21 = vadd.f32 %v5362_v34, %v12951_v51  ;;  %v10247_v56 = vadd.f32 %v5451_v24, %v12963_v10 }
 0xd53   :  { %v5556_v37 = vmul.f32 %v11346_v7, %v11344_v35  ;;  %v8501_v38 = vmul.f32 -1.442695, %v10080_v61  ;;  %v11348_v39 = vpop.eup %11347  ;;  %v10246_v61 = vadd.f32 %v5449_v23, %v12961_v6 }
 0xd54   :  { %v8502_v11 = vmul.f32 -1.442695, %v10081_v21  ;;  %v5552_v28 = vmul.f32 %v11348_v39, %v13684_v31 }
 0xd55   :  { %11353 = vpow2.f32 %v8501_v38 }
 0xd56   :  { %11355 = vrcp.f32 %v5514_v2  ;;  %v13756_v13 = vadd.f32 %v5556_v37, %v5552_v28  ;;  %v8503_v37 = vmul.f32 -1.442695, %v10246_v61 }
 0xd57   :  { %11357 = vpow2.f32 %v8502_v11  ;;  %v5366_v55 = vpop.f32.mrb[94].mxu0  ;;  %v5455_v41 = vpop.f32.mrb[100].mxu1 }
 0xd58   :  { %v11350_v16 = vpop.eup %11349  ;;  %11359 = vtanh.f32 %v10245_v58  ;;  %v10082_v9 = vadd.f32 %v5366_v55, %v14410_v33  ;;  %v5368_v45 = vpop.f32.mrb[95].mxu0  ;;  %v10248_v23 = vadd.f32 %v5455_v41, %v12961_v6 }
 0xd59   :  { %v5457_v35 = vpop.f32.mrb[101].mxu1  ;;  %11361 = vtanh.f32 %v13756_v13  ;;  %v5515_v48 = vadd.f32 1.0, %v11350_v16  ;;  %v10083_v31 = vadd.f32 %v5368_v45, %v12951_v51  ;;  %v11352_v34 = vpop.eup %11351 }
 0xd5a   :  { %11363 = vpow2.f32 %v8500_v5  ;;  %v8504_v7 = vmul.f32 -1.442695, %v10082_v9  ;;  %v5516_v2 = vadd.f32 1.0, %v11352_v34  ;;  %v8506_v45 = vmul.f32 -1.442695, %v10248_v23 }
 0xd5b   :  { %11365 = vrcp.f32 %v5515_v48  ;;  %v8505_v21 = vmul.f32 -1.442695, %v10083_v31  ;;  %v10249_v61 = vadd.f32 %v5457_v35, %v12963_v10 }
 0xd5c   :  { %11367 = vrcp.f32 %v5516_v2 }
 0xd5d   :  { %11369 = vpow2.f32 %v8504_v7 }
 0xd5e   :  { %11371 = vtanh.f32 %v10247_v56 }
 0xd5f   :  { %v11354_v38 = vpop.eup %11353  ;;  %11373 = vpow2.f32 %v8505_v21 }
 0xd60   :  { %v11356_v39 = vpop.eup %11355  ;;  %v5518_v58 = vadd.f32 1.0, %v11354_v38  ;;  %11375 = vpow2.f32 %v8503_v37 }
 0xd61   :  { %v11358_v11 = vpop.eup %11357 }
 0xd62   :  { %v11360_v28 = vpop.eup %11359  ;;  %11377 = vrcp.f32 %v5518_v58  ;;  %v5519_v5 = vadd.f32 1.0, %v11358_v11 }
 0xd63   :  { %v11362_v55 = vpop.eup %11361 }
 0xd64   :  { %v11364_v16 = vpop.eup %11363  ;;  %11379 = vrcp.f32 %v5519_v5  ;;  %v5568_v24 = vmul.f32 %v11362_v55, %v11356_v39 }
 0xd65   :  { %v11366_v9 = vpop.eup %11365  ;;  %v5517_v34 = vadd.f32 1.0, %v11364_v16  ;;  %11381 = vpow2.f32 %v8506_v45 }
 0xd66   :  { %v5557_v48 = vmul.f32 %v11366_v9, %v11360_v28  ;;  %5656 = vmatmul.mubr.f32.vlgmr.msra.gmra.mrb[96].mxu0 %v5568_v24  ;;  %5745 = vmatmul.mubr.f32.vlgmr.msra.gmra.mrb[102].mxu1 %v5568_v24  ;;  %v11368_v31 = vpop.eup %11367  ;;  %11383 = vtanh.f32 %v10249_v61 }
 0xd67   :  { %5661 = vmatprep.mubr.f32.mxu0 %v14408_v60  ;;  %5750 = vmatprep.mubr.f32.mxu1 %v14408_v60  ;;  %v11370_v41 = vpop.eup %11369  ;;  %v5553_v7 = vmul.f32 %v11368_v31, %v13696_v49 }
 0xd68   :  { %9509 = vmatpush1.bf16.msra.mxu0 %v12050_v22  ;;  %9541 = vmatpush1.bf16.msra.mxu1 %v12116_v40  ;;  %v11372_v2 = vpop.eup %11371  ;;  %v5521_v56 = vadd.f32 1.0, %v11370_v41 }
 0xd69   :  { %9511 = vmatprep.subr.bf16.mxu0 %v12089_v32  ;;  %9543 = vmatprep.subr.bf16.mxu1 %v12122_v42  ;;  %v11374_v35 = vpop.eup %11373  ;;  %v13772_v21 = vadd.f32 %v5557_v48, %v5553_v7 }
 0xd6a   :  { %v11376_v37 = vpop.eup %11375  ;;  %11385 = vrcp.f32 %v5521_v56  ;;  %v5522_v38 = vadd.f32 1.0, %v11374_v35 }
 0xd6b   :  { %11387 = vrcp.f32 %v5517_v34  ;;  %v5520_v11 = vadd.f32 1.0, %v11376_v37 }
 0xd6c   :  { %v11378_v39 = vpop.eup %11377  ;;  %9513 = vmatpush1.bf16.msra.mxu0 %v12100_v36  ;;  %9545 = vmatpush1.bf16.msra.mxu1 %v12156_v52  ;;  %11389 = vrcp.f32 %v5522_v38 }
 0xd6d   :  { %v5558_v49 = vmul.f32 %v11378_v39, %v11372_v2  ;;  %9515 = vmatprep.subr.bf16.mxu0 %v12133_v46  ;;  %9547 = vmatprep.subr.bf16.mxu1 %v12161_v54  ;;  %11391 = vtanh.f32 %v13772_v21 }
 0xd6e   :  { %v11380_v58 = vpop.eup %11379  ;;  %11393 = vrcp.f32 %v5520_v11 }
 0xd6f   :  { %v5554_v23 = vmul.f32 %v11380_v58, %v13710_v20  ;;  %v11382_v5 = vpop.eup %11381 }
 0xd70   :  { %9517 = vmatpush1.bf16.msra.mxu0 %v12158_v53  ;;  %9549 = vmatpush1.bf16.msra.mxu1 %v12195_v0  ;;  %v11384_v55 = vpop.eup %11383  ;;  %v5523_v45 = vadd.f32 1.0, %v11382_v5 }
 0xd71   :  { %v13782_v28 = vadd.f32 %v5558_v49, %v5554_v23  ;;  %9519 = vmatprep.subr.bf16.mxu0 %v12188_v62  ;;  %9551 = vmatprep.subr.bf16.mxu1 %v12204_v3 }
 0xd73   :  { %11395 = vtanh.f32 %v13782_v28 }
 0xd74   :  { %9521 = vmatpush1.bf16.msra.mxu0 %v12197_v1  ;;  %9553 = vmatpush1.bf16.msra.mxu1 %v12221_v8  ;;  %v11386_v20 = vpop.eup %11385  ;;  %11397 = vrcp.f32 %v5523_v45 }
 0xd75   :  { %9523 = vmatprep.subr.bf16.mxu0 %v12252_v14  ;;  %9555 = vmatprep.subr.bf16.mxu1 %v12294_v27  ;;  %v11388_v16 = vpop.eup %11387  ;;  %v5559_v24 = vmul.f32 %v11386_v20, %v11384_v55 }
 0xd76   :  { %v11390_v9 = vpop.eup %11389 }
 0xd77   :  { %v11392_v48 = vpop.eup %11391  ;;  %v5555_v61 = vmul.f32 %v11390_v9, %v13720_v17 }
 0xd78   :  { %9525 = vmatpush1.bf16.msra.mxu0 %v12267_v18  ;;  %9557 = vmatpush1.bf16.msra.mxu1 %v12299_v29  ;;  %v5569_v31 = vmul.f32 %v11392_v48, %v11388_v16  ;;  %v11394_v34 = vpop.eup %11393 }
 0xd79   :  { %9527 = vmatprep.subr.bf16.mxu0 %v12358_v43  ;;  %9559 = vmatprep.subr.bf16.mxu1 %v12400_v57  ;;  %v13796_v41 = vadd.f32 %v5559_v24, %v5555_v61 }
 0xd7a   :  { %5662 = vmatmul.mubr.f32.gmra.mrb[98].mxu0 %v5569_v31  ;;  %5751 = vmatmul.mubr.f32.gmra.mrb[104].mxu1 %v5569_v31 }
 0xd7b   :  { %5667 = vmatprep.mubr.f32.mxu0 %v14408_v60  ;;  %5756 = vmatprep.mubr.f32.mxu1 %v14408_v60  ;;  %11399 = vtanh.f32 %v13796_v41 }
 0xd7c   :  { %9529 = vmatpush1.bf16.msra.mxu0 %v12366_v47  ;;  %9561 = vmatpush1.bf16.msra.mxu1 %v12405_v59 }
 0xd7d   :  { %v11396_v17 = vpop.eup %11395  ;;  %9531 = vmatprep.subr.bf16.mxu0 %v12467_v12  ;;  %9563 = vmatprep.subr.bf16.mxu1 %v12506_v25 }
 0xd7e   :  { %v5570_v7 = vmul.f32 %v11396_v17, %v11394_v34  ;;  %v11398_v2 = vpop.eup %11397 }
 0xd80   :  { %5668 = vmatmul.mubr.f32.gmra.mrb[100].mxu0 %v5570_v7  ;;  %5757 = vmatmul.mubr.f32.gmra.mrb[106].mxu1 %v5570_v7 }
 0xd81   :  { %5673 = vmatprep.mubr.f32.mxu0 %v14408_v60  ;;  %5762 = vmatprep.mubr.f32.mxu1 %v14408_v60 }
 0xd82   :  { %9533 = vmatpush1.bf16.msra.mxu0 %v12472_v15  ;;  %9565 = vmatpush1.bf16.msra.mxu1 %v12511_v30 }
 0xd83   :  { %9535 = vmatprep.subr.bf16.mxu0 %v12563_v44  ;;  %9567 = vmatprep.subr.bf16.mxu1 %v12613_v63 }
 0xd85   :  { %v11400_v56 = vpop.eup %11399 }
 0xd86   :  { %9537 = vmatpush1.bf16.msra.mxu0 %v12578_v50  ;;  %9569 = vmatpush1.bf16.msra.mxu1 %v12618_v4  ;;  %v5571_v35 = vmul.f32 %v11400_v56, %v11398_v2 }
 0xd87   :  { %9571 = vmatprep.subr.bf16.mxu0 %v12040_v19  ;;  %9603 = vmatprep.subr.bf16.mxu1 %v12064_v26 }
 0xd88   :  { %5674 = vmatmul.mubr.f32.gmra.mrb[102].mxu0 %v5571_v35  ;;  %5763 = vmatmul.mubr.f32.gmra.mrb[108].mxu1 %v5571_v35 }
 0xd89   :  { %5964 = vmatprep.mubr.f32.mxu0 %v14408_v60  ;;  %6053 = vmatprep.mubr.f32.mxu1 %v14408_v60 }
 0xe39   :  { %v5657_v37 = vpop.f32.mrb[96].mxu0  ;;  %v5746_v38 = vpop.f32.mrb[102].mxu1 }
 0xe3a   :  { %v10084_v39 = vadd.f32 %v5657_v37, %v14410_v33  ;;  %v5659_v49 = vpop.f32.mrb[97].mxu0  ;;  %v5748_v58 = vpop.f32.mrb[103].mxu1  ;;  %v10250_v55 = vadd.f32 %v5746_v38, %v12961_v6 }
 0xe3b   :  { %v10085_v11 = vadd.f32 %v5659_v49, %v12951_v51  ;;  %v10251_v20 = vadd.f32 %v5748_v58, %v12963_v10 }
 0xe3c   :  { %v8507_v23 = vmul.f32 -1.442695, %v10084_v39  ;;  %v8509_v16 = vmul.f32 -1.442695, %v10250_v55 }
 0xe3d   :  { %v8508_v5 = vmul.f32 -1.442695, %v10085_v11 }
 0xe3e   :  { %11401 = vpow2.f32 %v8507_v23 }
 0xe3f   :  { %11403 = vpow2.f32 %v8508_v5 }
 0xe40   :  { %11405 = vtanh.f32 %v10251_v20 }
 0xe41   :  { %11407 = vpow2.f32 %v8509_v16 }
 0xe48   :  { %v11402_v24 = vpop.eup %11401 }
 0xe49   :  { %v5821_v9 = vadd.f32 1.0, %v11402_v24  ;;  %v11404_v45 = vpop.eup %11403 }
 0xe4a   :  { %v5822_v48 = vadd.f32 1.0, %v11404_v45  ;;  %v11406_v37 = vpop.eup %11405 }
 0xe4b   :  { %11409 = vrcp.f32 %v5821_v9  ;;  %v11408_v49 = vpop.eup %11407 }
 0xe4c   :  { %11411 = vrcp.f32 %v5822_v48  ;;  %v5823_v45 = vadd.f32 1.0, %v11408_v49 }
 0xe4d   :  { %v5663_v61 = vpop.f32.mrb[98].mxu0  ;;  %v5752_v31 = vpop.f32.mrb[104].mxu1 }
 0xe4e   :  { %v10086_v34 = vadd.f32 %v5663_v61, %v14410_v33  ;;  %v5665_v17 = vpop.f32.mrb[99].mxu0  ;;  %v5754_v7 = vpop.f32.mrb[105].mxu1  ;;  %v10252_v55 = vadd.f32 %v5752_v31, %v12961_v6 }
 0xe4f   :  { %v10087_v2 = vadd.f32 %v5665_v17, %v12951_v51  ;;  %v10253_v31 = vadd.f32 %v5754_v7, %v12963_v10 }
 0xe50   :  { %v8510_v56 = vmul.f32 -1.442695, %v10086_v34  ;;  %v8512_v34 = vmul.f32 -1.442695, %v10252_v55 }
 0xe51   :  { %v8511_v35 = vmul.f32 -1.442695, %v10087_v2 }
 0xe52   :  { %11413 = vpow2.f32 %v8510_v56 }
 0xe53   :  { %v5669_v38 = vpop.f32.mrb[100].mxu0  ;;  %v5758_v39 = vpop.f32.mrb[106].mxu1  ;;  %11415 = vpow2.f32 %v8511_v35 }
 0xe54   :  { %v10088_v58 = vadd.f32 %v5669_v38, %v14410_v33  ;;  %v5671_v11 = vpop.f32.mrb[101].mxu0  ;;  %v5760_v23 = vpop.f32.mrb[107].mxu1  ;;  %v10254_v17 = vadd.f32 %v5758_v39, %v12961_v6 }
 0xe55   :  { %v11410_v5 = vpop.eup %11409  ;;  %v10089_v20 = vadd.f32 %v5671_v11, %v12951_v51 }
 0xe56   :  { %v5865_v16 = vmul.f32 %v11410_v5, %v11406_v37  ;;  %v8513_v24 = vmul.f32 -1.442695, %v10088_v58  ;;  %v11412_v9 = vpop.eup %11411  ;;  %v8515_v38 = vmul.f32 -1.442695, %v10254_v17 }
 0xe57   :  { %v8514_v48 = vmul.f32 -1.442695, %v10089_v20  ;;  %v5861_v61 = vmul.f32 %v11412_v9, %v13756_v13  ;;  %v10255_v20 = vadd.f32 %v5760_v23, %v12963_v10 }
 0xe58   :  { %11417 = vpow2.f32 %v8513_v24 }
 0xe59   :  { %v13828_v2 = vadd.f32 %v5865_v16, %v5861_v61  ;;  %11419 = vpow2.f32 %v8514_v48 }
 0xe5a   :  { %11421 = vrcp.f32 %v5823_v45 }
 0xe5b   :  { %11423 = vtanh.f32 %v13828_v2  ;;  %v5675_v56 = vpop.f32.mrb[102].mxu0  ;;  %v5764_v35 = vpop.f32.mrb[108].mxu1 }
 0xe5c   :  { %v11414_v37 = vpop.eup %11413  ;;  %11425 = vpow2.f32 %v8512_v34  ;;  %v10090_v49 = vadd.f32 %v5675_v56, %v14410_v33  ;;  %v5677_v13 = vpop.f32.mrb[103].mxu0  ;;  %v10256_v23 = vadd.f32 %v5764_v35, %v12961_v6 }
 0xe5d   :  { %v5766_v58 = vpop.f32.mrb[109].mxu1  ;;  %v5824_v11 = vadd.f32 1.0, %v11414_v37  ;;  %v11416_v5 = vpop.eup %11415  ;;  %11427 = vtanh.f32 %v10253_v31  ;;  %v10091_v7 = vadd.f32 %v5677_v13, %v12951_v51 }
 0xe5e   :  { %v8516_v39 = vmul.f32 -1.442695, %v10090_v49  ;;  %v5825_v55 = vadd.f32 1.0, %v11416_v5 }
 0xe5f   :  { %11429 = vrcp.f32 %v5824_v11  ;;  %v8517_v45 = vmul.f32 -1.442695, %v10091_v7  ;;  %v10257_v11 = vadd.f32 %v5766_v58, %v12963_v10 }
 0xe60   :  { %11431 = vpow2.f32 %v8515_v38 }
 0xe61   :  { %11433 = vrcp.f32 %v5825_v55  ;;  %v8518_v55 = vmul.f32 -1.442695, %v10256_v23 }
 0xe62   :  { %v11418_v16 = vpop.eup %11417  ;;  %11435 = vpow2.f32 %v8516_v39 }
 0xe63   :  { %v5827_v24 = vadd.f32 1.0, %v11418_v16  ;;  %v11420_v9 = vpop.eup %11419  ;;  %11437 = vtanh.f32 %v10255_v20 }
 0xe64   :  { %v11422_v48 = vpop.eup %11421  ;;  %v5828_v61 = vadd.f32 1.0, %v11420_v9 }
 0xe65   :  { %11439 = vrcp.f32 %v5827_v24  ;;  %v11424_v34 = vpop.eup %11423 }
 0xe66   :  { %v11426_v17 = vpop.eup %11425  ;;  %11441 = vrcp.f32 %v5828_v61  ;;  %v5877_v31 = vmul.f32 %v11424_v34, %v11422_v48 }
 0xe67   :  { %11443 = vpow2.f32 %v8517_v45  ;;  %v11428_v56 = vpop.eup %11427  ;;  %v5826_v38 = vadd.f32 1.0, %v11426_v17 }
 0xe68   :  { %5965 = vmatmul.mubr.f32.vlgmr.msra.gmra.mrb[104].mxu0 %v5877_v31  ;;  %6054 = vmatmul.mubr.f32.vlgmr.msra.gmra.mrb[110].mxu1 %v5877_v31 }
 0xe69   :  { %v11430_v37 = vpop.eup %11429  ;;  %5970 = vmatprep.mubr.f32.mxu0 %v14408_v60  ;;  %6059 = vmatprep.mubr.f32.mxu1 %v14408_v60  ;;  %11445 = vrcp.f32 %v5826_v38 }
 0xe6a   :  { %v11432_v49 = vpop.eup %11431  ;;  %v5866_v13 = vmul.f32 %v11430_v37, %v11428_v56  ;;  %9573 = vmatpush1.bf16.msra.mxu0 %v12050_v22  ;;  %9605 = vmatpush1.bf16.msra.mxu1 %v12116_v40  ;;  %11447 = vtanh.f32 %v10257_v11 }
 0xe6b   :  { %v11434_v5 = vpop.eup %11433  ;;  %9575 = vmatprep.subr.bf16.mxu0 %v12089_v32  ;;  %9607 = vmatprep.subr.bf16.mxu1 %v12122_v42  ;;  %v5829_v58 = vadd.f32 1.0, %v11432_v49 }
 0xe6c   :  { %v11436_v35 = vpop.eup %11435  ;;  %v5862_v39 = vmul.f32 %v11434_v5, %v13772_v21 }
 0xe6d   :  { %v11438_v20 = vpop.eup %11437  ;;  %v5830_v7 = vadd.f32 1.0, %v11436_v35 }
 0xe6e   :  { %v13844_v24 = vadd.f32 %v5866_v13, %v5862_v39  ;;  %9577 = vmatpush1.bf16.msra.mxu0 %v12100_v36  ;;  %9609 = vmatpush1.bf16.msra.mxu1 %v12156_v52 }
 0xe6f   :  { %v11440_v16 = vpop.eup %11439  ;;  %11449 = vrcp.f32 %v5830_v7  ;;  %9579 = vmatprep.subr.bf16.mxu0 %v12133_v46  ;;  %9611 = vmatprep.subr.bf16.mxu1 %v12161_v54 }
 0xe70   :  { %v5867_v9 = vmul.f32 %v11440_v16, %v11438_v20  ;;  %v11442_v21 = vpop.eup %11441  ;;  %11451 = vpow2.f32 %v8518_v55 }
 0xe71   :  { %v11444_v45 = vpop.eup %11443  ;;  %v5863_v48 = vmul.f32 %v11442_v21, %v13782_v28  ;;  %11453 = vtanh.f32 %v13844_v24 }
 0xe72   :  { %v5831_v61 = vadd.f32 1.0, %v11444_v45  ;;  %9581 = vmatpush1.bf16.msra.mxu0 %v12158_v53  ;;  %9613 = vmatpush1.bf16.msra.mxu1 %v12195_v0  ;;  %11455 = vrcp.f32 %v5829_v58 }
 0xe73   :  { %v13854_v34 = vadd.f32 %v5867_v9, %v5863_v48  ;;  %9583 = vmatprep.subr.bf16.mxu0 %v12188_v62  ;;  %9615 = vmatprep.subr.bf16.mxu1 %v12204_v3  ;;  %v11446_v28 = vpop.eup %11445 }
 0xe74   :  { %11457 = vrcp.f32 %v5831_v61  ;;  %v11448_v17 = vpop.eup %11447 }
 0xe75   :  { %11459 = vtanh.f32 %v13854_v34 }
 0xe76   :  { %9585 = vmatpush1.bf16.msra.mxu0 %v12197_v1  ;;  %9617 = vmatpush1.bf16.msra.mxu1 %v12221_v8 }
 0xe77   :  { %9587 = vmatprep.subr.bf16.mxu0 %v12252_v14  ;;  %9619 = vmatprep.subr.bf16.mxu1 %v12294_v27 }
 0xe79   :  { %v11450_v31 = vpop.eup %11449 }
 0xe7a   :  { %v11452_v56 = vpop.eup %11451  ;;  %v5868_v23 = vmul.f32 %v11450_v31, %v11448_v17  ;;  %9589 = vmatpush1.bf16.msra.mxu0 %v12267_v18  ;;  %9621 = vmatpush1.bf16.msra.mxu1 %v12299_v29 }
 0xe7b   :  { %v11454_v37 = vpop.eup %11453  ;;  %9591 = vmatprep.subr.bf16.mxu0 %v12358_v43  ;;  %9623 = vmatprep.subr.bf16.mxu1 %v12400_v57  ;;  %v5832_v11 = vadd.f32 1.0, %v11452_v56 }
 0xe7c   :  { %v5878_v38 = vmul.f32 %v11454_v37, %v11446_v28  ;;  %v11456_v49 = vpop.eup %11455 }
 0xe7d   :  { %11461 = vrcp.f32 %v5832_v11 }
 0xe7e   :  { %v11458_v13 = vpop.eup %11457  ;;  %5971 = vmatmul.mubr.f32.gmra.mrb[106].mxu0 %v5878_v38  ;;  %6060 = vmatmul.mubr.f32.gmra.mrb[112].mxu1 %v5878_v38 }
 0xe7f   :  { %v11460_v5 = vpop.eup %11459  ;;  %v5864_v35 = vmul.f32 %v11458_v13, %v13796_v41  ;;  %5976 = vmatprep.mubr.f32.mxu0 %v14408_v60  ;;  %6065 = vmatprep.mubr.f32.mxu1 %v14408_v60 }
 0xe80   :  { %v5879_v39 = vmul.f32 %v11460_v5, %v11456_v49  ;;  %9593 = vmatpush1.bf16.msra.mxu0 %v12366_v47  ;;  %9625 = vmatpush1.bf16.msra.mxu1 %v12405_v59 }
 0xe81   :  { %v13872_v55 = vadd.f32 %v5868_v23, %v5864_v35  ;;  %9595 = vmatprep.subr.bf16.mxu0 %v12467_v12  ;;  %9627 = vmatprep.subr.bf16.mxu1 %v12506_v25 }
 0xe82   :  { %5977 = vmatmul.mubr.f32.gmra.mrb[108].mxu0 %v5879_v39  ;;  %6066 = vmatmul.mubr.f32.gmra.mrb[114].mxu1 %v5879_v39 }
 0xe83   :  { %5982 = vmatprep.mubr.f32.mxu0 %v14408_v60  ;;  %6071 = vmatprep.mubr.f32.mxu1 %v14408_v60  ;;  %11463 = vtanh.f32 %v13872_v55 }
 0xe84   :  { %9597 = vmatpush1.bf16.msra.mxu0 %v12472_v15  ;;  %9629 = vmatpush1.bf16.msra.mxu1 %v12511_v30 }
 0xe85   :  { %9599 = vmatprep.subr.bf16.mxu0 %v12563_v44  ;;  %9631 = vmatprep.subr.bf16.mxu1 %v12613_v63 }
 0xe87   :  { %v11462_v41 = vpop.eup %11461 }
 0xe88   :  { %9601 = vmatpush1.bf16.msra.mxu0 %v12578_v50  ;;  %9633 = vmatpush1.bf16.msra.mxu1 %v12618_v4 }
 0xe89   :  { %9635 = vmatprep.subr.bf16.mxu0 %v12040_v19  ;;  %9667 = vmatprep.subr.bf16.mxu1 %v12064_v26 }
 0xe8d   :  { %v11464_v20 = vpop.eup %11463 }
 0xe8e   :  { %v5880_v7 = vmul.f32 %v11464_v20, %v11462_v41 }
 0xe90   :  { %5983 = vmatmul.mubr.f32.gmra.mrb[110].mxu0 %v5880_v7  ;;  %6072 = vmatmul.mubr.f32.gmra.mrb[116].mxu1 %v5880_v7 }
 0xe91   :  { %6273 = vmatprep.mubr.f32.mxu0 %v14408_v60  ;;  %6362 = vmatprep.mubr.f32.mxu1 %v14408_v60 }
 0xf3b   :  { %v5966_v16 = vpop.f32.mrb[104].mxu0  ;;  %v6055_v58 = vpop.f32.mrb[110].mxu1 }
 0xf3c   :  { %v10092_v9 = vadd.f32 %v5966_v16, %v14410_v33  ;;  %v5968_v21 = vpop.f32.mrb[105].mxu0  ;;  %v6057_v45 = vpop.f32.mrb[111].mxu1  ;;  %v10258_v17 = vadd.f32 %v6055_v58, %v12961_v6 }
 0xf3d   :  { %v10093_v48 = vadd.f32 %v5968_v21, %v12951_v51  ;;  %v10259_v31 = vadd.f32 %v6057_v45, %v12963_v10 }
 0xf3e   :  { %v8519_v61 = vmul.f32 -1.442695, %v10092_v9  ;;  %v8521_v56 = vmul.f32 -1.442695, %v10258_v17 }
 0xf3f   :  { %v8520_v28 = vmul.f32 -1.442695, %v10093_v48 }
 0xf40   :  { %11465 = vpow2.f32 %v8519_v61 }
 0xf41   :  { %11467 = vpow2.f32 %v8520_v28 }
 0xf42   :  { %11469 = vtanh.f32 %v10259_v31 }
 0xf43   :  { %11471 = vpow2.f32 %v8521_v56 }
 0xf4a   :  { %v11466_v23 = vpop.eup %11465 }
 0xf4b   :  { %v6130_v37 = vadd.f32 1.0, %v11466_v23  ;;  %v11468_v38 = vpop.eup %11467 }
 0xf4c   :  { %v6131_v49 = vadd.f32 1.0, %v11468_v38  ;;  %v11470_v7 = vpop.eup %11469 }
 0xf4d   :  { %11473 = vrcp.f32 %v6130_v37  ;;  %v11472_v21 = vpop.eup %11471 }
 0xf4e   :  { %11475 = vrcp.f32 %v6131_v49  ;;  %v6132_v37 = vadd.f32 1.0, %v11472_v21 }
 0xf51   :  { %v5972_v13 = vpop.f32.mrb[106].mxu0  ;;  %v6061_v11 = vpop.f32.mrb[112].mxu1 }
 0xf52   :  { %v10094_v5 = vadd.f32 %v5972_v13, %v14410_v33  ;;  %v5974_v35 = vpop.f32.mrb[107].mxu0  ;;  %v6063_v39 = vpop.f32.mrb[113].mxu1  ;;  %v10260_v13 = vadd.f32 %v6061_v11, %v12961_v6 }
 0xf53   :  { %v10095_v41 = vadd.f32 %v5974_v35, %v12951_v51  ;;  %v10261_v35 = vadd.f32 %v6063_v39, %v12963_v10 }
 0xf54   :  { %v8522_v20 = vmul.f32 -1.442695, %v10094_v5 }
 0xf55   :  { %v8523_v16 = vmul.f32 -1.442695, %v10095_v41  ;;  %v5978_v58 = vpop.f32.mrb[108].mxu0  ;;  %v6067_v9 = vpop.f32.mrb[114].mxu1  ;;  %v8524_v41 = vmul.f32 -1.442695, %v10260_v13 }
 0xf56   :  { %11477 = vpow2.f32 %v8522_v20  ;;  %v10096_v45 = vadd.f32 %v5978_v58, %v14410_v33  ;;  %v5980_v48 = vpop.f32.mrb[109].mxu0  ;;  %v6069_v61 = vpop.f32.mrb[115].mxu1  ;;  %v10262_v20 = vadd.f32 %v6067_v9, %v12961_v6 }
 0xf57   :  { %v11474_v28 = vpop.eup %11473  ;;  %v10097_v17 = vadd.f32 %v5980_v48, %v12951_v51  ;;  %11479 = vpow2.f32 %v8523_v16  ;;  %v10263_v16 = vadd.f32 %v6069_v61, %v12963_v10 }
 0xf58   :  { %v6174_v31 = vmul.f32 %v11474_v28, %v11470_v7  ;;  %v8525_v56 = vmul.f32 -1.442695, %v10096_v45  ;;  %v11476_v23 = vpop.eup %11475  ;;  %v8527_v11 = vmul.f32 -1.442695, %v10262_v20 }
 0xf59   :  { %v8526_v38 = vmul.f32 -1.442695, %v10097_v17  ;;  %v6170_v49 = vmul.f32 %v11476_v23, %v13828_v2 }
 0xf5a   :  { %11481 = vpow2.f32 %v8525_v56 }
 0xf5b   :  { %v13899_v5 = vadd.f32 %v6174_v31, %v6170_v49  ;;  %11483 = vpow2.f32 %v8526_v38 }
 0xf5c   :  { %11485 = vrcp.f32 %v6132_v37 }
 0xf5d   :  { %11487 = vtanh.f32 %v13899_v5 }
 0xf5e   :  { %11489 = vtanh.f32 %v10261_v35 }
 0xf5f   :  { %11491 = vpow2.f32 %v8524_v41 }
 0xf60   :  { %v11478_v7 = vpop.eup %11477 }
 0xf61   :  { %v6133_v58 = vadd.f32 1.0, %v11478_v7  ;;  %v11480_v2 = vpop.eup %11479 }
 0xf62   :  { %v6134_v21 = vadd.f32 1.0, %v11480_v2 }
 0xf63   :  { %11493 = vrcp.f32 %v6133_v58  ;;  %v5984_v45 = vpop.f32.mrb[110].mxu0  ;;  %v6073_v48 = vpop.f32.mrb[116].mxu1 }
 0xf64   :  { %v11482_v28 = vpop.eup %11481  ;;  %11495 = vtanh.f32 %v10263_v16  ;;  %v10098_v39 = vadd.f32 %v5984_v45, %v14410_v33  ;;  %v5986_v17 = vpop.f32.mrb[111].mxu0  ;;  %v10264_v16 = vadd.f32 %v6073_v48, %v12961_v6 }
 0xf65   :  { %v6075_v31 = vpop.f32.mrb[117].mxu1  ;;  %11497 = vrcp.f32 %v6134_v21  ;;  %v6136_v9 = vadd.f32 1.0, %v11482_v28  ;;  %v10099_v56 = vadd.f32 %v5986_v17, %v12951_v51  ;;  %v11484_v61 = vpop.eup %11483 }
 0xf66   :  { %11499 = vpow2.f32 %v8527_v11  ;;  %v8528_v23 = vmul.f32 -1.442695, %v10098_v39  ;;  %v11486_v37 = vpop.eup %11485  ;;  %v6137_v38 = vadd.f32 1.0, %v11484_v61  ;;  %v8530_v17 = vmul.f32 -1.442695, %v10264_v16 }
 0xf67   :  { %11501 = vrcp.f32 %v6136_v9  ;;  %v11488_v49 = vpop.eup %11487  ;;  %v8529_v13 = vmul.f32 -1.442695, %v10099_v56  ;;  %v10265_v56 = vadd.f32 %v6075_v31, %v12963_v10 }
 0xf68   :  { %11503 = vrcp.f32 %v6137_v38  ;;  %v6186_v35 = vmul.f32 %v11488_v49, %v11486_v37  ;;  %v11490_v41 = vpop.eup %11489 }
 0xf69   :  { %11505 = vpow2.f32 %v8528_v23  ;;  %v11492_v20 = vpop.eup %11491 }
 0xf6a   :  { %6274 = vmatmul.mubr.f32.vlgmr.msra.gmra.mrb[112].mxu0 %v6186_v35  ;;  %6363 = vmatmul.mubr.f32.vlgmr.msra.gmra.mrb[118].mxu1 %v6186_v35  ;;  %11507 = vpow2.f32 %v8529_v13  ;;  %v6135_v21 = vadd.f32 1.0, %v11492_v20 }
 0xf6b   :  { %6279 = vmatprep.mubr.f32.mxu0 %v14408_v60  ;;  %6368 = vmatprep.mubr.f32.mxu1 %v14408_v60 }
 0xf6c   :  { %9637 = vmatpush1.bf16.msra.mxu0 %v12050_v22  ;;  %9669 = vmatpush1.bf16.msra.mxu1 %v12116_v40  ;;  %11509 = vrcp.f32 %v6135_v21 }
 0xf6d   :  { %v11494_v7 = vpop.eup %11493  ;;  %9639 = vmatprep.subr.bf16.mxu0 %v12089_v32  ;;  %9671 = vmatprep.subr.bf16.mxu1 %v12122_v42 }
 0xf6e   :  { %v11496_v58 = vpop.eup %11495  ;;  %v6175_v2 = vmul.f32 %v11494_v7, %v11490_v41 }
 0xf6f   :  { %v11498_v11 = vpop.eup %11497 }
 0xf70   :  { %v11500_v45 = vpop.eup %11499  ;;  %v6171_v28 = vmul.f32 %v11498_v11, %v13844_v24  ;;  %9641 = vmatpush1.bf16.msra.mxu0 %v12100_v36  ;;  %9673 = vmatpush1.bf16.msra.mxu1 %v12156_v52 }
 0xf71   :  { %v11502_v39 = vpop.eup %11501  ;;  %9643 = vmatprep.subr.bf16.mxu0 %v12133_v46  ;;  %9675 = vmatprep.subr.bf16.mxu1 %v12161_v54  ;;  %v6138_v37 = vadd.f32 1.0, %v11500_v45 }
 0xf72   :  { %v13917_v48 = vadd.f32 %v6175_v2, %v6171_v28  ;;  %v6176_v9 = vmul.f32 %v11502_v39, %v11496_v58  ;;  %v11504_v61 = vpop.eup %11503 }
 0xf73   :  { %v11506_v23 = vpop.eup %11505  ;;  %v6172_v24 = vmul.f32 %v11504_v61, %v13854_v34 }
 0xf74   :  { %11511 = vtanh.f32 %v13917_v48  ;;  %v6139_v38 = vadd.f32 1.0, %v11506_v23  ;;  %9645 = vmatpush1.bf16.msra.mxu0 %v12158_v53  ;;  %9677 = vmatpush1.bf16.msra.mxu1 %v12195_v0  ;;  %v11508_v49 = vpop.eup %11507 }
 0xf75   :  { %11513 = vpow2.f32 %v8530_v17  ;;  %v13926_v31 = vadd.f32 %v6176_v9, %v6172_v24  ;;  %9647 = vmatprep.subr.bf16.mxu0 %v12188_v62  ;;  %9679 = vmatprep.subr.bf16.mxu1 %v12204_v3  ;;  %v6140_v13 = vadd.f32 1.0, %v11508_v49 }
 0xf76   :  { %11515 = vtanh.f32 %v10265_v56  ;;  %v11510_v34 = vpop.eup %11509 }
 0xf77   :  { %11517 = vrcp.f32 %v6139_v38 }
 0xf78   :  { %11519 = vrcp.f32 %v6138_v37  ;;  %9649 = vmatpush1.bf16.msra.mxu0 %v12197_v1  ;;  %9681 = vmatpush1.bf16.msra.mxu1 %v12221_v8 }
 0xf79   :  { %11521 = vrcp.f32 %v6140_v13  ;;  %9651 = vmatprep.subr.bf16.mxu0 %v12252_v14  ;;  %9683 = vmatprep.subr.bf16.mxu1 %v12294_v27 }
 0xf7a   :  { %11523 = vtanh.f32 %v13926_v31 }
 0xf7c   :  { %9653 = vmatpush1.bf16.msra.mxu0 %v12267_v18  ;;  %9685 = vmatpush1.bf16.msra.mxu1 %v12299_v29 }
 0xf7d   :  { %9655 = vmatprep.subr.bf16.mxu0 %v12358_v43  ;;  %9687 = vmatprep.subr.bf16.mxu1 %v12400_v57 }
 0xf7e   :  { %v11512_v35 = vpop.eup %11511 }
 0xf7f   :  { %v11514_v41 = vpop.eup %11513  ;;  %v6187_v20 = vmul.f32 %v11512_v35, %v11510_v34 }
 0xf80   :  { %v11516_v7 = vpop.eup %11515  ;;  %v6141_v21 = vadd.f32 1.0, %v11514_v41  ;;  %9657 = vmatpush1.bf16.msra.mxu0 %v12366_v47  ;;  %9689 = vmatpush1.bf16.msra.mxu1 %v12405_v59 }
 0xf81   :  { %v11518_v16 = vpop.eup %11517  ;;  %6280 = vmatmul.mubr.f32.gmra.mrb[114].mxu0 %v6187_v20  ;;  %6369 = vmatmul.mubr.f32.gmra.mrb[120].mxu1 %v6187_v20 }
 0xf82   :  { %v11520_v58 = vpop.eup %11519  ;;  %v6177_v2 = vmul.f32 %v11518_v16, %v11516_v7  ;;  %6285 = vmatprep.mubr.f32.mxu0 %v14408_v60  ;;  %6374 = vmatprep.mubr.f32.mxu1 %v14408_v60  ;;  %11525 = vrcp.f32 %v6141_v21 }
 0xf83   :  { %v11522_v11 = vpop.eup %11521  ;;  %9659 = vmatprep.subr.bf16.mxu0 %v12467_v12  ;;  %9691 = vmatprep.subr.bf16.mxu1 %v12506_v25 }
 0xf84   :  { %v11524_v45 = vpop.eup %11523  ;;  %v6173_v28 = vmul.f32 %v11522_v11, %v13872_v55  ;;  %9661 = vmatpush1.bf16.msra.mxu0 %v12472_v15  ;;  %9693 = vmatpush1.bf16.msra.mxu1 %v12511_v30 }
 0xf85   :  { %v6188_v39 = vmul.f32 %v11524_v45, %v11520_v58  ;;  %9663 = vmatprep.subr.bf16.mxu0 %v12563_v44  ;;  %9695 = vmatprep.subr.bf16.mxu1 %v12613_v63 }
 0xf86   :  { %v13946_v17 = vadd.f32 %v6177_v2, %v6173_v28 }
 0xf87   :  { %6286 = vmatmul.mubr.f32.gmra.mrb[116].mxu0 %v6188_v39  ;;  %6375 = vmatmul.mubr.f32.gmra.mrb[122].mxu1 %v6188_v39 }
 0xf88   :  { %6291 = vmatprep.mubr.f32.mxu0 %v14408_v60  ;;  %6380 = vmatprep.mubr.f32.mxu1 %v14408_v60  ;;  %11527 = vtanh.f32 %v13946_v17 }
 0xf89   :  { %9665 = vmatpush1.bf16.msra.mxu0 %v12578_v50  ;;  %9697 = vmatpush1.bf16.msra.mxu1 %v12618_v4 }
 0xf8a   :  { %9699 = vmatprep.subr.bf16.mxu0 %v12040_v19  ;;  %9731 = vmatprep.subr.bf16.mxu1 %v12064_v26 }
 0xf8c   :  { %v11526_v55 = vpop.eup %11525 }
 0xf92   :  { %v11528_v9 = vpop.eup %11527 }
 0xf93   :  { %v6189_v56 = vmul.f32 %v11528_v9, %v11526_v55 }
 0xf95   :  { %6292 = vmatmul.mubr.f32.gmra.mrb[118].mxu0 %v6189_v56  ;;  %6381 = vmatmul.mubr.f32.gmra.mrb[124].mxu1 %v6189_v56 }
 0xf96   :  { %6582 = vmatprep.mubr.f32.mxu0 %v14408_v60  ;;  %6671 = vmatprep.mubr.f32.mxu1 %v14408_v60 }
0x103d   :  { %v6275_v61 = vpop.f32.mrb[112].mxu0  ;;  %v6364_v23 = vpop.f32.mrb[118].mxu1 }
0x103e   :  { %v10100_v37 = vadd.f32 %v6275_v61, %v14410_v33  ;;  %v6277_v24 = vpop.f32.mrb[113].mxu0  ;;  %v6366_v38 = vpop.f32.mrb[119].mxu1  ;;  %v10266_v35 = vadd.f32 %v6364_v23, %v12961_v6 }
0x103f   :  { %v10101_v49 = vadd.f32 %v6277_v24, %v12951_v51  ;;  %v10267_v41 = vadd.f32 %v6366_v38, %v12963_v10 }
0x1040   :  { %v8531_v13 = vmul.f32 -1.442695, %v10100_v37  ;;  %v8533_v20 = vmul.f32 -1.442695, %v10266_v35 }
0x1041   :  { %v8532_v34 = vmul.f32 -1.442695, %v10101_v49 }
0x1042   :  { %11529 = vpow2.f32 %v8531_v13 }
0x1043   :  { %11531 = vpow2.f32 %v8532_v34 }
0x1044   :  { %11533 = vtanh.f32 %v10267_v41 }
0x1045   :  { %11535 = vpow2.f32 %v8533_v20 }
0x104c   :  { %v11530_v7 = vpop.eup %11529 }
0x104d   :  { %v6439_v16 = vadd.f32 1.0, %v11530_v7  ;;  %v11532_v58 = vpop.eup %11531 }
0x104e   :  { %v6440_v2 = vadd.f32 1.0, %v11532_v58  ;;  %v11534_v56 = vpop.eup %11533 }
0x104f   :  { %11537 = vrcp.f32 %v6439_v16  ;;  %v11536_v23 = vpop.eup %11535 }
0x1050   :  { %11539 = vrcp.f32 %v6440_v2  ;;  %v6441_v20 = vadd.f32 1.0, %v11536_v23 }
0x1054   :  { %v6281_v11 = vpop.f32.mrb[114].mxu0  ;;  %v6370_v21 = vpop.f32.mrb[120].mxu1 }
0x1055   :  { %v10102_v45 = vadd.f32 %v6281_v11, %v14410_v33  ;;  %v6283_v28 = vpop.f32.mrb[115].mxu0  ;;  %v6372_v39 = vpop.f32.mrb[121].mxu1  ;;  %v10268_v58 = vadd.f32 %v6370_v21, %v12961_v6 }
0x1056   :  { %v10103_v55 = vadd.f32 %v6283_v28, %v12951_v51  ;;  %v10269_v28 = vadd.f32 %v6372_v39, %v12963_v10 }
0x1057   :  { %v8534_v9 = vmul.f32 -1.442695, %v10102_v45 }
0x1058   :  { %v8535_v61 = vmul.f32 -1.442695, %v10103_v55  ;;  %v8536_v55 = vmul.f32 -1.442695, %v10268_v58 }
0x1059   :  { %11541 = vpow2.f32 %v8534_v9  ;;  %v11538_v37 = vpop.eup %11537 }
0x105a   :  { %v6287_v24 = vpop.f32.mrb[116].mxu0  ;;  %v6376_v38 = vpop.f32.mrb[122].mxu1  ;;  %v6483_v49 = vmul.f32 %v11538_v37, %v11534_v56  ;;  %11543 = vpow2.f32 %v8535_v61 }
0x105b   :  { %v10104_v13 = vadd.f32 %v6287_v24, %v14410_v33  ;;  %v6289_v34 = vpop.f32.mrb[117].mxu0  ;;  %v6378_v35 = vpop.f32.mrb[123].mxu1  ;;  %v10270_v56 = vadd.f32 %v6376_v38, %v12961_v6 }
0x105c   :  { %v11540_v41 = vpop.eup %11539  ;;  %v10105_v7 = vadd.f32 %v6289_v34, %v12951_v51  ;;  %v10271_v23 = vadd.f32 %v6378_v35, %v12963_v10 }
0x105d   :  { %v6479_v16 = vmul.f32 %v11540_v41, %v13899_v5  ;;  %v8537_v2 = vmul.f32 -1.442695, %v10104_v13  ;;  %v8539_v37 = vmul.f32 -1.442695, %v10270_v56 }
0x105e   :  { %v8538_v11 = vmul.f32 -1.442695, %v10105_v7 }
0x105f   :  { %v13971_v45 = vadd.f32 %v6483_v49, %v6479_v16  ;;  %11545 = vpow2.f32 %v8537_v2 }
0x1060   :  { %11547 = vrcp.f32 %v6441_v20 }
0x1061   :  { %11549 = vtanh.f32 %v13971_v45 }
0x1062   :  { %11551 = vpow2.f32 %v8538_v11 }
0x1063   :  { %v11542_v9 = vpop.eup %11541  ;;  %11553 = vtanh.f32 %v10269_v28 }
0x1064   :  { %v6442_v61 = vadd.f32 1.0, %v11542_v9  ;;  %v11544_v5 = vpop.eup %11543  ;;  %11555 = vpow2.f32 %v8536_v55 }
0x1065   :  { %v6443_v21 = vadd.f32 1.0, %v11544_v5 }
0x1066   :  { %11557 = vrcp.f32 %v6442_v61 }
0x1067   :  { %11559 = vrcp.f32 %v6443_v21 }
0x1068   :  { %v6293_v24 = vpop.f32.mrb[118].mxu0  ;;  %v6382_v49 = vpop.f32.mrb[124].mxu1  ;;  %11561 = vtanh.f32 %v10271_v23 }
0x1069   :  { %v11546_v39 = vpop.eup %11545  ;;  %v10106_v13 = vadd.f32 %v6293_v24, %v14410_v33  ;;  %v6295_v34 = vpop.f32.mrb[119].mxu0  ;;  %11563 = vpow2.f32 %v8539_v37  ;;  %v10272_v5 = vadd.f32 %v6382_v49, %v12961_v6 }
0x106a   :  { %v6384_v41 = vpop.f32.mrb[125].mxu1  ;;  %v11548_v20 = vpop.eup %11547  ;;  %v6445_v7 = vadd.f32 1.0, %v11546_v39  ;;  %v10107_v38 = vadd.f32 %v6295_v34, %v12951_v51 }
0x106b   :  { %v11550_v16 = vpop.eup %11549  ;;  %v8540_v58 = vmul.f32 -1.442695, %v10106_v13  ;;  %v8542_v34 = vmul.f32 -1.442695, %v10272_v5 }
0x106c   :  { %v11552_v2 = vpop.eup %11551  ;;  %11565 = vrcp.f32 %v6445_v7  ;;  %v6495_v35 = vmul.f32 %v11550_v16, %v11548_v20  ;;  %v8541_v28 = vmul.f32 -1.442695, %v10107_v38  ;;  %v10273_v20 = vadd.f32 %v6384_v41, %v12963_v10 }
0x106d   :  { %v6446_v11 = vadd.f32 1.0, %v11552_v2  ;;  %v11554_v55 = vpop.eup %11553  ;;  %11567 = vpow2.f32 %v8540_v58 }
0x106e   :  { %6583 = vmatmul.mubr.f32.vlgmr.msra.gmra.mrb[120].mxu0 %v6495_v35  ;;  %6672 = vmatmul.mubr.f32.vlgmr.msra.gmra.mrb[126].mxu1 %v6495_v35  ;;  %v11556_v9 = vpop.eup %11555 }
0x106f   :  { %11569 = vrcp.f32 %v6446_v11  ;;  %6588 = vmatprep.mubr.f32.mxu0 %v14408_v60  ;;  %6677 = vmatprep.mubr.f32.mxu1 %v14408_v60  ;;  %v6444_v23 = vadd.f32 1.0, %v11556_v9 }
0x1070   :  { %v11558_v56 = vpop.eup %11557  ;;  %9701 = vmatpush1.bf16.msra.mxu0 %v12050_v22  ;;  %9733 = vmatpush1.bf16.msra.mxu1 %v12116_v40  ;;  %11571 = vpow2.f32 %v8541_v28 }
0x1071   :  { %v6484_v61 = vmul.f32 %v11558_v56, %v11554_v55  ;;  %9703 = vmatprep.subr.bf16.mxu0 %v12089_v32  ;;  %9735 = vmatprep.subr.bf16.mxu1 %v12122_v42  ;;  %v11560_v21 = vpop.eup %11559  ;;  %11573 = vrcp.f32 %v6444_v23 }
0x1072   :  { %v6480_v37 = vmul.f32 %v11560_v21, %v13917_v48  ;;  %v11562_v24 = vpop.eup %11561 }
0x1073   :  { %v11564_v39 = vpop.eup %11563 }
0x1074   :  { %9705 = vmatpush1.bf16.msra.mxu0 %v12100_v36  ;;  %9737 = vmatpush1.bf16.msra.mxu1 %v12156_v52  ;;  %v13989_v13 = vadd.f32 %v6484_v61, %v6480_v37  ;;  %v6447_v16 = vadd.f32 1.0, %v11564_v39 }
0x1075   :  { %9707 = vmatprep.subr.bf16.mxu0 %v12133_v46  ;;  %9739 = vmatprep.subr.bf16.mxu1 %v12161_v54 }
0x1076   :  { %v11566_v49 = vpop.eup %11565  ;;  %11575 = vtanh.f32 %v13989_v13 }
0x1077   :  { %v6485_v7 = vmul.f32 %v11566_v49, %v11562_v24  ;;  %v11568_v48 = vpop.eup %11567  ;;  %11577 = vpow2.f32 %v8542_v34 }
0x1078   :  { %9709 = vmatpush1.bf16.msra.mxu0 %v12158_v53  ;;  %9741 = vmatpush1.bf16.msra.mxu1 %v12195_v0  ;;  %v6448_v58 = vadd.f32 1.0, %v11568_v48  ;;  %11579 = vtanh.f32 %v10273_v20 }
0x1079   :  { %v11570_v38 = vpop.eup %11569  ;;  %9711 = vmatprep.subr.bf16.mxu0 %v12188_v62  ;;  %9743 = vmatprep.subr.bf16.mxu1 %v12204_v3 }
0x107a   :  { %v6481_v2 = vmul.f32 %v11570_v38, %v13926_v31  ;;  %v11572_v41 = vpop.eup %11571  ;;  %11581 = vrcp.f32 %v6448_v58 }
0x107b   :  { %v6449_v11 = vadd.f32 1.0, %v11572_v41  ;;  %11583 = vrcp.f32 %v6447_v16  ;;  %v11574_v28 = vpop.eup %11573 }
0x107c   :  { %v14000_v35 = vadd.f32 %v6485_v7, %v6481_v2  ;;  %9713 = vmatpush1.bf16.msra.mxu0 %v12197_v1  ;;  %9745 = vmatpush1.bf16.msra.mxu1 %v12221_v8 }
0x107d   :  { %9715 = vmatprep.subr.bf16.mxu0 %v12252_v14  ;;  %9747 = vmatprep.subr.bf16.mxu1 %v12294_v27  ;;  %11585 = vrcp.f32 %v6449_v11 }
0x107e   :  { %11587 = vtanh.f32 %v14000_v35 }
0x1080   :  { %9717 = vmatpush1.bf16.msra.mxu0 %v12267_v18  ;;  %9749 = vmatpush1.bf16.msra.mxu1 %v12299_v29  ;;  %v11576_v31 = vpop.eup %11575 }
0x1081   :  { %9719 = vmatprep.subr.bf16.mxu0 %v12358_v43  ;;  %9751 = vmatprep.subr.bf16.mxu1 %v12400_v57  ;;  %v6496_v55 = vmul.f32 %v11576_v31, %v11574_v28  ;;  %v11578_v9 = vpop.eup %11577 }
0x1082   :  { %v11580_v56 = vpop.eup %11579  ;;  %v6450_v37 = vadd.f32 1.0, %v11578_v9 }
0x1083   :  { %6589 = vmatmul.mubr.f32.gmra.mrb[122].mxu0 %v6496_v55  ;;  %6678 = vmatmul.mubr.f32.gmra.mrb[128].mxu1 %v6496_v55 }
0x1084   :  { %v11582_v61 = vpop.eup %11581  ;;  %6594 = vmatprep.mubr.f32.mxu0 %v14408_v60  ;;  %6683 = vmatprep.mubr.f32.mxu1 %v14408_v60  ;;  %11589 = vrcp.f32 %v6450_v37 }
0x1085   :  { %v6486_v5 = vmul.f32 %v11582_v61, %v11580_v56  ;;  %9721 = vmatpush1.bf16.msra.mxu0 %v12366_v47  ;;  %9753 = vmatpush1.bf16.msra.mxu1 %v12405_v59  ;;  %v11584_v21 = vpop.eup %11583 }
0x1086   :  { %9723 = vmatprep.subr.bf16.mxu0 %v12467_v12  ;;  %9755 = vmatprep.subr.bf16.mxu1 %v12506_v25 }
0x1087   :  { %v11586_v23 = vpop.eup %11585 }
0x1088   :  { %v11588_v24 = vpop.eup %11587  ;;  %v6482_v39 = vmul.f32 %v11586_v23, %v13946_v17 }
0x1089   :  { %v6497_v34 = vmul.f32 %v11588_v24, %v11584_v21  ;;  %9725 = vmatpush1.bf16.msra.mxu0 %v12472_v15  ;;  %9757 = vmatpush1.bf16.msra.mxu1 %v12511_v30 }
0x108a   :  { %v14020_v49 = vadd.f32 %v6486_v5, %v6482_v39  ;;  %9727 = vmatprep.subr.bf16.mxu0 %v12563_v44  ;;  %9759 = vmatprep.subr.bf16.mxu1 %v12613_v63 }
0x108b   :  { %6595 = vmatmul.mubr.f32.gmra.mrb[124].mxu0 %v6497_v34  ;;  %6684 = vmatmul.mubr.f32.gmra.mrb[130].mxu1 %v6497_v34 }
0x108c   :  { %6600 = vmatprep.mubr.f32.mxu0 %v14408_v60  ;;  %6689 = vmatprep.mubr.f32.mxu1 %v14408_v60  ;;  %11591 = vtanh.f32 %v14020_v49 }
0x108d   :  { %9729 = vmatpush1.bf16.msra.mxu0 %v12578_v50  ;;  %9761 = vmatpush1.bf16.msra.mxu1 %v12618_v4 }
0x108e   :  { %9763 = vmatprep.subr.bf16.mxu0 %v12040_v19  ;;  %9795 = vmatprep.subr.bf16.mxu1 %v12064_v26  ;;  %v11590_v17 = vpop.eup %11589 }
0x1096   :  { %v11592_v20 = vpop.eup %11591 }
0x1097   :  { %v6498_v7 = vmul.f32 %v11592_v20, %v11590_v17 }
0x1099   :  { %6601 = vmatmul.mubr.f32.gmra.mrb[126].mxu0 %v6498_v7  ;;  %6690 = vmatmul.mubr.f32.gmra.mrb[132].mxu1 %v6498_v7 }
0x109a   :  { %6891 = vmatprep.mubr.f32.mxu0 %v14408_v60  ;;  %6980 = vmatprep.mubr.f32.mxu1 %v14408_v60 }
0x1141   :  { %v6584_v48 = vpop.f32.mrb[120].mxu0  ;;  %v6673_v38 = vpop.f32.mrb[126].mxu1 }
0x1142   :  { %v10108_v16 = vadd.f32 %v6584_v48, %v14410_v33  ;;  %v6586_v58 = vpop.f32.mrb[121].mxu0  ;;  %v6675_v2 = vpop.f32.mrb[127].mxu1  ;;  %v10274_v31 = vadd.f32 %v6673_v38, %v12961_v6 }
0x1143   :  { %v10109_v41 = vadd.f32 %v6586_v58, %v12951_v51  ;;  %v10275_v55 = vadd.f32 %v6675_v2, %v12963_v10 }
0x1144   :  { %v8543_v11 = vmul.f32 -1.442695, %v10108_v16  ;;  %v8545_v9 = vmul.f32 -1.442695, %v10274_v31 }
0x1145   :  { %v8544_v28 = vmul.f32 -1.442695, %v10109_v41 }
0x1146   :  { %11593 = vpow2.f32 %v8543_v11 }
0x1147   :  { %11595 = vpow2.f32 %v8544_v28 }
0x1148   :  { %11597 = vtanh.f32 %v10275_v55 }
0x1149   :  { %11599 = vpow2.f32 %v8545_v9 }
0x1150   :  { %v11594_v56 = vpop.eup %11593 }
0x1151   :  { %v6748_v61 = vadd.f32 1.0, %v11594_v56  ;;  %v11596_v5 = vpop.eup %11595 }
0x1152   :  { %v6749_v21 = vadd.f32 1.0, %v11596_v5  ;;  %v11598_v7 = vpop.eup %11597 }
0x1153   :  { %11601 = vrcp.f32 %v6748_v61  ;;  %v11600_v38 = vpop.eup %11599 }
0x1154   :  { %11603 = vrcp.f32 %v6749_v21  ;;  %v6750_v41 = vadd.f32 1.0, %v11600_v38 }
0x1156   :  { %v6590_v23 = vpop.f32.mrb[122].mxu0  ;;  %v6679_v37 = vpop.f32.mrb[128].mxu1 }
0x1157   :  { %v10110_v24 = vadd.f32 %v6590_v23, %v14410_v33  ;;  %v6592_v39 = vpop.f32.mrb[123].mxu0  ;;  %v6681_v34 = vpop.f32.mrb[129].mxu1  ;;  %v10276_v55 = vadd.f32 %v6679_v37, %v12961_v6 }
0x1158   :  { %v10111_v17 = vadd.f32 %v6592_v39, %v12951_v51  ;;  %v10277_v23 = vadd.f32 %v6681_v34, %v12963_v10 }
0x1159   :  { %v8546_v20 = vmul.f32 -1.442695, %v10110_v24 }
0x115a   :  { %v8547_v48 = vmul.f32 -1.442695, %v10111_v17  ;;  %v8548_v17 = vmul.f32 -1.442695, %v10276_v55 }
0x115b   :  { %11605 = vpow2.f32 %v8546_v20 }
0x115c   :  { %11607 = vpow2.f32 %v8547_v48 }
0x115d   :  { %v11602_v16 = vpop.eup %11601  ;;  %11609 = vrcp.f32 %v6750_v41 }
0x115e   :  { %v6792_v58 = vmul.f32 %v11602_v16, %v11598_v7  ;;  %v11604_v2 = vpop.eup %11603  ;;  %v6596_v11 = vpop.f32.mrb[124].mxu0 }
0x115f   :  { %v6685_v28 = vpop.f32.mrb[130].mxu1  ;;  %v6788_v31 = vmul.f32 %v11604_v2, %v13971_v45  ;;  %v10112_v9 = vadd.f32 %v6596_v11, %v14410_v33  ;;  %v6598_v56 = vpop.f32.mrb[125].mxu0 }
0x1160   :  { %v6687_v61 = vpop.f32.mrb[131].mxu1  ;;  %v10113_v5 = vadd.f32 %v6598_v56, %v12951_v51  ;;  %v10278_v48 = vadd.f32 %v6685_v28, %v12961_v6 }
0x1161   :  { %v14043_v21 = vadd.f32 %v6792_v58, %v6788_v31  ;;  %v8549_v24 = vmul.f32 -1.442695, %v10112_v9  ;;  %v10279_v34 = vadd.f32 %v6687_v61, %v12963_v10 }
0x1162   :  { %v8550_v39 = vmul.f32 -1.442695, %v10113_v5  ;;  %v8551_v16 = vmul.f32 -1.442695, %v10278_v48 }
0x1163   :  { %11611 = vtanh.f32 %v14043_v21 }
0x1164   :  { %11613 = vpow2.f32 %v8549_v24 }
0x1165   :  { %v11606_v45 = vpop.eup %11605  ;;  %11615 = vtanh.f32 %v10277_v23 }
0x1166   :  { %v6751_v37 = vadd.f32 1.0, %v11606_v45  ;;  %11617 = vpow2.f32 %v8550_v39  ;;  %v11608_v20 = vpop.eup %11607 }
0x1167   :  { %11619 = vpow2.f32 %v8548_v17  ;;  %v6752_v7 = vadd.f32 1.0, %v11608_v20  ;;  %v11610_v38 = vpop.eup %11609 }
0x1168   :  { %11621 = vrcp.f32 %v6751_v37 }
0x1169   :  { %11623 = vrcp.f32 %v6752_v7 }
0x116a   :  { %11625 = vtanh.f32 %v10279_v34 }
0x116b   :  { %11627 = vpow2.f32 %v8551_v16 }
0x116c   :  { %v6602_v58 = vpop.f32.mrb[126].mxu0  ;;  %v6691_v2 = vpop.f32.mrb[132].mxu1 }
0x116d   :  { %v11612_v41 = vpop.eup %11611  ;;  %v10114_v11 = vadd.f32 %v6602_v58, %v14410_v33  ;;  %v6604_v31 = vpop.f32.mrb[127].mxu0  ;;  %v10280_v16 = vadd.f32 %v6691_v2, %v12961_v6 }
0x116e   :  { %v6693_v55 = vpop.f32.mrb[133].mxu1  ;;  %v11614_v9 = vpop.eup %11613  ;;  %v10115_v56 = vadd.f32 %v6604_v31, %v12951_v51  ;;  %v6804_v5 = vmul.f32 %v11612_v41, %v11610_v38 }
0x116f   :  { %v11616_v23 = vpop.eup %11615  ;;  %v6754_v24 = vadd.f32 1.0, %v11614_v9  ;;  %v8552_v39 = vmul.f32 -1.442695, %v10114_v11  ;;  %v10281_v11 = vadd.f32 %v6693_v55, %v12963_v10  ;;  %v8554_v9 = vmul.f32 -1.442695, %v10280_v16 }
0x1170   :  { %v11618_v28 = vpop.eup %11617  ;;  %6892 = vmatmul.mubr.f32.vlgmr.msra.gmra.mrb[128].mxu0 %v6804_v5  ;;  %6981 = vmatmul.mubr.f32.vlgmr.msra.gmra.mrb[134].mxu1 %v6804_v5  ;;  %v8553_v37 = vmul.f32 -1.442695, %v10115_v56 }
0x1171   :  { %v11620_v61 = vpop.eup %11619  ;;  %11629 = vrcp.f32 %v6754_v24  ;;  %v6755_v17 = vadd.f32 1.0, %v11618_v28  ;;  %6897 = vmatprep.mubr.f32.mxu0 %v14408_v60  ;;  %6986 = vmatprep.mubr.f32.mxu1 %v14408_v60 }
0x1172   :  { %v11622_v45 = vpop.eup %11621  ;;  %9765 = vmatpush1.bf16.msra.mxu0 %v12050_v22  ;;  %9797 = vmatpush1.bf16.msra.mxu1 %v12116_v40  ;;  %v6753_v48 = vadd.f32 1.0, %v11620_v61 }
0x1173   :  { %v6793_v20 = vmul.f32 %v11622_v45, %v11616_v23  ;;  %11631 = vrcp.f32 %v6755_v17  ;;  %9767 = vmatprep.subr.bf16.mxu0 %v12089_v32  ;;  %9799 = vmatprep.subr.bf16.mxu1 %v12122_v42  ;;  %v11624_v7 = vpop.eup %11623 }
0x1174   :  { %11633 = vpow2.f32 %v8552_v39  ;;  %v6789_v34 = vmul.f32 %v11624_v7, %v13989_v13  ;;  %v11626_v58 = vpop.eup %11625 }
0x1175   :  { %11635 = vpow2.f32 %v8553_v37  ;;  %v11628_v41 = vpop.eup %11627 }
0x1176   :  { %9769 = vmatpush1.bf16.msra.mxu0 %v12100_v36  ;;  %9801 = vmatpush1.bf16.msra.mxu1 %v12156_v52  ;;  %v14060_v38 = vadd.f32 %v6793_v20, %v6789_v34  ;;  %11637 = vrcp.f32 %v6753_v48  ;;  %v6756_v2 = vadd.f32 1.0, %v11628_v41 }
0x1177   :  { %9771 = vmatprep.subr.bf16.mxu0 %v12133_v46  ;;  %9803 = vmatprep.subr.bf16.mxu1 %v12161_v54 }
0x1178   :  { %11639 = vtanh.f32 %v14060_v38 }
0x1179   :  { %11641 = vtanh.f32 %v10281_v11 }
0x117a   :  { %9773 = vmatpush1.bf16.msra.mxu0 %v12158_v53  ;;  %9805 = vmatpush1.bf16.msra.mxu1 %v12195_v0  ;;  %11643 = vpow2.f32 %v8554_v9 }
0x117b   :  { %v11630_v13 = vpop.eup %11629  ;;  %9775 = vmatprep.subr.bf16.mxu0 %v12188_v62  ;;  %9807 = vmatprep.subr.bf16.mxu1 %v12204_v3 }
0x117c   :  { %v6794_v31 = vmul.f32 %v11630_v13, %v11626_v58 }
0x117d   :  { %v11632_v56 = vpop.eup %11631 }
0x117e   :  { %v11634_v5 = vpop.eup %11633  ;;  %v6790_v23 = vmul.f32 %v11632_v56, %v14000_v35  ;;  %9777 = vmatpush1.bf16.msra.mxu0 %v12197_v1  ;;  %9809 = vmatpush1.bf16.msra.mxu1 %v12221_v8 }
0x117f   :  { %v6757_v24 = vadd.f32 1.0, %v11634_v5  ;;  %9779 = vmatprep.subr.bf16.mxu0 %v12252_v14  ;;  %9811 = vmatprep.subr.bf16.mxu1 %v12294_v27  ;;  %v11636_v55 = vpop.eup %11635 }
0x1180   :  { %v14076_v28 = vadd.f32 %v6794_v31, %v6790_v23  ;;  %v6758_v39 = vadd.f32 1.0, %v11636_v55  ;;  %v11638_v61 = vpop.eup %11637 }
0x1181   :  { %11645 = vrcp.f32 %v6757_v24 }
0x1182   :  { %11647 = vrcp.f32 %v6756_v2  ;;  %9781 = vmatpush1.bf16.msra.mxu0 %v12267_v18  ;;  %9813 = vmatpush1.bf16.msra.mxu1 %v12299_v29  ;;  %v11640_v35 = vpop.eup %11639 }
0x1183   :  { %11649 = vrcp.f32 %v6758_v39  ;;  %9783 = vmatprep.subr.bf16.mxu0 %v12358_v43  ;;  %9815 = vmatprep.subr.bf16.mxu1 %v12400_v57  ;;  %v6805_v17 = vmul.f32 %v11640_v35, %v11638_v61  ;;  %v11642_v45 = vpop.eup %11641 }
0x1184   :  { %11651 = vtanh.f32 %v14076_v28  ;;  %v11644_v37 = vpop.eup %11643 }
0x1185   :  { %6898 = vmatmul.mubr.f32.gmra.mrb[130].mxu0 %v6805_v17  ;;  %6987 = vmatmul.mubr.f32.gmra.mrb[136].mxu1 %v6805_v17  ;;  %v6759_v16 = vadd.f32 1.0, %v11644_v37 }
0x1186   :  { %6903 = vmatprep.mubr.f32.mxu0 %v14408_v60  ;;  %6992 = vmatprep.mubr.f32.mxu1 %v14408_v60 }
0x1187   :  { %9785 = vmatpush1.bf16.msra.mxu0 %v12366_v47  ;;  %9817 = vmatpush1.bf16.msra.mxu1 %v12405_v59  ;;  %11653 = vrcp.f32 %v6759_v16 }
0x1188   :  { %9787 = vmatprep.subr.bf16.mxu0 %v12467_v12  ;;  %9819 = vmatprep.subr.bf16.mxu1 %v12506_v25 }
0x118b   :  { %v11646_v20 = vpop.eup %11645  ;;  %9789 = vmatpush1.bf16.msra.mxu0 %v12472_v15  ;;  %9821 = vmatpush1.bf16.msra.mxu1 %v12511_v30 }
0x118c   :  { %v11648_v7 = vpop.eup %11647  ;;  %v6795_v48 = vmul.f32 %v11646_v20, %v11642_v45  ;;  %9791 = vmatprep.subr.bf16.mxu0 %v12563_v44  ;;  %9823 = vmatprep.subr.bf16.mxu1 %v12613_v63 }
0x118d   :  { %v11650_v34 = vpop.eup %11649 }
0x118e   :  { %v11652_v58 = vpop.eup %11651  ;;  %v6791_v41 = vmul.f32 %v11650_v34, %v14020_v49 }
0x118f   :  { %v6806_v13 = vmul.f32 %v11652_v58, %v11648_v7  ;;  %9793 = vmatpush1.bf16.msra.mxu0 %v12578_v50  ;;  %9825 = vmatpush1.bf16.msra.mxu1 %v12618_v4 }
0x1190   :  { %v14094_v11 = vadd.f32 %v6795_v48, %v6791_v41  ;;  %9827 = vmatprep.subr.bf16.mxu0 %v12040_v19  ;;  %9859 = vmatprep.subr.bf16.mxu1 %v12064_v26 }
0x1191   :  { %6904 = vmatmul.mubr.f32.gmra.mrb[132].mxu0 %v6806_v13  ;;  %6993 = vmatmul.mubr.f32.gmra.mrb[138].mxu1 %v6806_v13  ;;  %v11654_v49 = vpop.eup %11653 }
0x1192   :  { %6909 = vmatprep.mubr.f32.mxu0 %v14408_v60  ;;  %6998 = vmatprep.mubr.f32.mxu1 %v14408_v60  ;;  %11655 = vtanh.f32 %v14094_v11 }
0x119c   :  { %v11656_v31 = vpop.eup %11655 }
0x119d   :  { %v6807_v9 = vmul.f32 %v11656_v31, %v11654_v49 }
0x119f   :  { %6910 = vmatmul.mubr.f32.gmra.mrb[134].mxu0 %v6807_v9  ;;  %6999 = vmatmul.mubr.f32.gmra.mrb[140].mxu1 %v6807_v9 }
0x11a0   :  { %7200 = vmatprep.mubr.f32.mxu0 %v14408_v60  ;;  %7289 = vmatprep.mubr.f32.mxu1 %v14408_v60 }
0x1243   :  { %v6893_v56 = vpop.f32.mrb[128].mxu0  ;;  %v6982_v5 = vpop.f32.mrb[134].mxu1 }
0x1244   :  { %v10116_v2 = vadd.f32 %v6893_v56, %v14410_v33  ;;  %v6895_v23 = vpop.f32.mrb[129].mxu0  ;;  %v6984_v24 = vpop.f32.mrb[135].mxu1  ;;  %v10282_v35 = vadd.f32 %v6982_v5, %v12961_v6 }
0x1245   :  { %v10117_v55 = vadd.f32 %v6895_v23, %v12951_v51  ;;  %v10283_v17 = vadd.f32 %v6984_v24, %v12963_v10 }
0x1246   :  { %v8555_v39 = vmul.f32 -1.442695, %v10116_v2  ;;  %v8557_v45 = vmul.f32 -1.442695, %v10282_v35 }
0x1247   :  { %v8556_v61 = vmul.f32 -1.442695, %v10117_v55 }
0x1248   :  { %11657 = vpow2.f32 %v8555_v39 }
0x1249   :  { %11659 = vpow2.f32 %v8556_v61 }
0x124a   :  { %11661 = vtanh.f32 %v10283_v17 }
0x124b   :  { %11663 = vpow2.f32 %v8557_v45 }
0x1252   :  { %v11658_v37 = vpop.eup %11657 }
0x1253   :  { %v7057_v20 = vadd.f32 1.0, %v11658_v37  ;;  %v11660_v7 = vpop.eup %11659 }
0x1254   :  { %v7058_v48 = vadd.f32 1.0, %v11660_v7  ;;  %v11662_v9 = vpop.eup %11661 }
0x1255   :  { %11665 = vrcp.f32 %v7057_v20  ;;  %v11664_v5 = vpop.eup %11663 }
0x1256   :  { %11667 = vrcp.f32 %v7058_v48  ;;  %v7059_v55 = vadd.f32 1.0, %v11664_v5 }
0x1258   :  { %v6899_v34 = vpop.f32.mrb[130].mxu0  ;;  %v6988_v16 = vpop.f32.mrb[136].mxu1 }
0x1259   :  { %v10118_v58 = vadd.f32 %v6899_v34, %v14410_v33  ;;  %v6901_v41 = vpop.f32.mrb[131].mxu0  ;;  %v6990_v13 = vpop.f32.mrb[137].mxu1  ;;  %v10284_v61 = vadd.f32 %v6988_v16, %v12961_v6 }
0x125a   :  { %v10119_v49 = vadd.f32 %v6901_v41, %v12951_v51  ;;  %v10285_v17 = vadd.f32 %v6990_v13, %v12963_v10 }
0x125b   :  { %v8558_v31 = vmul.f32 -1.442695, %v10118_v58  ;;  %v8560_v34 = vmul.f32 -1.442695, %v10284_v61 }
0x125c   :  { %v8559_v56 = vmul.f32 -1.442695, %v10119_v49 }
0x125d   :  { %11669 = vpow2.f32 %v8558_v31 }
0x125e   :  { %11671 = vpow2.f32 %v8559_v56 }
0x125f   :  { %v11666_v2 = vpop.eup %11665  ;;  %11673 = vrcp.f32 %v7059_v55 }
0x1260   :  { %v7101_v23 = vmul.f32 %v11666_v2, %v11662_v9  ;;  %v11668_v24 = vpop.eup %11667 }
0x1261   :  { %v7097_v39 = vmul.f32 %v11668_v24, %v14043_v21 }
0x1263   :  { %v14113_v35 = vadd.f32 %v7101_v23, %v7097_v39 }
0x1264   :  { %v6905_v45 = vpop.f32.mrb[132].mxu0  ;;  %v6994_v37 = vpop.f32.mrb[138].mxu1 }
0x1265   :  { %v10120_v20 = vadd.f32 %v6905_v45, %v14410_v33  ;;  %v6907_v7 = vpop.f32.mrb[133].mxu0  ;;  %v6996_v48 = vpop.f32.mrb[139].mxu1  ;;  %11675 = vtanh.f32 %v14113_v35  ;;  %v10286_v56 = vadd.f32 %v6994_v37, %v12961_v6 }
0x1266   :  { %v10121_v58 = vadd.f32 %v6907_v7, %v12951_v51  ;;  %11677 = vtanh.f32 %v10285_v17  ;;  %v10287_v2 = vadd.f32 %v6996_v48, %v12963_v10 }
0x1267   :  { %v8561_v41 = vmul.f32 -1.442695, %v10120_v20  ;;  %v11670_v21 = vpop.eup %11669  ;;  %v8563_v17 = vmul.f32 -1.442695, %v10286_v56 }
0x1268   :  { %v7060_v16 = vadd.f32 1.0, %v11670_v21  ;;  %v11672_v49 = vpop.eup %11671  ;;  %v8562_v13 = vmul.f32 -1.442695, %v10121_v58 }
0x1269   :  { %11679 = vpow2.f32 %v8561_v41  ;;  %v7061_v31 = vadd.f32 1.0, %v11672_v49  ;;  %v11674_v9 = vpop.eup %11673 }
0x126a   :  { %11681 = vpow2.f32 %v8560_v34 }
0x126b   :  { %11683 = vrcp.f32 %v7060_v16 }
0x126c   :  { %11685 = vrcp.f32 %v7061_v31 }
0x126d   :  { %11687 = vpow2.f32 %v8562_v13 }
0x126e   :  { %11689 = vtanh.f32 %v10287_v2 }
0x126f   :  { %v11676_v5 = vpop.eup %11675 }
0x1270   :  { %v7113_v23 = vmul.f32 %v11676_v5, %v11674_v9  ;;  %v11678_v24 = vpop.eup %11677 }
0x1272   :  { %v6911_v55 = vpop.f32.mrb[134].mxu0  ;;  %v7000_v39 = vpop.f32.mrb[140].mxu1  ;;  %7201 = vmatmul.mubr.f32.vlgmr.msra.gmra.mrb[136].mxu0 %v7113_v23  ;;  %7290 = vmatmul.mubr.f32.vlgmr.msra.gmra.mrb[142].mxu1 %v7113_v23 }
0x1273   :  { %v11680_v61 = vpop.eup %11679  ;;  %v10122_v45 = vadd.f32 %v6911_v55, %v14410_v33  ;;  %v6913_v20 = vpop.f32.mrb[135].mxu0  ;;  %7206 = vmatprep.mubr.f32.mxu0 %v14408_v60  ;;  %7295 = vmatprep.mubr.f32.mxu1 %v14408_v60  ;;  %v10288_v2 = vadd.f32 %v7000_v39, %v12961_v6 }
0x1274   :  { %v7002_v7 = vpop.f32.mrb[141].mxu1  ;;  %v11682_v34 = vpop.eup %11681  ;;  %v7063_v58 = vadd.f32 1.0, %v11680_v61  ;;  %v10123_v41 = vadd.f32 %v6913_v20, %v12951_v51  ;;  %9829 = vmatpush1.bf16.msra.mxu0 %v12050_v22  ;;  %9861 = vmatpush1.bf16.msra.mxu1 %v12116_v40 }
0x1275   :  { %v11684_v37 = vpop.eup %11683  ;;  %v8564_v48 = vmul.f32 -1.442695, %v10122_v45  ;;  %9831 = vmatprep.subr.bf16.mxu0 %v12089_v32  ;;  %9863 = vmatprep.subr.bf16.mxu1 %v12122_v42  ;;  %v7062_v31 = vadd.f32 1.0, %v11682_v34  ;;  %v8566_v23 = vmul.f32 -1.442695, %v10288_v2  ;;  %v10289_v55 = vadd.f32 %v7002_v7, %v12963_v10 }
0x1276   :  { %v7102_v21 = vmul.f32 %v11684_v37, %v11678_v24  ;;  %11691 = vrcp.f32 %v7063_v58  ;;  %v8565_v16 = vmul.f32 -1.442695, %v10123_v41  ;;  %v11686_v49 = vpop.eup %11685 }
0x1277   :  { %11693 = vpow2.f32 %v8563_v17  ;;  %v11688_v13 = vpop.eup %11687  ;;  %v7098_v9 = vmul.f32 %v11686_v49, %v14060_v38 }
0x1278   :  { %11695 = vpow2.f32 %v8564_v48  ;;  %v7064_v56 = vadd.f32 1.0, %v11688_v13  ;;  %9833 = vmatpush1.bf16.msra.mxu0 %v12100_v36  ;;  %9865 = vmatpush1.bf16.msra.mxu1 %v12156_v52  ;;  %v11690_v38 = vpop.eup %11689 }
0x1279   :  { %v14132_v5 = vadd.f32 %v7102_v21, %v7098_v9  ;;  %11697 = vpow2.f32 %v8565_v16  ;;  %9835 = vmatprep.subr.bf16.mxu0 %v12133_v46  ;;  %9867 = vmatprep.subr.bf16.mxu1 %v12161_v54 }
0x127a   :  { %11699 = vrcp.f32 %v7064_v56 }
0x127b   :  { %11701 = vrcp.f32 %v7062_v31 }
0x127c   :  { %11703 = vtanh.f32 %v14132_v5  ;;  %9837 = vmatpush1.bf16.msra.mxu0 %v12158_v53  ;;  %9869 = vmatpush1.bf16.msra.mxu1 %v12195_v0 }
0x127d   :  { %9839 = vmatprep.subr.bf16.mxu0 %v12188_v62  ;;  %9871 = vmatprep.subr.bf16.mxu1 %v12204_v3  ;;  %11705 = vpow2.f32 %v8566_v23 }
0x127e   :  { %11707 = vtanh.f32 %v10289_v55 }
0x1280   :  { %v11692_v24 = vpop.eup %11691  ;;  %9841 = vmatpush1.bf16.msra.mxu0 %v12197_v1  ;;  %9873 = vmatpush1.bf16.msra.mxu1 %v12221_v8 }
0x1281   :  { %v11694_v61 = vpop.eup %11693  ;;  %v7103_v17 = vmul.f32 %v11692_v24, %v11690_v38  ;;  %9843 = vmatprep.subr.bf16.mxu0 %v12252_v14  ;;  %9875 = vmatprep.subr.bf16.mxu1 %v12294_v27 }
0x1282   :  { %v11696_v39 = vpop.eup %11695  ;;  %v7065_v58 = vadd.f32 1.0, %v11694_v61 }
0x1283   :  { %v7066_v45 = vadd.f32 1.0, %v11696_v39  ;;  %v11698_v20 = vpop.eup %11697 }
0x1284   :  { %v11700_v34 = vpop.eup %11699  ;;  %v7067_v41 = vadd.f32 1.0, %v11698_v20  ;;  %9845 = vmatpush1.bf16.msra.mxu0 %v12267_v18  ;;  %9877 = vmatpush1.bf16.msra.mxu1 %v12299_v29 }
0x1285   :  { %11709 = vrcp.f32 %v7066_v45  ;;  %v11702_v7 = vpop.eup %11701  ;;  %v7099_v37 = vmul.f32 %v11700_v34, %v14076_v28  ;;  %9847 = vmatprep.subr.bf16.mxu0 %v12358_v43  ;;  %9879 = vmatprep.subr.bf16.mxu1 %v12400_v57 }
0x1286   :  { %v11704_v48 = vpop.eup %11703  ;;  %11711 = vrcp.f32 %v7067_v41 }
0x1287   :  { %v14152_v21 = vadd.f32 %v7103_v17, %v7099_v37  ;;  %v7114_v16 = vmul.f32 %v11704_v48, %v11702_v7  ;;  %11713 = vrcp.f32 %v7065_v58  ;;  %v11706_v28 = vpop.eup %11705 }
0x1288   :  { %9849 = vmatpush1.bf16.msra.mxu0 %v12366_v47  ;;  %9881 = vmatpush1.bf16.msra.mxu1 %v12405_v59  ;;  %v11708_v49 = vpop.eup %11707  ;;  %v7068_v56 = vadd.f32 1.0, %v11706_v28 }
0x1289   :  { %7207 = vmatmul.mubr.f32.gmra.mrb[138].mxu0 %v7114_v16  ;;  %7296 = vmatmul.mubr.f32.gmra.mrb[144].mxu1 %v7114_v16  ;;  %11715 = vtanh.f32 %v14152_v21 }
0x128a   :  { %7212 = vmatprep.mubr.f32.mxu0 %v14408_v60  ;;  %7301 = vmatprep.mubr.f32.mxu1 %v14408_v60  ;;  %11717 = vrcp.f32 %v7068_v56 }
0x128b   :  { %9851 = vmatprep.subr.bf16.mxu0 %v12467_v12  ;;  %9883 = vmatprep.subr.bf16.mxu1 %v12506_v25 }
0x128c   :  { %9853 = vmatpush1.bf16.msra.mxu0 %v12472_v15  ;;  %9885 = vmatpush1.bf16.msra.mxu1 %v12511_v30 }
0x128d   :  { %9855 = vmatprep.subr.bf16.mxu0 %v12563_v44  ;;  %9887 = vmatprep.subr.bf16.mxu1 %v12613_v63 }
0x128f   :  { %v11710_v13 = vpop.eup %11709 }
0x1290   :  { %v7104_v31 = vmul.f32 %v11710_v13, %v11708_v49  ;;  %v11712_v9 = vpop.eup %11711  ;;  %9857 = vmatpush1.bf16.msra.mxu0 %v12578_v50  ;;  %9889 = vmatpush1.bf16.msra.mxu1 %v12618_v4 }
0x1291   :  { %v7100_v2 = vmul.f32 %v11712_v9, %v14094_v11  ;;  %9891 = vmatprep.subr.bf16.mxu0 %v12040_v19  ;;  %9923 = vmatprep.subr.bf16.mxu1 %v12064_v26  ;;  %v11714_v38 = vpop.eup %11713 }
0x1293   :  { %v11716_v23 = vpop.eup %11715  ;;  %v14170_v24 = vadd.f32 %v7104_v31, %v7100_v2 }
0x1294   :  { %v7115_v55 = vmul.f32 %v11716_v23, %v11714_v38  ;;  %v11718_v61 = vpop.eup %11717 }
0x1295   :  { %11719 = vtanh.f32 %v14170_v24 }
0x1296   :  { %7213 = vmatmul.mubr.f32.gmra.mrb[140].mxu0 %v7115_v55  ;;  %7302 = vmatmul.mubr.f32.gmra.mrb[146].mxu1 %v7115_v55 }
0x1297   :  { %7218 = vmatprep.mubr.f32.mxu0 %v14408_v60  ;;  %7307 = vmatprep.mubr.f32.mxu1 %v14408_v60 }
0x129f   :  { %v11720_v11 = vpop.eup %11719 }
0x12a0   :  { %v7116_v17 = vmul.f32 %v11720_v11, %v11718_v61 }
0x12a2   :  { %7219 = vmatmul.mubr.f32.gmra.mrb[142].mxu0 %v7116_v17  ;;  %7308 = vmatmul.mubr.f32.gmra.mrb[148].mxu1 %v7116_v17 }
0x12a3   :  { %7509 = vmatprep.mubr.f32.mxu0 %v14408_v60  ;;  %7598 = vmatprep.mubr.f32.mxu1 %v14408_v60 }
0x1345   :  { %v7202_v19 = vpop.f32.mrb[136].mxu0  ;;  %v7291_v26 = vpop.f32.mrb[142].mxu1 }
0x1346   :  { %v10124_v39 = vadd.f32 %v7202_v19, %v14410_v33  ;;  %v7204_v45 = vpop.f32.mrb[137].mxu0  ;;  %v7293_v20 = vpop.f32.mrb[143].mxu1  ;;  %v10290_v7 = vadd.f32 %v7291_v26, %v12961_v6 }
0x1347   :  { %v10125_v34 = vadd.f32 %v7204_v45, %v12951_v51  ;;  %v10291_v37 = vadd.f32 %v7293_v20, %v12963_v10 }
0x1348   :  { %v8567_v58 = vmul.f32 -1.442695, %v10124_v39  ;;  %v8569_v48 = vmul.f32 -1.442695, %v10290_v7 }
0x1349   :  { %v8568_v41 = vmul.f32 -1.442695, %v10125_v34 }
0x134a   :  { %11721 = vpow2.f32 %v8567_v58 }
0x134b   :  { %11723 = vpow2.f32 %v8568_v41 }
0x134c   :  { %11725 = vtanh.f32 %v10291_v37 }
0x134d   :  { %11727 = vpow2.f32 %v8569_v48 }
0x1354   :  { %v11722_v16 = vpop.eup %11721 }
0x1355   :  { %v7366_v28 = vadd.f32 1.0, %v11722_v16  ;;  %v11724_v49 = vpop.eup %11723 }
0x1356   :  { %v7367_v13 = vadd.f32 1.0, %v11724_v49  ;;  %v11726_v55 = vpop.eup %11725 }
0x1357   :  { %11729 = vrcp.f32 %v7366_v28  ;;  %v11728_v11 = vpop.eup %11727 }
0x1358   :  { %11731 = vrcp.f32 %v7367_v13  ;;  %v7368_v45 = vadd.f32 1.0, %v11728_v11 }
0x135c   :  { %v7208_v31 = vpop.f32.mrb[138].mxu0  ;;  %v7297_v9 = vpop.f32.mrb[144].mxu1 }
0x135d   :  { %v10126_v56 = vadd.f32 %v7208_v31, %v14410_v33  ;;  %v7210_v2 = vpop.f32.mrb[139].mxu0  ;;  %v7299_v38 = vpop.f32.mrb[145].mxu1  ;;  %v10292_v34 = vadd.f32 %v7297_v9, %v12961_v6 }
0x135e   :  { %v10127_v23 = vadd.f32 %v7210_v2, %v12951_v51  ;;  %v10293_v41 = vadd.f32 %v7299_v38, %v12963_v10 }
0x135f   :  { %v8570_v61 = vmul.f32 -1.442695, %v10126_v56  ;;  %v8572_v7 = vmul.f32 -1.442695, %v10292_v34 }
0x1360   :  { %v8571_v17 = vmul.f32 -1.442695, %v10127_v23 }
0x1361   :  { %v11730_v19 = vpop.eup %11729  ;;  %11733 = vpow2.f32 %v8570_v61 }
0x1362   :  { %v7410_v26 = vmul.f32 %v11730_v19, %v11726_v55  ;;  %v11732_v39 = vpop.eup %11731  ;;  %11735 = vpow2.f32 %v8571_v17 }
0x1363   :  { %v7406_v20 = vmul.f32 %v11732_v39, %v14113_v35  ;;  %11737 = vrcp.f32 %v7368_v45 }
0x1365   :  { %v14185_v58 = vadd.f32 %v7410_v26, %v7406_v20 }
0x1367   :  { %11739 = vtanh.f32 %v14185_v58 }
0x1368   :  { %11741 = vtanh.f32 %v10293_v41 }
0x1369   :  { %v7214_v37 = vpop.f32.mrb[140].mxu0  ;;  %v7303_v48 = vpop.f32.mrb[146].mxu1  ;;  %11743 = vpow2.f32 %v8572_v7 }
0x136a   :  { %v10128_v16 = vadd.f32 %v7214_v37, %v14410_v33  ;;  %v7216_v28 = vpop.f32.mrb[141].mxu0  ;;  %v7305_v49 = vpop.f32.mrb[147].mxu1  ;;  %v10294_v11 = vadd.f32 %v7303_v48, %v12961_v6 }
0x136b   :  { %v11734_v13 = vpop.eup %11733  ;;  %v10129_v31 = vadd.f32 %v7216_v28, %v12951_v51  ;;  %v10295_v41 = vadd.f32 %v7305_v49, %v12963_v10 }
0x136c   :  { %v7369_v35 = vadd.f32 1.0, %v11734_v13  ;;  %v11736_v9 = vpop.eup %11735  ;;  %v8573_v56 = vmul.f32 -1.442695, %v10128_v16  ;;  %v8575_v28 = vmul.f32 -1.442695, %v10294_v11 }
0x136d   :  { %v7370_v2 = vadd.f32 1.0, %v11736_v9  ;;  %v8574_v23 = vmul.f32 -1.442695, %v10129_v31  ;;  %v11738_v38 = vpop.eup %11737 }
0x136e   :  { %11745 = vrcp.f32 %v7369_v35 }
0x136f   :  { %11747 = vrcp.f32 %v7370_v2 }
0x1370   :  { %11749 = vpow2.f32 %v8573_v56 }
0x1371   :  { %v11740_v55 = vpop.eup %11739  ;;  %11751 = vpow2.f32 %v8574_v23 }
0x1372   :  { %v7422_v61 = vmul.f32 %v11740_v55, %v11738_v38  ;;  %v11742_v26 = vpop.eup %11741 }
0x1373   :  { %v11744_v34 = vpop.eup %11743 }
0x1374   :  { %7510 = vmatmul.mubr.f32.vlgmr.msra.gmra.mrb[144].mxu0 %v7422_v61  ;;  %7599 = vmatmul.mubr.f32.vlgmr.msra.gmra.mrb[150].mxu1 %v7422_v61  ;;  %v7371_v9 = vadd.f32 1.0, %v11744_v34 }
0x1375   :  { %v7220_v17 = vpop.f32.mrb[142].mxu0  ;;  %v7309_v19 = vpop.f32.mrb[148].mxu1  ;;  %7515 = vmatprep.mubr.f32.mxu0 %v14408_v60  ;;  %7604 = vmatprep.mubr.f32.mxu1 %v14408_v60 }
0x1376   :  { %v10130_v39 = vadd.f32 %v7220_v17, %v14410_v33  ;;  %v7222_v45 = vpop.f32.mrb[143].mxu0  ;;  %v7311_v20 = vpop.f32.mrb[149].mxu1  ;;  %9893 = vmatpush1.bf16.msra.mxu0 %v12050_v22  ;;  %9925 = vmatpush1.bf16.msra.mxu1 %v12116_v40  ;;  %v10296_v56 = vadd.f32 %v7309_v19, %v12961_v6 }
0x1377   :  { %v10131_v7 = vadd.f32 %v7222_v45, %v12951_v51  ;;  %9895 = vmatprep.subr.bf16.mxu0 %v12089_v32  ;;  %9927 = vmatprep.subr.bf16.mxu1 %v12122_v42 }
0x1378   :  { %v11746_v37 = vpop.eup %11745  ;;  %v8576_v48 = vmul.f32 -1.442695, %v10130_v39 }
0x1379   :  { %v7411_v16 = vmul.f32 %v11746_v37, %v11742_v26  ;;  %v8577_v13 = vmul.f32 -1.442695, %v10131_v7  ;;  %v11748_v31 = vpop.eup %11747 }
0x137a   :  { %11753 = vpow2.f32 %v8576_v48  ;;  %v11750_v35 = vpop.eup %11749  ;;  %v7407_v49 = vmul.f32 %v11748_v31, %v14132_v5  ;;  %9897 = vmatpush1.bf16.msra.mxu0 %v12100_v36  ;;  %9929 = vmatpush1.bf16.msra.mxu1 %v12156_v52  ;;  %v10297_v36 = vadd.f32 %v7311_v20, %v12963_v10 }
0x137b   :  { %11755 = vtanh.f32 %v10295_v41  ;;  %v7372_v22 = vadd.f32 1.0, %v11750_v35  ;;  %9899 = vmatprep.subr.bf16.mxu0 %v12133_v46  ;;  %9931 = vmatprep.subr.bf16.mxu1 %v12161_v54  ;;  %v11752_v32 = vpop.eup %11751  ;;  %v8578_v46 = vmul.f32 -1.442695, %v10296_v56 }
0x137c   :  { %11757 = vpow2.f32 %v8577_v13  ;;  %v14206_v40 = vadd.f32 %v7411_v16, %v7407_v49  ;;  %v7373_v42 = vadd.f32 1.0, %v11752_v32 }
0x137d   :  { %11759 = vpow2.f32 %v8575_v28 }
0x137e   :  { %11761 = vrcp.f32 %v7372_v22  ;;  %9901 = vmatpush1.bf16.msra.mxu0 %v12158_v53  ;;  %9933 = vmatpush1.bf16.msra.mxu1 %v12195_v0 }
0x137f   :  { %11763 = vrcp.f32 %v7371_v9  ;;  %9903 = vmatprep.subr.bf16.mxu0 %v12188_v62  ;;  %9935 = vmatprep.subr.bf16.mxu1 %v12204_v3 }
0x1380   :  { %11765 = vrcp.f32 %v7373_v42 }
0x1381   :  { %11767 = vtanh.f32 %v14206_v40 }
0x1382   :  { %9905 = vmatpush1.bf16.msra.mxu0 %v12197_v1  ;;  %9937 = vmatpush1.bf16.msra.mxu1 %v12221_v8  ;;  %11769 = vtanh.f32 %v10297_v36 }
0x1383   :  { %9907 = vmatprep.subr.bf16.mxu0 %v12252_v14  ;;  %9939 = vmatprep.subr.bf16.mxu1 %v12294_v27  ;;  %11771 = vpow2.f32 %v8578_v46 }
0x1384   :  { %v11754_v52 = vpop.eup %11753 }
0x1385   :  { %v11756_v53 = vpop.eup %11755  ;;  %v7375_v54 = vadd.f32 1.0, %v11754_v52 }
0x1386   :  { %v11758_v62 = vpop.eup %11757  ;;  %9909 = vmatpush1.bf16.msra.mxu0 %v12267_v18  ;;  %9941 = vmatpush1.bf16.msra.mxu1 %v12299_v29 }
0x1387   :  { %v11760_v0 = vpop.eup %11759  ;;  %11773 = vrcp.f32 %v7375_v54  ;;  %v7376_v3 = vadd.f32 1.0, %v11758_v62  ;;  %9911 = vmatprep.subr.bf16.mxu0 %v12358_v43  ;;  %9943 = vmatprep.subr.bf16.mxu1 %v12400_v57 }
0x1388   :  { %v11762_v1 = vpop.eup %11761  ;;  %v7374_v5 = vadd.f32 1.0, %v11760_v0 }
0x1389   :  { %v11764_v8 = vpop.eup %11763  ;;  %v7412_v14 = vmul.f32 %v11762_v1, %v11756_v53  ;;  %11775 = vrcp.f32 %v7376_v3 }
0x138a   :  { %v11766_v27 = vpop.eup %11765  ;;  %9913 = vmatpush1.bf16.msra.mxu0 %v12366_v47  ;;  %9945 = vmatpush1.bf16.msra.mxu1 %v12405_v59  ;;  %11777 = vrcp.f32 %v7374_v5 }
0x138b   :  { %v11768_v2 = vpop.eup %11767  ;;  %v7408_v23 = vmul.f32 %v11766_v27, %v14152_v21  ;;  %9915 = vmatprep.subr.bf16.mxu0 %v12467_v12  ;;  %9947 = vmatprep.subr.bf16.mxu1 %v12506_v25 }
0x138c   :  { %v7423_v18 = vmul.f32 %v11768_v2, %v11764_v8  ;;  %v11770_v43 = vpop.eup %11769 }
0x138d   :  { %v14228_v29 = vadd.f32 %v7412_v14, %v7408_v23  ;;  %v11772_v47 = vpop.eup %11771 }
0x138e   :  { %7516 = vmatmul.mubr.f32.gmra.mrb[146].mxu0 %v7423_v18  ;;  %7605 = vmatmul.mubr.f32.gmra.mrb[152].mxu1 %v7423_v18  ;;  %v7377_v25 = vadd.f32 1.0, %v11772_v47 }
0x138f   :  { %7521 = vmatprep.mubr.f32.mxu0 %v14408_v60  ;;  %7610 = vmatprep.mubr.f32.mxu1 %v14408_v60  ;;  %11779 = vtanh.f32 %v14228_v29 }
0x1390   :  { %9917 = vmatpush1.bf16.msra.mxu0 %v12472_v15  ;;  %9949 = vmatpush1.bf16.msra.mxu1 %v12511_v30  ;;  %11781 = vrcp.f32 %v7377_v25 }
0x1391   :  { %v11774_v57 = vpop.eup %11773  ;;  %9919 = vmatprep.subr.bf16.mxu0 %v12563_v44  ;;  %9951 = vmatprep.subr.bf16.mxu1 %v12613_v63 }
0x1392   :  { %v7413_v59 = vmul.f32 %v11774_v57, %v11770_v43 }
0x1393   :  { %v11776_v12 = vpop.eup %11775 }
0x1394   :  { %v7409_v21 = vmul.f32 %v11776_v12, %v14170_v24  ;;  %9921 = vmatpush1.bf16.msra.mxu0 %v12578_v50  ;;  %9953 = vmatpush1.bf16.msra.mxu1 %v12618_v4  ;;  %v11778_v15 = vpop.eup %11777 }
0x1396   :  { %v14240_v38 = vadd.f32 %v7413_v59, %v7409_v21 }
0x1398   :  { %11783 = vtanh.f32 %v14240_v38 }
0x1399   :  { %v11780_v30 = vpop.eup %11779 }
0x139a   :  { %v7424_v55 = vmul.f32 %v11780_v30, %v11778_v15  ;;  %v11782_v44 = vpop.eup %11781 }
0x139c   :  { %7522 = vmatmul.mubr.f32.gmra.mrb[148].mxu0 %v7424_v55  ;;  %7611 = vmatmul.mubr.f32.gmra.mrb[154].mxu1 %v7424_v55 }
0x139d   :  { %7527 = vmatprep.mubr.f32.mxu0 %v14408_v60  ;;  %7616 = vmatprep.mubr.f32.mxu1 %v14408_v60 }
0x13a2   :  { %v11784_v63 = vpop.eup %11783 }
0x13a3   :  { %v7425_v24 = vmul.f32 %v11784_v63, %v11782_v44 }
0x13a5   :  { %7528 = vmatmul.mubr.f32.gmra.mrb[150].mxu0 %v7425_v24  ;;  %7617 = vmatmul.mubr.f32.gmra.mrb[156].mxu1 %v7425_v24 }
0x13a6   :  { %7818 = vmatprep.mubr.f32.mxu0 %v14408_v60  ;;  %7907 = vmatprep.mubr.f32.mxu1 %v14408_v60 }
0x1447   :  { %v7511_v50 = vpop.f32.mrb[144].mxu0  ;;  %v7600_v4 = vpop.f32.mrb[150].mxu1 }
0x1448   :  { %v10132_v61 = vadd.f32 %v7511_v50, %v14410_v33  ;;  %v7513_v11 = vpop.f32.mrb[145].mxu0  ;;  %v7602_v17 = vpop.f32.mrb[151].mxu1  ;;  %v10298_v45 = vadd.f32 %v7600_v4, %v12961_v6 }
0x1449   :  { %v10133_v19 = vadd.f32 %v7513_v11, %v12951_v51  ;;  %v10299_v20 = vadd.f32 %v7602_v17, %v12963_v10 }
0x144a   :  { %v8579_v26 = vmul.f32 -1.442695, %v10132_v61  ;;  %v8581_v34 = vmul.f32 -1.442695, %v10298_v45 }
0x144b   :  { %v8580_v39 = vmul.f32 -1.442695, %v10133_v19 }
0x144c   :  { %11785 = vpow2.f32 %v8579_v26 }
0x144d   :  { %11787 = vpow2.f32 %v8580_v39 }
0x144e   :  { %11789 = vtanh.f32 %v10299_v20 }
0x144f   :  { %11791 = vpow2.f32 %v8581_v34 }
0x1456   :  { %v11786_v41 = vpop.eup %11785 }
0x1457   :  { %v7675_v7 = vadd.f32 1.0, %v11786_v41  ;;  %v11788_v37 = vpop.eup %11787 }
0x1458   :  { %v7676_v48 = vadd.f32 1.0, %v11788_v37  ;;  %v11790_v13 = vpop.eup %11789 }
0x1459   :  { %11793 = vrcp.f32 %v7675_v7  ;;  %v11792_v49 = vpop.eup %11791 }
0x145a   :  { %11795 = vrcp.f32 %v7676_v48  ;;  %v7677_v52 = vadd.f32 1.0, %v11792_v49 }
0x1461   :  { %v7517_v16 = vpop.f32.mrb[146].mxu0  ;;  %v7606_v28 = vpop.f32.mrb[152].mxu1 }
0x1462   :  { %v10134_v31 = vadd.f32 %v7517_v16, %v14410_v33  ;;  %v7519_v35 = vpop.f32.mrb[147].mxu0  ;;  %v7608_v9 = vpop.f32.mrb[153].mxu1  ;;  %v10300_v62 = vadd.f32 %v7606_v28, %v12961_v6 }
0x1463   :  { %v10135_v22 = vadd.f32 %v7519_v35, %v12951_v51  ;;  %v11794_v32 = vpop.eup %11793  ;;  %v10301_v0 = vadd.f32 %v7608_v9, %v12963_v10 }
0x1464   :  { %v8582_v42 = vmul.f32 -1.442695, %v10134_v31  ;;  %v7719_v56 = vmul.f32 %v11794_v32, %v11790_v13  ;;  %v11796_v46 = vpop.eup %11795  ;;  %v8584_v3 = vmul.f32 -1.442695, %v10300_v62 }
0x1465   :  { %v8583_v36 = vmul.f32 -1.442695, %v10135_v22  ;;  %v7715_v53 = vmul.f32 %v11796_v46, %v14185_v58 }
0x1466   :  { %11797 = vpow2.f32 %v8582_v42 }
0x1467   :  { %11799 = vpow2.f32 %v8583_v36  ;;  %v14254_v54 = vadd.f32 %v7719_v56, %v7715_v53 }
0x1468   :  { %11801 = vrcp.f32 %v7677_v52 }
0x1469   :  { %11803 = vtanh.f32 %v14254_v54 }
0x146a   :  { %11805 = vtanh.f32 %v10301_v0 }
0x146b   :  { %11807 = vpow2.f32 %v8584_v3 }
0x146f   :  { %v7523_v1 = vpop.f32.mrb[148].mxu0  ;;  %v7612_v8 = vpop.f32.mrb[154].mxu1 }
0x1470   :  { %v11798_v14 = vpop.eup %11797  ;;  %v10136_v27 = vadd.f32 %v7523_v1, %v14410_v33  ;;  %v7525_v5 = vpop.f32.mrb[149].mxu0  ;;  %v10302_v30 = vadd.f32 %v7612_v8, %v12961_v6 }
0x1471   :  { %v7614_v2 = vpop.f32.mrb[155].mxu1  ;;  %v7678_v23 = vadd.f32 1.0, %v11798_v14  ;;  %v10137_v58 = vadd.f32 %v7525_v5, %v12951_v51  ;;  %v11800_v18 = vpop.eup %11799 }
0x1472   :  { %v8585_v43 = vmul.f32 -1.442695, %v10136_v27  ;;  %v7679_v47 = vadd.f32 1.0, %v11800_v18  ;;  %v11802_v57 = vpop.eup %11801  ;;  %v8587_v19 = vmul.f32 -1.442695, %v10302_v30  ;;  %v10303_v39 = vadd.f32 %v7614_v2, %v12963_v10  ;;  %v8052_v30 = vld [vmem:[%s14390_s4 + $0x20] sm:$0xff] }
0x1473   :  { %11809 = vrcp.f32 %v7678_v23  ;;  %v8586_v59 = vmul.f32 -1.442695, %v10137_v58  ;;  %v11804_v12 = vpop.eup %11803 }
0x1474   :  { %11811 = vrcp.f32 %v7679_v47  ;;  %v7731_v25 = vmul.f32 %v11804_v12, %v11802_v57  ;;  %v11806_v50 = vpop.eup %11805  ;;  %v8049_v12 = vld [vmem:[%s14390_s4 + $0x8] sm:$0xff] }
0x1475   :  { %11813 = vpow2.f32 %v8585_v43  ;;  %v11808_v61 = vpop.eup %11807 }
0x1476   :  { %11815 = vpow2.f32 %v8586_v59  ;;  %7819 = vmatmul.mubr.f32.vlgmr.msra.gmra.mrb[152].mxu0 %v7731_v25  ;;  %7908 = vmatmul.mubr.f32.vlgmr.msra.gmra.mrb[158].mxu1 %v7731_v25  ;;  %v7680_v34 = vadd.f32 1.0, %v11808_v61  ;;  %v8057_v61 = vld [vmem:[%s14390_s4 + $0x48] sm:$0xff] }
0x1477   :  { %7824 = vmatprep.mubr.f32.mxu0 %v14408_v60  ;;  %7913 = vmatprep.mubr.f32.mxu1 %v14408_v60 }
0x1478   :  { %v7529_v21 = vpop.f32.mrb[150].mxu0  ;;  %v7618_v15 = vpop.f32.mrb[156].mxu1 }
0x1479   :  { %v10138_v55 = vadd.f32 %v7529_v21, %v14410_v33  ;;  %v7531_v44 = vpop.f32.mrb[151].mxu0  ;;  %v7620_v63 = vpop.f32.mrb[157].mxu1  ;;  %v10304_v37 = vadd.f32 %v7618_v15, %v12961_v6  ;;  %v8051_v21 = vld [vmem:[%s14390_s4 + $0x18] sm:$0xff] }
0x147a   :  { %v10139_v24 = vadd.f32 %v7531_v44, %v12951_v51  ;;  %v10305_v13 = vadd.f32 %v7620_v63, %v12963_v10  ;;  %v8054_v63 = vld [vmem:[%s14390_s4 + $0x30] sm:$0xff] }
0x147b   :  { %v8588_v4 = vmul.f32 -1.442695, %v10138_v55  ;;  %v8590_v31 = vmul.f32 -1.442695, %v10304_v37  ;;  %v8053_v55 = vld [vmem:[%s14390_s4 + $0x28] sm:$0xff] }
0x147c   :  { %v8589_v11 = vmul.f32 -1.442695, %v10139_v24  ;;  %v9962_v44 = vpack.c.bf16 %v8053_v55, %v8052_v30  ;;  %v8055_v24 = vld [vmem:[%s14390_s4 + $0x38] sm:$0xff] }
0x147d   :  { %v11810_v17 = vpop.eup %11809  ;;  %11817 = vpow2.f32 %v8588_v4  ;;  %v8056_v4 = vld [vmem:[%s14390_s4 + $0x40] sm:$0xff] }
0x147e   :  { %v7720_v26 = vmul.f32 %v11810_v17, %v11806_v50  ;;  %v11812_v45 = vpop.eup %11811  ;;  %11819 = vpow2.f32 %v8589_v11  ;;  %v9966_v50 = vpack.c.bf16 %v8055_v24, %v8054_v63  ;;  %v9970_v11 = vpack.c.bf16 %v8057_v61, %v8056_v4  ;;  %v8058_v17 = vld [vmem:[%s14390_s4 + $0x50] sm:$0xff] }
0x147f   :  { %v11814_v20 = vpop.eup %11813  ;;  %v7716_v41 = vmul.f32 %v11812_v45, %v14206_v40  ;;  %11821 = vpow2.f32 %v8587_v19  ;;  %v8059_v19 = vld [vmem:[%s14390_s4 + $0x58] sm:$0xff]  ;;  %v8061_v45 = vld [vmem:[%s14390_s4 + $0x68] sm:$0xff] }
0x1480   :  { %v7681_v7 = vadd.f32 1.0, %v11814_v20  ;;  %v11816_v48 = vpop.eup %11815  ;;  %11823 = vtanh.f32 %v10303_v39  ;;  %v8060_v39 = vld [vmem:[%s14390_s4 + $0x60] sm:$0xff] }
0x1481   :  { %v14269_v16 = vadd.f32 %v7720_v26, %v7716_v41  ;;  %v7682_v28 = vadd.f32 1.0, %v11816_v48  ;;  %v9974_v26 = vpack.c.bf16 %v8059_v19, %v8058_v17  ;;  %v9978_v20 = vpack.c.bf16 %v8061_v45, %v8060_v39  ;;  %v8063_v41 = vld [vmem:[%s14390_s4 + $0x78] sm:$0xff] }
0x1482   :  { %11825 = vrcp.f32 %v7681_v7 }
0x1483   :  { %11827 = vrcp.f32 %v7680_v34  ;;  %v8062_v34 = vld [vmem:[%s14390_s4 + $0x70] sm:$0xff] }
0x1484   :  { %11829 = vrcp.f32 %v7682_v28  ;;  %v9982_v7 = vpack.c.bf16 %v8063_v41, %v8062_v34 }
0x1485   :  { %11831 = vtanh.f32 %v14269_v16 }
0x1486   :  { %11833 = vtanh.f32 %v10305_v13 }
0x1487   :  { %v11818_v35 = vpop.eup %11817  ;;  %11835 = vpow2.f32 %v8590_v31 }
0x1488   :  { %v7684_v9 = vadd.f32 1.0, %v11818_v35  ;;  %v11820_v40 = vpop.eup %11819 }
0x1489   :  { %v7685_v49 = vadd.f32 1.0, %v11820_v40  ;;  %v11822_v22 = vpop.eup %11821 }
0x148a   :  { %11837 = vrcp.f32 %v7684_v9  ;;  %v11824_v32 = vpop.eup %11823  ;;  %v7683_v52 = vadd.f32 1.0, %v11822_v22 }
0x148b   :  { %11839 = vrcp.f32 %v7685_v49 }
0x148c   :  { %v11826_v42 = vpop.eup %11825  ;;  %11841 = vrcp.f32 %v7683_v52 }
0x148d   :  { %v11828_v56 = vpop.eup %11827  ;;  %v7721_v36 = vmul.f32 %v11826_v42, %v11824_v32 }
0x148e   :  { %v11830_v46 = vpop.eup %11829 }
0x148f   :  { %v11832_v53 = vpop.eup %11831  ;;  %v7717_v62 = vmul.f32 %v11830_v46, %v14228_v29 }
0x1490   :  { %v7732_v0 = vmul.f32 %v11832_v53, %v11828_v56  ;;  %v11834_v3 = vpop.eup %11833  ;;  %v14411_v53 = vld [vmem:[#allocation6_spill] sm:$0xff] }
0x1491   :  { %v14274_v1 = vadd.f32 %v7721_v36, %v7717_v62  ;;  %v11836_v8 = vpop.eup %11835  ;;  %v919_v62 = vadd.f32 %v14411_v53, %v14410_v33 }
0x1492   :  { %7825 = vmatmul.mubr.f32.gmra.mrb[154].mxu0 %v7732_v0  ;;  %7914 = vmatmul.mubr.f32.gmra.mrb[160].mxu1 %v7732_v0  ;;  %v7686_v2 = vadd.f32 1.0, %v11836_v8 }
0x1493   :  { %7830 = vmatprep.mubr.f32.mxu0 %v14408_v60  ;;  %7919 = vmatprep.mubr.f32.mxu1 %v14408_v60  ;;  %11843 = vtanh.f32 %v14274_v1 }
0x1494   :  { %v11838_v14 = vpop.eup %11837  ;;  %11845 = vrcp.f32 %v7686_v2 }
0x1495   :  { %v7722_v27 = vmul.f32 %v11838_v14, %v11834_v3  ;;  %v11840_v5 = vpop.eup %11839  ;;  %v14412_v3 = vld [vmem:[#allocation7_spill] sm:$0xff] }
0x1496   :  { %v7718_v29 = vmul.f32 %v11840_v5, %v14240_v38  ;;  %v11842_v58 = vpop.eup %11841  ;;  %v8048_v38 = vld [vmem:[%s14390_s4] sm:$0xff]  ;;  %v921_v8 = vadd.f32 %v14412_v3, %v12951_v51 }
0x1497   :  { %v9954_v25 = vpack.c.bf16 %v8049_v12, %v8048_v38 }
0x1498   :  { %v14280_v23 = vadd.f32 %v7722_v27, %v7718_v29 }
0x1499   :  { %9955 = vmatprep.subr.bf16.mxu0 %v9954_v25 }
0x149a   :  { %11847 = vtanh.f32 %v14280_v23  ;;  %9957 = vmatpush3.bf16.msra.mxu0 %v9954_v25 }
0x149d   :  { %v11844_v18 = vpop.eup %11843 }
0x149e   :  { %v7733_v43 = vmul.f32 %v11844_v18, %v11842_v58  ;;  %v11846_v47 = vpop.eup %11845 }
0x14a0   :  { %7831 = vmatmul.mubr.f32.gmra.mrb[156].mxu0 %v7733_v43  ;;  %7920 = vmatmul.mubr.f32.gmra.mrb[162].mxu1 %v7733_v43 }
0x14a1   :  { %7836 = vmatprep.mubr.f32.mxu0 %v14408_v60  ;;  %7925 = vmatprep.mubr.f32.mxu1 %v14408_v60  ;;  %v8050_v60 = vld [vmem:[%s14390_s4 + $0x10] sm:$0xff]  ;;  %s11942_s4 = smov [#allocation3]  }
0x14a2   :  { %v9958_v15 = vpack.c.bf16 %v8051_v21, %v8050_v60  ;;  %s8167_s23 = sshll.u32 %s11942_s4, 4  ;;  %s8168_s23 = int_to_ptr.vmem [resolvable:$true] %s8167_s23 }
0x14a3   :  { %s11916_s24 = scalar_lea.vmem %s8168_s23, 512  ;;  %p11921_p1 = scmp.lt.s32.totalorder %s8168_s23, %s8168_s23 }
0x14a4   :  { %v11848_v57 = vpop.eup %11847  ;;  %9959 = vmatprep.subr.bf16.mxu0 %v9958_v15  ;;  %p11917_p0 = scmp.ne.s32.totalorder %s8168_s23, %s11916_s24  ;;  %p11922_p2 = scmp.lt.s32.totalorder %s11916_s24, %s11916_s24 }
0x14a5   :  { %v7734_v59 = vmul.f32 %v11848_v57, %v11846_v47  ;;  %9961 = vmatpush3.bf16.msra.mxu0 %v9958_v15  ;;  %v14413_v15 = vld [vmem:[#allocation8_spill] sm:$0xff] }
0x14a6   :  { %9963 = vmatprep.subr.bf16.mxu0 %v9962_v44  ;;  %v925_v30 = vadd.f32 %v14413_v15, %v14410_v33  ;;  %p11923_p3 = por %p11922_p2, %p11921_p1 }
0x14a7   :  { %7837 = vmatmul.mubr.f32.gmra.mrb[158].mxu0 %v7734_v59  ;;  %7926 = vmatmul.mubr.f32.gmra.mrb[164].mxu1 %v7734_v59 }
0x14a8   :  { %p11924_p4 = pnand %p11923_p3, %p11917_p0 }
0x14a9   :  { %9965 = vmatpush3.bf16.msra.mxu0 %v9962_v44  ;;  %v14414_v44 = vld [vmem:[#allocation9_spill] sm:$0xff] }
0x14aa   :  { %9967 = vmatprep.subr.bf16.mxu0 %v9966_v50  ;;  %v927_v63 = vadd.f32 %v14414_v44, %v12951_v51 }
0x14ad   :  { %9969 = vmatpush3.bf16.msra.mxu0 %v9966_v50 }
0x14ae   :  { %9971 = vmatprep.subr.bf16.mxu0 %v9970_v11 }
0x14b1   :  { %9973 = vmatpush3.bf16.msra.mxu0 %v9970_v11 }
0x14b2   :  { %9975 = vmatprep.subr.bf16.mxu0 %v9974_v26 }
0x14b5   :  { %9977 = vmatpush3.bf16.msra.mxu0 %v9974_v26 }
0x14b6   :  { %9979 = vmatprep.subr.bf16.mxu0 %v9978_v20 }
0x14b9   :  { %9981 = vmatpush3.bf16.msra.mxu0 %v9978_v20 }
0x14ba   :  { %9983 = vmatprep.subr.bf16.mxu0 %v9982_v7 }
0x14bd   :  { %9985 = vmatpush3.bf16.msra.mxu0 %v9982_v7 }
0x1549   :  { %v7820_v37 = vpop.f32.mrb[152].mxu0  ;;  %v7909_v48 = vpop.f32.mrb[158].mxu1 }
0x154a   :  { %v10140_v28 = vadd.f32 %v7820_v37, %v14410_v33  ;;  %v7822_v13 = vpop.f32.mrb[153].mxu0  ;;  %v7911_v31 = vpop.f32.mrb[159].mxu1  ;;  %v10306_v49 = vadd.f32 %v7909_v48, %v12961_v6  ;;  %v14415_v37 = vld [vmem:[#allocation10_spill] sm:$0xff] }
0x154b   :  { %v10141_v35 = vadd.f32 %v7822_v13, %v12951_v51  ;;  %v10307_v32 = vadd.f32 %v7911_v31, %v12963_v10  ;;  %v931_v48 = vadd.f32 %v14415_v37, %v14410_v33 }
0x154c   :  { %v8591_v9 = vmul.f32 -1.442695, %v10140_v28  ;;  %v8593_v22 = vmul.f32 -1.442695, %v10306_v49  ;;  %v14416_v28 = vld [vmem:[#allocation11_spill] sm:$0xff] }
0x154d   :  { %v8592_v40 = vmul.f32 -1.442695, %v10141_v35  ;;  %v933_v13 = vadd.f32 %v14416_v28, %v12951_v51 }
0x154e   :  { %11849 = vpow2.f32 %v8591_v9 }
0x154f   :  { %11851 = vpow2.f32 %v8592_v40 }
0x1550   :  { %11853 = vpow2.f32 %v8593_v22 }
0x1551   :  { %11855 = vtanh.f32 %v10307_v32 }
0x1558   :  { %v11850_v42 = vpop.eup %11849 }
0x1559   :  { %v7984_v56 = vadd.f32 1.0, %v11850_v42  ;;  %v11852_v36 = vpop.eup %11851 }
0x155a   :  { %v7985_v46 = vadd.f32 1.0, %v11852_v36  ;;  %v11854_v52 = vpop.eup %11853 }
0x155b   :  { %11857 = vrcp.f32 %v7984_v56  ;;  %v11856_v0 = vpop.eup %11855  ;;  %v7986_v18 = vadd.f32 1.0, %v11854_v52 }
0x155c   :  { %11859 = vrcp.f32 %v7985_v46 }
0x1565   :  { %v7826_v14 = vpop.f32.mrb[154].mxu0  ;;  %v7915_v27 = vpop.f32.mrb[160].mxu1 }
0x1566   :  { %v11858_v5 = vpop.eup %11857  ;;  %v7936_v2 = vadd.f32 %v7826_v14, %v919_v62  ;;  %v7828_v29 = vpop.f32.mrb[155].mxu0  ;;  %v10308_v60 = vadd.f32 %v7915_v27, %v12961_v6 }
0x1567   :  { %v7917_v58 = vpop.f32.mrb[161].mxu1  ;;  %v8028_v43 = vmul.f32 %v11858_v5, %v11856_v0  ;;  %v7937_v47 = vadd.f32 %v7828_v29, %v921_v8  ;;  %v11860_v57 = vpop.eup %11859 }
0x1568   :  { %v8594_v59 = vmul.f32 -1.442695, %v7936_v2  ;;  %v8024_v38 = vmul.f32 %v11860_v57, %v14254_v54  ;;  %v8596_v21 = vmul.f32 -1.442695, %v10308_v60  ;;  %v10309_v55 = vadd.f32 %v7917_v58, %v12963_v10 }
0x1569   :  { %v8595_v12 = vmul.f32 -1.442695, %v7937_v47 }
0x156a   :  { %11861 = vpow2.f32 %v8594_v59  ;;  %v8032_v25 = vadd.f32 %v8028_v43, %v8024_v38 }
0x156b   :  { %11863 = vrcp.f32 %v7986_v18 }
0x156c   :  { %11865 = vpow2.f32 %v8595_v12 }
0x156d   :  { %11867 = vtanh.f32 %v8032_v25 }
0x156e   :  { %11869 = vpow2.f32 %v8596_v21 }
0x156f   :  { %11871 = vtanh.f32 %v10309_v55 }
0x1573   :  { %v7832_v24 = vpop.f32.mrb[156].mxu0  ;;  %v7921_v54 = vpop.f32.mrb[162].mxu1 }
0x1574   :  { %v11862_v50 = vpop.eup %11861  ;;  %v7940_v4 = vadd.f32 %v7832_v24, %v925_v30  ;;  %v7834_v61 = vpop.f32.mrb[157].mxu0  ;;  %v10310_v42 = vadd.f32 %v7921_v54, %v12961_v6 }
0x1575   :  { %v7923_v11 = vpop.f32.mrb[163].mxu1  ;;  %v11864_v17 = vpop.eup %11863  ;;  %v7987_v19 = vadd.f32 1.0, %v11862_v50  ;;  %v7941_v26 = vadd.f32 %v7834_v61, %v927_v63 }
0x1576   :  { %v11866_v39 = vpop.eup %11865  ;;  %v8597_v45 = vmul.f32 -1.442695, %v7940_v4  ;;  %v8599_v51 = vmul.f32 -1.442695, %v10310_v42  ;;  %v10311_v62 = vadd.f32 %v7923_v11, %v12963_v10 }
0x1577   :  { %v11868_v20 = vpop.eup %11867  ;;  %11873 = vrcp.f32 %v7987_v19  ;;  %v7988_v34 = vadd.f32 1.0, %v11866_v39  ;;  %v8598_v41 = vmul.f32 -1.442695, %v7941_v26 }
0x1578   :  { %v8040_v7 = vmul.f32 %v11868_v20, %v11864_v17  ;;  %v11870_v32 = vpop.eup %11869 }
0x1579   :  { %11875 = vrcp.f32 %v7988_v34  ;;  %v11872_v33 = vpop.eup %11871  ;;  %v7989_v46 = vadd.f32 1.0, %v11870_v32 }
0x157a   :  { %11877 = vpow2.f32 %v8597_v45  ;;  %v7838_v31 = vpop.f32.mrb[158].mxu0  ;;  %v7927_v35 = vpop.f32.mrb[164].mxu1  ;;  %8044 = vst [vmem:[#allocation3] sm:$0xff] %v8040_v7  ;;  %8656 = vmatprep.mubr.f32.mxu0 %v8040_v7 }
0x157b   :  { %v7944_v9 = vadd.f32 %v7838_v31, %v931_v48  ;;  %v7840_v40 = vpop.f32.mrb[159].mxu0  ;;  %v7929_v49 = vpop.f32.mrb[165].mxu1  ;;  %11879 = vpow2.f32 %v8598_v41  ;;  %v10312_v3 = vadd.f32 %v7927_v35, %v12961_v6 }
0x157c   :  { %v7945_v22 = vadd.f32 %v7840_v40, %v933_v13  ;;  %v10313_v5 = vadd.f32 %v7929_v49, %v12963_v10 }
0x157d   :  { %v8600_v56 = vmul.f32 -1.442695, %v7944_v9  ;;  %v8602_v18 = vmul.f32 -1.442695, %v10312_v3 }
0x157e   :  { %v8601_v36 = vmul.f32 -1.442695, %v7945_v22 }
0x157f   :  { %11881 = vpow2.f32 %v8600_v56 }
0x1580   :  { %11883 = vpow2.f32 %v8601_v36 }
0x1581   :  { %v11874_v52 = vpop.eup %11873  ;;  %11885 = vrcp.f32 %v7989_v46 }
0x1582   :  { %v8029_v53 = vmul.f32 %v11874_v52, %v11872_v33  ;;  %11887 = vpow2.f32 %v8599_v51 }
0x1583   :  { %v11876_v0 = vpop.eup %11875  ;;  %11889 = vtanh.f32 %v10311_v62 }
0x1584   :  { %v11878_v8 = vpop.eup %11877  ;;  %v8025_v14 = vmul.f32 %v11876_v0, %v14269_v16 }
0x1585   :  { %v7990_v27 = vadd.f32 1.0, %v11878_v8  ;;  %v11880_v2 = vpop.eup %11879 }
0x1586   :  { %v8033_v29 = vadd.f32 %v8029_v53, %v8025_v14  ;;  %v7991_v58 = vadd.f32 1.0, %v11880_v2 }
0x1587   :  { %11891 = vrcp.f32 %v7990_v27 }
0x1588   :  { %11893 = vtanh.f32 %v8033_v29 }
0x1589   :  { %v11882_v43 = vpop.eup %11881  ;;  %11895 = vtanh.f32 %v10313_v5 }
0x158a   :  { %11897 = vrcp.f32 %v7991_v58  ;;  %v7993_v47 = vadd.f32 1.0, %v11882_v43  ;;  %v11884_v6 = vpop.eup %11883 }
0x158b   :  { %11899 = vpow2.f32 %v8602_v18  ;;  %v7994_v57 = vadd.f32 1.0, %v11884_v6  ;;  %v11886_v16 = vpop.eup %11885 }
0x158c   :  { %11901 = vrcp.f32 %v7993_v47  ;;  %v11888_v59 = vpop.eup %11887 }
0x158d   :  { %11903 = vrcp.f32 %v7994_v57  ;;  %v11890_v38 = vpop.eup %11889  ;;  %v7992_v30 = vadd.f32 1.0, %v11888_v59 }
0x158f   :  { %11905 = vrcp.f32 %v7992_v30 }
0x1591   :  { %v11892_v10 = vpop.eup %11891 }
0x1592   :  { %v11894_v12 = vpop.eup %11893  ;;  %v8030_v25 = vmul.f32 %v11892_v10, %v11890_v38 }
0x1593   :  { %v11896_v60 = vpop.eup %11895  ;;  %v8041_v21 = vmul.f32 %v11894_v12, %v11886_v16 }
0x1594   :  { %v11898_v15 = vpop.eup %11897 }
0x1595   :  { %v11900_v55 = vpop.eup %11899  ;;  %v8026_v44 = vmul.f32 %v11898_v15, %v14274_v1  ;;  %8045 = vst [vmem:[#allocation3 + $0x8] sm:$0xff] %v8041_v21  ;;  %8657 = vmatmul.mubr.f32.vlgmr.msra.gmra.mrb[160].mxu0 %v8041_v21 }
0x1596   :  { %v11902_v63 = vpop.eup %11901  ;;  %v7995_v4 = vadd.f32 1.0, %v11900_v55 }
0x1597   :  { %v8034_v24 = vadd.f32 %v8030_v25, %v8026_v44  ;;  %v8031_v54 = vmul.f32 %v11902_v63, %v11896_v60  ;;  %v11904_v50 = vpop.eup %11903 }
0x1598   :  { %v8027_v61 = vmul.f32 %v11904_v50, %v14280_v23 }
0x1599   :  { %11907 = vtanh.f32 %v8034_v24  ;;  %v11906_v17 = vpop.eup %11905 }
0x159a   :  { %v8035_v11 = vadd.f32 %v8031_v54, %v8027_v61  ;;  %11909 = vrcp.f32 %v7995_v4 }
0x159c   :  { %11911 = vtanh.f32 %v8035_v11 }
0x15a3   :  { %v11908_v19 = vpop.eup %11907 }
0x15a4   :  { %v8042_v26 = vmul.f32 %v11908_v19, %v11906_v17  ;;  %v11910_v39 = vpop.eup %11909 }
0x15a6   :  { %8046 = vst [vmem:[#allocation3 + $0x10] sm:$0xff] %v8042_v26  ;;  %8659 = vmatprep.mubr.f32.mxu0 %v8042_v26  ;;  %v11912_v1 = vpop.eup %11911 }
0x15a7   :  { %v8043_v45 = vmul.f32 %v11912_v1, %v11910_v39 }
0x15a9   :  { %8047 = vst [vmem:[#allocation3 + $0x18] sm:$0xff] %v8043_v45  ;;  %8660 = vmatmul.mubr.f32.gmra.mrb[162].mxu0 %v8043_v45 }
0x15aa   :  { %11927 = shalt.err (!%p11924_p4)
}
0x15ab   :  { %s11928_s27 = scalar_lea.hbm %s14393_s7, 512 }
0x15ac   :  { %p11929_p5 = scmp.ne.s32.totalorder %s14393_s7, %s11928_s27  ;;  %p11932_p6 = scmp.lt.u32.totalorder %s11928_s27, %s14393_s7 }
0x15ae   :  { %p11934_p7 = pnand %p11932_p6, %p11929_p5 }
0x15b0   :  { %11937 = shalt.err (!%p11934_p7)
}
0x15b1   :  { %s11943_s9 = smov 128   ;;  %s11944_s10 = smov 8   ;;  %v8603_v23 = vld [vmem:[%s14391_s5] ss:$0 sm:$0xff] }
0x15b2   :  { %8173 = dma.vmem_to_hbm [thread:$0]  %s8168_s23, 512, %s14393_s7, [#allocation4], %s11943_s9, %s11943_s9, %s11944_s10  }
0x1668   :  { %v8658_v20 = vpop.f32.mrb[160].mxu0 }
0x1669   :  { %v8143_v34 = vadd.f32 %v8658_v20, %v8603_v23  ;;  %v8137_v41 = vpop.f32.mrb[161].mxu0 }
0x166a   :  { %v8138_v7 = vadd.f32 %v8603_v23, %v8137_v41 }
0x166b   :  { %8157 = vst [vmem:[%s14392_s6 + $0x8] sm:$0xff] %v8143_v34 }
0x166c   :  { %8156 = vst [vmem:[%s14392_s6] sm:$0xff] %v8138_v7 }
0x167c   :  { %v8661_v37 = vpop.f32.mrb[162].mxu0 }
0x167d   :  { %v8153_v48 = vadd.f32 %v8661_v37, %v8603_v23  ;;  %v8147_v28 = vpop.f32.mrb[163].mxu0 }
0x167e   :  { %v8148_v13 = vadd.f32 %v8603_v23, %v8147_v28 }
0x167f   :  { %8159 = vst [vmem:[%s14392_s6 + $0x18] sm:$0xff] %v8153_v48 }
0x1680   :  { %8158 = vst [vmem:[%s14392_s6 + $0x10] sm:$0xff] %v8148_v13 }
0x1681   :  { %11938 = dma.done.wait [#allocation4], 512  }
0x1682   :  { %11939 = vsyncadd [#allocation4], 4294966784 }
0x1683   :  { %8179 = vsyncpa [#allocation4], 1 }

</bundles_post_ra>
